<compile_context>
chip_gen: v5e
topology: v5e:2x2
jax: 0.10.0
libtpu: 0.0.40
codegen_flags: <defaults>
</compile_context>

<pallas_src>
import jax
import jax.numpy as jnp
from jax.experimental import pallas as pl
from jax.experimental.pallas import tpu as pltpu

IMAGE_SIZE = 784
H_DIM = 400
Z_DIM = 20
N_CLASSES = 10
ZL_PAD = 32        # packed (z || l_onehot || zeros) lane width
LV_OFF = 64        # lane offset of log_var inside the packed mu/log_var slab
MLV_PAD = 128      # packed (mu ... log_var ...) lane width
_TB_ALIGN = 16     # bf16 output packs 2 rows / sublane -> keep TB 16-aligned


def _round_up(n, m):
    return ((n + m - 1) // m) * m


def cvae_kernel(
    x_ref, epsl_ref,
    w1_ref, b1_ref,
    w23_ref, b23_ref,
    w4_ref, b4_ref,
    w5_ref, b5_ref,
    xrec_ref, mlv_ref,
):
    # in-kernel cast: DMA f32 once, cast on the VPU
    x = x_ref[...].astype(jnp.bfloat16)                   # [TB, 784]

    # encode: h = relu(fc1(x))
    h = jnp.dot(x, w1_ref[...], preferred_element_type=jnp.float32) + b1_ref[...]
    h = jnp.maximum(h, 0.0).astype(jnp.bfloat16)          # [TB, 400]

    # fused fc2/fc3: lanes 0:20 = mu, lanes 64:84 = log_var, rest zero
    y = jnp.dot(h, w23_ref[...], preferred_element_type=jnp.float32) + b23_ref[...]
    mlv_ref[...] = y                                      # lane-dense [TB, 128] store

    # reparameterize + "concat" with the one-hot label, without any lane concat:
    #   y[:, :32]   = [mu      || 0]        (W23 cols 20:32 are zero)
    #   y[:, 64:96] = [log_var || 0]        (W23 cols 84:96 are zero)
    #   epsl        = [eps || l_onehot || 0]
    #   zl = y[:, :32] + epsl * exp(0.5*y[:, 64:96])
    #      = [mu + eps*std || l_onehot || 0] == cat(z, l_onehot) zero-padded
    mu32 = y[:, :ZL_PAD]
    lv32 = y[:, LV_OFF:LV_OFF + ZL_PAD]
    zl = (mu32 + epsl_ref[...] * jnp.exp(0.5 * lv32)).astype(jnp.bfloat16)

    # decode: relu(fc4(cat(z, l_onehot))) as a single K=32 MXU pass
    h2 = jnp.dot(zl, w4_ref[...], preferred_element_type=jnp.float32) + b4_ref[...]
    h2 = jnp.maximum(h2, 0.0).astype(jnp.bfloat16)        # [TB, 400]

    # x_reconst = sigmoid(fc5(h2)); bf16 store halves the writeback stream
    logits = jnp.dot(h2, w5_ref[...], preferred_element_type=jnp.float32) + b5_ref[...]
    xrec_ref[...] = jax.nn.sigmoid(logits).astype(xrec_ref.dtype)


def _choose_tiling(B, tb_max):
    # >=2 grid steps whenever possible so both v7x TensorCores get work, and
    # TB sized to the actual batch to keep padded-row waste small.
    n_tiles = max(pl.cdiv(B, tb_max), 2)
    TB = _round_up(pl.cdiv(B, n_tiles), _TB_ALIGN)
    Bp = _round_up(B, TB)
    return TB, Bp


def _vmem_limit_bytes():
    try:
        cap = int(pltpu.get_tpu_info().vmem_capacity_bytes)
    except Exception:
        cap = 64 << 20            # conservative fallback (v7x per-core VMEM)
    # 128-MiB parts (v5e/v6e): 64 MiB scoped; 64-MiB parts (v7x): 48 MiB.
    return (64 << 20) if cap >= (96 << 20) else (48 << 20)


def _build_call(TB, Bp, single_buffer_weights):
    grid = (Bp // TB,)

    def tiled(feat):
        return pl.BlockSpec((TB, feat), lambda i: (i, 0))

    if single_buffer_weights:
        def resident(shape):
            return pl.BlockSpec(shape, lambda i: (0, 0),
                                pipeline_mode=pl.Buffered(buffer_count=1))
    else:
        def resident(shape):
            return pl.BlockSpec(shape, lambda i: (0, 0))

    in_specs = [
        tiled(IMAGE_SIZE),                     # x (f32)
        tiled(ZL_PAD),                         # epsl = eps || l_onehot || 0 (f32)
        resident((IMAGE_SIZE, H_DIM)),         # w1 (bf16)
        resident((1, H_DIM)),                  # b1
        resident((H_DIM, MLV_PAD)),            # w23 (bf16)
        resident((1, MLV_PAD)),                # b23
        resident((ZL_PAD, H_DIM)),             # w4 (bf16, fused z/onehot halves)
        resident((1, H_DIM)),                  # b4
        resident((H_DIM, IMAGE_SIZE)),         # w5 (bf16)
        resident((1, IMAGE_SIZE)),             # b5
    ]
    out_specs = (
        tiled(IMAGE_SIZE),                     # x_reconst (bf16)
        tiled(MLV_PAD),                        # packed mu / log_var (f32)
    )
    out_shapes = (
        jax.ShapeDtypeStruct((Bp, IMAGE_SIZE), jnp.bfloat16),
        jax.ShapeDtypeStruct((Bp, MLV_PAD), jnp.float32),
    )

    mm_macs = (IMAGE_SIZE * H_DIM + H_DIM * MLV_PAD
               + ZL_PAD * H_DIM + H_DIM * IMAGE_SIZE)
    cost = pl.CostEstimate(
        flops=2 * Bp * mm_macs,
        transcendentals=Bp * (ZL_PAD + IMAGE_SIZE),
        bytes_accessed=(2 * mm_macs                                    # bf16 weights
                        + 4 * (2 * H_DIM + MLV_PAD + IMAGE_SIZE)       # f32 biases
                        + Bp * (4 * IMAGE_SIZE + 4 * ZL_PAD            # f32 inputs
                                + 2 * IMAGE_SIZE + 4 * MLV_PAD)),      # outputs
    )

    return pl.pallas_call(
        cvae_kernel,
        out_shape=out_shapes,
        grid=grid,
        in_specs=in_specs,
        out_specs=out_specs,
        compiler_params=pltpu.CompilerParams(
            dimension_semantics=("parallel",),
            vmem_limit_bytes=_vmem_limit_bytes(),
        ),
        cost_estimate=cost,
    )


def cvae_forward(x, l_onehot, eps, kp, tb_max=1024):
    """x:[B,784] f32, l_onehot:[B,10] f32, eps:[B,20] f32, kp: packed params."""
    B = x.shape[0]
    TB, Bp = _choose_tiling(B, tb_max)

    # eps || l_onehot || zeros : tiny (128 B/row) combined decode side-input
    epsl = jnp.concatenate(
        [eps.astype(jnp.float32), l_onehot.astype(jnp.float32),
         jnp.zeros((B, ZL_PAD - Z_DIM - N_CLASSES), jnp.float32)], axis=1)

    x_in = x.astype(jnp.float32)
    if Bp != B:                                    # pad only when actually needed
        x_in = jnp.pad(x_in, ((0, Bp - B), (0, 0)))
        epsl = jnp.pad(epsl, ((0, Bp - B), (0, 0)))

    args = (x_in, epsl,
            kp["w1"], kp["b1"], kp["w23"], kp["b23"],
            kp["w4"], kp["b4"], kp["w5"], kp["b5"])

    # single-buffer the VMEM-resident weights; fall back if backend rejects it
    try:
        outs = jax.block_until_ready(_build_call(TB, Bp, True)(*args))
    except Exception:
        outs = _build_call(TB, Bp, False)(*args)
    xrec_p, mlv_p = outs

    xrec = xrec_p[:B]                              # bf16 reconstruction
    mu = mlv_p[:B, :Z_DIM]
    log_var = mlv_p[:B, LV_OFF:LV_OFF + Z_DIM]
    return xrec, mu, log_var


# ----------------------------- parameter setup ------------------------------

def init_linear(key, fan_in, fan_out):
    # Matches torch nn.Linear default init: U(-1/sqrt(fan_in), 1/sqrt(fan_in)).
    kw, kb = jax.random.split(key)
    bound = 1.0 / jnp.sqrt(jnp.float32(fan_in))
    w = jax.random.uniform(kw, (fan_in, fan_out), jnp.float32, -bound, bound)
    b = jax.random.uniform(kb, (1, fan_out), jnp.float32, -bound, bound)
    return w, b


def init_params(key):
    k1, k2, k3, k4, k5 = jax.random.split(key, 5)
    w1, b1 = init_linear(k1, IMAGE_SIZE, H_DIM)
    w2, b2 = init_linear(k2, H_DIM, Z_DIM)
    w3, b3 = init_linear(k3, H_DIM, Z_DIM)
    w4, b4 = init_linear(k4, Z_DIM + N_CLASSES, H_DIM)
    w5, b5 = init_linear(k5, H_DIM, IMAGE_SIZE)
    return {"w1": w1, "b1": b1, "w2": w2, "b2": b2, "w3": w3, "b3": b3,
            "w4": w4, "b4": b4, "w5": w5, "b5": b5}


def prepare_kernel_params(p):
    """Cast weights to bf16 once; fuse fc2/fc3 into a zero-padded [400,128] slab
    (mu at lanes 0:20, log_var at lanes 64:84) and pad fc4 to a single [32,400]."""
    w23 = jnp.zeros((H_DIM, MLV_PAD), jnp.float32)
    w23 = w23.at[:, :Z_DIM].set(p["w2"])
    w23 = w23.at[:, LV_OFF:LV_OFF + Z_DIM].set(p["w3"])
    b23 = jnp.zeros((1, MLV_PAD), jnp.float32)
    b23 = b23.at[:, :Z_DIM].set(p["b2"])
    b23 = b23.at[:, LV_OFF:LV_OFF + Z_DIM].set(p["b3"])
    w4 = jnp.zeros((ZL_PAD, H_DIM), jnp.float32)
    w4 = w4.at[:Z_DIM + N_CLASSES, :].set(p["w4"])
    return {
        "w1": p["w1"].astype(jnp.bfloat16), "b1": p["b1"],
        "w23": w23.astype(jnp.bfloat16),    "b23": b23,
        "w4": w4.astype(jnp.bfloat16),      "b4": p["b4"],
        "w5": p["w5"].astype(jnp.bfloat16), "b5": p["b5"],
    }


def cvae_reference(x, l_onehot, eps, kp):
    """Plain-JAX replica of the kernel math (same bf16 casts / packing)."""
    B = x.shape[0]
    xb = x.astype(jnp.bfloat16)
    h = jnp.maximum(
        jnp.dot(xb, kp["w1"], preferred_element_type=jnp.float32) + kp["b1"], 0.0
    ).astype(jnp.bfloat16)
    y = jnp.dot(h, kp["w23"], preferred_element_type=jnp.float32) + kp["b23"]
    mu = y[:, :Z_DIM]
    log_var = y[:, LV_OFF:LV_OFF + Z_DIM]
    epsl = jnp.concatenate(
        [eps, l_onehot, jnp.zeros((B, ZL_PAD - Z_DIM - N_CLASSES), jnp.float32)],
        axis=1)
    zl = (y[:, :ZL_PAD] + epsl * jnp.exp(0.5 * y[:, LV_OFF:LV_OFF + ZL_PAD])
          ).astype(jnp.bfloat16)
    h2 = jnp.maximum(
        jnp.dot(zl, kp["w4"], preferred_element_type=jnp.float32) + kp["b4"], 0.0
    ).astype(jnp.bfloat16)
    xr = jax.nn.sigmoid(
        jnp.dot(h2, kp["w5"], preferred_element_type=jnp.float32) + kp["b5"]
    ).astype(jnp.bfloat16)
    return xr, mu, log_var


if __name__ == "__main__":
    key = jax.random.PRNGKey(0)
    k_params, k_x, k_label, k_eps = jax.random.split(key, 4)

    B = 48   # small; exercises the 2-step grid and the ragged-batch pad path
    params = init_params(k_params)
    kparams = prepare_kernel_params(params)

    x = jax.random.uniform(k_x, (B, IMAGE_SIZE), jnp.float32)        # flattened images
    labels = jax.random.randint(k_label, (B,), 0, N_CLASSES)
    l_onehot = jax.nn.one_hot(labels, N_CLASSES, dtype=jnp.float32)  # [B, 10]
    eps = jax.random.normal(k_eps, (B, Z_DIM), jnp.float32)          # reparam noise

    x_reconst, mu, log_var = cvae_forward(x, l_onehot, eps, kparams)
    jax.block_until_ready((x_reconst, mu, log_var))

    # sanity-check against a plain-JAX replica of the same (bf16-weight) math
    xr_ref, mu_ref, lv_ref = cvae_reference(x, l_onehot, eps, kparams)
    assert jnp.allclose(x_reconst.astype(jnp.float32),
                        xr_ref.astype(jnp.float32), atol=1e-2), \
        float(jnp.max(jnp.abs(x_reconst.astype(jnp.float32)
                              - xr_ref.astype(jnp.float32))))
    assert jnp.allclose(mu, mu_ref, atol=2e-3), \
        float(jnp.max(jnp.abs(mu - mu_ref)))
    assert jnp.allclose(log_var, lv_ref, atol=2e-3), \
        float(jnp.max(jnp.abs(log_var - lv_ref)))

    print("KERNEL_OK")
</pallas_src>

<mosaic_0001>
module attributes {stable_mosaic.version = 11 : i64} {
  func.func @cvae_kernel(%arg0: i32, %arg1: memref<32x784xf32, #tpu.memory_space<vmem>>, %arg2: memref<32x32xf32, #tpu.memory_space<vmem>>, %arg3: memref<784x400xbf16, #tpu.memory_space<vmem>>, %arg4: memref<1x400xf32, #tpu.memory_space<vmem>>, %arg5: memref<400x128xbf16, #tpu.memory_space<vmem>>, %arg6: memref<1x128xf32, #tpu.memory_space<vmem>>, %arg7: memref<32x400xbf16, #tpu.memory_space<vmem>>, %arg8: memref<1x400xf32, #tpu.memory_space<vmem>>, %arg9: memref<400x784xbf16, #tpu.memory_space<vmem>>, %arg10: memref<1x784xf32, #tpu.memory_space<vmem>>, %arg11: memref<32x784xbf16, #tpu.memory_space<vmem>>, %arg12: memref<32x128xf32, #tpu.memory_space<vmem>>) attributes {dimension_semantics = [#tpu.dimension_semantics<parallel>], iteration_bounds = array<i64: 2>, scalar_prefetch = 0 : i64, scratch_operands = 0 : i64, tpu.core_type = #tpu.core_type<tc>, window_params = [{transform_indices = @transform_0, window_bounds = array<i64: 32, 784>}, {transform_indices = @transform_1, window_bounds = array<i64: 32, 32>}, {pipeline_mode = #tpu.pipeline_mode<synchronous>, transform_indices = @transform_2, window_bounds = array<i64: 784, 400>}, {pipeline_mode = #tpu.pipeline_mode<synchronous>, transform_indices = @transform_3, window_bounds = array<i64: 1, 400>}, {pipeline_mode = #tpu.pipeline_mode<synchronous>, transform_indices = @transform_4, window_bounds = array<i64: 400, 128>}, {pipeline_mode = #tpu.pipeline_mode<synchronous>, transform_indices = @transform_5, window_bounds = array<i64: 1, 128>}, {pipeline_mode = #tpu.pipeline_mode<synchronous>, transform_indices = @transform_6, window_bounds = array<i64: 32, 400>}, {pipeline_mode = #tpu.pipeline_mode<synchronous>, transform_indices = @transform_7, window_bounds = array<i64: 1, 400>}, {pipeline_mode = #tpu.pipeline_mode<synchronous>, transform_indices = @transform_8, window_bounds = array<i64: 400, 784>}, {pipeline_mode = #tpu.pipeline_mode<synchronous>, transform_indices = @transform_9, window_bounds = array<i64: 1, 784>}, {transform_indices = @transform_10, window_bounds = array<i64: 32, 784>}, {transform_indices = @transform_11, window_bounds = array<i64: 32, 128>}]} {
    %c0 = arith.constant 0 : index
    %c0_0 = arith.constant 0 : index
    %0 = vector.load %arg1[%c0, %c0_0] : memref<32x784xf32, #tpu.memory_space<vmem>>, vector<32x784xf32>
    %1 = arith.truncf %0 : vector<32x784xf32> to vector<32x784xbf16>
    %c0_1 = arith.constant 0 : index
    %c0_2 = arith.constant 0 : index
    %2 = vector.load %arg3[%c0_1, %c0_2] : memref<784x400xbf16, #tpu.memory_space<vmem>>, vector<784x400xbf16>
    %cst = arith.constant dense<0.000000e+00> : vector<32x400xf32>
    %3 = tpu.matmul %1, %2, %cst {dimension_numbers = #tpu.dot_dimension_numbers<[1], [0], [0], [1], [0, 0, 1, 1], [], []>} : vector<32x784xbf16>, vector<784x400xbf16>, vector<32x400xf32> -> vector<32x400xf32>
    %c0_3 = arith.constant 0 : index
    %c0_4 = arith.constant 0 : index
    %4 = vector.load %arg4[%c0_3, %c0_4] : memref<1x400xf32, #tpu.memory_space<vmem>>, vector<1x400xf32>
    %5 = vector.broadcast %4 : vector<1x400xf32> to vector<32x400xf32>
    %6 = arith.addf %3, %5 : vector<32x400xf32>
    %cst_5 = arith.constant 0.000000e+00 : f32
    %7 = vector.broadcast %cst_5 : f32 to vector<32x400xf32>
    %8 = arith.maximumf %6, %7 : vector<32x400xf32>
    %9 = arith.truncf %8 : vector<32x400xf32> to vector<32x400xbf16>
    %c0_6 = arith.constant 0 : index
    %c0_7 = arith.constant 0 : index
    %10 = vector.load %arg5[%c0_6, %c0_7] : memref<400x128xbf16, #tpu.memory_space<vmem>>, vector<400x128xbf16>
    %cst_8 = arith.constant dense<0.000000e+00> : vector<32x128xf32>
    %11 = tpu.matmul %9, %10, %cst_8 {dimension_numbers = #tpu.dot_dimension_numbers<[1], [0], [0], [1], [0, 0, 1, 1], [], []>} : vector<32x400xbf16>, vector<400x128xbf16>, vector<32x128xf32> -> vector<32x128xf32>
    %c0_9 = arith.constant 0 : index
    %c0_10 = arith.constant 0 : index
    %12 = vector.load %arg6[%c0_9, %c0_10] : memref<1x128xf32, #tpu.memory_space<vmem>>, vector<1x128xf32>
    %13 = vector.broadcast %12 : vector<1x128xf32> to vector<32x128xf32>
    %14 = arith.addf %11, %13 : vector<32x128xf32>
    %c0_11 = arith.constant 0 : index
    %c0_12 = arith.constant 0 : index
    %15 = vector.load %arg12[%c0_11, %c0_12] : memref<32x128xf32, #tpu.memory_space<vmem>>, vector<32x128xf32>
    tpu.vector_store %arg12[%c0_11, %c0_12], %14 {strides = array<i32>} : memref<32x128xf32, #tpu.memory_space<vmem>>, vector<32x128xf32>,
    %16 = vector.extract_strided_slice %14 {offsets = [0, 0], sizes = [32, 32], strides = [1, 1]} : vector<32x128xf32> to vector<32x32xf32>
    %17 = vector.extract_strided_slice %14 {offsets = [0, 64], sizes = [32, 32], strides = [1, 1]} : vector<32x128xf32> to vector<32x32xf32>
    %c0_13 = arith.constant 0 : index
    %c0_14 = arith.constant 0 : index
    %18 = vector.load %arg2[%c0_13, %c0_14] : memref<32x32xf32, #tpu.memory_space<vmem>>, vector<32x32xf32>
    %cst_15 = arith.constant 5.000000e-01 : f32
    %19 = vector.broadcast %cst_15 : f32 to vector<32x32xf32>
    %20 = arith.mulf %19, %17 : vector<32x32xf32>
    %21 = math.exp %20 : vector<32x32xf32>
    %22 = arith.mulf %18, %21 : vector<32x32xf32>
    %23 = arith.addf %16, %22 : vector<32x32xf32>
    %24 = arith.truncf %23 : vector<32x32xf32> to vector<32x32xbf16>
    %c0_16 = arith.constant 0 : index
    %c0_17 = arith.constant 0 : index
    %25 = vector.load %arg7[%c0_16, %c0_17] : memref<32x400xbf16, #tpu.memory_space<vmem>>, vector<32x400xbf16>
    %cst_18 = arith.constant dense<0.000000e+00> : vector<32x400xf32>
    %26 = tpu.matmul %24, %25, %cst_18 {dimension_numbers = #tpu.dot_dimension_numbers<[1], [0], [0], [1], [0, 0, 1, 1], [], []>} : vector<32x32xbf16>, vector<32x400xbf16>, vector<32x400xf32> -> vector<32x400xf32>
    %c0_19 = arith.constant 0 : index
    %c0_20 = arith.constant 0 : index
    %27 = vector.load %arg8[%c0_19, %c0_20] : memref<1x400xf32, #tpu.memory_space<vmem>>, vector<1x400xf32>
    %28 = vector.broadcast %27 : vector<1x400xf32> to vector<32x400xf32>
    %29 = arith.addf %26, %28 : vector<32x400xf32>
    %cst_21 = arith.constant 0.000000e+00 : f32
    %30 = vector.broadcast %cst_21 : f32 to vector<32x400xf32>
    %31 = arith.maximumf %29, %30 : vector<32x400xf32>
    %32 = arith.truncf %31 : vector<32x400xf32> to vector<32x400xbf16>
    %c0_22 = arith.constant 0 : index
    %c0_23 = arith.constant 0 : index
    %33 = vector.load %arg9[%c0_22, %c0_23] : memref<400x784xbf16, #tpu.memory_space<vmem>>, vector<400x784xbf16>
    %cst_24 = arith.constant dense<0.000000e+00> : vector<32x784xf32>
    %34 = tpu.matmul %32, %33, %cst_24 {dimension_numbers = #tpu.dot_dimension_numbers<[1], [0], [0], [1], [0, 0, 1, 1], [], []>} : vector<32x400xbf16>, vector<400x784xbf16>, vector<32x784xf32> -> vector<32x784xf32>
    %c0_25 = arith.constant 0 : index
    %c0_26 = arith.constant 0 : index
    %35 = vector.load %arg10[%c0_25, %c0_26] : memref<1x784xf32, #tpu.memory_space<vmem>>, vector<1x784xf32>
    %36 = vector.broadcast %35 : vector<1x784xf32> to vector<32x784xf32>
    %37 = arith.addf %34, %36 : vector<32x784xf32>
    %38 = arith.negf %37 : vector<32x784xf32>
    %39 = math.exp %38 : vector<32x784xf32>
    %cst_27 = arith.constant 1.000000e+00 : f32
    %40 = vector.broadcast %cst_27 : f32 to vector<32x784xf32>
    %41 = arith.addf %40, %39 : vector<32x784xf32>
    %42 = arith.divf %40, %41 : vector<32x784xf32>
    %43 = arith.truncf %42 : vector<32x784xf32> to vector<32x784xbf16>
    %c0_28 = arith.constant 0 : index
    %c0_29 = arith.constant 0 : index
    %44 = vector.load %arg11[%c0_28, %c0_29] : memref<32x784xbf16, #tpu.memory_space<vmem>>, vector<32x784xbf16>
    tpu.vector_store %arg11[%c0_28, %c0_29], %43 {strides = array<i32>} : memref<32x784xbf16, #tpu.memory_space<vmem>>, vector<32x784xbf16>,
    return
  }
  func.func @transform_0(%arg0: i32) -> (i32, i32) {
    %c0_i32 = arith.constant 0 : i32
    %c0_i32_0 = arith.constant 0 : i32
    return %arg0, %c0_i32 : i32, i32
  }
  func.func @transform_1(%arg0: i32) -> (i32, i32) {
    %c0_i32 = arith.constant 0 : i32
    %c0_i32_0 = arith.constant 0 : i32
    return %arg0, %c0_i32 : i32, i32
  }
  func.func @transform_2(%arg0: i32) -> (i32, i32) {
    %c0_i32 = arith.constant 0 : i32
    %c0_i32_0 = arith.constant 0 : i32
    %c0_i32_1 = arith.constant 0 : i32
    return %c0_i32, %c0_i32_0 : i32, i32
  }
  func.func @transform_3(%arg0: i32) -> (i32, i32) {
    %c0_i32 = arith.constant 0 : i32
    %c0_i32_0 = arith.constant 0 : i32
    %c0_i32_1 = arith.constant 0 : i32
    return %c0_i32, %c0_i32_0 : i32, i32
  }
  func.func @transform_4(%arg0: i32) -> (i32, i32) {
    %c0_i32 = arith.constant 0 : i32
    %c0_i32_0 = arith.constant 0 : i32
    %c0_i32_1 = arith.constant 0 : i32
    return %c0_i32, %c0_i32_0 : i32, i32
  }
  func.func @transform_5(%arg0: i32) -> (i32, i32) {
    %c0_i32 = arith.constant 0 : i32
    %c0_i32_0 = arith.constant 0 : i32
    %c0_i32_1 = arith.constant 0 : i32
    return %c0_i32, %c0_i32_0 : i32, i32
  }
  func.func @transform_6(%arg0: i32) -> (i32, i32) {
    %c0_i32 = arith.constant 0 : i32
    %c0_i32_0 = arith.constant 0 : i32
    %c0_i32_1 = arith.constant 0 : i32
    return %c0_i32, %c0_i32_0 : i32, i32
  }
  func.func @transform_7(%arg0: i32) -> (i32, i32) {
    %c0_i32 = arith.constant 0 : i32
    %c0_i32_0 = arith.constant 0 : i32
    %c0_i32_1 = arith.constant 0 : i32
    return %c0_i32, %c0_i32_0 : i32, i32
  }
  func.func @transform_8(%arg0: i32) -> (i32, i32) {
    %c0_i32 = arith.constant 0 : i32
    %c0_i32_0 = arith.constant 0 : i32
    %c0_i32_1 = arith.constant 0 : i32
    return %c0_i32, %c0_i32_0 : i32, i32
  }
  func.func @transform_9(%arg0: i32) -> (i32, i32) {
    %c0_i32 = arith.constant 0 : i32
    %c0_i32_0 = arith.constant 0 : i32
    %c0_i32_1 = arith.constant 0 : i32
    return %c0_i32, %c0_i32_0 : i32, i32
  }
  func.func @transform_10(%arg0: i32) -> (i32, i32) {
    %c0_i32 = arith.constant 0 : i32
    %c0_i32_0 = arith.constant 0 : i32
    return %arg0, %c0_i32 : i32, i32
  }
  func.func @transform_11(%arg0: i32) -> (i32, i32) {
    %c0_i32 = arith.constant 0 : i32
    %c0_i32_0 = arith.constant 0 : i32
    return %arg0, %c0_i32 : i32, i32
  }
}

module attributes {stable_mosaic.version = 11 : i64} {
  func.func @cvae_kernel(%arg0: i32, %arg1: memref<32x784xf32, #tpu.memory_space<vmem>>, %arg2: memref<32x32xf32, #tpu.memory_space<vmem>>, %arg3: memref<784x400xbf16, #tpu.memory_space<vmem>>, %arg4: memref<1x400xf32, #tpu.memory_space<vmem>>, %arg5: memref<400x128xbf16, #tpu.memory_space<vmem>>, %arg6: memref<1x128xf32, #tpu.memory_space<vmem>>, %arg7: memref<32x400xbf16, #tpu.memory_space<vmem>>, %arg8: memref<1x400xf32, #tpu.memory_space<vmem>>, %arg9: memref<400x784xbf16, #tpu.memory_space<vmem>>, %arg10: memref<1x784xf32, #tpu.memory_space<vmem>>, %arg11: memref<32x784xbf16, #tpu.memory_space<vmem>>, %arg12: memref<32x128xf32, #tpu.memory_space<vmem>>) attributes {dimension_semantics = [#tpu.dimension_semantics<parallel>], iteration_bounds = array<i64: 2>, scalar_prefetch = 0 : i64, scratch_operands = 0 : i64, tpu.core_type = #tpu.core_type<tc>, window_params = [{transform_indices = @transform_0, window_bounds = array<i64: 32, 784>}, {transform_indices = @transform_1, window_bounds = array<i64: 32, 32>}, {pipeline_mode = #tpu.pipeline_mode<synchronous>, transform_indices = @transform_2, window_bounds = array<i64: 784, 400>}, {pipeline_mode = #tpu.pipeline_mode<synchronous>, transform_indices = @transform_3, window_bounds = array<i64: 1, 400>}, {pipeline_mode = #tpu.pipeline_mode<synchronous>, transform_indices = @transform_4, window_bounds = array<i64: 400, 128>}, {pipeline_mode = #tpu.pipeline_mode<synchronous>, transform_indices = @transform_5, window_bounds = array<i64: 1, 128>}, {pipeline_mode = #tpu.pipeline_mode<synchronous>, transform_indices = @transform_6, window_bounds = array<i64: 32, 400>}, {pipeline_mode = #tpu.pipeline_mode<synchronous>, transform_indices = @transform_7, window_bounds = array<i64: 1, 400>}, {pipeline_mode = #tpu.pipeline_mode<synchronous>, transform_indices = @transform_8, window_bounds = array<i64: 400, 784>}, {pipeline_mode = #tpu.pipeline_mode<synchronous>, transform_indices = @transform_9, window_bounds = array<i64: 1, 784>}, {transform_indices = @transform_10, window_bounds = array<i64: 32, 784>}, {transform_indices = @transform_11, window_bounds = array<i64: 32, 128>}]} {
    %c0 = arith.constant 0 : index
    %c0_0 = arith.constant 0 : index
    %0 = vector.load %arg1[%c0, %c0_0] : memref<32x784xf32, #tpu.memory_space<vmem>>, vector<32x784xf32>
    %1 = arith.truncf %0 : vector<32x784xf32> to vector<32x784xbf16>
    %c0_1 = arith.constant 0 : index
    %c0_2 = arith.constant 0 : index
    %2 = vector.load %arg3[%c0_1, %c0_2] : memref<784x400xbf16, #tpu.memory_space<vmem>>, vector<784x400xbf16>
    %cst = arith.constant dense<0.000000e+00> : vector<32x400xf32>
    %3 = tpu.matmul %1, %2, %cst {dimension_numbers = #tpu.dot_dimension_numbers<[1], [0], [0], [1], [0, 0, 1, 1], [], []>} : vector<32x784xbf16>, vector<784x400xbf16>, vector<32x400xf32> -> vector<32x400xf32>
    %c0_3 = arith.constant 0 : index
    %c0_4 = arith.constant 0 : index
    %4 = vector.load %arg4[%c0_3, %c0_4] : memref<1x400xf32, #tpu.memory_space<vmem>>, vector<1x400xf32>
    %5 = vector.broadcast %4 : vector<1x400xf32> to vector<32x400xf32>
    %6 = arith.addf %3, %5 : vector<32x400xf32>
    %cst_5 = arith.constant 0.000000e+00 : f32
    %7 = vector.broadcast %cst_5 : f32 to vector<32x400xf32>
    %8 = arith.maximumf %6, %7 : vector<32x400xf32>
    %9 = arith.truncf %8 : vector<32x400xf32> to vector<32x400xbf16>
    %c0_6 = arith.constant 0 : index
    %c0_7 = arith.constant 0 : index
    %10 = vector.load %arg5[%c0_6, %c0_7] : memref<400x128xbf16, #tpu.memory_space<vmem>>, vector<400x128xbf16>
    %cst_8 = arith.constant dense<0.000000e+00> : vector<32x128xf32>
    %11 = tpu.matmul %9, %10, %cst_8 {dimension_numbers = #tpu.dot_dimension_numbers<[1], [0], [0], [1], [0, 0, 1, 1], [], []>} : vector<32x400xbf16>, vector<400x128xbf16>, vector<32x128xf32> -> vector<32x128xf32>
    %c0_9 = arith.constant 0 : index
    %c0_10 = arith.constant 0 : index
    %12 = vector.load %arg6[%c0_9, %c0_10] : memref<1x128xf32, #tpu.memory_space<vmem>>, vector<1x128xf32>
    %13 = vector.broadcast %12 : vector<1x128xf32> to vector<32x128xf32>
    %14 = arith.addf %11, %13 : vector<32x128xf32>
    %c0_11 = arith.constant 0 : index
    %c0_12 = arith.constant 0 : index
    %15 = vector.load %arg12[%c0_11, %c0_12] : memref<32x128xf32, #tpu.memory_space<vmem>>, vector<32x128xf32>
    tpu.vector_store %arg12[%c0_11, %c0_12], %14 {strides = array<i32>} : memref<32x128xf32, #tpu.memory_space<vmem>>, vector<32x128xf32>,
    %16 = vector.extract_strided_slice %14 {offsets = [0, 0], sizes = [32, 32], strides = [1, 1]} : vector<32x128xf32> to vector<32x32xf32>
    %17 = vector.extract_strided_slice %14 {offsets = [0, 64], sizes = [32, 32], strides = [1, 1]} : vector<32x128xf32> to vector<32x32xf32>
    %c0_13 = arith.constant 0 : index
    %c0_14 = arith.constant 0 : index
    %18 = vector.load %arg2[%c0_13, %c0_14] : memref<32x32xf32, #tpu.memory_space<vmem>>, vector<32x32xf32>
    %cst_15 = arith.constant 5.000000e-01 : f32
    %19 = vector.broadcast %cst_15 : f32 to vector<32x32xf32>
    %20 = arith.mulf %19, %17 : vector<32x32xf32>
    %21 = math.exp %20 : vector<32x32xf32>
    %22 = arith.mulf %18, %21 : vector<32x32xf32>
    %23 = arith.addf %16, %22 : vector<32x32xf32>
    %24 = arith.truncf %23 : vector<32x32xf32> to vector<32x32xbf16>
    %c0_16 = arith.constant 0 : index
    %c0_17 = arith.constant 0 : index
    %25 = vector.load %arg7[%c0_16, %c0_17] : memref<32x400xbf16, #tpu.memory_space<vmem>>, vector<32x400xbf16>
    %cst_18 = arith.constant dense<0.000000e+00> : vector<32x400xf32>
    %26 = tpu.matmul %24, %25, %cst_18 {dimension_numbers = #tpu.dot_dimension_numbers<[1], [0], [0], [1], [0, 0, 1, 1], [], []>} : vector<32x32xbf16>, vector<32x400xbf16>, vector<32x400xf32> -> vector<32x400xf32>
    %c0_19 = arith.constant 0 : index
    %c0_20 = arith.constant 0 : index
    %27 = vector.load %arg8[%c0_19, %c0_20] : memref<1x400xf32, #tpu.memory_space<vmem>>, vector<1x400xf32>
    %28 = vector.broadcast %27 : vector<1x400xf32> to vector<32x400xf32>
    %29 = arith.addf %26, %28 : vector<32x400xf32>
    %cst_21 = arith.constant 0.000000e+00 : f32
    %30 = vector.broadcast %cst_21 : f32 to vector<32x400xf32>
    %31 = arith.maximumf %29, %30 : vector<32x400xf32>
    %32 = arith.truncf %31 : vector<32x400xf32> to vector<32x400xbf16>
    %c0_22 = arith.constant 0 : index
    %c0_23 = arith.constant 0 : index
    %33 = vector.load %arg9[%c0_22, %c0_23] : memref<400x784xbf16, #tpu.memory_space<vmem>>, vector<400x784xbf16>
    %cst_24 = arith.constant dense<0.000000e+00> : vector<32x784xf32>
    %34 = tpu.matmul %32, %33, %cst_24 {dimension_numbers = #tpu.dot_dimension_numbers<[1], [0], [0], [1], [0, 0, 1, 1], [], []>} : vector<32x400xbf16>, vector<400x784xbf16>, vector<32x784xf32> -> vector<32x784xf32>
    %c0_25 = arith.constant 0 : index
    %c0_26 = arith.constant 0 : index
    %35 = vector.load %arg10[%c0_25, %c0_26] : memref<1x784xf32, #tpu.memory_space<vmem>>, vector<1x784xf32>
    %36 = vector.broadcast %35 : vector<1x784xf32> to vector<32x784xf32>
    %37 = arith.addf %34, %36 : vector<32x784xf32>
    %38 = arith.negf %37 : vector<32x784xf32>
    %39 = math.exp %38 : vector<32x784xf32>
    %cst_27 = arith.constant 1.000000e+00 : f32
    %40 = vector.broadcast %cst_27 : f32 to vector<32x784xf32>
    %41 = arith.addf %40, %39 : vector<32x784xf32>
    %42 = arith.divf %40, %41 : vector<32x784xf32>
    %43 = arith.truncf %42 : vector<32x784xf32> to vector<32x784xbf16>
    %c0_28 = arith.constant 0 : index
    %c0_29 = arith.constant 0 : index
    %44 = vector.load %arg11[%c0_28, %c0_29] : memref<32x784xbf16, #tpu.memory_space<vmem>>, vector<32x784xbf16>
    tpu.vector_store %arg11[%c0_28, %c0_29], %43 {strides = array<i32>} : memref<32x784xbf16, #tpu.memory_space<vmem>>, vector<32x784xbf16>,
    return
  }
  func.func @transform_0(%arg0: i32) -> (i32, i32) {
    %c0_i32 = arith.constant 0 : i32
    %c0_i32_0 = arith.constant 0 : i32
    return %arg0, %c0_i32 : i32, i32
  }
  func.func @transform_1(%arg0: i32) -> (i32, i32) {
    %c0_i32 = arith.constant 0 : i32
    %c0_i32_0 = arith.constant 0 : i32
    return %arg0, %c0_i32 : i32, i32
  }
  func.func @transform_2(%arg0: i32) -> (i32, i32) {
    %c0_i32 = arith.constant 0 : i32
    %c0_i32_0 = arith.constant 0 : i32
    %c0_i32_1 = arith.constant 0 : i32
    return %c0_i32, %c0_i32_0 : i32, i32
  }
  func.func @transform_3(%arg0: i32) -> (i32, i32) {
    %c0_i32 = arith.constant 0 : i32
    %c0_i32_0 = arith.constant 0 : i32
    %c0_i32_1 = arith.constant 0 : i32
    return %c0_i32, %c0_i32_0 : i32, i32
  }
  func.func @transform_4(%arg0: i32) -> (i32, i32) {
    %c0_i32 = arith.constant 0 : i32
    %c0_i32_0 = arith.constant 0 : i32
    %c0_i32_1 = arith.constant 0 : i32
    return %c0_i32, %c0_i32_0 : i32, i32
  }
  func.func @transform_5(%arg0: i32) -> (i32, i32) {
    %c0_i32 = arith.constant 0 : i32
    %c0_i32_0 = arith.constant 0 : i32
    %c0_i32_1 = arith.constant 0 : i32
    return %c0_i32, %c0_i32_0 : i32, i32
  }
  func.func @transform_6(%arg0: i32) -> (i32, i32) {
    %c0_i32 = arith.constant 0 : i32
    %c0_i32_0 = arith.constant 0 : i32
    %c0_i32_1 = arith.constant 0 : i32
    return %c0_i32, %c0_i32_0 : i32, i32
  }
  func.func @transform_7(%arg0: i32) -> (i32, i32) {
    %c0_i32 = arith.constant 0 : i32
    %c0_i32_0 = arith.constant 0 : i32
    %c0_i32_1 = arith.constant 0 : i32
    return %c0_i32, %c0_i32_0 : i32, i32
  }
  func.func @transform_8(%arg0: i32) -> (i32, i32) {
    %c0_i32 = arith.constant 0 : i32
    %c0_i32_0 = arith.constant 0 : i32
    %c0_i32_1 = arith.constant 0 : i32
    return %c0_i32, %c0_i32_0 : i32, i32
  }
  func.func @transform_9(%arg0: i32) -> (i32, i32) {
    %c0_i32 = arith.constant 0 : i32
    %c0_i32_0 = arith.constant 0 : i32
    %c0_i32_1 = arith.constant 0 : i32
    return %c0_i32, %c0_i32_0 : i32, i32
  }
  func.func @transform_10(%arg0: i32) -> (i32, i32) {
    %c0_i32 = arith.constant 0 : i32
    %c0_i32_0 = arith.constant 0 : i32
    return %arg0, %c0_i32 : i32, i32
  }
  func.func @transform_11(%arg0: i32) -> (i32, i32) {
    %c0_i32 = arith.constant 0 : i32
    %c0_i32_0 = arith.constant 0 : i32
    return %arg0, %c0_i32 : i32, i32
  }
}

</mosaic_0001>

<bundles_post_ra>
// kernel: tpu_custom_call.1
= control target key start
LH: loop header
LB: loop body
LE: loop exit
PB: predicated region body
PF: predicated region fallthrough
CT: control target
= control target key end

     0   :  { %s10887_s0 = inlined_call_operand.vmem [shape: f32[64,784], index: 0, kind: input, shape index: {}]   ;;  %s10888_s1 = inlined_call_operand.vmem [shape: f32[64,32], index: 1, kind: input, shape index: {}]   ;;  %s10889_s2 = inlined_call_operand.vmem [shape: bf16[784,400], index: 2, kind: input, shape index: {}]   ;;  %s10890_s3 = inlined_call_operand.vmem [shape: f32[1,400], index: 3, kind: input, shape index: {}]   ;;  %s10891_s4 = inlined_call_operand.vmem [shape: bf16[400,128], index: 4, kind: input, shape index: {}]   ;;  %s10892_s5 = inlined_call_operand.vmem [shape: f32[1,128], index: 5, kind: input, shape index: {}]   ;;  %s10893_s6 = inlined_call_operand.vmem [shape: bf16[32,400], index: 6, kind: input, shape index: {}]   ;;  %s10894_s7 = inlined_call_operand.vmem [shape: f32[1,400], index: 7, kind: input, shape index: {}]   ;;  %s10895_s8 = inlined_call_operand.vmem [shape: bf16[400,784], index: 8, kind: input, shape index: {}]   ;;  %s10896_s9 = inlined_call_operand.vmem [shape: f32[1,784], index: 9, kind: input, shape index: {}]   ;;  %s10897_s10 = inlined_call_operand.hbm [shape: bf16[64,784], index: 10, kind: output, shape index: {0}]   ;;  %s10898_s11 = inlined_call_operand.hbm [shape: f32[64,128], index: 11, kind: output, shape index: {1}]  }
   0x1   :  { %10900 = sst [smem:[#allocation10_spill]] %s10887_s0 }
   0x2   :  { %10901 = sst [smem:[#allocation11_spill]] %s10888_s1 }
   0x3   :  { %10902 = sst [smem:[#allocation12_spill]] %s10889_s2 }
   0x4   :  { %17 = vsyncpa [#allocation3], 0 }
   0x5   :  { %19 = vsyncpa [#allocation3 + $0x1], 0 }
   0x6   :  { %20 = vsyncpa [#allocation5], 0 }
   0x7   :  { %22 = vsyncpa [#allocation5 + $0x1], 0  ;;  %s7512_s17 = smov 0   ;;  %s7514_s18 = smov 0  }
   0x8   :  { %s7516_s19 = smov 0   ;;  %s7518_s20 = smov 0  }
   0x9 LB: > { %10903 = sst [smem:[#allocation8_spill]] %s7441_s19  ;;  %s7533_s21 = sadd.s32 4294967295, %s7445_s20   ;;  %s7445_s20 = sphi %s7518_s20, %s10954_s20   ;;  %s7441_s19 = sphi %s7516_s19, %s10951_s19   ;;  %s7437_s18 = sphi %s7514_s18, %s10953_s18   ;;  %s7433_s17 = sphi %s7512_s17, %s10952_s17  }
   0xa   : > { %s5079_s22 = sadd.s32 4294967294, %s7445_s20   ;;  %s7537_s23 = sadd.s32 1, %s7445_s20  }
   0xb   : > { %s255_s24 = sadd.s32 1, %s7441_s19  ;;  %s252_s25 = ssub.s32 %s7445_s20, %s7537_s23 }
   0xc   : > { %p265_p0 = scmp.ne.s32.totalorder %s7441_s19, %s7437_s18  ;;  %p253_p1 = scmp.eq.s32.totalorder %s252_s25, 0 }
   0xd   : > { %p266_p2 = scmp.eq.s32.totalorder %s7533_s21, 1  ;;  %p271_p3 = scmp.ne.s32.totalorder %s7437_s18, %s7433_s17 }
   0xe   : > { %p272_p4 = scmp.eq.s32.totalorder %s5079_s22, 1  ;;  %p5082_p7 = scmp.ge.s32.totalorder %s7445_s20, 1 }
   0xf   : > { %s7548_s26 = scalar_select %p253_p1, %s7441_s19, %s255_s24  }
  0x10   : > { %p7550_p5 = por %p266_p2, %p265_p0  ;;  %p7554_p6 = por %p272_p4, %p271_p3 }
  0x11   : > { %10904 = sst [smem:[#allocation9_spill]] %s7548_s26  ;;  %p359_p8 = scmp.lt.s32.totalorder %s7445_s20, 3 }
  0x13   : > { %p360_p9 = pnand %p5082_p7, %p359_p8 }
  0x14   : > { %s10907_s2 = sld [smem:[#allocation12_spill]] (!%p360_p9)  ;;  %s5084_s26 = sshll.u32 (!%p360_p9), %s7533_s21, 2 }
  0x15   : > { %363 = sbr.rel (%p360_p9) target bundleno = 1212 (0x4bc), region = 60  ;;  %p411_p10 = scmp.lt.s32.totalorder (!%p360_p9), %s5084_s26, 7 }
  0x16   : > { %s10908_s0 = sld [smem:[#allocation10_spill]] (!%p360_p9)  ;;  %s9000_s24 = sand.u32 (!%p360_p9), 1, %s7437_s18  }
  0x17   : > { %s5083_s19 = sshll.u32 (!%p360_p9), %s9000_s24, 5  ;;  %s7447_s12 = smov (!%p360_p9), 64  }
  0x18   : > { %s9005_s29 = scalar_lea.vmem (!%p360_p9), [#allocation4], %s5083_s19  ;;  %s10909_s1 = sld [smem:[#allocation11_spill]] (!%p360_p9) }
  0x19   : > { %s7176_s14 = sshll.u32 (!%p360_p9), %s7533_s21, 5  ;;  %s4939_s19 = scalar_lea.sflag (!%p360_p9), [#allocation5], %s9000_s24 }
  0x1a   : > { %v5202_v0 = vld [vmem:[%s10907_s2 + $0xe0] sm:$0xf]  ;;  %v6802_v1 = vld [vmem:[%s10907_s2 + $0xec] sm:$0xf0]  ;;  %s10956_s26 = smov (!%p411_p10, %s5084_s26), 7  ;;  %vm1654_vm0 = vcmask 130048  }
  0x1b   : > { %v5330_v2 = vld [vmem:[%s10907_s2 + $0x1e0] sm:$0xf]  ;;  %v5203_v3 = vor.u32 %v6802_v1, %v5202_v0  ;;  %v6834_v4 = vld [vmem:[%s10907_s2 + $0x1ec] sm:$0xf0]  ;;  %s7178_s25 = smul.u32 56, %s10956_s26  ;;  %s5087_s13 = sshll.u32 %s10956_s26, 3 }
  0x1c   : > { %v5458_v5 = vld [vmem:[%s10907_s2 + $0x2e0] sm:$0xf]  ;;  %v6866_v6 = vld [vmem:[%s10907_s2 + $0x2ec] sm:$0xf0]  ;;  %v5331_v7 = vor.u32 %v6834_v4, %v5330_v2  ;;  %vm2607_vm1 = vcmask 261120  }
  0x1d   : > { %v5459_v8 = vor.u32 %v6866_v6, %v5458_v5  ;;  %v5586_v9 = vld [vmem:[%s10907_s2 + $0x3e0] sm:$0xf]  ;;  %v6898_v10 = vld [vmem:[%s10907_s2 + $0x3ec] sm:$0xf0]  ;;  %1661 = vmatpush.bf16.msra.mxu0 %v5203_v3  ;;  %s7774_s30 = scalar_lea.vmem %s10908_s0, %s7178_s25  ;;  %s4968_s25 = scalar_lea.hbm %s10898_s11, %s7176_s14 }
  0x1e   : > { %v5186_v11 = vld [vmem:[%s10907_s2 + $0xc0] sm:$0xf]  ;;  %v5587_v12 = vor.u32 %v6898_v10, %v5586_v9  ;;  %v6798_v13 = vld [vmem:[%s10907_s2 + $0xcc] sm:$0xf0]  ;;  %1680 = vmatpush.bf16.msra.mxu1 %v5331_v7  ;;  %s9077_s16 = scalar_lea.vmem %s10909_s1, %s5087_s13  ;;  %s4969_s13 = sshll.u32 %s9005_s29, 4  ;;  %s10531_s13 = int_to_ptr.vmem [resolvable:$true] %s4969_s13 }
  0x1f   : > { %v5314_v14 = vld [vmem:[%s10907_s2 + $0x1c0] sm:$0xf]  ;;  %v6830_v15 = vld [vmem:[%s10907_s2 + $0x1cc] sm:$0xf0]  ;;  %1699 = vmatpush.bf16.msra.mxu2 %v5459_v8  ;;  %v5187_v16 = vor.u32 %v6798_v13, %v5186_v11  ;;  %s7371_s1 = scalar_lea.hbm %s10898_s11, 64 }
  0x20   : > { %v5315_v17 = vor.u32 %v6830_v15, %v5314_v14  ;;  %v5442_v18 = vld [vmem:[%s10907_s2 + $0x2c0] sm:$0xf]  ;;  %v6862_v19 = vld [vmem:[%s10907_s2 + $0x2cc] sm:$0xf0]  ;;  %1718 = vmatpush.bf16.msra.mxu3 %v5587_v12 }
  0x21   : > { %v5570_v20 = vld [vmem:[%s10907_s2 + $0x3c0] sm:$0xf]  ;;  %v5443_v21 = vor.u32 %v6862_v19, %v5442_v18  ;;  %v6894_v22 = vld [vmem:[%s10907_s2 + $0x3cc] sm:$0xf0]  ;;  %1662 = vmatpush.bf16.msra.mxu0 %v5187_v16 }
  0x22   : > { %v5170_v23 = vld [vmem:[%s10907_s2 + $0xa0] sm:$0xf]  ;;  %v6794_v24 = vld [vmem:[%s10907_s2 + $0xac] sm:$0xf0]  ;;  %v5571_v25 = vor.u32 %v6894_v22, %v5570_v20  ;;  %1681 = vmatpush.bf16.msra.mxu1 %v5315_v17 }
  0x23   : > { %v5298_v26 = vld [vmem:[%s10907_s2 + $0x1a0] sm:$0xf]  ;;  %v6826_v27 = vld [vmem:[%s10907_s2 + $0x1ac] sm:$0xf0]  ;;  %v5171_v29 = vor.u32 %v6794_v24, %v5170_v23  ;;  %1700 = vmatpush.bf16.msra.mxu2 %v5443_v21 }
  0x24   : > { %v5426_v28 = vld [vmem:[%s10907_s2 + $0x2a0] sm:$0xf]  ;;  %v6858_v30 = vld [vmem:[%s10907_s2 + $0x2ac] sm:$0xf0]  ;;  %v5299_v33 = vor.u32 %v6826_v27, %v5298_v26  ;;  %1719 = vmatpush.bf16.msra.mxu3 %v5571_v25 }
  0x25   : > { %v5554_v31 = vld [vmem:[%s10907_s2 + $0x3a0] sm:$0xf]  ;;  %v6890_v32 = vld [vmem:[%s10907_s2 + $0x3ac] sm:$0xf0]  ;;  %v5427_v34 = vor.u32 %v6858_v30, %v5426_v28  ;;  %1663 = vmatpush.bf16.msra.mxu0 %v5171_v29 }
  0x26   : > { %v5154_v35 = vld [vmem:[%s10907_s2 + $0x80] sm:$0xf]  ;;  %v6790_v36 = vld [vmem:[%s10907_s2 + $0x8c] sm:$0xf0]  ;;  %v5555_v38 = vor.u32 %v6890_v32, %v5554_v31  ;;  %1682 = vmatpush.bf16.msra.mxu1 %v5299_v33 }
  0x27   : > { %v5282_v37 = vld [vmem:[%s10907_s2 + $0x180] sm:$0xf]  ;;  %v6822_v39 = vld [vmem:[%s10907_s2 + $0x18c] sm:$0xf0]  ;;  %v5155_v44 = vor.u32 %v6790_v36, %v5154_v35  ;;  %1701 = vmatpush.bf16.msra.mxu2 %v5427_v34 }
  0x28   : > { %v5410_v40 = vld [vmem:[%s10907_s2 + $0x280] sm:$0xf]  ;;  %v6854_v41 = vld [vmem:[%s10907_s2 + $0x28c] sm:$0xf0]  ;;  %v5283_v45 = vor.u32 %v6822_v39, %v5282_v37  ;;  %1720 = vmatpush.bf16.msra.mxu3 %v5555_v38  ;;  %v6800_v37 = vld [vmem:[%s10907_s2 + $0xe4] sm:$0xf] }
  0x29   : > { %v5538_v42 = vld [vmem:[%s10907_s2 + $0x380] sm:$0xf]  ;;  %v6886_v43 = vld [vmem:[%s10907_s2 + $0x38c] sm:$0xf0]  ;;  %v5411_v46 = vor.u32 %v6854_v41, %v5410_v40  ;;  %1664 = vmatpush.bf16.msra.mxu0 %v5155_v44  ;;  %v5204_v38 = vld [vmem:[%s10907_s2 + $0xf0] sm:$0xf0] }
  0x2a   : > { %v5138_v47 = vld [vmem:[%s10907_s2 + $0x60] sm:$0xf]  ;;  %v6786_v48 = vld [vmem:[%s10907_s2 + $0x6c] sm:$0xf0]  ;;  %v5539_v50 = vor.u32 %v6886_v43, %v5538_v42  ;;  %1683 = vmatpush.bf16.msra.mxu1 %v5283_v45  ;;  %v433_v41 = vld [vmem:[%s7774_s30 + $0x38] sm:$0xff] }
  0x2b   : > { %v5266_v49 = vld [vmem:[%s10907_s2 + $0x160] sm:$0xf]  ;;  %v6818_v51 = vld [vmem:[%s10907_s2 + $0x16c] sm:$0xf0]  ;;  %v5139_v56 = vor.u32 %v6786_v48, %v5138_v47  ;;  %1702 = vmatpush.bf16.msra.mxu2 %v5411_v46  ;;  %v427_v42 = vld [vmem:[%s7774_s30 + $0x8] sm:$0xff] }
  0x2c   : > { %v5394_v52 = vld [vmem:[%s10907_s2 + $0x260] sm:$0xf]  ;;  %v6850_v53 = vld [vmem:[%s10907_s2 + $0x26c] sm:$0xf0]  ;;  %v5267_v57 = vor.u32 %v6818_v51, %v5266_v49  ;;  %1721 = vmatpush.bf16.msra.mxu3 %v5539_v50  ;;  %v435_v48 = vld [vmem:[%s7774_s30 + $0x48] sm:$0xff] }
  0x2d   : > { %v5522_v54 = vld [vmem:[%s10907_s2 + $0x360] sm:$0xf]  ;;  %v6882_v55 = vld [vmem:[%s10907_s2 + $0x36c] sm:$0xf0]  ;;  %v5395_v58 = vor.u32 %v6850_v53, %v5394_v52  ;;  %1665 = vmatpush.bf16.msra.mxu0 %v5139_v56  ;;  %v429_v52 = vld [vmem:[%s7774_s30 + $0x18] sm:$0xff] }
  0x2e   : > { %v5122_v59 = vld [vmem:[%s10907_s2 + $0x40] sm:$0xf]  ;;  %v6782_v60 = vld [vmem:[%s10907_s2 + $0x4c] sm:$0xf0]  ;;  %v5523_v62 = vor.u32 %v6882_v55, %v5522_v54  ;;  %1684 = vmatpush.bf16.msra.mxu1 %v5267_v57  ;;  %v5207_v57 = vor.u32 %v6800_v37, %v5204_v38 }
  0x2f   : > { %v5250_v61 = vld [vmem:[%s10907_s2 + $0x140] sm:$0xf]  ;;  %v6814_v63 = vld [vmem:[%s10907_s2 + $0x14c] sm:$0xf0]  ;;  %v5123_v4 = vor.u32 %v6782_v60, %v5122_v59  ;;  %1703 = vmatpush.bf16.msra.mxu2 %v5395_v58 }
  0x30   : > { %v5378_v0 = vld [vmem:[%s10907_s2 + $0x240] sm:$0xf]  ;;  %v6846_v1 = vld [vmem:[%s10907_s2 + $0x24c] sm:$0xf0]  ;;  %v5251_v6 = vor.u32 %v6814_v63, %v5250_v61  ;;  %1722 = vmatpush.bf16.msra.mxu3 %v5523_v62  ;;  %v6796_v61 = vld [vmem:[%s10907_s2 + $0xc4] sm:$0xf] }
  0x31   : > { %v5506_v2 = vld [vmem:[%s10907_s2 + $0x340] sm:$0xf]  ;;  %v6878_v3 = vld [vmem:[%s10907_s2 + $0x34c] sm:$0xf0]  ;;  %v5379_v7 = vor.u32 %v6846_v1, %v5378_v0  ;;  %1666 = vmatpush.bf16.msra.mxu0 %v5123_v4  ;;  %v5188_v62 = vld [vmem:[%s10907_s2 + $0xd0] sm:$0xf0] }
  0x32   : > { %v5106_v5 = vld [vmem:[%s10907_s2 + $0x20] sm:$0xf]  ;;  %v6778_v8 = vld [vmem:[%s10907_s2 + $0x2c] sm:$0xf0]  ;;  %v5507_v11 = vor.u32 %v6878_v3, %v5506_v2  ;;  %1685 = vmatpush.bf16.msra.mxu1 %v5251_v6  ;;  %v5191_v2 = vor.u32 %v6796_v61, %v5188_v62  ;;  %v6792_v6 = vld [vmem:[%s10907_s2 + $0xa4] sm:$0xf] }
  0x33   : > { %v5234_v9 = vld [vmem:[%s10907_s2 + $0x120] sm:$0xf]  ;;  %v6810_v10 = vld [vmem:[%s10907_s2 + $0x12c] sm:$0xf0]  ;;  %v5107_v16 = vor.u32 %v6778_v8, %v5106_v5  ;;  %1704 = vmatpush.bf16.msra.mxu2 %v5379_v7  ;;  %v5172_v7 = vld [vmem:[%s10907_s2 + $0xb0] sm:$0xf0] }
  0x34   : > { %v5362_v12 = vld [vmem:[%s10907_s2 + $0x220] sm:$0xf]  ;;  %v6842_v13 = vld [vmem:[%s10907_s2 + $0x22c] sm:$0xf0]  ;;  %v5235_v20 = vor.u32 %v6810_v10, %v5234_v9  ;;  %1723 = vmatpush.bf16.msra.mxu3 %v5507_v11  ;;  %v6776_v62 = vld [vmem:[%s10907_s2 + $0x24] sm:$0xf] }
  0x35   : > { %v5490_v14 = vld [vmem:[%s10907_s2 + $0x320] sm:$0xf]  ;;  %v6874_v15 = vld [vmem:[%s10907_s2 + $0x32c] sm:$0xf0]  ;;  %v5363_v21 = vor.u32 %v6842_v13, %v5362_v12  ;;  %1667 = vmatpush.bf16.msra.mxu0 %v5107_v16  ;;  %v5175_v12 = vor.u32 %v6792_v6, %v5172_v7 }
  0x36   : > { %v5090_v17 = vld [vmem:[%s10907_s2] sm:$0xf]  ;;  %v6774_v18 = vld [vmem:[%s10907_s2 + $0xc] sm:$0xf0]  ;;  %v5491_v24 = vor.u32 %v6874_v15, %v5490_v14  ;;  %1686 = vmatpush.bf16.msra.mxu1 %v5235_v20  ;;  %v6788_v14 = vld [vmem:[%s10907_s2 + $0x84] sm:$0xf] }
  0x37   : > { %v5218_v19 = vld [vmem:[%s10907_s2 + $0x100] sm:$0xf]  ;;  %v6806_v22 = vld [vmem:[%s10907_s2 + $0x10c] sm:$0xf0]  ;;  %v5091_v30 = vor.u32 %v6774_v18, %v5090_v17  ;;  %1705 = vmatpush.bf16.msra.mxu2 %v5363_v21  ;;  %v5156_v15 = vld [vmem:[%s10907_s2 + $0x90] sm:$0xf0] }
  0x38   : > { %v5346_v23 = vld [vmem:[%s10907_s2 + $0x200] sm:$0xf]  ;;  %v6838_v25 = vld [vmem:[%s10907_s2 + $0x20c] sm:$0xf0]  ;;  %v5219_v34 = vor.u32 %v6806_v22, %v5218_v19  ;;  %1724 = vmatpush.bf16.msra.mxu3 %v5491_v24  ;;  %v447_v18 = vld [vmem:[%s7774_s30 + $0xa8] sm:$0xff] }
  0x39   : > { %v5474_v26 = vld [vmem:[%s10907_s2 + $0x300] sm:$0xf]  ;;  %v6870_v27 = vld [vmem:[%s10907_s2 + $0x30c] sm:$0xf0]  ;;  %v5347_v35 = vor.u32 %v6838_v25, %v5346_v23  ;;  %1668 = vmatpush.bf16.msra.mxu0 %v5091_v30  ;;  %v441_v19 = vld [vmem:[%s7774_s30 + $0x78] sm:$0xff] }
  0x3a   : > { %v5858_v28 = vld [vmem:[%s10907_s2 + $0x600] sm:$0xf]  ;;  %v6966_v29 = vld [vmem:[%s10907_s2 + $0x60c] sm:$0xf0]  ;;  %v5475_v39 = vor.u32 %v6870_v27, %v5474_v26  ;;  %1687 = vmatpush.bf16.msra.mxu1 %v5219_v34  ;;  %v449_v25 = vld [vmem:[%s7774_s30 + $0xb8] sm:$0xff]  ;;  %v5159_v27 = vor.u32 %v6788_v14, %v5156_v15 }
  0x3b   : > { %v5714_v31 = vld [vmem:[%s10907_s2 + $0x4e0] sm:$0xf]  ;;  %v6962_v33 = vld [vmem:[%s10907_s2 + $0x5ec] sm:$0xf0]  ;;  %v5859_v43 = vor.u32 %v6966_v29, %v5858_v28  ;;  %1706 = vmatpush.bf16.msra.mxu2 %v5347_v35  ;;  %v443_v26 = vld [vmem:[%s7774_s30 + $0x88] sm:$0xff] }
  0x3c   : > { %v5842_v32 = vld [vmem:[%s10907_s2 + $0x5e0] sm:$0xf]  ;;  %v6930_v36 = vld [vmem:[%s10907_s2 + $0x4ec] sm:$0xf0]  ;;  %1725 = vmatpush.bf16.msra.mxu3 %v5475_v39  ;;  %v5140_v34 = vld [vmem:[%s10907_s2 + $0x70] sm:$0xf0] }
  0x3d   : > { %v426_v40 = vld [vmem:[%s7774_s30] sm:$0xff]  ;;  %v428_v47 = vld [vmem:[%s7774_s30 + $0x10] sm:$0xff]  ;;  %v5843_v49 = vor.u32 %v6962_v33, %v5842_v32  ;;  %v5715_v56 = vor.u32 %v6930_v36, %v5714_v31 }
  0x3e   : > { %v5826_v44 = vld [vmem:[%s10907_s2 + $0x5c0] sm:$0xf]  ;;  %v7791_v45 = vpack.c.bf16 %v433_v41, %v426_v40  ;;  %v7798_v51 = vpack.c.bf16 %v435_v48, %v428_v47  ;;  %v436_v53 = vld [vmem:[%s7774_s30 + $0x50] sm:$0xff]  ;;  %v6784_v33 = vld [vmem:[%s10907_s2 + $0x64] sm:$0xf] }
  0x3f   : > { %v434_v46 = vld [vmem:[%s7774_s30 + $0x40] sm:$0xff]  ;;  %v6958_v54 = vld [vmem:[%s10907_s2 + $0x5cc] sm:$0xf0]  ;;  %v7805_v55 = vpack.c.bf16 %v436_v53, %v429_v52  ;;  %1782 = vmatpush.bf16.msrb.mxu2 %v5859_v43  ;;  %1756 = vmatpush.bf16.msrb.mxu1 %v5843_v49  ;;  %v5588_v40 = vld [vmem:[%s10907_s2 + $0x3f0] sm:$0xf0]  ;;  %v5143_v43 = vor.u32 %v6784_v33, %v5140_v34 }
  0x40   : > { %v7796_v50 = vpack.c.bf16 %v434_v46, %v427_v42  ;;  %v5698_v58 = vld [vmem:[%s10907_s2 + $0x4c0] sm:$0xf]  ;;  %v6926_v59 = vld [vmem:[%s10907_s2 + $0x4cc] sm:$0xf0]  ;;  %1669 = vmatmul.bf16.vlgmr.msra.gmra.mxu0 %v7791_v45  ;;  %v5827_v60 = vor.u32 %v6958_v54, %v5826_v44  ;;  %1707 = vmatmul.bf16.vlgmr.msra.gmra.mxu2 %v7798_v51  ;;  %v6896_v35 = vld [vmem:[%s10907_s2 + $0x3e4] sm:$0xf] }
  0x41   : > { %v5810_v63 = vld [vmem:[%s10907_s2 + $0x5a0] sm:$0xf]  ;;  %v6954_v0 = vld [vmem:[%s10907_s2 + $0x5ac] sm:$0xf0]  ;;  %1726 = vmatmul.bf16.vlgmr.msra.gmra.mxu3 %v7805_v55  ;;  %1737 = vmatpush.bf16.msrb.mxu0 %v5715_v56  ;;  %v5699_v1 = vor.u32 %v6926_v59, %v5698_v58  ;;  %v6780_v47 = vld [vmem:[%s10907_s2 + $0x44] sm:$0xf]  ;;  %v5591_v48 = vor.u32 %v6896_v35, %v5588_v40 }
  0x42   : > { %1688 = vmatmul.bf16.vlgmr.msra.gmra.mxu1 %v7796_v50  ;;  %1794 = vmatpush.bf16.msrb.mxu3 %v5207_v57  ;;  %v5682_v3 = vld [vmem:[%s10907_s2 + $0x4a0] sm:$0xf]  ;;  %v6922_v4 = vld [vmem:[%s10907_s2 + $0x4ac] sm:$0xf0]  ;;  %v5811_v5 = vor.u32 %v6954_v0, %v5810_v63  ;;  %v5124_v52 = vld [vmem:[%s10907_s2 + $0x50] sm:$0xf0] }
  0x43   : > { %1757 = vmatpush.bf16.msrb.mxu1 %v5827_v60  ;;  %v5794_v8 = vld [vmem:[%s10907_s2 + $0x580] sm:$0xf]  ;;  %v6950_v9 = vld [vmem:[%s10907_s2 + $0x58c] sm:$0xf0]  ;;  %v5683_v10 = vor.u32 %v6922_v4, %v5682_v3  ;;  %v6892_v53 = vld [vmem:[%s10907_s2 + $0x3c4] sm:$0xf]  ;;  %v5127_v59 = vor.u32 %v6780_v47, %v5124_v52  ;;  %1851 = vmatpush.bf16.msra.mxu2 %v5591_v48 }
  0x44   : > { %v5666_v11 = vld [vmem:[%s10907_s2 + $0x480] sm:$0xf]  ;;  %v6918_v13 = vld [vmem:[%s10907_s2 + $0x48c] sm:$0xf0]  ;;  %v5795_v16 = vor.u32 %v6950_v9, %v5794_v8  ;;  %v5572_v54 = vld [vmem:[%s10907_s2 + $0x3d0] sm:$0xf0] }
  0x45   : > { %1738 = vmatpush.bf16.msrb.mxu0 %v5699_v1  ;;  %v440_v17 = vld [vmem:[%s7774_s30 + $0x70] sm:$0xff]  ;;  %v5778_v21 = vld [vmem:[%s10907_s2 + $0x560] sm:$0xf]  ;;  %v5667_v23 = vor.u32 %v6918_v13, %v5666_v11  ;;  %v5575_v63 = vor.u32 %v6892_v53, %v5572_v54  ;;  %v6864_v8 = vld [vmem:[%s10907_s2 + $0x2e4] sm:$0xf] }
  0x46   : > { %1795 = vmatpush.bf16.msrb.mxu3 %v5191_v2  ;;  %v448_v20 = vld [vmem:[%s7774_s30 + $0xb0] sm:$0xff]  ;;  %v442_v24 = vld [vmem:[%s7774_s30 + $0x80] sm:$0xff]  ;;  %v7879_v31 = vpack.c.bf16 %v447_v18, %v440_v17  ;;  %v437_v17 = vld [vmem:[%s7774_s30 + $0x58] sm:$0xff] }
  0x47   : > { %1758 = vmatpush.bf16.msrb.mxu1 %v5811_v5  ;;  %v6946_v22 = vld [vmem:[%s10907_s2 + $0x56c] sm:$0xf0]  ;;  %v450_v28 = vld [vmem:[%s7774_s30 + $0xc0] sm:$0xff]  ;;  %v7890_v36 = vpack.c.bf16 %v448_v20, %v441_v19  ;;  %v7892_v37 = vpack.c.bf16 %v449_v25, %v442_v24  ;;  %v5108_v1 = vld [vmem:[%s10907_s2 + $0x30] sm:$0xf0]  ;;  %1852 = vmatpush.bf16.msra.mxu2 %v5575_v63 }
  0x48   : > { %v5650_v29 = vld [vmem:[%s10907_s2 + $0x460] sm:$0xf]  ;;  %v6914_v30 = vld [vmem:[%s10907_s2 + $0x46c] sm:$0xf0]  ;;  %v5779_v32 = vor.u32 %v6946_v22, %v5778_v21  ;;  %v7903_v41 = vpack.c.bf16 %v450_v28, %v443_v26  ;;  %v6888_v2 = vld [vmem:[%s10907_s2 + $0x3a4] sm:$0xf] }
  0x49   : > { %1739 = vmatpush.bf16.msrb.mxu0 %v5683_v10  ;;  %v5762_v38 = vld [vmem:[%s10907_s2 + $0x540] sm:$0xf]  ;;  %v6942_v39 = vld [vmem:[%s10907_s2 + $0x54c] sm:$0xf0]  ;;  %v5651_v42 = vor.u32 %v6914_v30, %v5650_v29  ;;  %v5556_v3 = vld [vmem:[%s10907_s2 + $0x3b0] sm:$0xf0]  ;;  %v5111_v10 = vor.u32 %v6776_v62, %v5108_v1 }
  0x4a   : > { %1796 = vmatpush.bf16.msrb.mxu3 %v5175_v12  ;;  %v5634_v44 = vld [vmem:[%s10907_s2 + $0x440] sm:$0xf]  ;;  %v6910_v46 = vld [vmem:[%s10907_s2 + $0x44c] sm:$0xf0]  ;;  %v5763_v49 = vor.u32 %v6942_v39, %v5762_v38  ;;  %v5460_v9 = vld [vmem:[%s10907_s2 + $0x2f0] sm:$0xf0]  ;;  %v5559_v14 = vor.u32 %v6888_v2, %v5556_v3 }
  0x4b   : > { %1759 = vmatpush.bf16.msrb.mxu1 %v5795_v16  ;;  %v5746_v56 = vld [vmem:[%s10907_s2 + $0x520] sm:$0xf]  ;;  %v6938_v57 = vld [vmem:[%s10907_s2 + $0x52c] sm:$0xf0]  ;;  %v5635_v58 = vor.u32 %v6910_v46, %v5634_v44  ;;  %v6772_v12 = vld [vmem:[%s10907_s2 + $0x4] sm:$0xf]  ;;  %v5463_v21 = vor.u32 %v6864_v8, %v5460_v9 }
  0x4c   : > { %v5618_v60 = vld [vmem:[%s10907_s2 + $0x420] sm:$0xf]  ;;  %v6906_v61 = vld [vmem:[%s10907_s2 + $0x42c] sm:$0xf0]  ;;  %v5747_v0 = vor.u32 %v6938_v57, %v5746_v56  ;;  %v5092_v13 = vld [vmem:[%s10907_s2 + $0x10] sm:$0xf0]  ;;  %1853 = vmatpush.bf16.msra.mxu2 %v5559_v14 }
  0x4d   : > { %1740 = vmatpush.bf16.msrb.mxu0 %v5667_v23  ;;  %v5730_v4 = vld [vmem:[%s10907_s2 + $0x500] sm:$0xf]  ;;  %v6934_v5 = vld [vmem:[%s10907_s2 + $0x50c] sm:$0xf0]  ;;  %v5619_v6 = vor.u32 %v6906_v61, %v5618_v60  ;;  %v6832_v18 = vld [vmem:[%s10907_s2 + $0x1e4] sm:$0xf]  ;;  %v5095_v29 = vor.u32 %v6772_v12, %v5092_v13 }
  0x4e   : > { %1797 = vmatpush.bf16.msrb.mxu3 %v5159_v27  ;;  %v5602_v7 = vld [vmem:[%s10907_s2 + $0x400] sm:$0xf]  ;;  %v6902_v11 = vld [vmem:[%s10907_s2 + $0x40c] sm:$0xf0]  ;;  %v5731_v15 = vor.u32 %v6934_v5, %v5730_v4  ;;  %v5332_v19 = vld [vmem:[%s10907_s2 + $0x1f0] sm:$0xf0] }
  0x4f   : > { %1760 = vmatpush.bf16.msrb.mxu1 %v5779_v32  ;;  %v430_v16 = vld [vmem:[%s7774_s30 + $0x20] sm:$0xff]  ;;  %v5716_v22 = vld [vmem:[%s10907_s2 + $0x4f0] sm:$0xf0]  ;;  %v5603_v25 = vor.u32 %v6902_v11, %v5602_v7  ;;  %v431_v26 = vld [vmem:[%s7774_s30 + $0x28] sm:$0xff]  ;;  %v5335_v32 = vor.u32 %v6832_v18, %v5332_v19 }
  0x50   : > { %1674 = vmatmul.bf16.gmra.mxu0 %v7879_v31  ;;  %1712 = vmatmul.bf16.gmra.mxu2 %v7892_v37  ;;  %v6928_v20 = vld [vmem:[%s10907_s2 + $0x4e4] sm:$0xf]  ;;  %v5540_v24 = vld [vmem:[%s10907_s2 + $0x390] sm:$0xf0]  ;;  %v439_v30 = vld [vmem:[%s7774_s30 + $0x68] sm:$0xff] }
  0x51   : > { %1731 = vmatmul.bf16.gmra.mxu3 %v7903_v41  ;;  %1741 = vmatpush.bf16.msrb.mxu0 %v5651_v42  ;;  %v6884_v23 = vld [vmem:[%s10907_s2 + $0x384] sm:$0xf]  ;;  %v432_v28 = vld [vmem:[%s7774_s30 + $0x30] sm:$0xff]  ;;  %v5719_v35 = vor.u32 %v6928_v20, %v5716_v22  ;;  %v451_v19 = vld [vmem:[%s7774_s30 + $0xc8] sm:$0xff] }
  0x52   : > { %1693 = vmatmul.bf16.gmra.mxu1 %v7890_v36  ;;  %1798 = vmatpush.bf16.msrb.mxu3 %v5143_v43  ;;  %v438_v27 = vld [vmem:[%s7774_s30 + $0x60] sm:$0xff]  ;;  %v5316_v34 = vld [vmem:[%s10907_s2 + $0x1d0] sm:$0xf0]  ;;  %v5543_v42 = vor.u32 %v6884_v23, %v5540_v24  ;;  %v8014_v43 = vpack.c.bf16 %v437_v17, %v430_v16  ;;  %v445_v20 = vld [vmem:[%s7774_s30 + $0x98] sm:$0xff] }
  0x53   : > { %1761 = vmatpush.bf16.msrb.mxu1 %v5763_v49  ;;  %v6828_v33 = vld [vmem:[%s10907_s2 + $0x1c4] sm:$0xf]  ;;  %v5444_v39 = vld [vmem:[%s10907_s2 + $0x2d0] sm:$0xf0]  ;;  %v8016_v44 = vpack.c.bf16 %v438_v27, %v431_v26  ;;  %v8027_v49 = vpack.c.bf16 %v439_v30, %v432_v28  ;;  %v453_v30 = vld [vmem:[%s7774_s30 + $0xd8] sm:$0xff] }
  0x54   : > { %v6860_v38 = vld [vmem:[%s10907_s2 + $0x2c4] sm:$0xf]  ;;  %v5700_v46 = vld [vmem:[%s10907_s2 + $0x4d0] sm:$0xf0]  ;;  %v5319_v52 = vor.u32 %v6828_v33, %v5316_v34  ;;  %1854 = vmatpush.bf16.msra.mxu2 %v5543_v42 }
  0x55   : > { %1742 = vmatpush.bf16.msrb.mxu0 %v5635_v58  ;;  %v6924_v40 = vld [vmem:[%s10907_s2 + $0x4c4] sm:$0xf]  ;;  %v5524_v48 = vld [vmem:[%s10907_s2 + $0x370] sm:$0xf0]  ;;  %v5447_v53 = vor.u32 %v6860_v38, %v5444_v39 }
  0x56   : > { %1799 = vmatpush.bf16.msrb.mxu3 %v5127_v59  ;;  %v6880_v47 = vld [vmem:[%s10907_s2 + $0x364] sm:$0xf]  ;;  %v5300_v56 = vld [vmem:[%s10907_s2 + $0x1b0] sm:$0xf0]  ;;  %v5703_v57 = vor.u32 %v6924_v40, %v5700_v46 }
  0x57   : > { %1762 = vmatpush.bf16.msrb.mxu1 %v5747_v0  ;;  %v6824_v54 = vld [vmem:[%s10907_s2 + $0x1a4] sm:$0xf]  ;;  %v5428_v59 = vld [vmem:[%s10907_s2 + $0x2b0] sm:$0xf0]  ;;  %v5527_v61 = vor.u32 %v6880_v47, %v5524_v48 }
  0x58   : > { %v6856_v58 = vld [vmem:[%s10907_s2 + $0x2a4] sm:$0xf]  ;;  %v5684_v62 = vld [vmem:[%s10907_s2 + $0x4b0] sm:$0xf0]  ;;  %v5303_v1 = vor.u32 %v6824_v54, %v5300_v56  ;;  %v6803_v54 = vld [vmem:[%s10907_s2 + $0xf4] sm:$0xf0] }
  0x59   : > { %1743 = vmatpush.bf16.msrb.mxu0 %v5619_v6  ;;  %v6920_v60 = vld [vmem:[%s10907_s2 + $0x4a4] sm:$0xf]  ;;  %v5508_v0 = vld [vmem:[%s10907_s2 + $0x350] sm:$0xf0]  ;;  %v5431_v2 = vor.u32 %v6856_v58, %v5428_v59  ;;  %1855 = vmatpush.bf16.msra.mxu2 %v5527_v61 }
  0x5a   : > { %1800 = vmatpush.bf16.msrb.mxu3 %v5111_v10  ;;  %v6876_v63 = vld [vmem:[%s10907_s2 + $0x344] sm:$0xf]  ;;  %v5284_v4 = vld [vmem:[%s10907_s2 + $0x190] sm:$0xf0]  ;;  %v5687_v5 = vor.u32 %v6920_v60, %v5684_v62 }
  0x5b   : > { %1763 = vmatpush.bf16.msrb.mxu1 %v5731_v15  ;;  %v6820_v3 = vld [vmem:[%s10907_s2 + $0x184] sm:$0xf]  ;;  %v5412_v7 = vld [vmem:[%s10907_s2 + $0x290] sm:$0xf0]  ;;  %v5511_v9 = vor.u32 %v6876_v63, %v5508_v0 }
  0x5c   : > { %v6852_v6 = vld [vmem:[%s10907_s2 + $0x284] sm:$0xf]  ;;  %v5668_v10 = vld [vmem:[%s10907_s2 + $0x490] sm:$0xf0]  ;;  %v5287_v13 = vor.u32 %v6820_v3, %v5284_v4  ;;  %v5194_v3 = vld [vmem:[%s10907_s2 + $0xc8] sm:$0xf] }
  0x5d   : > { %1744 = vmatpush.bf16.msrb.mxu0 %v5603_v25  ;;  %v6916_v8 = vld [vmem:[%s10907_s2 + $0x484] sm:$0xf]  ;;  %v5492_v12 = vld [vmem:[%s10907_s2 + $0x330] sm:$0xf0]  ;;  %v5415_v14 = vor.u32 %v6852_v6, %v5412_v7  ;;  %1856 = vmatpush.bf16.msra.mxu2 %v5511_v9  ;;  %v6799_v4 = vld [vmem:[%s10907_s2 + $0xd4] sm:$0xf0] }
  0x5e   : > { %1801 = vmatpush.bf16.msrb.mxu3 %v5095_v29  ;;  %v6872_v11 = vld [vmem:[%s10907_s2 + $0x324] sm:$0xf]  ;;  %v5268_v16 = vld [vmem:[%s10907_s2 + $0x170] sm:$0xf0]  ;;  %v5671_v17 = vor.u32 %v6916_v8, %v5668_v10 }
  0x5f   : > { %1832 = vmatpush.bf16.msra.mxu1 %v5463_v21  ;;  %v6816_v15 = vld [vmem:[%s10907_s2 + $0x164] sm:$0xf]  ;;  %v444_v18 = vld [vmem:[%s7774_s30 + $0x90] sm:$0xff]  ;;  %v5495_v24 = vor.u32 %v6872_v11, %v5492_v12 }
  0x60   : > { %1745 = vmatmul.bf16.vlgmr.msrb.gmra.mxu0 %v8014_v43  ;;  %5872 = vmatmul.msk.bf16.vlgmr.msrb.gmra.mxu2 %vm1654_vm0, %v8027_v49  ;;  %v6848_v21 = vld [vmem:[%s10907_s2 + $0x264] sm:$0xf]  ;;  %v5396_v22 = vld [vmem:[%s10907_s2 + $0x270] sm:$0xf0]  ;;  %v8127_v47 = vpack.c.bf16 %v451_v19, %v444_v18  ;;  %v6835_v18 = vld [vmem:[%s10907_s2 + $0x1f4] sm:$0xf0] }
  0x61   : > { %1813 = vmatpush.bf16.msra.mxu0 %v5335_v32  ;;  %1802 = vmatmul.bf16.vlgmr.msrb.gmra.mxu3 %v7791_v45  ;;  %v6912_v23 = vld [vmem:[%s10907_s2 + $0x464] sm:$0xf]  ;;  %v5652_v25 = vld [vmem:[%s10907_s2 + $0x470] sm:$0xf0]  ;;  %v5271_v32 = vor.u32 %v6816_v15, %v5268_v16  ;;  %v5399_v33 = vor.u32 %v6848_v21, %v5396_v22 }
  0x62   : > { %1870 = vmatpush.bf16.msra.mxu3 %v5719_v35  ;;  %1764 = vmatmul.bf16.vlgmr.msrb.gmra.mxu1 %v8016_v44  ;;  %v6868_v26 = vld [vmem:[%s10907_s2 + $0x304] sm:$0xf]  ;;  %v5476_v27 = vld [vmem:[%s10907_s2 + $0x310] sm:$0xf0]  ;;  %v5655_v39 = vor.u32 %v6912_v23, %v5652_v25  ;;  %v5178_v23 = vld [vmem:[%s10907_s2 + $0xa8] sm:$0xf] }
  0x63   : > { %1833 = vmatpush.bf16.msra.mxu1 %v5447_v53  ;;  %v452_v28 = vld [vmem:[%s7774_s30 + $0xd0] sm:$0xff]  ;;  %v446_v29 = vld [vmem:[%s7774_s30 + $0xa0] sm:$0xff]  ;;  %1857 = vmatpush.bf16.msra.mxu2 %v5495_v24  ;;  %v5479_v46 = vor.u32 %v6868_v26, %v5476_v27  ;;  %v5210_v53 = vld [vmem:[%s10907_s2 + $0xe8] sm:$0xf]  ;;  %s7177_s30 = smul.u32 112, %s9000_s24 }
  0x64   : > { %v6812_v34 = vld [vmem:[%s10907_s2 + $0x144] sm:$0xf]  ;;  %v5252_v35 = vld [vmem:[%s10907_s2 + $0x150] sm:$0xf0]  ;;  %v8129_v48 = vpack.c.bf16 %v452_v28, %v445_v20  ;;  %v8140_v56 = vpack.c.bf16 %v453_v30, %v446_v29  ;;  %v6795_v24 = vld [vmem:[%s10907_s2 + $0xb4] sm:$0xf0] }
  0x65   : > { %1814 = vmatpush.bf16.msra.mxu0 %v5319_v52  ;;  %v6844_v38 = vld [vmem:[%s10907_s2 + $0x244] sm:$0xf]  ;;  %v5380_v40 = vld [vmem:[%s10907_s2 + $0x250] sm:$0xf0]  ;;  %s10387_s26 = scalar_lea.vmem [#allocation2], %s7177_s30 }
  0x66   : > { %1871 = vmatpush.bf16.msra.mxu3 %v5703_v57  ;;  %v6908_v42 = vld [vmem:[%s10907_s2 + $0x444] sm:$0xf]  ;;  %v5636_v52 = vld [vmem:[%s10907_s2 + $0x450] sm:$0xf0]  ;;  %v5255_v57 = vor.u32 %v6812_v34, %v5252_v35  ;;  %v5383_v58 = vor.u32 %v6844_v38, %v5380_v40  ;;  %v6831_v35 = vld [vmem:[%s10907_s2 + $0x1d4] sm:$0xf0] }
  0x67   : > { %1834 = vmatpush.bf16.msra.mxu1 %v5431_v2  ;;  %v6808_v59 = vld [vmem:[%s10907_s2 + $0x124] sm:$0xf]  ;;  %v5236_v60 = vld [vmem:[%s10907_s2 + $0x130] sm:$0xf0]  ;;  %v5639_v61 = vor.u32 %v6908_v42, %v5636_v52  ;;  %1858 = vmatpush.bf16.msra.mxu2 %v5479_v46  ;;  %v5162_v38 = vld [vmem:[%s10907_s2 + $0x88] sm:$0xf] }
  0x68   : > { %v6840_v62 = vld [vmem:[%s10907_s2 + $0x224] sm:$0xf]  ;;  %v5364_v63 = vld [vmem:[%s10907_s2 + $0x230] sm:$0xf0]  ;;  %v5306_v52 = vld [vmem:[%s10907_s2 + $0x1a8] sm:$0xf] }
  0x69   : > { %1815 = vmatpush.bf16.msra.mxu0 %v5303_v1  ;;  %v6904_v0 = vld [vmem:[%s10907_s2 + $0x424] sm:$0xf]  ;;  %v5211_v1 = vor.u32 %v6803_v54, %v5210_v53  ;;  %v5620_v2 = vld [vmem:[%s10907_s2 + $0x430] sm:$0xf0]  ;;  %v5367_v6 = vor.u32 %v6840_v62, %v5364_v63  ;;  %v6827_v53 = vld [vmem:[%s10907_s2 + $0x1b4] sm:$0xf0] }
  0x6a   : > { %1872 = vmatpush.bf16.msra.mxu3 %v5687_v5  ;;  %v5239_v5 = vor.u32 %v6808_v59, %v5236_v60  ;;  %v6804_v7 = vld [vmem:[%s10907_s2 + $0x104] sm:$0xf]  ;;  %v5220_v8 = vld [vmem:[%s10907_s2 + $0x110] sm:$0xf0]  ;;  %v5623_v10 = vor.u32 %v6904_v0, %v5620_v2  ;;  %v5146_v59 = vld [vmem:[%s10907_s2 + $0x68] sm:$0xf] }
  0x6b   : > { %1835 = vmatpush.bf16.msra.mxu1 %v5415_v14  ;;  %v6836_v9 = vld [vmem:[%s10907_s2 + $0x204] sm:$0xf]  ;;  %v5348_v11 = vld [vmem:[%s10907_s2 + $0x210] sm:$0xf0]  ;;  %1927 = vmatpush.bf16.msrb.mxu2 %v5211_v1  ;;  %v5195_v14 = vor.u32 %v6799_v4, %v5194_v3  ;;  %v5223_v21 = vor.u32 %v6804_v7, %v5220_v8  ;;  %v6787_v60 = vld [vmem:[%s10907_s2 + $0x74] sm:$0xf0]  ;;  %v5307_v1 = vor.u32 %v6827_v53, %v5306_v52 }
  0x6c   : > { %v6900_v12 = vld [vmem:[%s10907_s2 + $0x404] sm:$0xf]  ;;  %v5844_v16 = vld [vmem:[%s10907_s2 + $0x5f0] sm:$0xf0]  ;;  %v5351_v22 = vor.u32 %v6836_v9, %v5348_v11  ;;  %v5594_v62 = vld [vmem:[%s10907_s2 + $0x3e8] sm:$0xf]  ;;  %v5147_v4 = vor.u32 %v6787_v60, %v5146_v59 }
  0x6d   : > { %1816 = vmatpush.bf16.msra.mxu0 %v5287_v13  ;;  %v5604_v13 = vld [vmem:[%s10907_s2 + $0x410] sm:$0xf0]  ;;  %v6960_v15 = vld [vmem:[%s10907_s2 + $0x5e4] sm:$0xf]  ;;  %v6899_v63 = vld [vmem:[%s10907_s2 + $0x3f4] sm:$0xf0] }
  0x6e   : > { %1873 = vmatpush.bf16.msra.mxu3 %v5671_v17  ;;  %v5338_v17 = vld [vmem:[%s10907_s2 + $0x1e8] sm:$0xf]  ;;  %v6964_v19 = vld [vmem:[%s10907_s2 + $0x604] sm:$0xf]  ;;  %v5860_v20 = vld [vmem:[%s10907_s2 + $0x610] sm:$0xf0]  ;;  %v5607_v25 = vor.u32 %v6900_v12, %v5604_v13  ;;  %v5847_v26 = vor.u32 %v6960_v15, %v5844_v16  ;;  %v5595_v0 = vor.u32 %v6899_v63, %v5594_v62 }
  0x6f   : > { %1836 = vmatpush.bf16.msra.mxu1 %v5399_v33  ;;  %1928 = vmatpush.bf16.msrb.mxu2 %v5195_v14  ;;  %v5339_v27 = vor.u32 %v6835_v18, %v5338_v17  ;;  %v5863_v28 = vor.u32 %v6964_v19, %v5860_v20  ;;  %v6956_v29 = vld [vmem:[%s10907_s2 + $0x5c4] sm:$0xf]  ;;  %v5828_v30 = vld [vmem:[%s10907_s2 + $0x5d0] sm:$0xf0]  ;;  %v5322_v33 = vld [vmem:[%s10907_s2 + $0x1c8] sm:$0xf] }
  0x70   : > { %1750 = vmatmul.bf16.gmra.mxu0 %v8127_v47  ;;  %5873 = vmatmul.msk.bf16.gmra.mxu2 %vm1654_vm0, %v8140_v56  ;;  %v5831_v34 = vor.u32 %v6956_v29, %v5828_v30  ;;  %v6952_v40 = vld [vmem:[%s10907_s2 + $0x5a4] sm:$0xf]  ;;  %v5812_v42 = vld [vmem:[%s10907_s2 + $0x5b0] sm:$0xf0]  ;;  %v5323_v46 = vor.u32 %v6831_v35, %v5322_v33  ;;  %v5290_v2 = vld [vmem:[%s10907_s2 + $0x188] sm:$0xf] }
  0x71   : > { %1817 = vmatpush.bf16.msra.mxu0 %v5271_v32  ;;  %1807 = vmatmul.bf16.gmra.mxu3 %v7879_v31  ;;  %v5179_v32 = vor.u32 %v6795_v24, %v5178_v23  ;;  %v6823_v3 = vld [vmem:[%s10907_s2 + $0x194] sm:$0xf0]  ;;  %v5578_v8 = vld [vmem:[%s10907_s2 + $0x3c8] sm:$0xf]  ;;  %v5780_v11 = vld [vmem:[%s10907_s2 + $0x570] sm:$0xf0] }
  0x72   : > { %1874 = vmatpush.bf16.msra.mxu3 %v5655_v39  ;;  %1769 = vmatmul.bf16.gmra.mxu1 %v8129_v48  ;;  %v6791_v39 = vld [vmem:[%s10907_s2 + $0x94] sm:$0xf0]  ;;  %v5562_v13 = vld [vmem:[%s10907_s2 + $0x3a8] sm:$0xf]  ;;  %v5291_v14 = vor.u32 %v6823_v3, %v5290_v2  ;;  %v6940_v20 = vld [vmem:[%s10907_s2 + $0x544] sm:$0xf] }
  0x73   : > { %1837 = vmatpush.bf16.msra.mxu1 %v5383_v58  ;;  %1929 = vmatpush.bf16.msrb.mxu2 %v5179_v32  ;;  %v5163_v54 = vor.u32 %v6791_v39, %v5162_v38  ;;  %v6948_v58 = vld [vmem:[%s10907_s2 + $0x584] sm:$0xf]  ;;  %v6783_v7 = vld [vmem:[%s10907_s2 + $0x54] sm:$0xf0]  ;;  %v5274_v15 = vld [vmem:[%s10907_s2 + $0x168] sm:$0xf] }
  0x74   : > { %v6895_v9 = vld [vmem:[%s10907_s2 + $0x3d4] sm:$0xf0]  ;;  %v5764_v24 = vld [vmem:[%s10907_s2 + $0x550] sm:$0xf0]  ;;  %v6936_v33 = vld [vmem:[%s10907_s2 + $0x524] sm:$0xf] }
  0x75   : > { %1818 = vmatpush.bf16.msra.mxu0 %v5255_v57  ;;  %v5815_v57 = vor.u32 %v6952_v40, %v5812_v42  ;;  %v5579_v12 = vor.u32 %v6895_v9, %v5578_v8  ;;  %v6819_v16 = vld [vmem:[%s10907_s2 + $0x174] sm:$0xf0]  ;;  %v5767_v32 = vor.u32 %v6940_v20, %v5764_v24  ;;  %v5748_v39 = vld [vmem:[%s10907_s2 + $0x530] sm:$0xf0]  ;;  %v5722_v40 = vld [vmem:[%s10907_s2 + $0x4e8] sm:$0xf] }
  0x76   : > { %1875 = vmatpush.bf16.msra.mxu3 %v5639_v61  ;;  %v5796_v61 = vld [vmem:[%s10907_s2 + $0x590] sm:$0xf0]  ;;  %v6891_v18 = vld [vmem:[%s10907_s2 + $0x3b4] sm:$0xf0]  ;;  %v5242_v52 = vld [vmem:[%s10907_s2 + $0x128] sm:$0xf] }
  0x77   : > { %1838 = vmatpush.bf16.msra.mxu1 %v5367_v6  ;;  %1930 = vmatpush.bf16.msrb.mxu2 %v5163_v54  ;;  %v5799_v6 = vor.u32 %v6948_v58, %v5796_v61  ;;  %v5563_v23 = vor.u32 %v6891_v18, %v5562_v13  ;;  %v6815_v29 = vld [vmem:[%s10907_s2 + $0x154] sm:$0xf0]  ;;  %v6932_v58 = vld [vmem:[%s10907_s2 + $0x504] sm:$0xf]  ;;  %v5732_v59 = vld [vmem:[%s10907_s2 + $0x510] sm:$0xf0] }
  0x78   : > { %v6775_v35 = vld [vmem:[%s10907_s2 + $0x14] sm:$0xf0]  ;;  %v5706_v61 = vld [vmem:[%s10907_s2 + $0x4c8] sm:$0xf] }
  0x79   : > { %1819 = vmatpush.bf16.msra.mxu0 %v5239_v5  ;;  %v5130_v5 = vld [vmem:[%s10907_s2 + $0x48] sm:$0xf]  ;;  %v6931_v42 = vld [vmem:[%s10907_s2 + $0x4f4] sm:$0xf0] }
  0x7a   : > { %1876 = vmatpush.bf16.msra.mxu3 %v5623_v10  ;;  %v6944_v10 = vld [vmem:[%s10907_s2 + $0x564] sm:$0xf]  ;;  %v5131_v17 = vor.u32 %v6783_v7, %v5130_v5  ;;  %v6811_v53 = vld [vmem:[%s10907_s2 + $0x134] sm:$0xf0]  ;;  %v5723_v60 = vor.u32 %v6931_v42, %v5722_v40  ;;  %v5530_v63 = vld [vmem:[%s10907_s2 + $0x368] sm:$0xf]  ;;  %v5735_v7 = vor.u32 %v6932_v58, %v5732_v59 }
  0x7b   : > { %1839 = vmatpush.bf16.msra.mxu1 %v5351_v22  ;;  %1931 = vmatpush.bf16.msrb.mxu2 %v5147_v4  ;;  %v5783_v19 = vor.u32 %v6944_v10, %v5780_v11  ;;  %v6779_v22 = vld [vmem:[%s10907_s2 + $0x34] sm:$0xf0]  ;;  %v5243_v4 = vor.u32 %v6811_v53, %v5242_v52  ;;  %v5226_v5 = vld [vmem:[%s10907_s2 + $0x108] sm:$0xf] }
  0x7c   : > { %v6927_v62 = vld [vmem:[%s10907_s2 + $0x4d4] sm:$0xf0]  ;;  %v5850_v8 = vld [vmem:[%s10907_s2 + $0x5e8] sm:$0xf] }
  0x7d   : > { %1820 = vmatpush.bf16.msra.mxu0 %v5223_v21  ;;  %v5114_v21 = vld [vmem:[%s10907_s2 + $0x28] sm:$0xf]  ;;  %v6867_v2 = vld [vmem:[%s10907_s2 + $0x2f4] sm:$0xf0]  ;;  %v5707_v9 = vor.u32 %v6927_v62, %v5706_v61  ;;  %v6801_v62 = vld [vmem:[%s10907_s2 + $0xec] sm:$0xf] }
  0x7e   : > { %1877 = vmatpush.bf16.msra.mxu3 %v5607_v25  ;;  %v5546_v25 = vld [vmem:[%s10907_s2 + $0x388] sm:$0xf]  ;;  %v5115_v30 = vor.u32 %v6779_v22, %v5114_v21  ;;  %v6879_v11 = vld [vmem:[%s10907_s2 + $0x354] sm:$0xf0] }
  0x7f   : > { %1915 = vmatpush.bf16.msrb.mxu1 %v5863_v28  ;;  %1932 = vmatpush.bf16.msrb.mxu2 %v5131_v17  ;;  %v5258_v28 = vld [vmem:[%s10907_s2 + $0x148] sm:$0xf]  ;;  %v6963_v13 = vld [vmem:[%s10907_s2 + $0x5f4] sm:$0xf0] }
  0x80   : > { %1821 = vmatmul.bf16.vlgmr.msra.gmra.mxu0 %v7796_v50  ;;  %1859 = vmatmul.bf16.vlgmr.msra.gmra.mxu2 %v7805_v55  ;;  %v5514_v10 = vld [vmem:[%s10907_s2 + $0x348] sm:$0xf]  ;;  %v6863_v18 = vld [vmem:[%s10907_s2 + $0x2d4] sm:$0xf0]  ;;  %v5851_v22 = vor.u32 %v6963_v13, %v5850_v8  ;;  %v5196_v13 = vld [vmem:[%s10907_s2 + $0xd8] sm:$0xf0] }
  0x81   : > { %1889 = vmatpush.bf16.msrb.mxu0 %v5847_v26  ;;  %1878 = vmatmul.bf16.vlgmr.msra.gmra.mxu3 %v8014_v43  ;;  %v6887_v26 = vld [vmem:[%s10907_s2 + $0x394] sm:$0xf0]  ;;  %v5450_v17 = vld [vmem:[%s10907_s2 + $0x2c8] sm:$0xf] }
  0x82   : > { %1946 = vmatpush.bf16.msrb.mxu3 %v5339_v27  ;;  %1840 = vmatmul.bf16.vlgmr.msra.gmra.mxu1 %v7798_v51  ;;  %v5275_v27 = vor.u32 %v6819_v16, %v5274_v15  ;;  %v5547_v38 = vor.u32 %v6887_v26, %v5546_v25  ;;  %v6923_v15 = vld [vmem:[%s10907_s2 + $0x4b4] sm:$0xf0]  ;;  %v5515_v16 = vor.u32 %v6879_v11, %v5514_v10  ;;  %v5658_v40 = vld [vmem:[%s10907_s2 + $0x468] sm:$0xf]  ;;  %v6797_v10 = vld [vmem:[%s10907_s2 + $0xcc] sm:$0xf] }
  0x83   : > { %1984 = vmatpush.bf16.msra.mxu1 %v5595_v0  ;;  %1933 = vmatpush.bf16.msrb.mxu2 %v5115_v30  ;;  %v6883_v0 = vld [vmem:[%s10907_s2 + $0x374] sm:$0xf0]  ;;  %v5451_v25 = vor.u32 %v6863_v18, %v5450_v17  ;;  %v5434_v30 = vld [vmem:[%s10907_s2 + $0x2a8] sm:$0xf] }
  0x84   : > { %v5531_v3 = vor.u32 %v6883_v0, %v5530_v63  ;;  %v6875_v21 = vld [vmem:[%s10907_s2 + $0x334] sm:$0xf0]  ;;  %v5418_v53 = vld [vmem:[%s10907_s2 + $0x288] sm:$0xf] }
  0x85   : > { %1890 = vmatpush.bf16.msrb.mxu0 %v5831_v34  ;;  %v5098_v34 = vld [vmem:[%s10907_s2 + $0x8] sm:$0xf]  ;;  %v6959_v26 = vld [vmem:[%s10907_s2 + $0x5d4] sm:$0xf0] }
  0x86   : > { %1947 = vmatpush.bf16.msrb.mxu3 %v5323_v46  ;;  %v5259_v46 = vor.u32 %v6815_v29, %v5258_v28  ;;  %v5099_v54 = vor.u32 %v6775_v35, %v5098_v34  ;;  %v6919_v28 = vld [vmem:[%s10907_s2 + $0x494] sm:$0xf0]  ;;  %v5818_v34 = vld [vmem:[%s10907_s2 + $0x5a8] sm:$0xf] }
  0x87   : > { %1985 = vmatpush.bf16.msra.mxu1 %v5579_v12  ;;  %v6955_v35 = vld [vmem:[%s10907_s2 + $0x5b4] sm:$0xf0]  ;;  %v5802_v59 = vld [vmem:[%s10907_s2 + $0x588] sm:$0xf] }
  0x88   : > { %1934 = vmatpush.bf16.msrb.mxu2 %v5099_v54  ;;  %v6915_v42 = vld [vmem:[%s10907_s2 + $0x474] sm:$0xf0]  ;;  %v5819_v58 = vor.u32 %v6955_v35, %v5818_v34  ;;  %v5642_v63 = vld [vmem:[%s10907_s2 + $0x448] sm:$0xf]  ;;  %v6833_v34 = vld [vmem:[%s10907_s2 + $0x1ec] sm:$0xf] }
  0x89   : > { %1891 = vmatpush.bf16.msrb.mxu0 %v5815_v57  ;;  %v5751_v57 = vor.u32 %v6936_v33, %v5748_v39  ;;  %v5482_v39 = vld [vmem:[%s10907_s2 + $0x308] sm:$0xf]  ;;  %v6855_v54 = vld [vmem:[%s10907_s2 + $0x294] sm:$0xf0]  ;;  %v5659_v61 = vor.u32 %v6915_v42, %v5658_v40  ;;  %v5340_v35 = vld [vmem:[%s10907_s2 + $0x1f8] sm:$0xf0] }
  0x8a   : > { %1948 = vmatpush.bf16.msrb.mxu3 %v5307_v1  ;;  %v5466_v1 = vld [vmem:[%s10907_s2 + $0x2e8] sm:$0xf]  ;;  %v6911_v0 = vld [vmem:[%s10907_s2 + $0x454] sm:$0xf0]  ;;  %v5164_v40 = vld [vmem:[%s10907_s2 + $0x98] sm:$0xf0] }
  0x8b   : > { %1986 = vmatpush.bf16.msra.mxu1 %v5563_v23  ;;  %v5467_v12 = vor.u32 %v6867_v2, %v5466_v1  ;;  %v5834_v23 = vld [vmem:[%s10907_s2 + $0x5c8] sm:$0xf]  ;;  %v5212_v1 = vld [vmem:[%s10907_s2 + $0xf8] sm:$0xf0]  ;;  %v6947_v8 = vld [vmem:[%s10907_s2 + $0x574] sm:$0xf0] }
  0x8c   : > { %2003 = vmatpush.bf16.msra.mxu2 %v5723_v60  ;;  %v5835_v33 = vor.u32 %v6959_v26, %v5834_v23  ;;  %v6951_v60 = vld [vmem:[%s10907_s2 + $0x594] sm:$0xf0]  ;;  %v5215_v2 = vor.u32 %v6801_v62, %v5212_v1  ;;  %v5626_v11 = vld [vmem:[%s10907_s2 + $0x428] sm:$0xf]  ;;  %v6865_v62 = vld [vmem:[%s10907_s2 + $0x2ec] sm:$0xf] }
  0x8d   : > { %1892 = vmatpush.bf16.msrb.mxu0 %v5799_v6  ;;  %v6807_v6 = vld [vmem:[%s10907_s2 + $0x114] sm:$0xf0]  ;;  %v5610_v23 = vld [vmem:[%s10907_s2 + $0x408] sm:$0xf]  ;;  %v5468_v1 = vld [vmem:[%s10907_s2 + $0x2f8] sm:$0xf0] }
  0x8e   : > { %1949 = vmatpush.bf16.msrb.mxu3 %v5291_v14  ;;  %v5690_v14 = vld [vmem:[%s10907_s2 + $0x4a8] sm:$0xf]  ;;  %v5227_v20 = vor.u32 %v6807_v6, %v5226_v5  ;;  %v6851_v5 = vld [vmem:[%s10907_s2 + $0x274] sm:$0xf0]  ;;  %v5803_v6 = vor.u32 %v6951_v60, %v5802_v59  ;;  %v6829_v59 = vld [vmem:[%s10907_s2 + $0x1cc] sm:$0xf] }
  0x8f   : > { %1987 = vmatpush.bf16.msra.mxu1 %v5547_v38  ;;  %v5691_v24 = vor.u32 %v6923_v15, %v5690_v14  ;;  %v5199_v14 = vor.u32 %v6797_v10, %v5196_v13  ;;  %v6847_v17 = vld [vmem:[%s10907_s2 + $0x254] sm:$0xf0]  ;;  %v5324_v60 = vld [vmem:[%s10907_s2 + $0x1d8] sm:$0xf0]  ;;  %v5471_v10 = vor.u32 %v6865_v62, %v5468_v1 }
  0x90   : > { %1826 = vmatmul.bf16.gmra.mxu0 %v7890_v36  ;;  %1864 = vmatmul.bf16.gmra.mxu2 %v7903_v41  ;;  %v5452_v13 = vld [vmem:[%s10907_s2 + $0x2d8] sm:$0xf0] }
  0x91   : > { %1893 = vmatpush.bf16.msrb.mxu0 %v5783_v19  ;;  %1883 = vmatmul.bf16.gmra.mxu3 %v8127_v47  ;;  %v5498_v19 = vld [vmem:[%s10907_s2 + $0x328] sm:$0xf] }
  0x92   : > { %1950 = vmatpush.bf16.msrb.mxu3 %v5275_v27  ;;  %1845 = vmatmul.bf16.gmra.mxu1 %v7892_v37  ;;  %v5674_v27 = vld [vmem:[%s10907_s2 + $0x488] sm:$0xf]  ;;  %v5499_v29 = vor.u32 %v6875_v21, %v5498_v19 }
  0x93   : > { %1988 = vmatpush.bf16.msra.mxu1 %v5531_v3  ;;  %2004 = vmatpush.bf16.msra.mxu2 %v5707_v9  ;;  %v5675_v38 = vor.u32 %v6919_v28, %v5674_v27  ;;  %v5419_v3 = vor.u32 %v6855_v54, %v5418_v53  ;;  %v5643_v9 = vor.u32 %v6911_v0, %v5642_v63  ;;  %v5770_v19 = vld [vmem:[%s10907_s2 + $0x548] sm:$0xf]  ;;  %v6967_v0 = vld [vmem:[%s10907_s2 + $0x614] sm:$0xf0] }
  0x94   : > { %v5370_v28 = vld [vmem:[%s10907_s2 + $0x228] sm:$0xf]  ;;  %v5343_v54 = vor.u32 %v6833_v34, %v5340_v35  ;;  %v6853_v35 = vld [vmem:[%s10907_s2 + $0x28c] sm:$0xf] }
  0x95   : > { %1894 = vmatpush.bf16.msrb.mxu0 %v5767_v32  ;;  %v6859_v32 = vld [vmem:[%s10907_s2 + $0x2b4] sm:$0xf0]  ;;  %v5738_v53 = vld [vmem:[%s10907_s2 + $0x508] sm:$0xf] }
  0x96   : > { %1951 = vmatpush.bf16.msrb.mxu3 %v5259_v46  ;;  %v6871_v46 = vld [vmem:[%s10907_s2 + $0x314] sm:$0xf0]  ;;  %v5435_v52 = vor.u32 %v6859_v32, %v5434_v30  ;;  %v5754_v32 = vld [vmem:[%s10907_s2 + $0x528] sm:$0xf] }
  0x97   : > { %1989 = vmatpush.bf16.msra.mxu1 %v5515_v16  ;;  %2005 = vmatpush.bf16.msra.mxu2 %v5691_v24  ;;  %v5386_v16 = vld [vmem:[%s10907_s2 + $0x248] sm:$0xf]  ;;  %v6903_v24 = vld [vmem:[%s10907_s2 + $0x414] sm:$0xf0] }
  0x98   : > { %v5387_v27 = vor.u32 %v6847_v17, %v5386_v16  ;;  %v5866_v63 = vld [vmem:[%s10907_s2 + $0x608] sm:$0xf]  ;;  %v8612_v16 = vld [vmem:[%s10890_s3] sm:$0xf] }
  0x99   : > { %1895 = vmatpush.bf16.msrb.mxu0 %v5751_v57  ;;  %v5483_v57 = vor.u32 %v6871_v46, %v5482_v39  ;;  %v6789_v39 = vld [vmem:[%s10907_s2 + $0x8c] sm:$0xf]  ;;  %v5354_v46 = vld [vmem:[%s10907_s2 + $0x208] sm:$0xf] }
  0x9a   : > { %1952 = vmatpush.bf16.msrb.mxu3 %v5243_v4  ;;  %v5402_v4 = vld [vmem:[%s10907_s2 + $0x268] sm:$0xf] }
  0x9b   : > { %1990 = vmatpush.bf16.msra.mxu1 %v5499_v29  ;;  %2006 = vmatpush.bf16.msra.mxu2 %v5675_v38  ;;  %v5403_v15 = vor.u32 %v6851_v5, %v5402_v4  ;;  %v6843_v29 = vld [vmem:[%s10907_s2 + $0x234] sm:$0xf0]  ;;  %v5327_v5 = vor.u32 %v6829_v59, %v5324_v60  ;;  %v6929_v60 = vld [vmem:[%s10907_s2 + $0x4ec] sm:$0xf] }
  0x9c   : > { %v6939_v38 = vld [vmem:[%s10907_s2 + $0x534] sm:$0xf0]  ;;  %v5371_v42 = vor.u32 %v6843_v29, %v5370_v28  ;;  %v6777_v29 = vld [vmem:[%s10907_s2 + $0x2c] sm:$0xf] }
  0x9d   : > { %1896 = vmatpush.bf16.msrb.mxu0 %v5735_v7  ;;  %v5786_v7 = vld [vmem:[%s10907_s2 + $0x568] sm:$0xf] }
  0x9e   : > { %1953 = vmatpush.bf16.msrb.mxu3 %v5227_v20  ;;  %v5787_v18 = vor.u32 %v6947_v8, %v5786_v7  ;;  %v6943_v20 = vld [vmem:[%s10907_s2 + $0x554] sm:$0xf0]  ;;  %v5867_v7 = vor.u32 %v6967_v0, %v5866_v63  ;;  %v6825_v8 = vld [vmem:[%s10907_s2 + $0x1ac] sm:$0xf]  ;;  %v5404_v0 = vld [vmem:[%s10907_s2 + $0x278] sm:$0xf0] }
  0x9f   : > { %1991 = vmatpush.bf16.msra.mxu1 %v5483_v57  ;;  %2007 = vmatpush.bf16.msra.mxu2 %v5659_v61  ;;  %v5771_v30 = vor.u32 %v6943_v20, %v5770_v19  ;;  %v5755_v57 = vor.u32 %v6939_v38, %v5754_v32  ;;  %v5167_v61 = vor.u32 %v6789_v39, %v5164_v40  ;;  %v5292_v19 = vld [vmem:[%s10907_s2 + $0x198] sm:$0xf0]  ;;  %v6849_v63 = vld [vmem:[%s10907_s2 + $0x26c] sm:$0xf] }
  0xa0   : > { %1897 = vmatmul.bf16.vlgmr.msrb.gmra.mxu0 %v8016_v44  ;;  %1935 = vmatmul.bf16.vlgmr.msrb.gmra.mxu2 %v7791_v45  ;;  %v5420_v38 = vld [vmem:[%s10907_s2 + $0x298] sm:$0xf0] }
  0xa1   : > { %1965 = vmatpush.bf16.msra.mxu0 %v5467_v12  ;;  %1954 = vmatmul.bf16.vlgmr.msrb.gmra.mxu3 %v7796_v50  ;;  %v6907_v12 = vld [vmem:[%s10907_s2 + $0x434] sm:$0xf0]  ;;  %v5423_v62 = vor.u32 %v6853_v35, %v5420_v38  ;;  %v6841_v35 = vld [vmem:[%s10907_s2 + $0x22c] sm:$0xf]  ;;  %v5372_v38 = vld [vmem:[%s10907_s2 + $0x238] sm:$0xf0] }
  0xa2   : > { %2022 = vmatpush.bf16.msra.mxu3 %v5851_v22  ;;  %5874 = vmatmul.msk.bf16.vlgmr.msrb.gmra.mxu1 %vm1654_vm0, %v8027_v49  ;;  %v5627_v21 = vor.u32 %v6907_v12, %v5626_v11  ;;  %v6793_v22 = vld [vmem:[%s10907_s2 + $0xac] sm:$0xf] }
  0xa3   : > { %2060 = vmatpush.bf16.msrb.mxu1 %v5215_v2  ;;  %2008 = vmatpush.bf16.msra.mxu2 %v5643_v9  ;;  %v6785_v2 = vld [vmem:[%s10907_s2 + $0x6c] sm:$0xf]  ;;  %v5308_v9 = vld [vmem:[%s10907_s2 + $0x1b8] sm:$0xf0] }
  0xa4   : > { %v6861_v11 = vld [vmem:[%s10907_s2 + $0x2cc] sm:$0xf]  ;;  %v5311_v17 = vor.u32 %v6825_v8, %v5308_v9 }
  0xa5   : > { %1966 = vmatpush.bf16.msra.mxu0 %v5451_v25  ;;  %v5180_v25 = vld [vmem:[%s10907_s2 + $0xb8] sm:$0xf0]  ;;  %v5455_v20 = vor.u32 %v6861_v11, %v5452_v13 }
  0xa6   : > { %2023 = vmatpush.bf16.msra.mxu3 %v5835_v33  ;;  %v5183_v26 = vor.u32 %v6793_v22, %v5180_v25  ;;  %v5611_v33 = vor.u32 %v6903_v24, %v5610_v23  ;;  %v8621_v22 = vperm.slane %v8612_v16, 0  ;;  %v6857_v23 = vld [vmem:[%s10907_s2 + $0x2ac] sm:$0xf]  ;;  %v5436_v25 = vld [vmem:[%s10907_s2 + $0x2b8] sm:$0xf0] }
  0xa7   : > { %2061 = vmatpush.bf16.msrb.mxu1 %v5199_v14  ;;  %2009 = vmatpush.bf16.msra.mxu2 %v5627_v21  ;;  %v6781_v14 = vld [vmem:[%s10907_s2 + $0x4c] sm:$0xf]  ;;  %v5439_v34 = vor.u32 %v6857_v23, %v5436_v25  ;;  %v5580_v11 = vld [vmem:[%s10907_s2 + $0x3d8] sm:$0xf0] }
  0xa8   : > { %v6805_v25 = vld [vmem:[%s10907_s2 + $0x10c] sm:$0xf] }
  0xa9   : > { %1967 = vmatpush.bf16.msra.mxu0 %v5435_v52  ;;  %v6839_v52 = vld [vmem:[%s10907_s2 + $0x214] sm:$0xf0] }
  0xaa   : > { %2024 = vmatpush.bf16.msra.mxu3 %v5819_v58  ;;  %v6935_v58 = vld [vmem:[%s10907_s2 + $0x514] sm:$0xf0]  ;;  %v5355_v4 = vor.u32 %v6839_v52, %v5354_v46  ;;  %v5260_v46 = vld [vmem:[%s10907_s2 + $0x158] sm:$0xf0] }
  0xab   : > { %2062 = vmatpush.bf16.msrb.mxu1 %v5183_v26  ;;  %2010 = vmatpush.bf16.msra.mxu2 %v5611_v33  ;;  %v6817_v26 = vld [vmem:[%s10907_s2 + $0x16c] sm:$0xf] }
  0xad   : > { %1968 = vmatpush.bf16.msra.mxu0 %v5419_v3  ;;  %v5148_v3 = vld [vmem:[%s10907_s2 + $0x78] sm:$0xf0] }
  0xae   : > { %2025 = vmatpush.bf16.msra.mxu3 %v5803_v6  ;;  %v5739_v6 = vor.u32 %v6935_v58, %v5738_v53  ;;  %v5151_v12 = vor.u32 %v6785_v2, %v5148_v3  ;;  %v6897_v53 = vld [vmem:[%s10907_s2 + $0x3ec] sm:$0xf]  ;;  %v5596_v58 = vld [vmem:[%s10907_s2 + $0x3f8] sm:$0xf0] }
  0xaf   : > { %2079 = vmatpush.bf16.msrb.mxu2 %v5343_v54  ;;  %2063 = vmatpush.bf16.msrb.mxu1 %v5167_v61  ;;  %v6773_v54 = vld [vmem:[%s10907_s2 + $0xc] sm:$0xf]  ;;  %v5599_v59 = vor.u32 %v6897_v53, %v5596_v58  ;;  %v5724_v61 = vld [vmem:[%s10907_s2 + $0x4f8] sm:$0xf0] }
  0xb0   : > { %1902 = vmatmul.bf16.gmra.mxu0 %v8129_v48  ;;  %1940 = vmatmul.bf16.gmra.mxu2 %v7879_v31  ;;  %v6809_v3 = vld [vmem:[%s10907_s2 + $0x12c] sm:$0xf] }
  0xb1   : > { %1969 = vmatpush.bf16.msra.mxu0 %v5403_v15  ;;  %1959 = vmatmul.bf16.gmra.mxu3 %v7890_v36  ;;  %v5132_v15 = vld [vmem:[%s10907_s2 + $0x58] sm:$0xf0]  ;;  %v6885_v53 = vld [vmem:[%s10907_s2 + $0x38c] sm:$0xf] }
  0xb2   : > { %2026 = vmatpush.bf16.msra.mxu3 %v5787_v18  ;;  %5875 = vmatmul.msk.bf16.gmra.mxu1 %vm1654_vm0, %v8140_v56  ;;  %v6821_v18 = vld [vmem:[%s10907_s2 + $0x18c] sm:$0xf]  ;;  %v5135_v21 = vor.u32 %v6781_v14, %v5132_v15 }
  0xb3   : > { %2080 = vmatpush.bf16.msrb.mxu2 %v5327_v5  ;;  %2064 = vmatpush.bf16.msrb.mxu1 %v5151_v12  ;;  %v5295_v24 = vor.u32 %v6821_v18, %v5292_v19  ;;  %v6925_v15 = vld [vmem:[%s10907_s2 + $0x4cc] sm:$0xf]  ;;  %v5407_v19 = vor.u32 %v6849_v63, %v5404_v0 }
  0xb4   : > { %v6837_v0 = vld [vmem:[%s10907_s2 + $0x20c] sm:$0xf] }
  0xb5   : > { %1970 = vmatpush.bf16.msra.mxu0 %v5387_v27  ;;  %v5276_v27 = vld [vmem:[%s10907_s2 + $0x178] sm:$0xf0] }
  0xb6   : > { %2027 = vmatpush.bf16.msra.mxu3 %v5771_v30  ;;  %v5116_v30 = vld [vmem:[%s10907_s2 + $0x38] sm:$0xf0]  ;;  %v5279_v39 = vor.u32 %v6817_v26, %v5276_v27  ;;  %v6889_v27 = vld [vmem:[%s10907_s2 + $0x3ac] sm:$0xf] }
  0xb7   : > { %2081 = vmatpush.bf16.msrb.mxu2 %v5311_v17  ;;  %2065 = vmatpush.bf16.msrb.mxu1 %v5135_v21  ;;  %v5119_v52 = vor.u32 %v6777_v29, %v5116_v30  ;;  %v5708_v17 = vld [vmem:[%s10907_s2 + $0x4d8] sm:$0xf0] }
  0xb8   : > { %v5388_v21 = vld [vmem:[%s10907_s2 + $0x258] sm:$0xf0]  ;;  %v5711_v30 = vor.u32 %v6925_v15, %v5708_v17 }
  0xb9   : > { %1971 = vmatpush.bf16.msra.mxu0 %v5371_v42  ;;  %v6813_v42 = vld [vmem:[%s10907_s2 + $0x14c] sm:$0xf]  ;;  %v5228_v26 = vld [vmem:[%s10907_s2 + $0x118] sm:$0xf0] }
  0xba   : > { %2028 = vmatpush.bf16.msra.mxu3 %v5755_v57  ;;  %v5100_v57 = vld [vmem:[%s10907_s2 + $0x18] sm:$0xf0]  ;;  %v5263_v1 = vor.u32 %v6813_v42, %v5260_v46  ;;  %v6921_v46 = vld [vmem:[%s10907_s2 + $0x4ac] sm:$0xf] }
  0xbb   : > { %2082 = vmatpush.bf16.msrb.mxu2 %v5295_v24  ;;  %2066 = vmatpush.bf16.msrb.mxu1 %v5119_v52  ;;  %v5103_v5 = vor.u32 %v6773_v54, %v5100_v57  ;;  %v5852_v29 = vld [vmem:[%s10907_s2 + $0x5f8] sm:$0xf0] }
  0xbc   : > { %v5692_v52 = vld [vmem:[%s10907_s2 + $0x4b8] sm:$0xf0] }
  0xbd   : > { %1972 = vmatpush.bf16.msra.mxu0 %v5355_v4  ;;  %v1670_v28 = vpop.f32.mrf.mxu0  ;;  %v5244_v4 = vld [vmem:[%s10907_s2 + $0x138] sm:$0xf0] }
  0xbe   : > { %2029 = vmatpush.bf16.msra.mxu3 %v5739_v6  ;;  %v1671_v32 = vadd.f32 %v1670_v28, %v8621_v22  ;;  %v6893_v6 = vld [vmem:[%s10907_s2 + $0x3cc] sm:$0xf]  ;;  %v5247_v23 = vor.u32 %v6809_v3, %v5244_v4  ;;  %v5375_v3 = vor.u32 %v6841_v35, %v5372_v38  ;;  %v5356_v4 = vld [vmem:[%s10907_s2 + $0x218] sm:$0xf0] }
  0xbf   : > { %v1689_v33 = vpop.f32.mrf.mxu1  ;;  %2083 = vmatpush.bf16.msrb.mxu2 %v5279_v39  ;;  %v5583_v14 = vor.u32 %v6893_v6, %v5580_v11  ;;  %2067 = vmatpush.bf16.msrb.mxu1 %v5103_v5  ;;  %v6961_v28 = vld [vmem:[%s10907_s2 + $0x5ec] sm:$0xf]  ;;  %v5231_v39 = vor.u32 %v6805_v25, %v5228_v26  ;;  %v5868_v6 = vld [vmem:[%s10907_s2 + $0x618] sm:$0xf0] }
  0xc0   : > { %v1690_v40 = vadd.f32 %v1689_v33, %v1671_v32  ;;  %1973 = vmatmul.bf16.vlgmr.msra.gmra.mxu0 %v7798_v51  ;;  %2011 = vmatmul.bf16.vlgmr.msra.gmra.mxu2 %v8014_v43  ;;  %v5564_v32 = vld [vmem:[%s10907_s2 + $0x3b8] sm:$0xf0]  ;;  %v5855_v42 = vor.u32 %v6961_v28, %v5852_v29  ;;  %v6965_v5 = vld [vmem:[%s10907_s2 + $0x60c] sm:$0xf] }
  0xc1   : > { %2048 = vmatpush.bf16.msrb.mxu0 %v5867_v7  ;;  %2030 = vmatmul.bf16.vlgmr.msra.gmra.mxu3 %v8016_v44  ;;  %v5567_v33 = vor.u32 %v6889_v27, %v5564_v32  ;;  %v5676_v11 = vld [vmem:[%s10907_s2 + $0x498] sm:$0xf0]  ;;  %v6913_v25 = vld [vmem:[%s10907_s2 + $0x46c] sm:$0xf] }
  0xc2   : > { %2098 = vmatpush.bf16.msrb.mxu3 %v5471_v10  ;;  %1992 = vmatmul.bf16.vlgmr.msra.gmra.mxu1 %v7805_v55  ;;  %v5727_v10 = vor.u32 %v6929_v60, %v5724_v61  ;;  %v5836_v60 = vld [vmem:[%s10907_s2 + $0x5d8] sm:$0xf0]  ;;  %v6877_v27 = vld [vmem:[%s10907_s2 + $0x34c] sm:$0xf] }
  0xc3   : > { %v1708_v2 = vpop.f32.mrf.mxu2  ;;  %2084 = vmatpush.bf16.msrb.mxu2 %v5263_v1  ;;  %v5548_v61 = vld [vmem:[%s10907_s2 + $0x398] sm:$0xf0]  ;;  %v6949_v32 = vld [vmem:[%s10907_s2 + $0x58c] sm:$0xf] }
  0xc4   : > { %v1709_v7 = vadd.f32 %v1708_v2, %v1690_v40  ;;  %v1727_v8 = vpop.f32.mrf.mxu3  ;;  %2136 = vmatpush.bf16.msra.mxu1 %v5727_v10  ;;  %v5551_v1 = vor.u32 %v6885_v53, %v5548_v61  ;;  %v6917_v10 = vld [vmem:[%s10907_s2 + $0x48c] sm:$0xf]  ;;  %v5532_v15 = vld [vmem:[%s10907_s2 + $0x378] sm:$0xf0] }
  0xc5   : > { %2117 = vmatpush.bf16.msra.mxu0 %v5599_v59  ;;  %v1672_v9 = vpop.f32.mrf.mxu0  ;;  %v6957_v59 = vld [vmem:[%s10907_s2 + $0x5cc] sm:$0xf]  ;;  %v5660_v26 = vld [vmem:[%s10907_s2 + $0x478] sm:$0xf0] }
  0xc6   : > { %2099 = vmatpush.bf16.msrb.mxu3 %v5455_v20  ;;  %v1673_v12 = vadd.f32 %v1672_v9, %v8621_v22  ;;  %v8701_v18 = vadd.f32 %v1727_v8, %v1709_v7  ;;  %v6845_v20 = vld [vmem:[%s10907_s2 + $0x24c] sm:$0xf]  ;;  %v5695_v7 = vor.u32 %v6921_v46, %v5692_v52  ;;  %v5839_v9 = vor.u32 %v6957_v59, %v5836_v60  ;;  %v5500_v59 = vld [vmem:[%s10907_s2 + $0x338] sm:$0xf0] }
  0xc7   : > { %v1691_v13 = vpop.f32.mrf.mxu1  ;;  %2085 = vmatpush.bf16.msrb.mxu2 %v5247_v23  ;;  %v5871_v23 = vor.u32 %v6965_v5, %v5868_v6  ;;  %v6909_v53 = vld [vmem:[%s10907_s2 + $0x44c] sm:$0xf] }
  0xc8   : > { %v1692_v24 = vadd.f32 %v1691_v13, %v1673_v12  ;;  %2137 = vmatpush.bf16.msra.mxu1 %v5711_v30  ;;  %v6881_v12 = vld [vmem:[%s10907_s2 + $0x36c] sm:$0xf] }
  0xc9   : > { %2118 = vmatpush.bf16.msra.mxu0 %v5583_v14  ;;  %v6953_v13 = vld [vmem:[%s10907_s2 + $0x5ac] sm:$0xf]  ;;  %v5820_v14 = vld [vmem:[%s10907_s2 + $0x5b8] sm:$0xf0]  ;;  %v5535_v17 = vor.u32 %v6881_v12, %v5532_v15 }
  0xca   : > { %2100 = vmatpush.bf16.msrb.mxu3 %v5439_v34  ;;  %v5391_v34 = vor.u32 %v6845_v20, %v5388_v21  ;;  %v5679_v20 = vor.u32 %v6917_v10, %v5676_v11  ;;  %v6941_v6 = vld [vmem:[%s10907_s2 + $0x54c] sm:$0xf] }
  0xcb   : > { %v1710_v40 = vpop.f32.mrf.mxu2  ;;  %2086 = vmatpush.bf16.msrb.mxu2 %v5231_v39  ;;  %v6901_v15 = vld [vmem:[%s10907_s2 + $0x40c] sm:$0xf] }
  0xcc   : > { %v1711_v54 = vadd.f32 %v1710_v40, %v1692_v24  ;;  %v1729_v57 = vpop.f32.mrf.mxu3  ;;  %2138 = vmatpush.bf16.msra.mxu1 %v5695_v7  ;;  %v5823_v24 = vor.u32 %v6953_v13, %v5820_v14  ;;  %v5772_v7 = vld [vmem:[%s10907_s2 + $0x558] sm:$0xf0] }
  0xcd   : > { %2119 = vmatpush.bf16.msra.mxu0 %v5567_v33  ;;  %v1675_v58 = vpop.f32.mrf.mxu0  ;;  %v5804_v33 = vld [vmem:[%s10907_s2 + $0x598] sm:$0xf0]  ;;  %v5775_v14 = vor.u32 %v6941_v6, %v5772_v7 }
  0xce   : > { %2101 = vmatpush.bf16.msrb.mxu3 %v5423_v62  ;;  %v1676_v62 = vadd.f32 %v1675_v58, %v8621_v22  ;;  %v8755_v2 = vadd.f32 %v1729_v57, %v1711_v54  ;;  %v5807_v52 = vor.u32 %v6949_v32, %v5804_v33  ;;  %v5644_v54 = vld [vmem:[%s10907_s2 + $0x458] sm:$0xf0]  ;;  %v6945_v57 = vld [vmem:[%s10907_s2 + $0x56c] sm:$0xf] }
  0xcf   : > { %v1694_v63 = vpop.f32.mrf.mxu1  ;;  %2155 = vmatpush.bf16.msra.mxu2 %v5855_v42  ;;  %v5663_v42 = vor.u32 %v6913_v25, %v5660_v26  ;;  %v5788_v58 = vld [vmem:[%s10907_s2 + $0x578] sm:$0xf0]  ;;  %v5647_v61 = vor.u32 %v6909_v53, %v5644_v54  ;;  %v6933_v26 = vld [vmem:[%s10907_s2 + $0x50c] sm:$0xf] }
  0xd0   : > { %v1695_v8 = vadd.f32 %v1694_v63, %v1676_v62  ;;  %1978 = vmatmul.bf16.gmra.mxu0 %v7892_v37  ;;  %2016 = vmatmul.bf16.gmra.mxu2 %v8127_v47  ;;  %v5791_v63 = vor.u32 %v6945_v57, %v5788_v58  ;;  %v6973_v33 = vld [vmem:[%s10891_s4 + $0x28] sm:$0xff]  ;;  %v6983_v53 = vld [vmem:[%s10891_s4 + $0x78] sm:$0xff] }
  0xd1   : > { %2120 = vmatpush.bf16.msra.mxu0 %v5551_v1  ;;  %2035 = vmatmul.bf16.gmra.mxu3 %v8129_v48  ;;  %v5628_v1 = vld [vmem:[%s10907_s2 + $0x438] sm:$0xf0] }
  0xd2   : > { %2102 = vmatpush.bf16.msrb.mxu3 %v5407_v19  ;;  %1997 = vmatmul.bf16.gmra.mxu1 %v7903_v41  ;;  %v5359_v19 = vor.u32 %v6837_v0, %v5356_v4  ;;  %v6905_v0 = vld [vmem:[%s10907_s2 + $0x42c] sm:$0xf]  ;;  %v6971_v57 = vld [vmem:[%s10891_s4 + $0x18] sm:$0xff] }
  0xd3   : > { %v1713_v21 = vpop.f32.mrf.mxu2  ;;  %2156 = vmatpush.bf16.msra.mxu2 %v5839_v9  ;;  %2139 = vmatpush.bf16.msra.mxu1 %v5679_v20  ;;  %v5631_v12 = vor.u32 %v6905_v0, %v5628_v1  ;;  %v5756_v20 = vld [vmem:[%s10907_s2 + $0x538] sm:$0xf0]  ;;  %v6969_v1 = vld [vmem:[%s10891_s4 + $0x8] sm:$0xff] }
  0xd4   : > { %v1714_v28 = vadd.f32 %v1713_v21, %v1695_v8  ;;  %v1732_v29 = vpop.f32.mrf.mxu3  ;;  %v5484_v8 = vld [vmem:[%s10907_s2 + $0x318] sm:$0xf0] }
  0xd5   : > { %2121 = vmatpush.bf16.msra.mxu0 %v5535_v17  ;;  %v1677_v30 = vpop.f32.mrf.mxu0  ;;  %v5612_v17 = vld [vmem:[%s10907_s2 + $0x418] sm:$0xf0] }
  0xd6   : > { %2103 = vmatpush.bf16.msrb.mxu3 %v5391_v34  ;;  %v5516_v34 = vld [vmem:[%s10907_s2 + $0x358] sm:$0xf0]  ;;  %v1678_v35 = vadd.f32 %v1677_v30, %v8621_v22  ;;  %v8807_v40 = vadd.f32 %v1732_v29, %v1714_v28  ;;  %v6873_v22 = vld [vmem:[%s10907_s2 + $0x32c] sm:$0xf] }
  0xd7   : > { %v1696_v38 = vpop.f32.mrf.mxu1  ;;  %v5519_v39 = vor.u32 %v6877_v27, %v5516_v34  ;;  %2157 = vmatpush.bf16.msra.mxu2 %v5823_v24  ;;  %v5503_v60 = vor.u32 %v6873_v22, %v5500_v59  ;;  %2140 = vmatpush.bf16.msra.mxu1 %v5663_v42  ;;  %v6975_v21 = vld [vmem:[%s10891_s4 + $0x38] sm:$0xff]  ;;  %v6982_v59 = vld [vmem:[%s10891_s4 + $0x70] sm:$0xff] }
  0xd8   : > { %v1697_v46 = vadd.f32 %v1696_v38, %v1678_v35  ;;  %v5740_v27 = vld [vmem:[%s10907_s2 + $0x518] sm:$0xf0] }
  0xd9   : > { %2122 = vmatpush.bf16.msra.mxu0 %v5519_v39  ;;  %v5743_v32 = vor.u32 %v6933_v26, %v5740_v27  ;;  %v667_v26 = vperm.slane %v8612_v16, 1 }
  0xda   : > { %2104 = vmatpush.bf16.msrb.mxu3 %v5375_v3  ;;  %v6869_v3 = vld [vmem:[%s10907_s2 + $0x30c] sm:$0xf] }
  0xdb   : > { %v1715_v62 = vpop.f32.mrf.mxu2  ;;  %2158 = vmatpush.bf16.msra.mxu2 %v5807_v52  ;;  %2141 = vmatpush.bf16.msra.mxu1 %v5647_v61  ;;  %v5487_v13 = vor.u32 %v6869_v3, %v5484_v8  ;;  %v6968_v8 = vld [vmem:[%s10891_s4] sm:$0xff] }
  0xdc   : > { %v1716_v4 = vadd.f32 %v1715_v62, %v1697_v46  ;;  %v1734_v5 = vpop.f32.mrf.mxu3 }
  0xdd   : > { %2123 = vmatpush.bf16.msra.mxu0 %v5503_v60  ;;  %v1746_v9 = vpop.f32.mrf.mxu0 }
  0xde   : > { %2105 = vmatpush.bf16.msrb.mxu3 %v5359_v19  ;;  %v8845_v11 = vadd.f32 %v1734_v5, %v1716_v4  ;;  %v6937_v19 = vld [vmem:[%s10907_s2 + $0x52c] sm:$0xf] }
  0xdf   : > { %v1765_v10 = vpop.f32.mrf.mxu1  ;;  %2159 = vmatpush.bf16.msra.mxu2 %v5791_v63  ;;  %2142 = vmatpush.bf16.msra.mxu1 %v5631_v12  ;;  %v6979_v12 = vld [vmem:[%s10891_s4 + $0x58] sm:$0xff] }
  0xe0   : > { %5876 = vmatmul.msk.bf16.vlgmr.msrb.gmra.mxu0 %vm1654_vm0, %v8027_v49  ;;  %2087 = vmatmul.bf16.vlgmr.msrb.gmra.mxu2 %v7796_v50  ;;  %v6974_v50 = vld [vmem:[%s10891_s4 + $0x30] sm:$0xff] }
  0xe1   : > { %2106 = vmatmul.bf16.vlgmr.msrb.gmra.mxu3 %v7798_v51  ;;  %2124 = vmatpush.bf16.msra.mxu0 %v5487_v13  ;;  %v1747_v51 = vadd.f32 %v1746_v9, %v8701_v18  ;;  %v6972_v18 = vld [vmem:[%s10891_s4 + $0x20] sm:$0xff] }
  0xe2   : > { %2181 = vmatpush.bf16.msra.mxu3 %v5871_v23  ;;  %2068 = vmatmul.bf16.vlgmr.msrb.gmra.mxu1 %v7791_v45  ;;  %v5615_v23 = vor.u32 %v6901_v15, %v5612_v17  ;;  %v5759_v45 = vor.u32 %v6937_v19, %v5756_v20  ;;  %v6978_v17 = vld [vmem:[%s10891_s4 + $0x50] sm:$0xff] }
  0xe3   : > { %2160 = vmatpush.bf16.msra.mxu2 %v5775_v14  ;;  %v1784_v24 = vpop.f32.mrf.mxu2  ;;  %v1766_v34 = vadd.f32 %v1765_v10, %v1747_v51 }
  0xe4   : > { %v8867_v25 = vpop.f32.mrf.mxu3  ;;  %2143 = vmatpush.bf16.msra.mxu1 %v5615_v23 }
  0xe5   : > { %2427 = vmatpush.bf16.msrb.mxu0 %v6975_v21  ;;  %v1748_v28 = vpop.f32.mrf.mxu0  ;;  %v1785_v35 = vadd.f32 %v1784_v24, %v1766_v34  ;;  %v1804_v27 = vadd.f32 %v8867_v25, %v667_v26 }
  0xe6   : > { %v1749_v30 = vadd.f32 %v1748_v28, %v8755_v2 }
  0xe7   : > { %v1767_v29 = vpop.f32.mrf.mxu1  ;;  %2161 = vmatpush.bf16.msra.mxu2 %v5759_v45  ;;  %v2193_v54 = vmax.f32 %v1785_v35, 0.0 }
  0xe8   : > { %v1768_v38 = vadd.f32 %v1767_v29, %v1749_v30  ;;  %2446 = vmatpush.bf16.msrb.mxu1 %v6983_v53 }
  0xe9   : > { %2428 = vmatpush.bf16.msrb.mxu0 %v6974_v50 }
  0xeb   : > { %2162 = vmatpush.bf16.msra.mxu2 %v5743_v32  ;;  %v1786_v39 = vpop.f32.mrf.mxu2 }
  0xec   : > { %v8883_v42 = vpop.f32.mrf.mxu3  ;;  %v1787_v2 = vadd.f32 %v1786_v39, %v1768_v38  ;;  %2447 = vmatpush.bf16.msrb.mxu1 %v6982_v59 }
  0xed   : > { %2429 = vmatpush.bf16.msrb.mxu0 %v6973_v33  ;;  %v1751_v46 = vpop.f32.mrf.mxu0  ;;  %v1806_v32 = vadd.f32 %v8883_v42, %v667_v26 }
  0xee   : > { %v2197_v22 = vmax.f32 %v1787_v2, 0.0  ;;  %v1752_v62 = vadd.f32 %v1751_v46, %v8807_v40  ;;  %v6980_v40 = vld [vmem:[%s10891_s4 + $0x60] sm:$0xff] }
  0xef   : > { %v1770_v52 = vpop.f32.mrf.mxu1 }
  0xf0   : > { %5877 = vmatmul.msk.bf16.gmra.mxu0 %vm1654_vm0, %v8140_v56  ;;  %v8897_v58 = vpack.c.bf16 %v2197_v22, %v2193_v54  ;;  %2092 = vmatmul.bf16.gmra.mxu2 %v7890_v36  ;;  %v6981_v36 = vld [vmem:[%s10891_s4 + $0x68] sm:$0xff]  ;;  %v1771_v3 = vadd.f32 %v1770_v52, %v1752_v62 }
  0xf1   : > { %2430 = vmatpush.bf16.msrb.mxu0 %v6972_v18  ;;  %2111 = vmatmul.bf16.gmra.mxu3 %v7892_v37 }
  0xf2   : > { %2073 = vmatmul.bf16.gmra.mxu1 %v7879_v31  ;;  %v6970_v31 = vld [vmem:[%s10891_s4 + $0x10] sm:$0xff] }
  0xf3   : > { %v1789_v60 = vpop.f32.mrf.mxu2  ;;  %2448 = vmatpush.bf16.msrb.mxu1 %v6981_v36 }
  0xf4   : > { %v8904_v61 = vpop.f32.mrf.mxu3  ;;  %v1790_v4 = vadd.f32 %v1789_v60, %v1771_v3  ;;  %v6991_v3 = vld [vmem:[%s10891_s4 + $0xb8] sm:$0xff] }
  0xf5   : > { %2431 = vmatpush.bf16.msrb.mxu0 %v6971_v57  ;;  %v1753_v63 = vpop.f32.mrf.mxu0  ;;  %v1809_v25 = vadd.f32 %v8904_v61, %v667_v26  ;;  %2465 = vmatpush.bf16.msrb.mxu2 %v6991_v3 }
  0xf6   : > { %v1754_v37 = vadd.f32 %v1753_v63, %v8845_v11  ;;  %v2201_v13 = vmax.f32 %v1790_v4, 0.0 }
  0xf7   : > { %v1772_v0 = vpop.f32.mrf.mxu1  ;;  %2449 = vmatpush.bf16.msrb.mxu1 %v6980_v40 }
  0xf8   : > { %v1773_v5 = vadd.f32 %v1772_v0, %v1754_v37 }
  0xf9   : > { %2432 = vmatpush.bf16.msrb.mxu0 %v6970_v31 }
  0xfb   : > { %v1791_v6 = vpop.f32.mrf.mxu2  ;;  %2450 = vmatpush.bf16.msrb.mxu1 %v6979_v12 }
  0xfc   : > { %v8920_v7 = vpop.f32.mrf.mxu3  ;;  %v1792_v9 = vadd.f32 %v1791_v6, %v1773_v5 }
  0xfd   : > { %2433 = vmatpush.bf16.msrb.mxu0 %v6969_v1  ;;  %v1822_v10 = vpop.f32.mrf.mxu0  ;;  %v1811_v60 = vadd.f32 %v8920_v7, %v667_v26 }
  0xfe   : > { %v2205_v14 = vmax.f32 %v1792_v9, 0.0  ;;  %v1823_v30 = vadd.f32 %v1822_v10, %v1804_v27  ;;  %v6986_v27 = vld [vmem:[%s10891_s4 + $0x90] sm:$0xff] }
  0xff   : > { %v1841_v11 = vpop.f32.mrf.mxu1  ;;  %2451 = vmatpush.bf16.msrb.mxu1 %v6978_v17 }
 0x100   : > { %2125 = vmatmul.bf16.vlgmr.msra.gmra.mxu0 %v7805_v55  ;;  %2163 = vmatmul.bf16.vlgmr.msra.gmra.mxu2 %v8016_v44  ;;  %v8933_v15 = vpack.c.bf16 %v2205_v14, %v2201_v13  ;;  %v6977_v55 = vld [vmem:[%s10891_s4 + $0x48] sm:$0xff]  ;;  %v1842_v33 = vadd.f32 %v1841_v11, %v1823_v30 }
 0x101   : > { %2434 = vmatpush.bf16.msrb.mxu0 %v6968_v8  ;;  %5878 = vmatmul.msk.bf16.vlgmr.msra.gmra.mxu3 %vm1654_vm0, %v8027_v49  ;;  %v6990_v8 = vld [vmem:[%s10891_s4 + $0xb0] sm:$0xff]  ;;  %v6989_v13 = vld [vmem:[%s10891_s4 + $0xa8] sm:$0xff] }
 0x102   : > { %2144 = vmatmul.bf16.vlgmr.msra.gmra.mxu1 %v8014_v43  ;;  %v6976_v43 = vld [vmem:[%s10891_s4 + $0x40] sm:$0xff]  ;;  %2466 = vmatpush.bf16.msrb.mxu2 %v6990_v8 }
 0x103   : > { %v1860_v19 = vpop.f32.mrf.mxu2  ;;  %2452 = vmatpush.bf16.msrb.mxu1 %v6977_v55 }
 0x104   : > { %v1879_v20 = vpop.f32.mrf.mxu3  ;;  %v1861_v35 = vadd.f32 %v1860_v19, %v1842_v33 }
 0x105   : > { %v1824_v21 = vpop.f32.mrf.mxu0 }
 0x106   : > { %v1825_v34 = vadd.f32 %v1824_v21, %v1806_v32  ;;  %v1880_v18 = vadd.f32 %v1879_v20, %v1861_v35  ;;  %2467 = vmatpush.bf16.msrb.mxu2 %v6989_v13  ;;  %v6988_v21 = vld [vmem:[%s10891_s4 + $0xa0] sm:$0xff] }
 0x107   : > { %v1843_v23 = vpop.f32.mrf.mxu1  ;;  %2453 = vmatpush.bf16.msrb.mxu1 %v6976_v43  ;;  %v6984_v32 = vld [vmem:[%s10891_s4 + $0x80] sm:$0xff] }
 0x10a   : > { %2468 = vmatpush.bf16.msrb.mxu2 %v6988_v21 }
 0x10b   : > { %v1862_v44 = vpop.f32.mrf.mxu2 }
 0x10c   : > { %v1881_v49 = vpop.f32.mrf.mxu3 }
 0x10d   : > { %v1827_v45 = vpop.f32.mrf.mxu0 }
 0x10e   : > { %v1828_v22 = vadd.f32 %v1827_v45, %v1809_v25  ;;  %v6987_v45 = vld [vmem:[%s10891_s4 + $0x98] sm:$0xff] }
 0x10f   : > { %v1846_v24 = vpop.f32.mrf.mxu1  ;;  %2469 = vmatpush.bf16.msrb.mxu2 %v6987_v45 }
 0x110   : > { %2130 = vmatmul.bf16.gmra.mxu0 %v7903_v41  ;;  %2168 = vmatmul.bf16.gmra.mxu2 %v8129_v48  ;;  %v1844_v48 = vadd.f32 %v1843_v23, %v1825_v34  ;;  %v1847_v62 = vadd.f32 %v1846_v24, %v1828_v22 }
 0x111   : > { %5879 = vmatmul.msk.bf16.gmra.mxu3 %vm1654_vm0, %v8140_v56 }
 0x112   : > { %2149 = vmatmul.bf16.gmra.mxu1 %v8127_v47  ;;  %v1863_v2 = vadd.f32 %v1862_v44, %v1844_v48 }
 0x113   : > { %v1865_v50 = vpop.f32.mrf.mxu2  ;;  %2470 = vmatpush.bf16.msrb.mxu2 %v6986_v27 }
 0x114   : > { %v1884_v51 = vpop.f32.mrf.mxu3  ;;  %v1882_v46 = vadd.f32 %v1881_v49, %v1863_v2  ;;  %v1866_v36 = vadd.f32 %v1865_v50, %v1847_v62 }
 0x115   : > { %v1829_v28 = vpop.f32.mrf.mxu0 }
 0x116   : > { %v1830_v63 = vadd.f32 %v1829_v28, %v1811_v60  ;;  %v1885_v6 = vadd.f32 %v1884_v51, %v1866_v36  ;;  %v6985_v28 = vld [vmem:[%s10891_s4 + $0x88] sm:$0xff] }
 0x117   : > { %v1848_v29 = vpop.f32.mrf.mxu1  ;;  %2471 = vmatpush.bf16.msrb.mxu2 %v6985_v28 }
 0x118   : > { %v1849_v5 = vadd.f32 %v1848_v29, %v1830_v63 }
 0x11b   : > { %v1867_v41 = vpop.f32.mrf.mxu2  ;;  %2472 = vmatpush.bf16.msrb.mxu2 %v6984_v32 }
 0x11c   : > { %v1886_v38 = vpop.f32.mrf.mxu3  ;;  %v1868_v7 = vadd.f32 %v1867_v41, %v1849_v5 }
 0x11d   : > { %v1898_v47 = vpop.f32.mrf.mxu0 }
 0x11e   : > { %v1899_v56 = vadd.f32 %v1898_v47, %v1880_v18  ;;  %v1887_v10 = vadd.f32 %v1886_v38, %v1868_v7  ;;  %v668_v38 = vperm.slane %v8612_v16, 2 }
 0x11f   : > { %v1917_v39 = vpop.f32.mrf.mxu1 }
 0x120   : > { %2435 = vmatmul.bf16.vlgmr.msrb.gmra.mxu0 %v8897_v58  ;;  %v1918_v57 = vadd.f32 %v1917_v39, %v1899_v56 }
 0x122   : > { %v2194_v0 = vmax.f32 %v1918_v57, 0.0 }
 0x123   : > { %v8954_v52 = vpop.f32.mrf.mxu2 }
 0x124   : > { %v8956_v53 = vpop.f32.mrf.mxu3  ;;  %v1937_v47 = vadd.f32 %v8954_v52, %v668_v38 }
 0x125   : > { %v1900_v42 = vpop.f32.mrf.mxu0 }
 0x126   : > { %v1901_v59 = vadd.f32 %v1900_v42, %v1882_v46  ;;  %v1956_v25 = vadd.f32 %v8956_v53, %v1937_v47  ;;  %v6992_v46 = vld [vmem:[%s10891_s4 + $0xc0] sm:$0xff] }
 0x127   : > { %v1919_v54 = vpop.f32.mrf.mxu1  ;;  %2491 = vmatpush.bf16.msrb.mxu3 %v6992_v46 }
 0x128   : > { %v1920_v31 = vadd.f32 %v1919_v54, %v1901_v59 }
 0x12a   : > { %v2198_v58 = vmax.f32 %v1920_v31, 0.0 }
 0x12b   : > { %v1938_v61 = vpop.f32.mrf.mxu2 }
 0x12c   : > { %v2210_v37 = vpack.c.bf16 %v2198_v58, %v2194_v0  ;;  %v1957_v1 = vpop.f32.mrf.mxu3  ;;  %v1939_v39 = vadd.f32 %v1938_v61, %v668_v38 }
 0x12d   : > { %v1903_v40 = vpop.f32.mrf.mxu0 }
 0x12e   : > { %2454 = vmatmul.bf16.vlgmr.msrb.gmra.mxu1 %v2210_v37  ;;  %v1904_v9 = vadd.f32 %v1903_v40, %v1885_v6  ;;  %v1958_v42 = vadd.f32 %v1957_v1, %v1939_v39 }
 0x12f   : > { %v1922_v4 = vpop.f32.mrf.mxu1 }
 0x130   : > { %2440 = vmatmul.bf16.gmra.mxu0 %v8933_v15  ;;  %v1923_v19 = vadd.f32 %v1922_v4, %v1904_v9 }
 0x132   : > { %v2202_v23 = vmax.f32 %v1923_v19, 0.0 }
 0x133   : > { %v1941_v11 = vpop.f32.mrf.mxu2 }
 0x134   : > { %v8966_v12 = vpop.f32.mrf.mxu3  ;;  %v1942_v58 = vadd.f32 %v1941_v11, %v668_v38 }
 0x135   : > { %v1905_v14 = vpop.f32.mrf.mxu0 }
 0x136   : > { %v1906_v20 = vadd.f32 %v1905_v14, %v1887_v10  ;;  %v1961_v5 = vadd.f32 %v8966_v12, %v1942_v58 }
 0x137   : > { %v1924_v17 = vpop.f32.mrf.mxu1 }
 0x138   : > { %v1925_v15 = vadd.f32 %v1924_v17, %v1906_v20 }
 0x13a   : > { %v2206_v55 = vmax.f32 %v1925_v15, 0.0 }
 0x13b   : > { %v1943_v43 = vpop.f32.mrf.mxu2 }
 0x13c   : > { %v1962_v44 = vpop.f32.mrf.mxu3  ;;  %v2214_v49 = vpack.c.bf16 %v2206_v55, %v2202_v23  ;;  %v1944_v37 = vadd.f32 %v1943_v43, %v668_v38 }
 0x13d   : > { %v1974_v24 = vpop.f32.mrf.mxu0 }
 0x13e   : > { %2459 = vmatmul.bf16.gmra.mxu1 %v2214_v49  ;;  %v1975_v54 = vadd.f32 %v1974_v24, %v1956_v25  ;;  %v1963_v7 = vadd.f32 %v1962_v44, %v1944_v37  ;;  %v669_v44 = vperm.slane %v8612_v16, 3 }
 0x13f   : > { %v1993_v26 = vpop.f32.mrf.mxu1 }
 0x140   : > { %v1994_v57 = vadd.f32 %v1993_v26, %v1975_v54 }
 0x143   : > { %v2012_v50 = vpop.f32.mrf.mxu2 }
 0x144   : > { %v2031_v51 = vpop.f32.mrf.mxu3  ;;  %v2013_v62 = vadd.f32 %v2012_v50, %v1994_v57 }
 0x145   : > { %v1976_v29 = vpop.f32.mrf.mxu0 }
 0x146   : > { %v1977_v22 = vadd.f32 %v1976_v29, %v1958_v42  ;;  %v2032_v36 = vadd.f32 %v2031_v51, %v2013_v62 }
 0x147   : > { %v1995_v30 = vpop.f32.mrf.mxu1 }
 0x148   : > { %v1996_v63 = vadd.f32 %v1995_v30, %v1977_v22 }
 0x14b   : > { %v2014_v33 = vpop.f32.mrf.mxu2 }
 0x14c   : > { %v2033_v34 = vpop.f32.mrf.mxu3  ;;  %v2015_v0 = vadd.f32 %v2014_v33, %v1996_v63 }
 0x14d   : > { %v1979_v35 = vpop.f32.mrf.mxu0 }
 0x14e   : > { %v2034_v53 = vadd.f32 %v2033_v34, %v2015_v0  ;;  %v1980_v8 = vadd.f32 %v1979_v35, %v1961_v5 }
 0x14f   : > { %v1998_v41 = vpop.f32.mrf.mxu1 }
 0x150   : > { %v1999_v17 = vadd.f32 %v1998_v41, %v1980_v8 }
 0x153   : > { %v2017_v48 = vpop.f32.mrf.mxu2 }
 0x154   : > { %v2036_v18 = vpop.f32.mrf.mxu3  ;;  %v2018_v21 = vadd.f32 %v2017_v48, %v1999_v17 }
 0x155   : > { %v1981_v2 = vpop.f32.mrf.mxu0 }
 0x156   : > { %v1982_v13 = vadd.f32 %v1981_v2, %v1963_v7  ;;  %v2037_v43 = vadd.f32 %v2036_v18, %v2018_v21 }
 0x157   : > { %v2000_v56 = vpop.f32.mrf.mxu1 }
 0x158   : > { %v2001_v23 = vadd.f32 %v2000_v56, %v1982_v13 }
 0x15b   : > { %v2019_v59 = vpop.f32.mrf.mxu2 }
 0x15c   : > { %v2038_v60 = vpop.f32.mrf.mxu3  ;;  %v2020_v55 = vadd.f32 %v2019_v59, %v2001_v23 }
 0x15d   : > { %v2050_v31 = vpop.f32.mrf.mxu0 }
 0x15e   : > { %v2051_v61 = vadd.f32 %v2050_v31, %v2032_v36  ;;  %v2039_v49 = vadd.f32 %v2038_v60, %v2020_v55 }
 0x15f   : > { %v2069_v52 = vpop.f32.mrf.mxu1 }
 0x160   : > { %v2195_v9 = vmax.f32 %v2051_v61, 0.0  ;;  %v2070_v29 = vadd.f32 %v2069_v52, %v669_v44 }
 0x163   : > { %v2088_v3 = vpop.f32.mrf.mxu2 }
 0x164   : > { %v2107_v40 = vpop.f32.mrf.mxu3  ;;  %v2089_v34 = vadd.f32 %v2088_v3, %v2070_v29 }
 0x165   : > { %v2052_v4 = vpop.f32.mrf.mxu0 }
 0x166   : > { %v2053_v6 = vadd.f32 %v2052_v4, %v2034_v53  ;;  %v2108_v47 = vadd.f32 %v2107_v40, %v2089_v34 }
 0x167   : > { %v2071_v1 = vpop.f32.mrf.mxu1 }
 0x168   : > { %v2199_v10 = vmax.f32 %v2053_v6, 0.0  ;;  %v2072_v38 = vadd.f32 %v2071_v1, %v669_v44 }
 0x16a   : > { %v2211_v14 = vpack.c.bf16 %v2199_v10, %v2195_v9 }
 0x16b   : > { %v2090_v19 = vpop.f32.mrf.mxu2 }
 0x16c   : > { %v2109_v11 = vpop.f32.mrf.mxu3  ;;  %2473 = vmatmul.bf16.vlgmr.msrb.gmra.mxu2 %v2211_v14  ;;  %v2091_v39 = vadd.f32 %v2090_v19, %v2072_v38  ;;  %v7000_v38 = vld [vmem:[%s10893_s6 + $0x34] sm:$0xf0] }
 0x16d   : > { %v2055_v20 = vpop.f32.mrf.mxu0 }
 0x16e   : > { %v2056_v45 = vadd.f32 %v2055_v20, %v2037_v43  ;;  %v2110_v16 = vadd.f32 %v2109_v11, %v2091_v39 }
 0x16f   : > { %v2074_v15 = vpop.f32.mrf.mxu1 }
 0x170   : > { %v2203_v51 = vmax.f32 %v2056_v45, 0.0  ;;  %v2075_v54 = vadd.f32 %v2074_v15, %v669_v44 }
 0x173   : > { %v2093_v12 = vpop.f32.mrf.mxu2 }
 0x174   : > { %v2112_v24 = vpop.f32.mrf.mxu3  ;;  %v2094_v31 = vadd.f32 %v2093_v12, %v2075_v54  ;;  %v7229_v12 = vld [vmem:[%s10892_s5] ss:$0 sm:$0xff]  ;;  %v6997_v54 = vld [vmem:[%s10893_s6 + $0x24] sm:$0xf] }
 0x175   : > { %v2057_v26 = vpop.f32.mrf.mxu0 }
 0x176   : > { %v2058_v50 = vadd.f32 %v2057_v26, %v2039_v49  ;;  %v2113_v37 = vadd.f32 %v2112_v24, %v2094_v31  ;;  %v6996_v31 = vld [vmem:[%s10893_s6 + $0x14] sm:$0xf0] }
 0x177   : > { %v2076_v27 = vpop.f32.mrf.mxu1 }
 0x178   : > { %v2207_v28 = vmax.f32 %v2058_v50, 0.0  ;;  %v2077_v0 = vadd.f32 %v2076_v27, %v669_v44 }
 0x17a   : > { %v2215_v30 = vpack.c.bf16 %v2207_v28, %v2203_v51 }
 0x17b   : > { %v2095_v32 = vpop.f32.mrf.mxu2 }
 0x17c   : > { %v2114_v33 = vpop.f32.mrf.mxu3  ;;  %2478 = vmatmul.bf16.gmra.mxu2 %v2215_v30  ;;  %v2096_v53 = vadd.f32 %v2095_v32, %v2077_v0 }
 0x17d   : > { %v2126_v35 = vpop.f32.mrf.mxu0 }
 0x17e   : > { %v2127_v48 = vadd.f32 %v2126_v35, %v2108_v47  ;;  %v2115_v6 = vadd.f32 %v2114_v33, %v2096_v53  ;;  %v6998_v47 = vld [vmem:[%s10893_s6 + $0x2c] sm:$0xf] }
 0x17f   : > { %v2145_v41 = vpop.f32.mrf.mxu1 }
 0x180   : > { %v2146_v46 = vadd.f32 %v2145_v41, %v2127_v48  ;;  %v6008_v41 = vld [vmem:[%s10893_s6 + $0x28] sm:$0xf] }
 0x181   : > { %v6009_v48 = vor.u32 %v7000_v38, %v6008_v41  ;;  %v7102_v41 = vld [vmem:[%s10895_s8 + $0x328] sm:$0xf0]  ;;  %v6668_v38 = vld [vmem:[%s10895_s8 + $0x508] sm:$0xf] }
 0x183   : > { %v2164_v18 = vpop.f32.mrf.mxu2  ;;  %2658 = vmatpush.bf16.msra.mxu2 %v6009_v48  ;;  %v6696_v48 = vld [vmem:[%s10895_s8 + $0x540] sm:$0xf] }
 0x184   : > { %v2183_v2 = vpop.f32.mrf.mxu3  ;;  %v2165_v22 = vadd.f32 %v2164_v18, %v2146_v46  ;;  %v6010_v18 = vld [vmem:[%s10893_s6 + $0x38] sm:$0xf0] }
 0x185   : > { %v2128_v56 = vpop.f32.mrf.mxu0  ;;  %v6013_v46 = vor.u32 %v6998_v47, %v6010_v18  ;;  %v7172_v18 = vld [vmem:[%s10895_s8 + $0x558] sm:$0xf0] }
 0x186   : > { %v2129_v42 = vadd.f32 %v2128_v56, %v2110_v16  ;;  %v2184_v52 = vadd.f32 %v2183_v2, %v2165_v22  ;;  %v6000_v2 = vld [vmem:[%s10893_s6 + $0x20] sm:$0xf]  ;;  %v6999_v16 = vld [vmem:[%s10893_s6 + $0x2c] sm:$0xf0]  ;;  %v6002_v22 = vld [vmem:[%s10893_s6 + $0x30] sm:$0xf0] }
 0x187   : > { %v2147_v25 = vpop.f32.mrf.mxu1  ;;  %2677 = vmatpush.bf16.msra.mxu3 %v6013_v46  ;;  %v7039_v46 = vld [vmem:[%s10895_s8 + $0x130] sm:$0xf0] }
 0x188   : > { %v2148_v57 = vadd.f32 %v2147_v25, %v2129_v42  ;;  %v2196_v61 = vmax.f32 %v2184_v52, 0.0  ;;  %v6001_v42 = vor.u32 %v6999_v16, %v6000_v2 }
 0x18a   : > { %2620 = vmatpush.bf16.msra.mxu0 %v6001_v42  ;;  %v6388_v42 = vld [vmem:[%s10895_s8 + $0x2d8] sm:$0xf] }
 0x18b   : > { %v2166_v59 = vpop.f32.mrf.mxu2 }
 0x18c   : > { %v2185_v60 = vpop.f32.mrf.mxu3  ;;  %v2167_v62 = vadd.f32 %v2166_v59, %v2148_v57  ;;  %v5992_v57 = vld [vmem:[%s10893_s6 + $0x8] sm:$0xf] }
 0x18d   : > { %v2131_v63 = vpop.f32.mrf.mxu0 }
 0x18e   : > { %v2186_v58 = vadd.f32 %v2185_v60, %v2167_v62  ;;  %v2132_v4 = vadd.f32 %v2131_v63, %v2113_v37  ;;  %v6005_v60 = vor.u32 %v6997_v54, %v6002_v22  ;;  %v5993_v62 = vor.u32 %v6996_v31, %v5992_v57  ;;  %v7095_v54 = vld [vmem:[%s10895_s8 + $0x2f0] sm:$0xf0]  ;;  %v6640_v22 = vld [vmem:[%s10895_s8 + $0x4d0] sm:$0xf]  ;;  %v7158_v57 = vld [vmem:[%s10895_s8 + $0x4e8] sm:$0xf0] }
 0x18f   : > { %v2150_v36 = vpop.f32.mrf.mxu1  ;;  %v6641_v31 = vor.u32 %v7158_v57, %v6640_v22  ;;  %v7123_v22 = vld [vmem:[%s10895_s8 + $0x3d0] sm:$0xf0] }
 0x190   : > { %v2200_v3 = vmax.f32 %v2186_v58, 0.0  ;;  %v2151_v8 = vadd.f32 %v2150_v36, %v2132_v4  ;;  %2639 = vmatpush.bf16.msra.mxu1 %v6005_v60  ;;  %2659 = vmatpush.bf16.msra.mxu2 %v5993_v62  ;;  %v2508_v60 = vld [vmem:[%s9077_s16 + $0x8] sm:$0xff] }
 0x192   : > { %v2212_v40 = vpack.c.bf16 %v2200_v3, %v2196_v61 }
 0x193   : > { %v2169_v1 = vpop.f32.mrf.mxu2 }
 0x194   : > { %v2188_v5 = vpop.f32.mrf.mxu3  ;;  %5980 = vmatmul.msk.bf16.vlgmr.msrb.gmra.mxu3 %vm1654_vm0, %v2212_v40  ;;  %v2170_v10 = vadd.f32 %v2169_v1, %v2151_v8 }
 0x195   : > { %v2133_v7 = vpop.f32.mrf.mxu0 }
 0x196   : > { %v2134_v9 = vadd.f32 %v2133_v7, %v2115_v6  ;;  %v2189_v19 = vadd.f32 %v2188_v5, %v2170_v10 }
 0x197   : > { %v2152_v13 = vpop.f32.mrf.mxu1 }
 0x198   : > { %v2153_v14 = vadd.f32 %v2152_v13, %v2134_v9  ;;  %v2204_v21 = vmax.f32 %v2189_v19, 0.0 }
 0x19b   : > { %v2171_v17 = vpop.f32.mrf.mxu2 }
 0x19c   : > { %v2172_v11 = vadd.f32 %v2171_v17, %v2153_v14  ;;  %v2190_v20 = vpop.f32.mrf.mxu3 }
 0x19d   : > { %v2436_v43 = vpop.f32.mrf.mxu0 }
 0x19e   : > { %v2191_v15 = vadd.f32 %v2190_v20, %v2172_v11  ;;  %v2437_v24 = vadd.f32 %v7229_v12, %v2436_v43  ;;  %v6995_v43 = vld [vmem:[%s10893_s6 + $0xc] sm:$0xf0] }
 0x1a0   : > { %v2208_v23 = vmax.f32 %v2191_v15, 0.0  ;;  %v6994_v15 = vld [vmem:[%s10893_s6 + $0xc] sm:$0xf] }
 0x1a2   : > { %v2216_v55 = vpack.c.bf16 %v2208_v23, %v2204_v21  ;;  %v5994_v21 = vld [vmem:[%s10893_s6 + $0x18] sm:$0xf0]  ;;  %v5984_v23 = vld [vmem:[%s10893_s6] sm:$0xf] }
 0x1a4   : > { %5981 = vmatmul.msk.bf16.gmra.mxu3 %vm1654_vm0, %v2216_v55  ;;  %v5997_v55 = vor.u32 %v6994_v15, %v5994_v21  ;;  %v6108_v21 = vld [vmem:[%s10895_s8 + $0xa8] sm:$0xf] }
 0x1a5   : > { %v2438_v44 = vpop.f32.mrf.mxu0 }
 0x1a6   : > { %v2439_v30 = vadd.f32 %v7229_v12, %v2438_v44  ;;  %2678 = vmatpush.bf16.msra.mxu3 %v5997_v55  ;;  %v7081_v55 = vld [vmem:[%s10895_s8 + $0x280] sm:$0xf0] }
 0x1ab   : > { %v2455_v49 = vpop.f32.mrf.mxu1 }
 0x1ac   : > { %v2456_v26 = vadd.f32 %v2455_v49, %v2437_v24  ;;  %v5985_v49 = vor.u32 %v6995_v43, %v5984_v23  ;;  %v7025_v23 = vld [vmem:[%s10895_s8 + $0xc0] sm:$0xf0] }
 0x1ad   : > { %v2441_v35 = vpop.f32.mrf.mxu0 }
 0x1ae   : > { %v2442_v63 = vadd.f32 %v7229_v12, %v2441_v35  ;;  %2621 = vmatpush.bf16.msra.mxu0 %v5985_v49  ;;  %v6416_v35 = vld [vmem:[%s10895_s8 + $0x310] sm:$0xf]  ;;  %v6584_v49 = vld [vmem:[%s10895_s8 + $0x460] sm:$0xf] }
 0x1af   : > { %v6417_v2 = vor.u32 %v7102_v41, %v6416_v35  ;;  %v6276_v41 = vld [vmem:[%s10895_s8 + $0x1f8] sm:$0xf] }
 0x1b3   : > { %v2457_v27 = vpop.f32.mrf.mxu1 }
 0x1b4   : > { %v2458_v33 = vadd.f32 %v2457_v27, %v2439_v30  ;;  %v7053_v27 = vld [vmem:[%s10895_s8 + $0x1a0] sm:$0xf0]  ;;  %v6192_v30 = vld [vmem:[%s10895_s8 + $0x150] sm:$0xf] }
 0x1b5   : > { %v2443_v61 = vpop.f32.mrf.mxu0 }
 0x1b6   : > { %v2444_v1 = vadd.f32 %v7229_v12, %v2443_v61  ;;  %v5986_v12 = vld [vmem:[%s10893_s6 + $0x10] sm:$0xf0]  ;;  %v7032_v61 = vld [vmem:[%s10895_s8 + $0xf8] sm:$0xf0] }
 0x1bb   : > { %v2460_v56 = vpop.f32.mrf.mxu1 }
 0x1bc   : > { %v2461_v36 = vadd.f32 %v2460_v56, %v2442_v63  ;;  %v6697_v56 = vor.u32 %v7172_v18, %v6696_v48  ;;  %v6612_v63 = vld [vmem:[%s10895_s8 + $0x498] sm:$0xf]  ;;  %v7130_v48 = vld [vmem:[%s10895_s8 + $0x408] sm:$0xf0] }
 0x1be   : > { %3900 = vmatpush.bf16.msrb.mxu3 %v6697_v56  ;;  %v6248_v56 = vld [vmem:[%s10895_s8 + $0x1c0] sm:$0xf] }
 0x1c3   : > { %v2462_v4 = vpop.f32.mrf.mxu1 }
 0x1c4   : > { %v2463_v8 = vadd.f32 %v2462_v4, %v2444_v1  ;;  %v7088_v4 = vld [vmem:[%s10895_s8 + $0x2b8] sm:$0xf0] }
 0x1ef   : > { %v2474_v45 = vpop.f32.mrf.mxu2 }
 0x1f0   : > { %v2475_v50 = vadd.f32 %v2474_v45, %v2456_v26  ;;  %v6993_v45 = vld [vmem:[%s10893_s6 + $0x4] sm:$0xf]  ;;  %v6220_v26 = vld [vmem:[%s10895_s8 + $0x188] sm:$0xf] }
 0x1f1   : > { %v5989_v24 = vor.u32 %v6993_v45, %v5986_v12  ;;  %v7144_v45 = vld [vmem:[%s10895_s8 + $0x478] sm:$0xf0] }
 0x1f2   : > { %v6585_v12 = vor.u32 %v7144_v45, %v6584_v49 }
 0x1f3   : > { %2640 = vmatpush.bf16.msra.mxu1 %v5989_v24  ;;  %v6080_v24 = vld [vmem:[%s10895_s8 + $0x70] sm:$0xf] }
 0x1f7   : > { %v2476_v51 = vpop.f32.mrf.mxu2 }
 0x1f8   : > { %v2477_v39 = vadd.f32 %v2476_v51, %v2458_v33  ;;  %v6221_v51 = vor.u32 %v7053_v27, %v6220_v26  ;;  %v2507_v33 = vld [vmem:[%s9077_s16] sm:$0xff]  ;;  %v6304_v26 = vld [vmem:[%s10895_s8 + $0x230] sm:$0xf] }
 0x1fa   : > { %3836 = vmatpush.bf16.msrb.mxu0 %v6221_v51  ;;  %v6556_v51 = vld [vmem:[%s10895_s8 + $0x428] sm:$0xf] }
 0x1ff   : > { %v2479_v52 = vpop.f32.mrf.mxu2 }
 0x200   : > { %v2480_v53 = vadd.f32 %v2479_v52, %v2461_v36  ;;  %v6389_v36 = vor.u32 %v7095_v54, %v6388_v42  ;;  %v6500_v54 = vld [vmem:[%s10895_s8 + $0x3b8] sm:$0xf] }
 0x201   : > { %v6501_v57 = vor.u32 %v7123_v22, %v6500_v54  ;;  %v7008_v22 = vld [vmem:[%s10895_s8 + $0x3c] sm:$0xf] }
 0x207   : > { %v2481_v6 = vpop.f32.mrf.mxu2 }
 0x208   : > { %v2482_v10 = vadd.f32 %v2481_v6, %v2463_v8 }
 0x217   : > { %v2493_v28 = vpop.f32.mrf.mxu3 }
 0x218   : > { %v9003_v29 = vadd.f32 %v2493_v28, %v2475_v50  ;;  %v6444_v50 = vld [vmem:[%s10895_s8 + $0x348] sm:$0xf]  ;;  %v7109_v28 = vld [vmem:[%s10895_s8 + $0x360] sm:$0xf0] }
 0x21a   : > { %2503 = vst [vmem:[%s9005_s29] sm:$0xff] %v9003_v29  ;;  %v2511_v32 = vmul.f32 0.5, %v9003_v29 }
 0x21c   : > { %v2515_v34 = vmul.f32 1.442695, %v2511_v32  ;;  %v7046_v32 = vld [vmem:[%s10895_s8 + $0x168] sm:$0xf0] }
 0x21d   : > { %v6193_v47 = vor.u32 %v7046_v32, %v6192_v30 }
 0x21e   : > { %7230 = vpow2.f32 %v2515_v34  ;;  %v6445_v34 = vor.u32 %v7109_v28, %v6444_v50  ;;  %v7074_v50 = vld [vmem:[%s10895_s8 + $0x248] sm:$0xf0]  ;;  %v7137_v28 = vld [vmem:[%s10895_s8 + $0x440] sm:$0xf0] }
 0x21f   : > { %v2495_v25 = vpop.f32.mrf.mxu3  ;;  %3837 = vmatpush.bf16.msrb.mxu0 %v6193_v47  ;;  %v6305_v30 = vor.u32 %v7074_v50, %v6304_v26  ;;  %v6557_v32 = vor.u32 %v7137_v28, %v6556_v51  ;;  %v7022_v26 = vld [vmem:[%s10895_s8 + $0xac] sm:$0xf]  ;;  %v6334_v28 = vld [vmem:[%s10895_s8 + $0x284] sm:$0xf0] }
 0x220   : > { %v9037_v59 = vadd.f32 %v2495_v25, %v2477_v39  ;;  %v7165_v39 = vld [vmem:[%s10895_s8 + $0x520] sm:$0xf0]  ;;  %3855 = vmatpush.bf16.msrb.mxu1 %v6445_v34  ;;  %v6164_v25 = vld [vmem:[%s10895_s8 + $0x118] sm:$0xf]  ;;  %v7011_v34 = vld [vmem:[%s10895_s8 + $0x50] sm:$0xf0] }
 0x221   : > { %v6669_v16 = vor.u32 %v7165_v39, %v6668_v38  ;;  %v6165_v62 = vor.u32 %v7039_v46, %v6164_v25  ;;  %v7067_v38 = vld [vmem:[%s10895_s8 + $0x210] sm:$0xf0]  ;;  %v6528_v39 = vld [vmem:[%s10895_s8 + $0x3f0] sm:$0xf]  ;;  %v7060_v46 = vld [vmem:[%s10895_s8 + $0x1d8] sm:$0xf0] }
 0x222   : > { %2504 = vst [vmem:[%s9005_s29 + $0x8] sm:$0xff] %v9037_v59  ;;  %v2512_v0 = vmul.f32 0.5, %v9037_v59  ;;  %v6277_v47 = vor.u32 %v7067_v38, %v6276_v41  ;;  %v6529_v18 = vor.u32 %v7130_v48, %v6528_v39  ;;  %v6249_v42 = vor.u32 %v7060_v46, %v6248_v56  ;;  %v7078_v50 = vld [vmem:[%s10895_s8 + $0x26c] sm:$0xf]  ;;  %v6586_v41 = vld [vmem:[%s10895_s8 + $0x47c] sm:$0xf0] }
 0x223   : > { %3874 = vmatpush.bf16.msrb.mxu2 %v6669_v16  ;;  %3838 = vmatpush.bf16.msrb.mxu0 %v6165_v62  ;;  %v7004_v16 = vld [vmem:[%s10895_s8 + $0x18] sm:$0xf0]  ;;  %v6082_v39 = vld [vmem:[%s10895_s8 + $0x8c] sm:$0xf0]  ;;  %v7071_v48 = vld [vmem:[%s10895_s8 + $0x234] sm:$0xf] }
 0x224   : > { %v7231_v58 = vpop.eup %7230  ;;  %v2517_v37 = vmul.f32 1.442695, %v2512_v0  ;;  %v7151_v0 = vld [vmem:[%s10895_s8 + $0x4b0] sm:$0xf0]  ;;  %3856 = vmatpush.bf16.msrb.mxu1 %v6417_v2  ;;  %v6024_v2 = vld [vmem:[%s10895_s8] sm:$0xf] }
 0x225   : > { %2527 = vrot.lane.b32.xlu0 %v7231_v58, %s7447_s12  ;;  %v6613_v1 = vor.u32 %v7151_v0, %v6612_v63  ;;  %v6025_v25 = vor.u32 %v7004_v16, %v6024_v2  ;;  %v6446_v63 = vld [vmem:[%s10895_s8 + $0x364] sm:$0xf0]  ;;  %v6306_v56 = vld [vmem:[%s10895_s8 + $0x24c] sm:$0xf0]  ;;  %v7134_v46 = vld [vmem:[%s10895_s8 + $0x42c] sm:$0xf] }
 0x226   : > { %7232 = vpow2.f32 %v2517_v37 }
 0x227   : > { %v2498_v3 = vpop.f32.mrf.mxu3  ;;  %3875 = vmatpush.bf16.msrb.mxu2 %v6641_v31  ;;  %v6222_v31 = vld [vmem:[%s10895_s8 + $0x1a4] sm:$0xf0] }
 0x228   : > { %v9045_v40 = vadd.f32 %v2498_v3, %v2480_v53  ;;  %v6136_v53 = vld [vmem:[%s10895_s8 + $0xe0] sm:$0xf]  ;;  %3857 = vmatpush.bf16.msrb.mxu1 %v6389_v36  ;;  %v7116_v36 = vld [vmem:[%s10895_s8 + $0x398] sm:$0xf0] }
 0x229   : > { %v6360_v3 = vld [vmem:[%s10895_s8 + $0x2a0] sm:$0xf]  ;;  %v6137_v8 = vor.u32 %v7032_v61, %v6136_v53  ;;  %v7043_v53 = vld [vmem:[%s10895_s8 + $0x154] sm:$0xf]  ;;  %v6194_v61 = vld [vmem:[%s10895_s8 + $0x16c] sm:$0xf0] }
 0x22a   : > { %2505 = vst [vmem:[%s9005_s29 + $0x10] sm:$0xff] %v9045_v40  ;;  %v2513_v5 = vmul.f32 0.5, %v9045_v40 }
 0x22b   : > { %3876 = vmatpush.bf16.msrb.mxu2 %v6613_v1  ;;  %3839 = vmatpush.bf16.msrb.mxu0 %v6137_v8  ;;  %v6418_v1 = vld [vmem:[%s10895_s8 + $0x32c] sm:$0xf0] }
 0x22c   : > { %v7233_v7 = vpop.eup %7232  ;;  %v2519_v9 = vmul.f32 1.442695, %v2513_v5 }
 0x22d   : > { %2529 = vrot.lane.b32.xlu0 %v7233_v7, %s7447_s12 }
 0x22e   : > { %7234 = vpow2.f32 %v2519_v9  ;;  %v6361_v9 = vor.u32 %v7088_v4, %v6360_v3  ;;  %v7099_v3 = vld [vmem:[%s10895_s8 + $0x314] sm:$0xf]  ;;  %v6197_v4 = vor.u32 %v7043_v53, %v6194_v61 }
 0x22f   : > { %v2500_v13 = vpop.f32.mrf.mxu3  ;;  %3877 = vmatpush.bf16.msrb.mxu2 %v6585_v12  ;;  %v7148_v12 = vld [vmem:[%s10895_s8 + $0x49c] sm:$0xf] }
 0x230   : > { %v9050_v14 = vadd.f32 %v2500_v13, %v2482_v10  ;;  %3858 = vmatpush.bf16.msrb.mxu1 %v6361_v9  ;;  %v2510_v10 = vld [vmem:[%s9077_s16 + $0x18] sm:$0xff] }
 0x231   : > { %v7036_v9 = vld [vmem:[%s10895_s8 + $0x11c] sm:$0xf] }
 0x232   : > { %2506 = vst [vmem:[%s9005_s29 + $0x18] sm:$0xff] %v9050_v14  ;;  %v2514_v17 = vmul.f32 0.5, %v9050_v14  ;;  %s4971_s29 = sshll.u32 %s4968_s25, 4  ;;  %s4972_s29 = int_to_ptr.hbm [resolvable:$true] %s4971_s29 }
 0x233   : > { %3878 = vmatpush.bf16.msrb.mxu2 %v6557_v32 }
 0x234   : > { %v7235_v19 = vpop.eup %7234  ;;  %v2521_v11 = vmul.f32 1.442695, %v2514_v17 }
 0x235   : > { %2531 = vrot.lane.b32.xlu1 %v7235_v19, %s7447_s12 }
 0x236   : > { %7236 = vpow2.f32 %v2521_v11 }
 0x237   : > { %3879 = vmatpush.bf16.msrb.mxu2 %v6529_v18 }
 0x23b   : > { %3880 = vmatpush.bf16.msrb.mxu2 %v6501_v57  ;;  %v6054_v57 = vld [vmem:[%s10895_s8 + $0x54] sm:$0xf0] }
 0x23c   : > { %v7237_v20 = vpop.eup %7236 }
 0x23d   : > { %2533 = vrot.lane.b32.xlu1 %v7237_v20, %s7447_s12  ;;  %s7365_s12 = sshra.s32 %s4972_s29, 4  ;;  %s7366_s12 = int_to_ptr.hbm [resolvable:$true] %s7365_s12 }
 0x23e   : > { %p7372_p0 = scmp.lt.s32.totalorder %s7366_s12, %s10898_s11 }
 0x297   : > { %v2528_v44 = vpop.permute.xlu0 %2527 }
 0x298   : > { %v2539_v52 = vmul.f32 %v2528_v44, %v2507_v33  ;;  %v7018_v44 = vld [vmem:[%s10895_s8 + $0x88] sm:$0xf0]  ;;  %v6052_v33 = vld [vmem:[%s10895_s8 + $0x38] sm:$0xf] }
 0x299   : > { %v6081_v27 = vor.u32 %v7018_v44, %v6080_v24  ;;  %v6053_v35 = vor.u32 %v7011_v34, %v6052_v33  ;;  %v6614_v24 = vld [vmem:[%s10895_s8 + $0x4b4] sm:$0xf0]  ;;  %v6337_v34 = vor.u32 %v7078_v50, %v6334_v28  ;;  %v7113_v50 = vld [vmem:[%s10895_s8 + $0x384] sm:$0xf] }
 0x29a   : > { %v2543_v5 = vadd.f32 %v2539_v52, %v9003_v29  ;;  %v7106_v52 = vld [vmem:[%s10895_s8 + $0x34c] sm:$0xf]  ;;  %v6617_v44 = vor.u32 %v7148_v12, %v6614_v24  ;;  %v6452_v12 = vld [vmem:[%s10895_s8 + $0x350] sm:$0xf] }
 0x29b   : > { %v6449_v0 = vor.u32 %v7106_v52, %v6446_v63 }
 0x29f   : > { %v2530_v58 = vpop.permute.xlu0 %2529 }
 0x2a0   : > { %v2540_v37 = vmul.f32 %v2530_v58, %v2508_v60  ;;  %v7050_v60 = vld [vmem:[%s10895_s8 + $0x18c] sm:$0xf]  ;;  %v6472_v58 = vld [vmem:[%s10895_s8 + $0x380] sm:$0xf] }
 0x2a1   : > { %v6225_v62 = vor.u32 %v7050_v60, %v6222_v31  ;;  %v7064_v60 = vld [vmem:[%s10895_s8 + $0x1fc] sm:$0xf] }
 0x2a2   : > { %v2544_v6 = vadd.f32 %v2540_v37, %v9037_v59  ;;  %v2509_v59 = vld [vmem:[%s9077_s16 + $0x10] sm:$0xff]  ;;  %v6473_v37 = vor.u32 %v7116_v36, %v6472_v58  ;;  %v6278_v58 = vld [vmem:[%s10895_s8 + $0x214] sm:$0xf0]  ;;  %s7367_s16 = scalar_lea.hbm %s7366_s12, 32 }
 0x2a3   : > { %v7127_v36 = vld [vmem:[%s10895_s8 + $0x3f4] sm:$0xf]  ;;  %p7368_p11 = scmp.ne.s32.totalorder %s7366_s12, %s7367_s16  ;;  %p7373_p1 = scmp.lt.s32.totalorder %s7371_s1, %s7367_s16 }
 0x2a4   : > { %v2547_v7 = vpack.c.bf16 %v2544_v6, %v2543_v5  ;;  %3881 = vmatpush.bf16.msrb.mxu2 %v6473_v37  ;;  %v6421_v5 = vor.u32 %v7099_v3, %v6418_v1  ;;  %v7162_v6 = vld [vmem:[%s10895_s8 + $0x50c] sm:$0xf]  ;;  %v6530_v37 = vld [vmem:[%s10895_s8 + $0x40c] sm:$0xf0]  ;;  %v6281_v3 = vor.u32 %v7064_v60, %v6278_v58  ;;  %v7001_v1 = vld [vmem:[%s10895_s8 + $0x4] sm:$0xf] }
 0x2a5   : > { %v7166_v60 = vld [vmem:[%s10895_s8 + $0x528] sm:$0xf0]  ;;  %p7369_p12 = pnand %p7368_p11, %p7550_p5  ;;  %p7374_p2 = por %p7373_p1, %p7372_p0 }
 0x2a6   : > { %6014 = vmatmul.msk.bf16.vlgmr.msra.gmra.mxu0 %vm2607_vm1, %v2547_v7  ;;  %6016 = vmatmul.msk.bf16.vlgmr.msra.gmra.mxu1 %vm2607_vm1, %v2547_v7 }
 0x2a7   : > { %6018 = vmatmul.msk.bf16.vlgmr.msra.gmra.mxu2 %vm2607_vm1, %v2547_v7  ;;  %6020 = vmatmul.msk.bf16.vlgmr.msra.gmra.mxu3 %vm2607_vm1, %v2547_v7  ;;  %v2532_v29 = vpop.permute.xlu1 %2531  ;;  %v6670_v7 = vld [vmem:[%s10895_s8 + $0x524] sm:$0xf0]  ;;  %p7370_p13 = pneg %p7369_p12 }
 0x2a8   : > { %v2541_v13 = vmul.f32 %v2532_v29, %v2509_v59  ;;  %v6673_v8 = vor.u32 %v7162_v6, %v6670_v7  ;;  %v6166_v29 = vld [vmem:[%s10895_s8 + $0x134] sm:$0xf0]  ;;  %v7092_v59 = vld [vmem:[%s10895_s8 + $0x2dc] sm:$0xf]  ;;  %v7057_v6 = vld [vmem:[%s10895_s8 + $0x1c4] sm:$0xf] }
 0x2a9   : > { %p7375_p3 = pnand %p7374_p2, %p7370_p13 }
 0x2aa   : > { %v2545_v11 = vadd.f32 %v2541_v13, %v9045_v40  ;;  %v6332_v40 = vld [vmem:[%s10895_s8 + $0x268] sm:$0xf]  ;;  %3950 = vmatpush.bf16.msra.mxu2 %v6673_v8  ;;  %v6390_v13 = vld [vmem:[%s10895_s8 + $0x2f4] sm:$0xf0] }
 0x2ab   : > { %v6333_v43 = vor.u32 %v7081_v55, %v6332_v40  ;;  %v7085_v55 = vld [vmem:[%s10895_s8 + $0x2a4] sm:$0xf] }
 0x2ad   : > { %3859 = vmatpush.bf16.msrb.mxu1 %v6333_v43  ;;  %v6362_v43 = vld [vmem:[%s10895_s8 + $0x2bc] sm:$0xf0] }
 0x2ae   : > { %v6365_v45 = vor.u32 %v7085_v55, %v6362_v43 }
 0x2af   : > { %v2534_v17 = vpop.permute.xlu1 %2533 }
 0x2b0   : > { %v2542_v19 = vmul.f32 %v2534_v17, %v2510_v10  ;;  %v6169_v10 = vor.u32 %v7036_v9, %v6166_v29  ;;  %v6393_v17 = vor.u32 %v7092_v59, %v6390_v13  ;;  %v6250_v9 = vld [vmem:[%s10895_s8 + $0x1dc] sm:$0xf0]  ;;  %v7120_v29 = vld [vmem:[%s10895_s8 + $0x3bc] sm:$0xf]  ;;  %v6502_v59 = vld [vmem:[%s10895_s8 + $0x3d4] sm:$0xf0] }
 0x2b1   : > { %3860 = vmatpush.bf16.msrb.mxu1 %v6305_v30  ;;  %v2557_v30 = vld [vmem:[%s10894_s7] sm:$0xf] }
 0x2b2   : > { %v2546_v20 = vadd.f32 %v2542_v19, %v9050_v14  ;;  %v6109_v14 = vor.u32 %v7025_v23, %v6108_v21  ;;  %v7155_v19 = vld [vmem:[%s10895_s8 + $0x4d4] sm:$0xf]  ;;  %v6698_v21 = vld [vmem:[%s10895_s8 + $0x55c] sm:$0xf0]  ;;  %v7029_v23 = vld [vmem:[%s10895_s8 + $0xe4] sm:$0xf] }
 0x2b3   : > { %v9347_v18 = vperm.slane %v2557_v30, 0  ;;  %v9349_v2 = vperm.slane %v2557_v30, 1  ;;  %v9402_v13 = vperm.slane %v2557_v30, 3 }
 0x2b4   : > { %v2548_v15 = vpack.c.bf16 %v2546_v20, %v2545_v11  ;;  %3840 = vmatpush.bf16.msrb.mxu0 %v6109_v14  ;;  %v6642_v11 = vld [vmem:[%s10895_s8 + $0x4ec] sm:$0xf0]  ;;  %v6138_v14 = vld [vmem:[%s10895_s8 + $0xfc] sm:$0xf0] }
 0x2b5   : > { %3861 = vmatpush.bf16.msrb.mxu1 %v6277_v47  ;;  %v6645_v20 = vor.u32 %v7155_v19, %v6642_v11  ;;  %v6141_v49 = vor.u32 %v7029_v23, %v6138_v14  ;;  %v7015_v47 = vld [vmem:[%s10895_s8 + $0x74] sm:$0xf]  ;;  %v6253_v19 = vor.u32 %v7057_v6, %v6250_v9  ;;  %v6505_v23 = vor.u32 %v7120_v29, %v6502_v59  ;;  %v6144_v29 = vld [vmem:[%s10895_s8 + $0xe8] sm:$0xf] }
 0x2b6   : > { %6015 = vmatmul.msk.bf16.gmra.mxu0 %vm2607_vm1, %v2548_v15  ;;  %6017 = vmatmul.msk.bf16.gmra.mxu1 %vm2607_vm1, %v2548_v15  ;;  %v6085_v16 = vor.u32 %v7015_v47, %v6082_v39  ;;  %v6424_v47 = vld [vmem:[%s10895_s8 + $0x318] sm:$0xf]  ;;  %v7159_v9 = vld [vmem:[%s10895_s8 + $0x4f0] sm:$0xf0] }
 0x2b7   : > { %6019 = vmatmul.msk.bf16.gmra.mxu2 %vm2607_vm1, %v2548_v15  ;;  %6021 = vmatmul.msk.bf16.gmra.mxu3 %vm2607_vm1, %v2548_v15  ;;  %v7169_v15 = vld [vmem:[%s10895_s8 + $0x544] sm:$0xf] }
 0x2b8   : > { %3841 = vmatpush.bf16.msrb.mxu0 %v6081_v27  ;;  %v6701_v40 = vor.u32 %v7169_v15, %v6698_v21  ;;  %3951 = vmatpush.bf16.msra.mxu2 %v6645_v20  ;;  %v6110_v27 = vld [vmem:[%s10895_s8 + $0xc4] sm:$0xf0] }
 0x2b9   : > { %3862 = vmatpush.bf16.msrb.mxu1 %v6249_v42  ;;  %v6113_v51 = vor.u32 %v7022_v26, %v6110_v27  ;;  %v6558_v42 = vld [vmem:[%s10895_s8 + $0x444] sm:$0xf0]  ;;  %v7110_v27 = vld [vmem:[%s10895_s8 + $0x368] sm:$0xf0] }
 0x2ba   : > { %3976 = vmatpush.bf16.msra.mxu3 %v6701_v40  ;;  %v6561_v54 = vor.u32 %v7134_v46, %v6558_v42 }
 0x2bc   : > { %3842 = vmatpush.bf16.msrb.mxu0 %v6053_v35  ;;  %3952 = vmatpush.bf16.msra.mxu2 %v6617_v44  ;;  %v7141_v35 = vld [vmem:[%s10895_s8 + $0x464] sm:$0xf] }
 0x2bd   : > { %3931 = vmatpush.bf16.msra.mxu1 %v6449_v0  ;;  %v6589_v38 = vor.u32 %v7141_v35, %v6586_v41  ;;  %v6057_v0 = vor.u32 %v7008_v22, %v6054_v57  ;;  %v6200_v41 = vld [vmem:[%s10895_s8 + $0x158] sm:$0xf]  ;;  %v6676_v57 = vld [vmem:[%s10895_s8 + $0x510] sm:$0xf] }
 0x2c0   : > { %3843 = vmatpush.bf16.msrb.mxu0 %v6025_v25  ;;  %3953 = vmatpush.bf16.msra.mxu2 %v6589_v38  ;;  %v6309_v25 = vor.u32 %v7071_v48, %v6306_v56  ;;  %v7047_v38 = vld [vmem:[%s10895_s8 + $0x170] sm:$0xf0] }
 0x2c1   : > { %3932 = vmatpush.bf16.msra.mxu1 %v6421_v5  ;;  %v6026_v5 = vld [vmem:[%s10895_s8 + $0x1c] sm:$0xf0]  ;;  %v6201_v39 = vor.u32 %v7047_v38, %v6200_v41  ;;  %v7103_v48 = vld [vmem:[%s10895_s8 + $0x330] sm:$0xf0]  ;;  %v7145_v41 = vld [vmem:[%s10895_s8 + $0x480] sm:$0xf0] }
 0x2c2   : > { %v6425_v42 = vor.u32 %v7103_v48, %v6424_v47  ;;  %v6088_v48 = vld [vmem:[%s10895_s8 + $0x78] sm:$0xf] }
 0x2c4   : > { %3912 = vmatpush.bf16.msra.mxu0 %v6225_v62  ;;  %3954 = vmatpush.bf16.msra.mxu2 %v6561_v54 }
 0x2c5   : > { %3933 = vmatpush.bf16.msra.mxu1 %v6393_v17  ;;  %v6029_v17 = vor.u32 %v7001_v1, %v6026_v5 }
 0x2c8   : > { %3913 = vmatpush.bf16.msra.mxu0 %v6197_v4  ;;  %v6533_v4 = vor.u32 %v7127_v36, %v6530_v37 }
 0x2c9   : > { %3934 = vmatpush.bf16.msra.mxu1 %v6365_v45  ;;  %v7054_v45 = vld [vmem:[%s10895_s8 + $0x1a8] sm:$0xf0] }
 0x2ca   : > { %3955 = vmatpush.bf16.msra.mxu2 %v6533_v4  ;;  %v7096_v4 = vld [vmem:[%s10895_s8 + $0x2f8] sm:$0xf0] }
 0x2cc   : > { %3914 = vmatpush.bf16.msra.mxu0 %v6169_v10  ;;  %v9400_v10 = vperm.slane %v2557_v30, 2 }
 0x2cd   : > { %3935 = vmatpush.bf16.msra.mxu1 %v6337_v34  ;;  %v6453_v34 = vor.u32 %v7110_v27, %v6452_v12 }
 0x2ce   : > { %3956 = vmatpush.bf16.msra.mxu2 %v6505_v23 }
 0x2d0   : > { %3915 = vmatpush.bf16.msra.mxu0 %v6141_v49  ;;  %v6228_v49 = vld [vmem:[%s10895_s8 + $0x190] sm:$0xf] }
 0x2d1   : > { %3936 = vmatpush.bf16.msra.mxu1 %v6309_v25  ;;  %v6229_v26 = vor.u32 %v7054_v45, %v6228_v49 }
 0x2d4   : > { %3916 = vmatpush.bf16.msra.mxu0 %v6113_v51  ;;  %v6474_v51 = vld [vmem:[%s10895_s8 + $0x39c] sm:$0xf0] }
 0x2d5   : > { %3937 = vmatpush.bf16.msra.mxu1 %v6281_v3  ;;  %v6477_v35 = vor.u32 %v7113_v50, %v6474_v51  ;;  %v6396_v3 = vld [vmem:[%s10895_s8 + $0x2e0] sm:$0xf]  ;;  %v6116_v50 = vld [vmem:[%s10895_s8 + $0xb0] sm:$0xf]  ;;  %v7026_v51 = vld [vmem:[%s10895_s8 + $0xc8] sm:$0xf0] }
 0x2d7   : > { %3957 = vmatpush.bf16.msra.mxu2 %v6477_v35  ;;  %v6592_v35 = vld [vmem:[%s10895_s8 + $0x468] sm:$0xf] }
 0x2d8   : > { %3917 = vmatpush.bf16.msra.mxu0 %v6085_v16 }
 0x2d9   : > { %3938 = vmatpush.bf16.msra.mxu1 %v6253_v19 }
 0x2dc   : > { %3918 = vmatpush.bf16.msra.mxu0 %v6057_v0 }
 0x2e0   : > { %3919 = vmatpush.bf16.msra.mxu0 %v6029_v17 }
 0x323   : > { %v2623_v32 = vpop.f32.mrf.mxu0  ;;  %v2642_v33 = vpop.f32.mrf.mxu1 }
 0x324   : > { %v2624_v31 = vadd.f32 %v2623_v32, %v9347_v18  ;;  %v2643_v52 = vadd.f32 %v2642_v33, %v9349_v2 }
 0x326   : > { %v2690_v11 = vmax.f32 %v2624_v31, 0.0  ;;  %v2691_v20 = vmax.f32 %v2643_v52, 0.0  ;;  %v6677_v31 = vor.u32 %v7166_v60, %v6676_v57  ;;  %v6704_v52 = vld [vmem:[%s10895_s8 + $0x548] sm:$0xf] }
 0x32a   : > { %v2661_v62 = vpop.f32.mrf.mxu2  ;;  %v2680_v63 = vpop.f32.mrf.mxu3 }
 0x32b   : > { %v2625_v53 = vpop.f32.mrf.mxu0  ;;  %v2644_v61 = vpop.f32.mrf.mxu1  ;;  %v2662_v55 = vadd.f32 %v2661_v62, %v9400_v10  ;;  %v2681_v43 = vadd.f32 %v2680_v63, %v9402_v13  ;;  %v7173_v62 = vld [vmem:[%s10895_s8 + $0x560] sm:$0xf0]  ;;  %v6172_v63 = vld [vmem:[%s10895_s8 + $0x120] sm:$0xf] }
 0x32c   : > { %v2626_v7 = vadd.f32 %v2625_v53, %v9347_v18  ;;  %v2645_v8 = vadd.f32 %v2644_v61, %v9349_v2  ;;  %v6705_v53 = vor.u32 %v7173_v62, %v6704_v52  ;;  %v7040_v61 = vld [vmem:[%s10895_s8 + $0x138] sm:$0xf0] }
 0x32d   : > { %v2692_v16 = vmax.f32 %v2662_v55, 0.0  ;;  %v2693_v56 = vmax.f32 %v2681_v43, 0.0  ;;  %v6173_v6 = vor.u32 %v7040_v61, %v6172_v63  ;;  %v6564_v63 = vld [vmem:[%s10895_s8 + $0x430] sm:$0xf] }
 0x32e   : > { %v2694_v15 = vmax.f32 %v2626_v7, 0.0  ;;  %v2695_v21 = vmax.f32 %v2645_v8, 0.0  ;;  %v6397_v7 = vor.u32 %v7096_v4, %v6396_v3  ;;  %v6648_v8 = vld [vmem:[%s10895_s8 + $0x4d8] sm:$0xf]  ;;  %v7068_v3 = vld [vmem:[%s10895_s8 + $0x218] sm:$0xf0] }
 0x32f   : > { %v6649_v19 = vor.u32 %v7159_v9, %v6648_v8  ;;  %v6536_v4 = vld [vmem:[%s10895_s8 + $0x3f8] sm:$0xf]  ;;  %v7005_v8 = vld [vmem:[%s10895_s8 + $0x20] sm:$0xf0]  ;;  %v6256_v9 = vld [vmem:[%s10895_s8 + $0x1c8] sm:$0xf] }
 0x330   : > { %v9404_v40 = vpack.c.bf16 %v2694_v15, %v2690_v11  ;;  %v9406_v14 = vpack.c.bf16 %v2695_v21, %v2691_v20  ;;  %v7033_v11 = vld [vmem:[%s10895_s8 + $0x100] sm:$0xf0]  ;;  %v6368_v20 = vld [vmem:[%s10895_s8 + $0x2a8] sm:$0xf] }
 0x331   : > { %v7089_v15 = vld [vmem:[%s10895_s8 + $0x2c0] sm:$0xf0]  ;;  %v6145_v21 = vor.u32 %v7033_v11, %v6144_v29 }
 0x332   : > { %v2663_v24 = vpop.f32.mrf.mxu2  ;;  %v2682_v44 = vpop.f32.mrf.mxu3  ;;  %3844 = vmatmul.bf16.vlgmr.msrb.gmra.mxu0 %v9404_v40  ;;  %3863 = vmatmul.bf16.vlgmr.msrb.gmra.mxu1 %v9406_v14  ;;  %v6369_v45 = vor.u32 %v7089_v15, %v6368_v20  ;;  %v7061_v29 = vld [vmem:[%s10895_s8 + $0x1e0] sm:$0xf0]  ;;  %v7051_v15 = vld [vmem:[%s10895_s8 + $0x194] sm:$0xf] }
 0x333   : > { %v2664_v28 = vadd.f32 %v2663_v24, %v9400_v10  ;;  %v2683_v30 = vadd.f32 %v2682_v44, %v9402_v13  ;;  %v2628_v32 = vpop.f32.mrf.mxu0  ;;  %v2647_v33 = vpop.f32.mrf.mxu1  ;;  %3988 = vmatpush.bf16.msrb.mxu0 %v6229_v26  ;;  %4007 = vmatpush.bf16.msrb.mxu1 %v6453_v34  ;;  %v7082_v34 = vld [vmem:[%s10895_s8 + $0x288] sm:$0xf0]  ;;  %v6257_v11 = vor.u32 %v7061_v29, %v6256_v9  ;;  %v6090_v9 = vld [vmem:[%s10895_s8 + $0x94] sm:$0xf0]  ;;  %v7072_v29 = vld [vmem:[%s10895_s8 + $0x23c] sm:$0xf] }
 0x334   : > { %v2629_v0 = vadd.f32 %v2628_v32, %v9347_v18  ;;  %v2648_v58 = vadd.f32 %v2647_v33, %v9349_v2  ;;  %v6117_v33 = vor.u32 %v7026_v51, %v6116_v50  ;;  %v6426_v51 = vld [vmem:[%s10895_s8 + $0x334] sm:$0xf0] }
 0x335   : > { %v2696_v25 = vmax.f32 %v2664_v28, 0.0  ;;  %v2697_v46 = vmax.f32 %v2683_v30, 0.0  ;;  %v6340_v28 = vld [vmem:[%s10895_s8 + $0x270] sm:$0xf] }
 0x336   : > { %v2698_v23 = vmax.f32 %v2629_v0, 0.0  ;;  %v2699_v55 = vmax.f32 %v2648_v58, 0.0  ;;  %v7138_v0 = vld [vmem:[%s10895_s8 + $0x448] sm:$0xf0] }
 0x337   : > { %v9444_v54 = vpack.c.bf16 %v2696_v25, %v2692_v16  ;;  %v9446_v22 = vpack.c.bf16 %v2697_v46, %v2693_v56  ;;  %3989 = vmatpush.bf16.msrb.mxu0 %v6201_v39  ;;  %4008 = vmatpush.bf16.msrb.mxu1 %v6425_v42  ;;  %v6341_v39 = vor.u32 %v7082_v34, %v6340_v28  ;;  %v7019_v16 = vld [vmem:[%s10895_s8 + $0x90] sm:$0xf0]  ;;  %v6312_v25 = vld [vmem:[%s10895_s8 + $0x238] sm:$0xf]  ;;  %v7170_v34 = vld [vmem:[%s10895_s8 + $0x54c] sm:$0xf] }
 0x338   : > { %v6593_v56 = vor.u32 %v7145_v41, %v6592_v35  ;;  %v6089_v60 = vor.u32 %v7019_v16, %v6088_v48  ;;  %v6565_v58 = vor.u32 %v7138_v0, %v6564_v63  ;;  %v6706_v35 = vld [vmem:[%s10895_s8 + $0x564] sm:$0xf0]  ;;  %v7037_v41 = vld [vmem:[%s10895_s8 + $0x124] sm:$0xf]  ;;  %v6398_v48 = vld [vmem:[%s10895_s8 + $0x2fc] sm:$0xf0] }
 0x339   : > { %3882 = vmatmul.bf16.vlgmr.msrb.gmra.mxu2 %v9444_v54  ;;  %6722 = vmatmul.msk.bf16.vlgmr.msrb.gmra.mxu3 %vm1654_vm0, %v9446_v22  ;;  %v7149_v63 = vld [vmem:[%s10895_s8 + $0x4a4] sm:$0xf]  ;;  %v6622_v0 = vld [vmem:[%s10895_s8 + $0x4bc] sm:$0xf0] }
 0x33a   : > { %v2666_v36 = vpop.f32.mrf.mxu2  ;;  %v2685_v37 = vpop.f32.mrf.mxu3  ;;  %4026 = vmatpush.bf16.msrb.mxu2 %v6677_v31  ;;  %4052 = vmatpush.bf16.msrb.mxu3 %v6705_v53  ;;  %v6284_v53 = vld [vmem:[%s10895_s8 + $0x200] sm:$0xf] }
 0x33b   : > { %v2630_v1 = vpop.f32.mrf.mxu0  ;;  %v2649_v5 = vpop.f32.mrf.mxu1  ;;  %3990 = vmatpush.bf16.msrb.mxu0 %v6173_v6  ;;  %4009 = vmatpush.bf16.msrb.mxu1 %v6397_v7  ;;  %v2667_v26 = vadd.f32 %v2666_v36, %v9400_v10  ;;  %v2686_v27 = vadd.f32 %v2685_v37, %v9402_v13  ;;  %v6060_v36 = vld [vmem:[%s10895_s8 + $0x40] sm:$0xf]  ;;  %v7012_v37 = vld [vmem:[%s10895_s8 + $0x58] sm:$0xf0]  ;;  %v6032_v7 = vld [vmem:[%s10895_s8 + $0x8] sm:$0xf] }
 0x33c   : > { %v2631_v59 = vadd.f32 %v2630_v1, %v9347_v18  ;;  %v2650_v17 = vadd.f32 %v2649_v5, %v9349_v2  ;;  %v6620_v18 = vld [vmem:[%s10895_s8 + $0x4a0] sm:$0xf]  ;;  %v7152_v2 = vld [vmem:[%s10895_s8 + $0x4b8] sm:$0xf0]  ;;  %v6061_v61 = vor.u32 %v7012_v37, %v6060_v36  ;;  %v7131_v1 = vld [vmem:[%s10895_s8 + $0x410] sm:$0xf0]  ;;  %v6285_v5 = vor.u32 %v7068_v3, %v6284_v53 }
 0x33d   : > { %v6621_v12 = vor.u32 %v7152_v2, %v6620_v18  ;;  %v2701_v46 = vmax.f32 %v2686_v27, 0.0  ;;  %v6537_v6 = vor.u32 %v7131_v1, %v6536_v4  ;;  %v7107_v18 = vld [vmem:[%s10895_s8 + $0x354] sm:$0xf]  ;;  %v6625_v36 = vor.u32 %v7149_v63, %v6622_v0  ;;  %v6118_v53 = vld [vmem:[%s10895_s8 + $0xcc] sm:$0xf0] }
 0x33e   : > { %v2702_v43 = vmax.f32 %v2631_v59, 0.0  ;;  %v2703_v49 = vmax.f32 %v2650_v17, 0.0  ;;  %4027 = vmatpush.bf16.msrb.mxu2 %v6649_v19  ;;  %v6508_v59 = vld [vmem:[%s10895_s8 + $0x3c0] sm:$0xf]  ;;  %v7124_v17 = vld [vmem:[%s10895_s8 + $0x3d8] sm:$0xf0]  ;;  %v6033_v19 = vor.u32 %v7005_v8, %v6032_v7 }
 0x33f   : > { %3991 = vmatpush.bf16.msrb.mxu0 %v6145_v21  ;;  %4010 = vmatpush.bf16.msrb.mxu1 %v6369_v45  ;;  %v6509_v20 = vor.u32 %v7124_v17, %v6508_v59  ;;  %v6230_v21 = vld [vmem:[%s10895_s8 + $0x1ac] sm:$0xf0]  ;;  %v7044_v45 = vld [vmem:[%s10895_s8 + $0x15c] sm:$0xf]  ;;  %v7023_v37 = vld [vmem:[%s10895_s8 + $0xb4] sm:$0xf] }
 0x340   : > { %v9503_v24 = vpack.c.bf16 %v2702_v43, %v2698_v23  ;;  %v9505_v44 = vpack.c.bf16 %v2703_v49, %v2699_v55  ;;  %v6233_v2 = vor.u32 %v7051_v15, %v6230_v21  ;;  %v6454_v23 = vld [vmem:[%s10895_s8 + $0x36c] sm:$0xf0]  ;;  %v6480_v55 = vld [vmem:[%s10895_s8 + $0x388] sm:$0xf]  ;;  %v7117_v43 = vld [vmem:[%s10895_s8 + $0x3a0] sm:$0xf0]  ;;  %v6121_v3 = vor.u32 %v7023_v37, %v6118_v53 }
 0x341   : > { %v6457_v49 = vor.u32 %v7107_v18, %v6454_v23  ;;  %v6481_v27 = vor.u32 %v7117_v43, %v6480_v55  ;;  %v6342_v4 = vld [vmem:[%s10895_s8 + $0x28c] sm:$0xf0]  ;;  %v7142_v1 = vld [vmem:[%s10895_s8 + $0x46c] sm:$0xf]  ;;  %v7016_v8 = vld [vmem:[%s10895_s8 + $0x7c] sm:$0xf] }
 0x342   : > { %v2668_v30 = vpop.f32.mrf.mxu2  ;;  %v2687_v32 = vpop.f32.mrf.mxu3  ;;  %3849 = vmatmul.bf16.gmra.mxu0 %v9503_v24  ;;  %3868 = vmatmul.bf16.gmra.mxu1 %v9505_v44  ;;  %v6314_v59 = vld [vmem:[%s10895_s8 + $0x254] sm:$0xf0]  ;;  %v6093_v17 = vor.u32 %v7016_v8, %v6090_v9  ;;  %v7009_v21 = vld [vmem:[%s10895_s8 + $0x44] sm:$0xf]  ;;  %v6062_v18 = vld [vmem:[%s10895_s8 + $0x5c] sm:$0xf0] }
 0x343   : > { %v2669_v38 = vadd.f32 %v2668_v30, %v9400_v10  ;;  %v2688_v47 = vadd.f32 %v2687_v32, %v9402_v13  ;;  %4028 = vmatpush.bf16.msrb.mxu2 %v6621_v12  ;;  %v7075_v10 = vld [vmem:[%s10895_s8 + $0x250] sm:$0xf0]  ;;  %v2700_v13 = vmax.f32 %v2667_v26, 0.0  ;;  %3992 = vmatpush.bf16.msrb.mxu0 %v6117_v33  ;;  %v6202_v12 = vld [vmem:[%s10895_s8 + $0x174] sm:$0xf0]  ;;  %v6065_v23 = vor.u32 %v7009_v21, %v6062_v18 }
 0x344   : > { %4011 = vmatpush.bf16.msrb.mxu1 %v6341_v39  ;;  %v6313_v62 = vor.u32 %v7075_v10, %v6312_v25  ;;  %v7100_v26 = vld [vmem:[%s10895_s8 + $0x31c] sm:$0xf]  ;;  %v6205_v50 = vor.u32 %v7044_v45, %v6202_v12  ;;  %v7163_v30 = vld [vmem:[%s10895_s8 + $0x514] sm:$0xf]  ;;  %v6678_v32 = vld [vmem:[%s10895_s8 + $0x52c] sm:$0xf0] }
 0x345   : > { %v2704_v42 = vmax.f32 %v2669_v38, 0.0  ;;  %v2705_v57 = vmax.f32 %v2688_v47, 0.0  ;;  %v6429_v28 = vor.u32 %v7100_v26, %v6426_v51  ;;  %v6681_v33 = vor.u32 %v7163_v30, %v6678_v32  ;;  %v6174_v47 = vld [vmem:[%s10895_s8 + $0x13c] sm:$0xf0]  ;;  %v7093_v39 = vld [vmem:[%s10895_s8 + $0x2e4] sm:$0xf] }
 0x346   : > { %v6709_v38 = vor.u32 %v7170_v34, %v6706_v35  ;;  %v6177_v16 = vor.u32 %v7037_v41, %v6174_v47  ;;  %v7156_v25 = vld [vmem:[%s10895_s8 + $0x4dc] sm:$0xf]  ;;  %v6650_v10 = vld [vmem:[%s10895_s8 + $0x4f4] sm:$0xf0]  ;;  %v6286_v55 = vld [vmem:[%s10895_s8 + $0x21c] sm:$0xf0] }
 0x347   : > { %v9543_v31 = vpack.c.bf16 %v2704_v42, %v2700_v13  ;;  %v9545_v52 = vpack.c.bf16 %v2705_v57, %v2701_v46  ;;  %4029 = vmatpush.bf16.msrb.mxu2 %v6593_v56  ;;  %3993 = vmatpush.bf16.msrb.mxu0 %v6089_v60  ;;  %v6401_v56 = vor.u32 %v7093_v39, %v6398_v48  ;;  %v7030_v13 = vld [vmem:[%s10895_s8 + $0xec] sm:$0xf]  ;;  %v6146_v42 = vld [vmem:[%s10895_s8 + $0x104] sm:$0xf0]  ;;  %v7128_v43 = vld [vmem:[%s10895_s8 + $0x3fc] sm:$0xf] }
 0x348   : > { %4012 = vmatpush.bf16.msrb.mxu1 %v6313_v62  ;;  %v6653_v46 = vor.u32 %v7156_v25, %v6650_v10  ;;  %v7086_v57 = vld [vmem:[%s10895_s8 + $0x2ac] sm:$0xf]  ;;  %v6370_v60 = vld [vmem:[%s10895_s8 + $0x2c4] sm:$0xf0]  ;;  %v6149_v62 = vor.u32 %v7030_v13, %v6146_v42  ;;  %v6510_v30 = vld [vmem:[%s10895_s8 + $0x3dc] sm:$0xf0] }
 0x349   : > { %3887 = vmatmul.bf16.gmra.mxu2 %v9543_v31  ;;  %6723 = vmatmul.msk.bf16.gmra.mxu3 %vm1654_vm0, %v9545_v52  ;;  %v7002_v26 = vld [vmem:[%s10895_s8 + $0xc] sm:$0xf]  ;;  %v6258_v51 = vld [vmem:[%s10895_s8 + $0x1e4] sm:$0xf0]  ;;  %v6236_v35 = vld [vmem:[%s10895_s8 + $0x198] sm:$0xf] }
 0x34a   : > { %v7055_v41 = vld [vmem:[%s10895_s8 + $0x1b0] sm:$0xf0]  ;;  %v7114_v48 = vld [vmem:[%s10895_s8 + $0x38c] sm:$0xf]  ;;  %v6208_v25 = vld [vmem:[%s10895_s8 + $0x160] sm:$0xf] }
 0x34b   : > { %4030 = vmatpush.bf16.msrb.mxu2 %v6565_v58  ;;  %3994 = vmatpush.bf16.msrb.mxu0 %v6061_v61  ;;  %v6373_v58 = vor.u32 %v7086_v57, %v6370_v60  ;;  %v7079_v61 = vld [vmem:[%s10895_s8 + $0x274] sm:$0xf]  ;;  %v6237_v47 = vor.u32 %v7055_v41, %v6236_v35  ;;  %v7048_v10 = vld [vmem:[%s10895_s8 + $0x178] sm:$0xf0]  ;;  %v6432_v13 = vld [vmem:[%s10895_s8 + $0x320] sm:$0xf] }
 0x34c   : > { %4013 = vmatpush.bf16.msrb.mxu1 %v6285_v5  ;;  %v6594_v5 = vld [vmem:[%s10895_s8 + $0x484] sm:$0xf0]  ;;  %v7111_v39 = vld [vmem:[%s10895_s8 + $0x370] sm:$0xf0]  ;;  %v6209_v42 = vor.u32 %v7048_v10, %v6208_v25  ;;  %v7104_v57 = vld [vmem:[%s10895_s8 + $0x338] sm:$0xf0] }
 0x34d   : > { %v6597_v7 = vor.u32 %v7142_v1, %v6594_v5  ;;  %v6433_v60 = vor.u32 %v7104_v57, %v6432_v13  ;;  %v7167_v63 = vld [vmem:[%s10895_s8 + $0x530] sm:$0xf0]  ;;  %v6180_v37 = vld [vmem:[%s10895_s8 + $0x128] sm:$0xf]  ;;  %v6152_v8 = vld [vmem:[%s10895_s8 + $0xf0] sm:$0xf] }
 0x34e   : > { %v6124_v18 = vld [vmem:[%s10895_s8 + $0xb8] sm:$0xf]  ;;  %v6068_v41 = vld [vmem:[%s10895_s8 + $0x48] sm:$0xf]  ;;  %v6040_v13 = vld [vmem:[%s10895_s8 + $0x10] sm:$0xf] }
 0x34f   : > { %4031 = vmatpush.bf16.msrb.mxu2 %v6537_v6  ;;  %3995 = vmatpush.bf16.msrb.mxu0 %v6033_v19  ;;  %v6345_v6 = vor.u32 %v7079_v61, %v6342_v4  ;;  %v6317_v19 = vor.u32 %v7072_v29, %v6314_v59  ;;  %v7041_v61 = vld [vmem:[%s10895_s8 + $0x140] sm:$0xf0]  ;;  %v7034_v29 = vld [vmem:[%s10895_s8 + $0x108] sm:$0xf0]  ;;  %v6376_v59 = vld [vmem:[%s10895_s8 + $0x2b0] sm:$0xf] }
 0x350   : > { %4014 = vmatpush.bf16.msrb.mxu1 %v6257_v11  ;;  %v7135_v11 = vld [vmem:[%s10895_s8 + $0x434] sm:$0xf]  ;;  %v7097_v4 = vld [vmem:[%s10895_s8 + $0x300] sm:$0xf0]  ;;  %v6181_v1 = vor.u32 %v7041_v61, %v6180_v37  ;;  %v7062_v57 = vld [vmem:[%s10895_s8 + $0x1e8] sm:$0xf0] }
 0x351   : > { %v6238_v37 = vld [vmem:[%s10895_s8 + $0x1b4] sm:$0xf0] }
 0x352   : > { %3920 = vmatmul.bf16.vlgmr.msra.gmra.mxu0 %v9404_v40  ;;  %3939 = vmatmul.bf16.vlgmr.msra.gmra.mxu1 %v9406_v14 }
 0x353   : > { %4032 = vmatpush.bf16.msrb.mxu2 %v6509_v20  ;;  %4064 = vmatpush.bf16.msra.mxu0 %v6233_v2  ;;  %v6566_v20 = vld [vmem:[%s10895_s8 + $0x44c] sm:$0xf0]  ;;  %v7065_v2 = vld [vmem:[%s10895_s8 + $0x204] sm:$0xf] }
 0x354   : > { %4083 = vmatpush.bf16.msra.mxu1 %v6457_v49  ;;  %v6569_v15 = vor.u32 %v7135_v11, %v6566_v20  ;;  %v6538_v49 = vld [vmem:[%s10895_s8 + $0x414] sm:$0xf0]  ;;  %v6289_v45 = vor.u32 %v7065_v2, %v6286_v55  ;;  %v6628_v11 = vld [vmem:[%s10895_s8 + $0x4a8] sm:$0xf]  ;;  %v7153_v20 = vld [vmem:[%s10895_s8 + $0x4c0] sm:$0xf0] }
 0x355   : > { %v6541_v12 = vor.u32 %v7128_v43, %v6538_v49  ;;  %v6629_v21 = vor.u32 %v7153_v20, %v6628_v11  ;;  %v7027_v2 = vld [vmem:[%s10895_s8 + $0xd0] sm:$0xf0]  ;;  %v6600_v49 = vld [vmem:[%s10895_s8 + $0x470] sm:$0xf]  ;;  %v6686_v11 = vld [vmem:[%s10895_s8 + $0x534] sm:$0xf0] }
 0x356   : > { %v6125_v55 = vor.u32 %v7027_v2, %v6124_v18  ;;  %v7083_v43 = vld [vmem:[%s10895_s8 + $0x290] sm:$0xf0]  ;;  %v7094_v18 = vld [vmem:[%s10895_s8 + $0x2ec] sm:$0xf] }
 0x357   : > { %4033 = vmatpush.bf16.msrb.mxu2 %v6481_v27  ;;  %4065 = vmatpush.bf16.msra.mxu0 %v6205_v50  ;;  %v6034_v27 = vld [vmem:[%s10895_s8 + $0x24] sm:$0xf0]  ;;  %v7058_v50 = vld [vmem:[%s10895_s8 + $0x1cc] sm:$0xf]  ;;  %v7171_v2 = vld [vmem:[%s10895_s8 + $0x554] sm:$0xf] }
 0x358   : > { %4084 = vmatpush.bf16.msra.mxu1 %v6429_v28  ;;  %v7121_v28 = vld [vmem:[%s10895_s8 + $0x3c4] sm:$0xf]  ;;  %v6037_v32 = vor.u32 %v7002_v26, %v6034_v27  ;;  %v6096_v27 = vld [vmem:[%s10895_s8 + $0x80] sm:$0xf] }
 0x359   : > { %3958 = vmatmul.bf16.vlgmr.msra.gmra.mxu2 %v9444_v54  ;;  %6724 = vmatmul.msk.bf16.vlgmr.msra.gmra.mxu3 %vm1654_vm0, %v9446_v22  ;;  %v6513_v34 = vor.u32 %v7121_v28, %v6510_v30  ;;  %v7076_v28 = vld [vmem:[%s10895_s8 + $0x258] sm:$0xf0] }
 0x35a   : > { %4128 = vmatpush.bf16.msra.mxu3 %v6709_v38  ;;  %v6460_v38 = vld [vmem:[%s10895_s8 + $0x358] sm:$0xf] }
 0x35b   : > { %4102 = vmatpush.bf16.msra.mxu2 %v6681_v33  ;;  %4066 = vmatpush.bf16.msra.mxu0 %v6177_v16  ;;  %v6261_v33 = vor.u32 %v7058_v50, %v6258_v51  ;;  %v6482_v16 = vld [vmem:[%s10895_s8 + $0x3a4] sm:$0xf0]  ;;  %v7020_v50 = vld [vmem:[%s10895_s8 + $0x98] sm:$0xf0]  ;;  %v6320_v51 = vld [vmem:[%s10895_s8 + $0x240] sm:$0xf] }
 0x35c   : > { %4085 = vmatpush.bf16.msra.mxu1 %v6401_v56  ;;  %v6461_v56 = vor.u32 %v7111_v39, %v6460_v38  ;;  %v6097_v30 = vor.u32 %v7020_v50, %v6096_v27  ;;  %v7013_v38 = vld [vmem:[%s10895_s8 + $0x60] sm:$0xf0]  ;;  %v7031_v50 = vld [vmem:[%s10895_s8 + $0xf4] sm:$0xf] }
 0x35d   : > { %v6069_v39 = vor.u32 %v7013_v38, %v6068_v41  ;;  %v7024_v38 = vld [vmem:[%s10895_s8 + $0xbc] sm:$0xf] }
 0x35f   : > { %4103 = vmatpush.bf16.msra.mxu2 %v6653_v46  ;;  %4067 = vmatpush.bf16.msra.mxu0 %v6149_v62  ;;  %v6485_v46 = vor.u32 %v7114_v48, %v6482_v16  ;;  %v6684_v62 = vld [vmem:[%s10895_s8 + $0x518] sm:$0xf]  ;;  %v7069_v48 = vld [vmem:[%s10895_s8 + $0x220] sm:$0xf0]  ;;  %v6544_v16 = vld [vmem:[%s10895_s8 + $0x400] sm:$0xf] }
 0x360   : > { %4086 = vmatpush.bf16.msra.mxu1 %v6373_v58  ;;  %v6685_v0 = vor.u32 %v7167_v63, %v6684_v62  ;;  %v6712_v58 = vld [vmem:[%s10895_s8 + $0x550] sm:$0xf]  ;;  %v6516_v63 = vld [vmem:[%s10895_s8 + $0x3c8] sm:$0xf] }
 0x362   : > { %3925 = vmatmul.bf16.gmra.mxu0 %v9503_v24  ;;  %3944 = vmatmul.bf16.gmra.mxu1 %v9505_v44 }
 0x363   : > { %4104 = vmatpush.bf16.msra.mxu2 %v6625_v36  ;;  %4068 = vmatpush.bf16.msra.mxu0 %v6121_v3  ;;  %v7174_v36 = vld [vmem:[%s10895_s8 + $0x568] sm:$0xf0]  ;;  %v6404_v3 = vld [vmem:[%s10895_s8 + $0x2e8] sm:$0xf] }
 0x364   : > { %4087 = vmatpush.bf16.msra.mxu1 %v6345_v6  ;;  %v6713_v53 = vor.u32 %v7174_v36, %v6712_v58  ;;  %v6405_v5 = vor.u32 %v7097_v4, %v6404_v3  ;;  %v6656_v6 = vld [vmem:[%s10895_s8 + $0x4e0] sm:$0xf]  ;;  %v7052_v36 = vld [vmem:[%s10895_s8 + $0x19c] sm:$0xf]  ;;  %v6462_v3 = vld [vmem:[%s10895_s8 + $0x374] sm:$0xf0] }
 0x365   : > { %v6241_v61 = vor.u32 %v7052_v36, %v6238_v37  ;;  %v6488_v4 = vld [vmem:[%s10895_s8 + $0x390] sm:$0xf]  ;;  %v7010_v37 = vld [vmem:[%s10895_s8 + $0x4c] sm:$0xf] }
 0x367   : > { %4105 = vmatpush.bf16.msra.mxu2 %v6597_v7  ;;  %4069 = vmatpush.bf16.msra.mxu0 %v6093_v17  ;;  %v7160_v7 = vld [vmem:[%s10895_s8 + $0x4f8] sm:$0xf0]  ;;  %v7090_v17 = vld [vmem:[%s10895_s8 + $0x2c8] sm:$0xf0] }
 0x368   : > { %4088 = vmatpush.bf16.msra.mxu1 %v6317_v19  ;;  %v6657_v9 = vor.u32 %v7160_v7, %v6656_v6  ;;  %v6153_v19 = vor.u32 %v7034_v29, %v6152_v8  ;;  %v7045_v7 = vld [vmem:[%s10895_s8 + $0x164] sm:$0xf]  ;;  %v6210_v8 = vld [vmem:[%s10895_s8 + $0x17c] sm:$0xf0] }
 0x369   : > { %3963 = vmatmul.bf16.gmra.mxu2 %v9543_v31  ;;  %6725 = vmatmul.msk.bf16.gmra.mxu3 %vm1654_vm0, %v9545_v52  ;;  %v6213_v29 = vor.u32 %v7045_v7, %v6210_v8  ;;  %v7003_v8 = vld [vmem:[%s10895_s8 + $0x14] sm:$0xf] }
 0x36b   : > { %4106 = vmatpush.bf16.msra.mxu2 %v6569_v15  ;;  %4070 = vmatpush.bf16.msra.mxu0 %v6065_v23  ;;  %v6377_v15 = vor.u32 %v7090_v17, %v6376_v59  ;;  %v6348_v23 = vld [vmem:[%s10895_s8 + $0x278] sm:$0xf]  ;;  %v6434_v59 = vld [vmem:[%s10895_s8 + $0x33c] sm:$0xf0] }
 0x36c   : > { %4089 = vmatpush.bf16.msra.mxu1 %v6289_v45  ;;  %v7146_v45 = vld [vmem:[%s10895_s8 + $0x488] sm:$0xf0] }
 0x36d   : > { %v6601_v26 = vor.u32 %v7146_v45, %v6600_v49 }
 0x36f   : > { %4107 = vmatpush.bf16.msra.mxu2 %v6541_v12  ;;  %4071 = vmatpush.bf16.msra.mxu0 %v6037_v32  ;;  %v6349_v12 = vor.u32 %v7083_v43, %v6348_v23  ;;  %v6321_v32 = vor.u32 %v7076_v28, %v6320_v51  ;;  %v6714_v23 = vld [vmem:[%s10895_s8 + $0x56c] sm:$0xf0]  ;;  %v6406_v43 = vld [vmem:[%s10895_s8 + $0x304] sm:$0xf0]  ;;  %v7087_v28 = vld [vmem:[%s10895_s8 + $0x2b4] sm:$0xf] }
 0x370   : > { %4090 = vmatpush.bf16.msra.mxu1 %v6261_v33  ;;  %v6572_v33 = vld [vmem:[%s10895_s8 + $0x438] sm:$0xf]  ;;  %v6717_v49 = vor.u32 %v7171_v2, %v6714_v23  ;;  %v6409_v45 = vor.u32 %v7094_v18, %v6406_v43  ;;  %v6154_v51 = vld [vmem:[%s10895_s8 + $0x10c] sm:$0xf0]  ;;  %v6244_v2 = vld [vmem:[%s10895_s8 + $0x1a0] sm:$0xf] }
 0x371   : > { %v7056_v23 = vld [vmem:[%s10895_s8 + $0x1b8] sm:$0xf0] }
 0x372   : > { %3996 = vmatmul.bf16.vlgmr.msrb.gmra.mxu0 %v9404_v40  ;;  %4015 = vmatmul.bf16.vlgmr.msrb.gmra.mxu1 %v9406_v14  ;;  %v6245_v43 = vor.u32 %v7056_v23, %v6244_v2  ;;  %v7147_v2 = vld [vmem:[%s10895_s8 + $0x490] sm:$0xf0] }
 0x373   : > { %4108 = vmatpush.bf16.msra.mxu2 %v6513_v34  ;;  %4140 = vmatpush.bf16.msrb.mxu0 %v6237_v47  ;;  %v7139_v34 = vld [vmem:[%s10895_s8 + $0x450] sm:$0xf0]  ;;  %v6292_v47 = vld [vmem:[%s10895_s8 + $0x208] sm:$0xf] }
 0x374   : > { %4159 = vmatpush.bf16.msrb.mxu1 %v6461_v56  ;;  %v6573_v35 = vor.u32 %v7139_v34, %v6572_v33  ;;  %v7132_v56 = vld [vmem:[%s10895_s8 + $0x418] sm:$0xf0]  ;;  %v6293_v25 = vor.u32 %v7069_v48, %v6292_v47  ;;  %v7150_v34 = vld [vmem:[%s10895_s8 + $0x4ac] sm:$0xf]  ;;  %v6126_v47 = vld [vmem:[%s10895_s8 + $0xd4] sm:$0xf0] }
 0x375   : > { %v6545_v10 = vor.u32 %v7132_v56, %v6544_v16  ;;  %v6129_v48 = vor.u32 %v7024_v38, %v6126_v47  ;;  %v6350_v16 = vld [vmem:[%s10895_s8 + $0x294] sm:$0xf0]  ;;  %v7168_v38 = vld [vmem:[%s10895_s8 + $0x538] sm:$0xf0]  ;;  %v10121_v47 = vld [vmem:[%s10896_s9] sm:$0x7f] }
 0x377   : > { %4109 = vmatpush.bf16.msra.mxu2 %v6485_v46  ;;  %4141 = vmatpush.bf16.msrb.mxu0 %v6209_v42  ;;  %v7006_v46 = vld [vmem:[%s10895_s8 + $0x28] sm:$0xf0]  ;;  %v6264_v42 = vld [vmem:[%s10895_s8 + $0x1d0] sm:$0xf] }
 0x378   : > { %4160 = vmatpush.bf16.msrb.mxu1 %v6433_v60  ;;  %v6041_v60 = vor.u32 %v7006_v46, %v6040_v13  ;;  %v6265_v62 = vor.u32 %v7062_v57, %v6264_v42  ;;  %v7017_v46 = vld [vmem:[%s10895_s8 + $0x84] sm:$0xf]  ;;  %v6098_v42 = vld [vmem:[%s10895_s8 + $0x9c] sm:$0xf0] }
 0x379   : > { %4034 = vmatmul.bf16.vlgmr.msrb.gmra.mxu2 %v9444_v54  ;;  %6726 = vmatmul.msk.bf16.vlgmr.msrb.gmra.mxu3 %vm1654_vm0, %v9446_v22  ;;  %v7073_v57 = vld [vmem:[%s10895_s8 + $0x244] sm:$0xf] }
 0x37a   : > { %4204 = vmatpush.bf16.msrb.mxu3 %v6713_v53  ;;  %v7108_v53 = vld [vmem:[%s10895_s8 + $0x35c] sm:$0xf] }
 0x37b   : > { %4178 = vmatpush.bf16.msrb.mxu2 %v6685_v0  ;;  %4142 = vmatpush.bf16.msrb.mxu0 %v6181_v1  ;;  %v7125_v0 = vld [vmem:[%s10895_s8 + $0x3e0] sm:$0xf0]  ;;  %v7118_v1 = vld [vmem:[%s10895_s8 + $0x3a8] sm:$0xf0] }
 0x37c   : > { %4161 = vmatpush.bf16.msrb.mxu1 %v6405_v5  ;;  %v6517_v58 = vor.u32 %v7125_v0, %v6516_v63  ;;  %v6465_v5 = vor.u32 %v7108_v53, %v6462_v3  ;;  %v6489_v6 = vor.u32 %v7118_v1, %v6488_v4  ;;  %v7136_v0 = vld [vmem:[%s10895_s8 + $0x43c] sm:$0xf]  ;;  %v6070_v53 = vld [vmem:[%s10895_s8 + $0x64] sm:$0xf0] }
 0x37d   : > { %v6073_v3 = vor.u32 %v7010_v37, %v6070_v53  ;;  %v6294_v4 = vld [vmem:[%s10895_s8 + $0x224] sm:$0xf0] }
 0x37f   : > { %4179 = vmatpush.bf16.msrb.mxu2 %v6657_v9  ;;  %4143 = vmatpush.bf16.msrb.mxu0 %v6153_v19  ;;  %v7101_v9 = vld [vmem:[%s10895_s8 + $0x324] sm:$0xf]  ;;  %v7164_v19 = vld [vmem:[%s10895_s8 + $0x51c] sm:$0xf] }
 0x380   : > { %4162 = vmatpush.bf16.msrb.mxu1 %v6377_v15  ;;  %v6437_v17 = vor.u32 %v7101_v9, %v6434_v59  ;;  %v6689_v20 = vor.u32 %v7164_v19, %v6686_v11  ;;  %v7038_v15 = vld [vmem:[%s10895_s8 + $0x12c] sm:$0xf]  ;;  %v6042_v9 = vld [vmem:[%s10895_s8 + $0x2c] sm:$0xf0] }
 0x381   : > { %v6045_v19 = vor.u32 %v7003_v8, %v6042_v9  ;;  %v6266_v11 = vld [vmem:[%s10895_s8 + $0x1ec] sm:$0xf0]  ;;  %v6132_v8 = vld [vmem:[%s10895_s8 + $0xc0] sm:$0xf]  ;;  %v7028_v9 = vld [vmem:[%s10895_s8 + $0xd8] sm:$0xf0] }
 0x382   : > { %4001 = vmatmul.bf16.gmra.mxu0 %v9503_v24  ;;  %4020 = vmatmul.bf16.gmra.mxu1 %v9505_v44 }
 0x383   : > { %4180 = vmatpush.bf16.msrb.mxu2 %v6629_v21  ;;  %4144 = vmatpush.bf16.msrb.mxu0 %v6125_v55  ;;  %v6182_v21 = vld [vmem:[%s10895_s8 + $0x144] sm:$0xf0] }
 0x384   : > { %4163 = vmatpush.bf16.msrb.mxu1 %v6349_v12  ;;  %v6185_v55 = vor.u32 %v7038_v15, %v6182_v21  ;;  %v7157_v12 = vld [vmem:[%s10895_s8 + $0x4e4] sm:$0xf]  ;;  %v7122_v15 = vld [vmem:[%s10895_s8 + $0x3cc] sm:$0xf]  ;;  %v6518_v21 = vld [vmem:[%s10895_s8 + $0x3e4] sm:$0xf0] }
 0x385   : > { %v6521_v18 = vor.u32 %v7122_v15, %v6518_v21 }
 0x387   : > { %4181 = vmatpush.bf16.msrb.mxu2 %v6601_v26  ;;  %4145 = vmatpush.bf16.msrb.mxu0 %v6097_v30  ;;  %v6658_v26 = vld [vmem:[%s10895_s8 + $0x4fc] sm:$0xf0]  ;;  %v6157_v30 = vor.u32 %v7031_v50, %v6154_v51  ;;  %v6216_v50 = vld [vmem:[%s10895_s8 + $0x168] sm:$0xf]  ;;  %v7049_v51 = vld [vmem:[%s10895_s8 + $0x180] sm:$0xf0] }
 0x388   : > { %4164 = vmatpush.bf16.msrb.mxu1 %v6321_v32  ;;  %v6661_v27 = vor.u32 %v7157_v12, %v6658_v26  ;;  %v6378_v32 = vld [vmem:[%s10895_s8 + $0x2cc] sm:$0xf0]  ;;  %v7115_v12 = vld [vmem:[%s10895_s8 + $0x394] sm:$0xf] }
 0x389   : > { %4039 = vmatmul.bf16.gmra.mxu2 %v9543_v31  ;;  %6727 = vmatmul.msk.bf16.gmra.mxu3 %vm1654_vm0, %v9545_v52  ;;  %v6381_v33 = vor.u32 %v7087_v28, %v6378_v32  ;;  %v6490_v26 = vld [vmem:[%s10895_s8 + $0x3ac] sm:$0xf0]  ;;  %v6440_v28 = vld [vmem:[%s10895_s8 + $0x328] sm:$0xf] }
 0x38b   : > { %4182 = vmatpush.bf16.msrb.mxu2 %v6573_v35  ;;  %4146 = vmatpush.bf16.msrb.mxu0 %v6069_v39  ;;  %v6630_v35 = vld [vmem:[%s10895_s8 + $0x4c4] sm:$0xf0]  ;;  %v7080_v39 = vld [vmem:[%s10895_s8 + $0x27c] sm:$0xf] }
 0x38c   : > { %4165 = vmatpush.bf16.msrb.mxu1 %v6293_v25  ;;  %v6633_v41 = vor.u32 %v7150_v34, %v6630_v35  ;;  %v6353_v56 = vor.u32 %v7080_v39, %v6350_v16  ;;  %v7143_v25 = vld [vmem:[%s10895_s8 + $0x474] sm:$0xf]  ;;  %v7105_v34 = vld [vmem:[%s10895_s8 + $0x340] sm:$0xf0]  ;;  %v7042_v16 = vld [vmem:[%s10895_s8 + $0x148] sm:$0xf0] }
 0x38d   : > { %v6441_v35 = vor.u32 %v7105_v34, %v6440_v28  ;;  %v6580_v28 = vld [vmem:[%s10895_s8 + $0x440] sm:$0xf] }
 0x38f   : > { %4183 = vmatpush.bf16.msrb.mxu2 %v6545_v10  ;;  %4147 = vmatpush.bf16.msrb.mxu0 %v6041_v60  ;;  %v6602_v10 = vld [vmem:[%s10895_s8 + $0x48c] sm:$0xf0]  ;;  %v6101_v60 = vor.u32 %v7017_v46, %v6098_v42 }
 0x390   : > { %4166 = vmatpush.bf16.msrb.mxu1 %v6265_v62  ;;  %v6605_v13 = vor.u32 %v7143_v25, %v6602_v10  ;;  %v6322_v62 = vld [vmem:[%s10895_s8 + $0x25c] sm:$0xf0]  ;;  %v7098_v10 = vld [vmem:[%s10895_s8 + $0x308] sm:$0xf0] }
 0x391   : > { %v6325_v63 = vor.u32 %v7073_v57, %v6322_v62  ;;  %v7161_v62 = vld [vmem:[%s10895_s8 + $0x500] sm:$0xf0] }
 0x392   : > { %4072 = vmatmul.bf16.vlgmr.msra.gmra.mxu0 %v9404_v40  ;;  %4091 = vmatmul.bf16.vlgmr.msra.gmra.mxu1 %v9406_v14 }
 0x393   : > { %4184 = vmatpush.bf16.msrb.mxu2 %v6517_v58  ;;  %4216 = vmatpush.bf16.msra.mxu0 %v6241_v61  ;;  %v6574_v58 = vld [vmem:[%s10895_s8 + $0x454] sm:$0xf0]  ;;  %v7066_v61 = vld [vmem:[%s10895_s8 + $0x20c] sm:$0xf] }
 0x394   : > { %4235 = vmatpush.bf16.msra.mxu1 %v6465_v5  ;;  %v6577_v36 = vor.u32 %v7136_v0, %v6574_v58  ;;  %v6297_v1 = vor.u32 %v7066_v61, %v6294_v4  ;;  %v7129_v5 = vld [vmem:[%s10895_s8 + $0x404] sm:$0xf]  ;;  %v6160_v0 = vld [vmem:[%s10895_s8 + $0xf8] sm:$0xf]  ;;  %v7035_v58 = vld [vmem:[%s10895_s8 + $0x110] sm:$0xf0] }
 0x395   : > { %v6161_v61 = vor.u32 %v7035_v58, %v6160_v0 }
 0x397   : > { %4185 = vmatpush.bf16.msrb.mxu2 %v6489_v6  ;;  %4217 = vmatpush.bf16.msra.mxu0 %v6213_v29  ;;  %v6546_v6 = vld [vmem:[%s10895_s8 + $0x41c] sm:$0xf0]  ;;  %v7059_v29 = vld [vmem:[%s10895_s8 + $0x1d4] sm:$0xf] }
 0x398   : > { %4236 = vmatpush.bf16.msra.mxu1 %v6437_v17  ;;  %v6549_v7 = vor.u32 %v7129_v5, %v6546_v6  ;;  %v6636_v5 = vld [vmem:[%s10895_s8 + $0x4b0] sm:$0xf]  ;;  %v7154_v6 = vld [vmem:[%s10895_s8 + $0x4c8] sm:$0xf0] }
 0x399   : > { %4110 = vmatmul.bf16.vlgmr.msra.gmra.mxu2 %v9444_v54  ;;  %6728 = vmatmul.msk.bf16.vlgmr.msra.gmra.mxu3 %vm1654_vm0, %v9446_v22 }
 0x39a   : > { %4280 = vmatpush.bf16.msra.mxu3 %v6717_v49  ;;  %v7112_v49 = vld [vmem:[%s10895_s8 + $0x378] sm:$0xf0] }
 0x39b   : > { %4254 = vmatpush.bf16.msra.mxu2 %v6689_v20  ;;  %4218 = vmatpush.bf16.msra.mxu0 %v6185_v55  ;;  %v6269_v20 = vor.u32 %v7059_v29, %v6266_v11  ;;  %v6468_v55 = vld [vmem:[%s10895_s8 + $0x360] sm:$0xf] }
 0x39c   : > { %4237 = vmatpush.bf16.msra.mxu1 %v6409_v45  ;;  %v6469_v45 = vor.u32 %v7112_v49, %v6468_v55  ;;  %v6356_v29 = vld [vmem:[%s10895_s8 + $0x280] sm:$0xf]  ;;  %v6328_v49 = vld [vmem:[%s10895_s8 + $0x248] sm:$0xf] }
 0x39f   : > { %4255 = vmatpush.bf16.msra.mxu2 %v6661_v27  ;;  %4219 = vmatpush.bf16.msra.mxu0 %v6157_v30  ;;  %v6493_v27 = vor.u32 %v7115_v12, %v6490_v26 }
 0x3a0   : > { %4238 = vmatpush.bf16.msra.mxu1 %v6381_v33  ;;  %v6217_v33 = vor.u32 %v7049_v51, %v6216_v50 }
 0x3a2   : > { %4077 = vmatmul.bf16.gmra.mxu0 %v9503_v24  ;;  %4096 = vmatmul.bf16.gmra.mxu1 %v9505_v44 }
 0x3a3   : > { %4256 = vmatpush.bf16.msra.mxu2 %v6633_v41  ;;  %4220 = vmatpush.bf16.msra.mxu0 %v6129_v48  ;;  %v6692_v41 = vld [vmem:[%s10895_s8 + $0x520] sm:$0xf]  ;;  %v6188_v48 = vld [vmem:[%s10895_s8 + $0x130] sm:$0xf] }
 0x3a4   : > { %4239 = vmatpush.bf16.msra.mxu1 %v6353_v56  ;;  %v6693_v39 = vor.u32 %v7168_v38, %v6692_v41  ;;  %v6412_v56 = vld [vmem:[%s10895_s8 + $0x2f0] sm:$0xf]  ;;  %v6189_v25 = vor.u32 %v7042_v16, %v6188_v48  ;;  %v7014_v41 = vld [vmem:[%s10895_s8 + $0x68] sm:$0xf0] }
 0x3a5   : > { %v6413_v57 = vor.u32 %v7098_v10, %v6412_v56  ;;  %v7070_v48 = vld [vmem:[%s10895_s8 + $0x228] sm:$0xf0]  ;;  %v6552_v10 = vld [vmem:[%s10895_s8 + $0x408] sm:$0xf] }
 0x3a7   : > { %4257 = vmatpush.bf16.msra.mxu2 %v6605_v13  ;;  %4221 = vmatpush.bf16.msra.mxu0 %v6101_v60  ;;  %v10139_v13 = vperm.slane %v10121_v47, 0  ;;  %v6664_v60 = vld [vmem:[%s10895_s8 + $0x4e8] sm:$0xf] }
 0x3a8   : > { %4240 = vmatpush.bf16.msra.mxu1 %v6325_v63  ;;  %v6665_v63 = vor.u32 %v7161_v62, %v6664_v60 }
 0x3a9   : > { %4115 = vmatmul.bf16.gmra.mxu2 %v9543_v31  ;;  %6729 = vmatmul.msk.bf16.gmra.mxu3 %vm1654_vm0, %v9545_v52 }
 0x3ab   : > { %4258 = vmatpush.bf16.msra.mxu2 %v6577_v36  ;;  %4222 = vmatpush.bf16.msra.mxu0 %v6073_v3  ;;  %v6384_v36 = vld [vmem:[%s10895_s8 + $0x2b8] sm:$0xf]  ;;  %v7091_v3 = vld [vmem:[%s10895_s8 + $0x2d0] sm:$0xf0] }
 0x3ac   : > { %4241 = vmatpush.bf16.msra.mxu1 %v6297_v1  ;;  %v6385_v1 = vor.u32 %v7091_v3, %v6384_v36  ;;  %v7063_v3 = vld [vmem:[%s10895_s8 + $0x1f0] sm:$0xf0] }
 0x3af   : > { %v10063_v59 = vpop.f32.mrf.mxu0  ;;  %v10065_v17 = vpop.f32.mrf.mxu1  ;;  %4259 = vmatpush.bf16.msra.mxu2 %v6549_v7  ;;  %4223 = vmatpush.bf16.msra.mxu0 %v6045_v19  ;;  %v6637_v7 = vor.u32 %v7154_v6, %v6636_v5  ;;  %v7084_v19 = vld [vmem:[%s10895_s8 + $0x298] sm:$0xf0]  ;;  %v6524_v5 = vld [vmem:[%s10895_s8 + $0x3d0] sm:$0xf]  ;;  %v7126_v6 = vld [vmem:[%s10895_s8 + $0x3e8] sm:$0xf0] }
 0x3b0   : > { %4242 = vmatpush.bf16.msra.mxu1 %v6269_v20  ;;  %v3846_v4 = vadd.f32 %v10063_v59, %v10139_v13  ;;  %v6133_v59 = vor.u32 %v7028_v9, %v6132_v8  ;;  %v6357_v21 = vor.u32 %v7084_v19, %v6356_v29  ;;  %v10261_v9 = vperm.slane %v10121_v47, 1  ;;  %v6720_v19 = vld [vmem:[%s10895_s8 + $0x558] sm:$0xf] }
 0x3b2   : > { %4148 = vmatmul.bf16.vlgmr.msrb.gmra.mxu0 %v9404_v40  ;;  %4167 = vmatmul.bf16.vlgmr.msrb.gmra.mxu1 %v9406_v14  ;;  %v3865_v11 = vadd.f32 %v10065_v17, %v3846_v4  ;;  %v7021_v17 = vld [vmem:[%s10895_s8 + $0xa0] sm:$0xf0] }
 0x3b3   : > { %4260 = vmatpush.bf16.msra.mxu2 %v6521_v18  ;;  %4292 = vmatpush.bf16.msrb.mxu0 %v6245_v43  ;;  %v6608_v18 = vld [vmem:[%s10895_s8 + $0x478] sm:$0xf]  ;;  %v6104_v43 = vld [vmem:[%s10895_s8 + $0x88] sm:$0xf] }
 0x3b4   : > { %4311 = vmatpush.bf16.msrb.mxu1 %v6469_v45  ;;  %v6609_v23 = vor.u32 %v7147_v2, %v6608_v18  ;;  %v6105_v26 = vor.u32 %v7021_v17, %v6104_v43 }
 0x3b7   : > { %v10105_v30 = vpop.f32.mrf.mxu0  ;;  %v10107_v32 = vpop.f32.mrf.mxu1  ;;  %4261 = vmatpush.bf16.msra.mxu2 %v6493_v27  ;;  %4293 = vmatpush.bf16.msrb.mxu0 %v6217_v33  ;;  %v7077_v27 = vld [vmem:[%s10895_s8 + $0x260] sm:$0xf0]  ;;  %v7140_v33 = vld [vmem:[%s10895_s8 + $0x458] sm:$0xf0] }
 0x3b8   : > { %4312 = vmatpush.bf16.msrb.mxu1 %v6441_v35  ;;  %v3848_v50 = vadd.f32 %v10105_v30, %v10139_v13  ;;  %v6329_v51 = vor.u32 %v7077_v27, %v6328_v49  ;;  %v6581_v34 = vor.u32 %v7140_v33, %v6580_v28  ;;  %v6076_v30 = vld [vmem:[%s10895_s8 + $0x50] sm:$0xf] }
 0x3b9   : > { %4186 = vmatmul.bf16.vlgmr.msrb.gmra.mxu2 %v9444_v54  ;;  %6730 = vmatmul.msk.bf16.vlgmr.msrb.gmra.mxu3 %vm1654_vm0, %v9446_v22  ;;  %v6077_v38 = vor.u32 %v7014_v41, %v6076_v30 }
 0x3ba   : > { %v3867_v16 = vadd.f32 %v10107_v32, %v3848_v50  ;;  %v7007_v32 = vld [vmem:[%s10895_s8 + $0x30] sm:$0xf0] }
 0x3bb   : > { %4330 = vmatpush.bf16.msrb.mxu2 %v6693_v39  ;;  %4294 = vmatpush.bf16.msrb.mxu0 %v6189_v25  ;;  %v6300_v39 = vld [vmem:[%s10895_s8 + $0x210] sm:$0xf] }
 0x3bc   : > { %v3883_v46 = vpop.f32.mrf.mxu2  ;;  %v3902_v42 = vpop.f32.mrf.mxu3  ;;  %4313 = vmatpush.bf16.msrb.mxu1 %v6413_v57 }
 0x3bd   : > { %v3884_v55 = vadd.f32 %v3883_v46, %v3865_v11  ;;  %v6301_v46 = vor.u32 %v7070_v48, %v6300_v39  ;;  %v7175_v11 = vld [vmem:[%s10895_s8 + $0x570] sm:$0xf0] }
 0x3be   : > { %v6721_v18 = vor.u32 %v7175_v11, %v6720_v19 }
 0x3bf   : > { %v10156_v37 = vpop.f32.mrf.mxu0  ;;  %v10158_v53 = vpop.f32.mrf.mxu1  ;;  %4331 = vmatpush.bf16.msrb.mxu2 %v6665_v63  ;;  %4295 = vmatpush.bf16.msrb.mxu0 %v6161_v61  ;;  %v3903_v35 = vadd.f32 %v3902_v42, %v3884_v55  ;;  %v7133_v42 = vld [vmem:[%s10895_s8 + $0x420] sm:$0xf0]  ;;  %v6048_v63 = vld [vmem:[%s10895_s8 + $0x18] sm:$0xf] }
 0x3c0   : > { %4314 = vmatpush.bf16.msrb.mxu1 %v6385_v1  ;;  %v6553_v62 = vor.u32 %v7133_v42, %v6552_v10  ;;  %v6049_v36 = vor.u32 %v7007_v32, %v6048_v63  ;;  %v6272_v61 = vld [vmem:[%s10895_s8 + $0x1d8] sm:$0xf]  ;;  %v3851_v4 = vadd.f32 %v10156_v37, %v10139_v13  ;;  %4356 = vmatpush.bf16.msrb.mxu3 %v6721_v18 }
 0x3c1   : > { %v6736_v57 = vmul.f32 -1.442695, %v3903_v35  ;;  %v6273_v1 = vor.u32 %v7063_v3, %v6272_v61 }
 0x3c2   : > { %4153 = vmatmul.bf16.gmra.mxu0 %v9503_v24  ;;  %4172 = vmatmul.bf16.gmra.mxu1 %v9505_v44  ;;  %v3870_v37 = vadd.f32 %v10158_v53, %v3851_v4  ;;  %v7119_v53 = vld [vmem:[%s10895_s8 + $0x3b0] sm:$0xf0] }
 0x3c3   : > { %4332 = vmatpush.bf16.msrb.mxu2 %v6637_v7  ;;  %4296 = vmatpush.bf16.msrb.mxu0 %v6133_v59  ;;  %v6525_v7 = vor.u32 %v7126_v6, %v6524_v5  ;;  %7238 = vpow2.f32 %v6736_v57 }
 0x3c4   : > { %v3885_v20 = vpop.f32.mrf.mxu2  ;;  %v3904_v15 = vpop.f32.mrf.mxu3  ;;  %4315 = vmatpush.bf16.msrb.mxu1 %v6357_v21 }
 0x3c5   : > { %v3886_v60 = vadd.f32 %v3885_v20, %v3867_v16  ;;  %v6496_v20 = vld [vmem:[%s10895_s8 + $0x398] sm:$0xf] }
 0x3c6   : > { %v6497_v43 = vor.u32 %v7119_v53, %v6496_v20 }
 0x3c7   : > { %v10201_v45 = vpop.f32.mrf.mxu0  ;;  %v10203_v12 = vpop.f32.mrf.mxu1  ;;  %4333 = vmatpush.bf16.msrb.mxu2 %v6609_v23  ;;  %4297 = vmatpush.bf16.msrb.mxu0 %v6105_v26  ;;  %v3905_v8 = vadd.f32 %v3904_v15, %v3886_v60 }
 0x3c8   : > { %4316 = vmatpush.bf16.msrb.mxu1 %v6329_v51  ;;  %v3853_v49 = vadd.f32 %v10201_v45, %v10139_v13 }
 0x3c9   : > { %4191 = vmatmul.bf16.gmra.mxu2 %v9543_v31  ;;  %6731 = vmatmul.msk.bf16.gmra.mxu3 %vm1654_vm0, %v9545_v52  ;;  %v6743_v15 = vmul.f32 -1.442695, %v3905_v8  ;;  %v7239_v17 = vpop.eup %7238 }
 0x3ca   : > { %v10282_v27 = vadd.f32 1.0, %v7239_v17  ;;  %v3872_v51 = vadd.f32 %v10203_v12, %v3853_v49 }
 0x3cb   : > { %4334 = vmatpush.bf16.msrb.mxu2 %v6581_v34  ;;  %4298 = vmatpush.bf16.msrb.mxu0 %v6077_v38  ;;  %7240 = vpow2.f32 %v6743_v15 }
 0x3cc   : > { %v3888_v56 = vpop.f32.mrf.mxu2  ;;  %v3907_v25 = vpop.f32.mrf.mxu3  ;;  %4317 = vmatpush.bf16.msrb.mxu1 %v6301_v46  ;;  %7242 = vrcp.f32 %v10282_v27  ;;  %vm4485_vm3 = vweird.f32 %v10282_v27 }
 0x3cd   : > { %v3889_v21 = vadd.f32 %v3888_v56, %v3870_v37 }
 0x3cf   : > { %v3921_v0 = vpop.f32.mrf.mxu0  ;;  %v3940_v58 = vpop.f32.mrf.mxu1  ;;  %4335 = vmatpush.bf16.msrb.mxu2 %v6553_v62  ;;  %4299 = vmatpush.bf16.msrb.mxu0 %v6049_v36  ;;  %v3908_v26 = vadd.f32 %v3907_v25, %v3889_v21 }
 0x3d0   : > { %4318 = vmatpush.bf16.msrb.mxu1 %v6273_v1  ;;  %v3922_v2 = vadd.f32 %v3921_v0, %v10261_v9 }
 0x3d1   : > { %v6750_v35 = vmul.f32 -1.442695, %v3908_v26  ;;  %v7241_v39 = vpop.eup %7240 }
 0x3d2   : > { %4224 = vmatmul.bf16.vlgmr.msra.gmra.mxu0 %v9404_v40  ;;  %4243 = vmatmul.bf16.vlgmr.msra.gmra.mxu1 %v9406_v14  ;;  %v3941_v50 = vadd.f32 %v3940_v58, %v3922_v2  ;;  %v10289_v12 = vadd.f32 1.0, %v7241_v39  ;;  %v10291_v46 = vpop.eup %7242 }
 0x3d3   : > { %4336 = vmatpush.bf16.msrb.mxu2 %v6525_v7  ;;  %7244 = vpow2.f32 %v6750_v35  ;;  %v4481_v58 = vmul.f32 %v10291_v46, %v10282_v27  ;;  %vm4486_vm2 = vweird.f32 %v10291_v46 }
 0x3d4   : > { %v3890_v29 = vpop.f32.mrf.mxu2  ;;  %v3909_v59 = vpop.f32.mrf.mxu3  ;;  %vm10338_vm5 = vmor %vm4485_vm3, %vm4486_vm2  ;;  %vm4590_vm11 = vweird.f32 %v10289_v12 }
 0x3d5   : > { %v3891_v30 = vadd.f32 %v3890_v29, %v3872_v51  ;;  %v4482_v1 = vsub.f32 1.0, %v4481_v58 }
 0x3d7   : > { %v3923_v23 = vpop.f32.mrf.mxu0  ;;  %v3942_v55 = vpop.f32.mrf.mxu1  ;;  %4337 = vmatpush.bf16.msrb.mxu2 %v6497_v43  ;;  %v3910_v16 = vadd.f32 %v3909_v59, %v3891_v30  ;;  %v4483_v15 = vmul.f32 %v10291_v46, %v4482_v1 }
 0x3d8   : > { %v3924_v13 = vadd.f32 %v3923_v23, %v10261_v9  ;;  %v4489_v23 = vand.u32 2147483647, %v10282_v27 }
 0x3d9   : > { %4262 = vmatmul.bf16.vlgmr.msra.gmra.mxu2 %v9444_v54  ;;  %6732 = vmatmul.msk.bf16.vlgmr.msra.gmra.mxu3 %vm1654_vm0, %v9446_v22  ;;  %v6757_v57 = vmul.f32 -1.442695, %v3910_v16  ;;  %v7245_v0 = vpop.eup %7244  ;;  %v4484_v49 = vadd.f32 %v10291_v46, %v4483_v15 }
 0x3da   : > { %v3943_v56 = vadd.f32 %v3942_v55, %v3924_v13  ;;  %v10302_v5 = vadd.f32 1.0, %v7245_v0  ;;  %vm10331_vm4 = vcmp.eq.f32.partialorder %v4489_v23, 8.507059e+37 }
 0x3db   : > { %v4488_v39 = vsel %vm10338_vm5, %v10291_v46, %v4484_v49 }
 0x3dc   : > { %v3959_v28 = vpop.f32.mrf.mxu2  ;;  %v3978_v33 = vpop.f32.mrf.mxu3  ;;  %v4701_v30 = vand.u32 2147483648, %v10302_v5 }
 0x3dd   : > { %v3960_v34 = vadd.f32 %v3959_v28, %v3941_v50 }
 0x3df   : > { %v3979_v45 = vadd.f32 %v3978_v33, %v3960_v34  ;;  %v3926_v41 = vpop.f32.mrf.mxu0  ;;  %v3945_v38 = vpop.f32.mrf.mxu1 }
 0x3e0   : > { %v3927_v60 = vadd.f32 %v3926_v41, %v10261_v9 }
 0x3e1   : > { %v6737_v48 = vmul.f32 -1.442695, %v3979_v45 }
 0x3e2   : > { %4229 = vmatmul.bf16.gmra.mxu0 %v9503_v24  ;;  %4248 = vmatmul.bf16.gmra.mxu1 %v9505_v44  ;;  %v3946_v4 = vadd.f32 %v3945_v38, %v3927_v60 }
 0x3e3   : > { %7246 = vpow2.f32 %v6737_v48 }
 0x3e4   : > { %v3961_v25 = vpop.f32.mrf.mxu2  ;;  %v3980_v10 = vpop.f32.mrf.mxu3  ;;  %7248 = vrcp.f32 %v10289_v12 }
 0x3e5   : > { %v3962_v42 = vadd.f32 %v3961_v25, %v3943_v56  ;;  %7250 = vpow2.f32 %v6757_v57 }
 0x3e7   : > { %v3981_v62 = vadd.f32 %v3980_v10, %v3962_v42  ;;  %v3928_v63 = vpop.f32.mrf.mxu0  ;;  %v3947_v32 = vpop.f32.mrf.mxu1 }
 0x3e8   : > { %v3929_v29 = vadd.f32 %v3928_v63, %v10261_v9  ;;  %v4491_v9 = vand.u32 2147483648, %v10282_v27 }
 0x3e9   : > { %v7247_v36 = vpop.eup %7246  ;;  %v6744_v61 = vmul.f32 -1.442695, %v3981_v62  ;;  %4267 = vmatmul.bf16.gmra.mxu2 %v9543_v31  ;;  %6733 = vmatmul.msk.bf16.gmra.mxu3 %vm1654_vm0, %v9545_v52  ;;  %v10364_v62 = vperm.slane %v10121_v47, 2 }
 0x3ea   : > { %v10300_v3 = vadd.f32 1.0, %v7247_v36  ;;  %v10305_v8 = vpop.eup %7248  ;;  %v3948_v17 = vadd.f32 %v3947_v32, %v3929_v29  ;;  %v4492_v48 = vor.u32 1.1754944e-38, %v4491_v9 }
 0x3eb   : > { %7252 = vpow2.f32 %v6744_v61  ;;  %v7251_v20 = vpop.eup %7250  ;;  %v4586_v21 = vmul.f32 %v10305_v8, %v10289_v12  ;;  %vm4591_vm8 = vweird.f32 %v10305_v8 }
 0x3ec   : > { %7254 = vrcp.f32 %v10300_v3  ;;  %v3964_v6 = vpop.f32.mrf.mxu2  ;;  %v3983_v7 = vpop.f32.mrf.mxu3  ;;  %v10325_v50 = vadd.f32 1.0, %v7251_v20  ;;  %v4506_v35 = vand.u32 2147483648, %v10300_v3  ;;  %v4504_v45 = vand.u32 2147483647, %v10300_v3  ;;  %vm10381_vm12 = vmor %vm4590_vm11, %vm4591_vm8 }
 0x3ed   : > { %v3965_v37 = vadd.f32 %v3964_v6, %v3946_v4  ;;  %7256 = vrcp.f32 %v10302_v5  ;;  %v4587_v26 = vsub.f32 1.0, %v4586_v21  ;;  %vm4500_vm7 = vweird.f32 %v10300_v3 }
 0x3ee   : > { %v4507_v46 = vor.u32 1.1754944e-38, %v4506_v35  ;;  %vm4505_vm10 = vcmp.eq.f32.partialorder %v4504_v45, 8.507059e+37  ;;  %v4594_v6 = vand.u32 2147483647, %v10289_v12  ;;  %vm4800_vm11 = vweird.f32 %v10325_v50 }
 0x3ef   : > { %v3984_v59 = vadd.f32 %v3983_v7, %v3965_v37  ;;  %v10308_v19 = vpop.f32.mrf.mxu0  ;;  %v10310_v11 = vpop.f32.mrf.mxu1  ;;  %v4588_v16 = vmul.f32 %v10305_v8, %v4587_v26  ;;  %v4596_v7 = vand.u32 2147483648, %v10289_v12 }
 0x3f0   : > { %vm4595_vm15 = vcmp.eq.f32.partialorder %v4594_v6, 8.507059e+37 }
 0x3f1   : > { %v7253_v18 = vpop.eup %7252  ;;  %v6751_v53 = vmul.f32 -1.442695, %v3984_v59 }
 0x3f2   : > { %v7255_v2 = vpop.eup %7254  ;;  %v10318_v55 = vadd.f32 1.0, %v7253_v18  ;;  %4300 = vmatmul.bf16.vlgmr.msrb.gmra.mxu0 %v9404_v40  ;;  %4319 = vmatmul.bf16.vlgmr.msrb.gmra.mxu1 %v9406_v14  ;;  %v3998_v18 = vadd.f32 %v10308_v19, %v10364_v62 }
 0x3f3   : > { %v4496_v43 = vmul.f32 %v7255_v2, %v10300_v3  ;;  %7258 = vpow2.f32 %v6751_v53  ;;  %v10328_v34 = vpop.eup %7256  ;;  %vm4501_vm6 = vweird.f32 %v7255_v2 }
 0x3f4   : > { %7260 = vrcp.f32 %v10318_v55  ;;  %v3966_v51 = vpop.f32.mrf.mxu2  ;;  %v3985_v28 = vpop.f32.mrf.mxu3  ;;  %v4691_v25 = vmul.f32 %v10328_v34, %v10302_v5  ;;  %vm4502_vm9 = vmor %vm4500_vm7, %vm4501_vm6  ;;  %v4611_v37 = vand.u32 2147483648, %v10318_v55  ;;  %v4609_v20 = vand.u32 2147483647, %v10318_v55 }
 0x3f5   : > { %v4497_v33 = vsub.f32 1.0, %v4496_v43  ;;  %v3967_v40 = vadd.f32 %v3966_v51, %v3948_v17  ;;  %7262 = vrcp.f32 %v10325_v50  ;;  %vm4605_vm14 = vweird.f32 %v10318_v55 }
 0x3f6   : > { %v4692_v61 = vsub.f32 1.0, %v4691_v25  ;;  %v4597_v17 = vor.u32 1.1754944e-38, %v4596_v7  ;;  %v4612_v49 = vor.u32 1.1754944e-38, %v4611_v37  ;;  %vm4696_vm2 = vweird.f32 %v10328_v34 }
 0x3f7   : > { %v4498_v13 = vmul.f32 %v7255_v2, %v4497_v33  ;;  %v3986_v41 = vadd.f32 %v3985_v28, %v3967_v40  ;;  %v10343_v38 = vpop.f32.mrf.mxu0  ;;  %v10345_v27 = vpop.f32.mrf.mxu1  ;;  %vm4610_vm3 = vcmp.eq.f32.partialorder %v4609_v20, 8.507059e+37  ;;  %v4017_v28 = vadd.f32 %v10310_v11, %v3998_v18 }
 0x3f8   : > { %v4000_v25 = vadd.f32 %v10343_v38, %v10364_v62  ;;  %v4804_v7 = vand.u32 2147483647, %v10325_v50 }
 0x3f9   : > { %v7259_v56 = vpop.eup %7258  ;;  %v4499_v10 = vadd.f32 %v7255_v2, %v4498_v13  ;;  %v6758_v42 = vmul.f32 -1.442695, %v3986_v41  ;;  %4338 = vmatmul.bf16.vlgmr.msrb.gmra.mxu2 %v9444_v54  ;;  %6734 = vmatmul.msk.bf16.vlgmr.msrb.gmra.mxu3 %vm1654_vm0, %v9446_v22  ;;  %v4493_v54 = vsel %vm10331_vm4, %v4492_v48, %v4488_v39  ;;  %v4589_v22 = vadd.f32 %v10305_v8, %v4588_v16 }
 0x3fa   : > { %v7261_v57 = vpop.eup %7260  ;;  %v10361_v60 = vadd.f32 1.0, %v7259_v56  ;;  %vm4695_vm4 = vweird.f32 %v10302_v5  ;;  %v4699_v41 = vand.u32 2147483647, %v10302_v5 }
 0x3fb   : > { %v4503_v63 = vsel %vm4502_vm9, %v7255_v2, %v4499_v10  ;;  %v4601_v32 = vmul.f32 %v7261_v57, %v10318_v55  ;;  %7264 = vpow2.f32 %v6758_v42  ;;  %v10373_v1 = vpop.eup %7262  ;;  %vm4606_vm13 = vweird.f32 %v7261_v57  ;;  %vm10427_vm6 = vmor %vm4695_vm4, %vm4696_vm2 }
 0x3fc   : > { %v4508_v0 = vsel %vm4505_vm10, %v4507_v46, %v4503_v63  ;;  %7266 = vrcp.f32 %v10361_v60  ;;  %v4035_v58 = vpop.f32.mrf.mxu2  ;;  %v10371_v36 = vpop.f32.mrf.mxu3  ;;  %v4593_v21 = vsel %vm10381_vm12, %v10305_v8, %v4589_v22  ;;  %v4693_v2 = vmul.f32 %v10328_v34, %v4692_v61  ;;  %vm4607_vm1 = vmor %vm4605_vm14, %vm4606_vm13 }
 0x3fd   : > { %v4900_v3 = vpack.c.bf16 %v4508_v0, %v4493_v54  ;;  %v4602_v4 = vsub.f32 1.0, %v4601_v32  ;;  %v4796_v23 = vmul.f32 %v10373_v1, %v10325_v50  ;;  %v4598_v51 = vsel %vm4595_vm15, %v4597_v17, %v4593_v21 }
 0x3fe   : > { %v4716_v13 = vand.u32 2147483648, %v10361_v60  ;;  %v4036_v45 = vadd.f32 %v4035_v58, %v4017_v28  ;;  %v4714_v39 = vand.u32 2147483647, %v10361_v60  ;;  %vm4710_vm7 = vweird.f32 %v10361_v60 }
 0x3ff   : > { %4916 = vst [vmem:[%s10387_s26] sm:$0xff] %v4900_v3  ;;  %v4603_v59 = vmul.f32 %v7261_v57, %v4602_v4  ;;  %v10391_v15 = vpop.f32.mrf.mxu0  ;;  %v10393_v12 = vpop.f32.mrf.mxu1  ;;  %v4797_v14 = vsub.f32 1.0, %v4796_v23  ;;  %v4702_v46 = vor.u32 1.1754944e-38, %v4701_v30  ;;  %vm4700_vm9 = vcmp.eq.f32.partialorder %v4699_v41, 8.507059e+37 }
 0x400   : > { %v4717_v63 = vor.u32 1.1754944e-38, %v4716_v13  ;;  %v4055_v38 = vadd.f32 %v10371_v36, %v4036_v45  ;;  %vm4715_vm10 = vcmp.eq.f32.partialorder %v4714_v39, 8.507059e+37  ;;  %v4806_v61 = vand.u32 2147483648, %v10325_v50 }
 0x401   : > { %v7265_v53 = vpop.eup %7264  ;;  %v4604_v9 = vadd.f32 %v7261_v57, %v4603_v59  ;;  %v4798_v10 = vmul.f32 %v10373_v1, %v4797_v14  ;;  %v4003_v20 = vadd.f32 %v10391_v15, %v10364_v62  ;;  %v2919_v50 = vperm.slane %v10121_v47, 3 }
 0x402   : > { %v7267_v43 = vpop.eup %7266  ;;  %v10404_v26 = vadd.f32 1.0, %v7265_v53  ;;  %4305 = vmatmul.bf16.gmra.mxu0 %v9503_v24  ;;  %4324 = vmatmul.bf16.gmra.mxu1 %v9505_v44  ;;  %v4694_v24 = vadd.f32 %v10328_v34, %v4693_v2  ;;  %v6738_v4 = vmul.f32 -1.442695, %v4055_v38  ;;  %v4807_v53 = vor.u32 1.1754944e-38, %v4806_v61 }
 0x403   : > { %v4608_v8 = vsel %vm4607_vm1, %v7261_v57, %v4604_v9  ;;  %v4706_v19 = vmul.f32 %v7267_v43, %v10361_v60  ;;  %vm4711_vm5 = vweird.f32 %v7267_v43  ;;  %v4799_v0 = vadd.f32 %v10373_v1, %v4798_v10 }
 0x404   : > { %v4613_v55 = vsel %vm4610_vm3, %v4612_v49, %v4608_v8  ;;  %7268 = vrcp.f32 %v10404_v26  ;;  %v4037_v33 = vpop.f32.mrf.mxu2  ;;  %v10412_v40 = vpop.f32.mrf.mxu3  ;;  %v4698_v5 = vsel %vm10427_vm6, %v10328_v34, %v4694_v24  ;;  %vm4712_vm8 = vmor %vm4710_vm7, %vm4711_vm5  ;;  %v4821_v3 = vand.u32 2147483648, %v10404_v26 }
 0x405   : > { %v4904_v44 = vpack.c.bf16 %v4613_v55, %v4598_v51  ;;  %v4707_v35 = vsub.f32 1.0, %v4706_v19  ;;  %v4703_v54 = vsel %vm4700_vm9, %v4702_v46, %v4698_v5  ;;  %vm4815_vm14 = vweird.f32 %v10404_v26 }
 0x406   : > { %v4822_v2 = vor.u32 1.1754944e-38, %v4821_v3  ;;  %7270 = vpow2.f32 %v6738_v4  ;;  %vm4805_vm1 = vcmp.eq.f32.partialorder %v4804_v7, 8.507059e+37  ;;  %v4022_v15 = vadd.f32 %v10393_v12, %v4003_v20 }
 0x407   : > { %4921 = vst [vmem:[%s10387_s26 + $0x1c] sm:$0xff] %v4904_v44  ;;  %v4708_v11 = vmul.f32 %v7267_v43, %v4707_v35  ;;  %v10421_v48 = vpop.f32.mrf.mxu0  ;;  %v10423_v16 = vpop.f32.mrf.mxu1 }
 0x409   : > { %v4709_v42 = vadd.f32 %v7267_v43, %v4708_v11  ;;  %4343 = vmatmul.bf16.gmra.mxu2 %v9543_v31  ;;  %6735 = vmatmul.msk.bf16.gmra.mxu3 %vm1654_vm0, %v9545_v52  ;;  %v4019_v31 = vadd.f32 %v10345_v27, %v4000_v25  ;;  %vm4801_vm0 = vweird.f32 %v10373_v1  ;;  %v4819_v27 = vand.u32 2147483647, %v10404_v26 }
 0x40a   : > { %v7269_v57 = vpop.eup %7268  ;;  %vm4802_vm13 = vmor %vm4800_vm11, %vm4801_vm0 }
 0x40b   : > { %v4713_v32 = vsel %vm4712_vm8, %v7267_v43, %v4709_v42  ;;  %v4811_v34 = vmul.f32 %v7269_v57, %v10404_v26  ;;  %v4038_v6 = vadd.f32 %v4037_v33, %v4019_v31  ;;  %vm4816_vm12 = vweird.f32 %v7269_v57 }
 0x40c   : > { %v4718_v60 = vsel %vm4715_vm10, %v4717_v63, %v4713_v32  ;;  %v4040_v22 = vpop.f32.mrf.mxu2  ;;  %v4059_v52 = vpop.f32.mrf.mxu3  ;;  %v4803_v21 = vsel %vm4802_vm13, %v10373_v1, %v4799_v0  ;;  %vm4817_vm15 = vmor %vm4815_vm14, %vm4816_vm12  ;;  %vm4820_vm2 = vcmp.eq.f32.partialorder %v4819_v27, 8.507059e+37 }
 0x40d   : > { %v4908_v58 = vpack.c.bf16 %v4718_v60, %v4703_v54  ;;  %v4812_v36 = vsub.f32 1.0, %v4811_v34  ;;  %v4057_v23 = vadd.f32 %v10412_v40, %v4038_v6  ;;  %v4808_v43 = vsel %vm4805_vm1, %v4807_v53, %v4803_v21  ;;  %v7271_v33 = vpop.eup %7270 }
 0x40e   : > { %v4041_v19 = vadd.f32 %v4040_v22, %v4022_v15  ;;  %v4005_v40 = vadd.f32 %v10421_v48, %v10364_v62  ;;  %v10464_v14 = vadd.f32 1.0, %v7271_v33 }
 0x40f   : > { %4925 = vst [vmem:[%s10387_s26 + $0x38] sm:$0xff] %v4908_v58  ;;  %v4813_v37 = vmul.f32 %v7269_v57, %v4812_v36  ;;  %v4073_v29 = vpop.f32.mrf.mxu0  ;;  %v4092_v59 = vpop.f32.mrf.mxu1  ;;  %v6745_v26 = vmul.f32 -1.442695, %v4057_v23 }
 0x410   : > { %v4074_v51 = vadd.f32 %v4073_v29, %v2919_v50  ;;  %v4060_v24 = vadd.f32 %v4059_v52, %v4041_v19  ;;  %v4024_v12 = vadd.f32 %v10423_v16, %v4005_v40  ;;  %vm4515_vm4 = vweird.f32 %v10464_v14 }
 0x411   : > { %v4814_v18 = vadd.f32 %v7269_v57, %v4813_v37  ;;  %7272 = vpow2.f32 %v6745_v26 }
 0x412   : > { %v4093_v44 = vadd.f32 %v4092_v59, %v4074_v51  ;;  %v6752_v45 = vmul.f32 -1.442695, %v4060_v24  ;;  %7274 = vrcp.f32 %v10464_v14 }
 0x413   : > { %v4818_v9 = vsel %vm4817_vm15, %v7269_v57, %v4814_v18 }
 0x414   : > { %v4823_v17 = vsel %vm4820_vm2, %v4822_v2, %v4818_v9  ;;  %v4042_v1 = vpop.f32.mrf.mxu2  ;;  %v4061_v49 = vpop.f32.mrf.mxu3  ;;  %7276 = vpow2.f32 %v6752_v45 }
 0x415   : > { %v4912_v8 = vpack.c.bf16 %v4823_v17, %v4808_v43  ;;  %v4043_v41 = vadd.f32 %v4042_v1, %v4024_v12  ;;  %v4521_v43 = vand.u32 2147483648, %v10464_v14 }
 0x417   : > { %4929 = vst [vmem:[%s10387_s26 + $0x54] sm:$0xff] %v4912_v8  ;;  %v4075_v55 = vpop.f32.mrf.mxu0  ;;  %v4094_v28 = vpop.f32.mrf.mxu1  ;;  %v4062_v48 = vadd.f32 %v4061_v49, %v4043_v41  ;;  %v4522_v24 = vor.u32 1.1754944e-38, %v4521_v43 }
 0x418   : > { %v4076_v11 = vadd.f32 %v4075_v55, %v2919_v50  ;;  %v7273_v5 = vpop.eup %7272 }
 0x419   : > { %v10468_v10 = vadd.f32 1.0, %v7273_v5  ;;  %v10470_v46 = vpop.eup %7274  ;;  %v6759_v38 = vmul.f32 -1.442695, %v4062_v48 }
 0x41a   : > { %v4095_v42 = vadd.f32 %v4094_v28, %v4076_v11  ;;  %v7277_v31 = vpop.eup %7276  ;;  %v4511_v22 = vmul.f32 %v10470_v46, %v10464_v14  ;;  %vm4516_vm3 = vweird.f32 %v10470_v46 }
 0x41b   : > { %v10477_v3 = vadd.f32 1.0, %v7277_v31  ;;  %vm10520_vm6 = vmor %vm4515_vm4, %vm4516_vm3 }
 0x41c   : > { %v4111_v35 = vpop.f32.mrf.mxu2  ;;  %v4130_v30 = vpop.f32.mrf.mxu3  ;;  %v4512_v61 = vsub.f32 1.0, %v4511_v22 }
 0x41d   : > { %v4112_v13 = vadd.f32 %v4111_v35, %v4093_v44 }
 0x41e   : > { %v4513_v18 = vmul.f32 %v10470_v46, %v4512_v61 }
 0x41f   : > { %v4131_v39 = vadd.f32 %v4130_v30, %v4112_v13  ;;  %v4078_v56 = vpop.f32.mrf.mxu0  ;;  %v4097_v25 = vpop.f32.mrf.mxu1 }
 0x420   : > { %v4079_v32 = vadd.f32 %v4078_v56, %v2919_v50  ;;  %v10500_v49 = vadd.f32 %v10470_v46, %v4513_v18 }
 0x421   : > { %v6739_v62 = vmul.f32 -1.442695, %v4131_v39  ;;  %v10540_v39 = vperm.slane %v10121_v47, 4 }
 0x422   : > { %v4098_v36 = vadd.f32 %v4097_v25, %v4079_v32  ;;  %v4518_v41 = vsel %vm10520_vm6, %v10470_v46, %v10500_v49 }
 0x423   : > { %7278 = vpow2.f32 %v6739_v62 }
 0x424   : > { %v4113_v16 = vpop.f32.mrf.mxu2  ;;  %v4132_v57 = vpop.f32.mrf.mxu3  ;;  %7280 = vrcp.f32 %v10468_v10 }
 0x425   : > { %v4114_v63 = vadd.f32 %v4113_v16, %v4095_v42  ;;  %7282 = vpow2.f32 %v6759_v38  ;;  %v4624_v42 = vand.u32 2147483647, %v10468_v10 }
 0x427   : > { %v4133_v34 = vadd.f32 %v4132_v57, %v4114_v63  ;;  %v4080_v54 = vpop.f32.mrf.mxu0  ;;  %v4099_v60 = vpop.f32.mrf.mxu1 }
 0x428   : > { %v4081_v27 = vadd.f32 %v4080_v54, %v2919_v50  ;;  %v4519_v50 = vand.u32 2147483647, %v10464_v14 }
 0x429   : > { %v7279_v52 = vpop.eup %7278  ;;  %v6746_v0 = vmul.f32 -1.442695, %v4133_v34 }
 0x42a   : > { %v10475_v58 = vadd.f32 1.0, %v7279_v52  ;;  %v10480_v7 = vpop.eup %7280  ;;  %v4100_v1 = vadd.f32 %v4099_v60, %v4081_v27  ;;  %vm10510_vm5 = vcmp.eq.f32.partialorder %v4519_v50, 8.507059e+37 }
 0x42b   : > { %7284 = vpow2.f32 %v6746_v0  ;;  %v7283_v21 = vpop.eup %7282  ;;  %v4616_v53 = vmul.f32 %v10480_v7, %v10468_v10  ;;  %vm4621_vm9 = vweird.f32 %v10480_v7 }
 0x42c   : > { %7286 = vrcp.f32 %v10475_v58  ;;  %v4116_v4 = vpop.f32.mrf.mxu2  ;;  %v4135_v6 = vpop.f32.mrf.mxu3  ;;  %v10502_v26 = vadd.f32 1.0, %v7283_v21  ;;  %v4536_v44 = vand.u32 2147483648, %v10475_v58  ;;  %v4534_v14 = vand.u32 2147483647, %v10475_v58 }
 0x42d   : > { %v4117_v37 = vadd.f32 %v4116_v4, %v4098_v36  ;;  %7288 = vrcp.f32 %v10477_v3  ;;  %v4617_v8 = vsub.f32 1.0, %v4616_v53  ;;  %vm4530_vm8 = vweird.f32 %v10475_v58 }
 0x42e   : > { %v4537_v16 = vor.u32 1.1754944e-38, %v4536_v44  ;;  %vm10561_vm11 = vcmp.eq.f32.partialorder %v4534_v14, 8.507059e+37 }
 0x42f   : > { %v4136_v29 = vadd.f32 %v4135_v6, %v4117_v37  ;;  %v10482_v59 = vpop.f32.mrf.mxu0  ;;  %v10484_v20 = vpop.f32.mrf.mxu1  ;;  %v4618_v11 = vmul.f32 %v10480_v7, %v4617_v8 }
 0x431   : > { %v7285_v2 = vpop.eup %7284  ;;  %v6753_v23 = vmul.f32 -1.442695, %v4136_v29 }
 0x432   : > { %v10490_v9 = vpop.eup %7286  ;;  %v10494_v17 = vadd.f32 1.0, %v7285_v2 }
 0x433   : > { %v4526_v15 = vmul.f32 %v10490_v9, %v10475_v58  ;;  %7290 = vpow2.f32 %v6753_v23  ;;  %v10507_v33 = vpop.eup %7288  ;;  %vm4531_vm7 = vweird.f32 %v10490_v9 }
 0x434   : > { %7292 = vrcp.f32 %v10494_v17  ;;  %v4118_v19 = vpop.f32.mrf.mxu2  ;;  %v4137_v51 = vpop.f32.mrf.mxu3  ;;  %v4721_v25 = vmul.f32 %v10507_v33, %v10477_v3  ;;  %vm10552_vm10 = vmor %vm4530_vm8, %vm4531_vm7 }
 0x435   : > { %v4527_v55 = vsub.f32 1.0, %v4526_v15  ;;  %v4119_v28 = vadd.f32 %v4118_v19, %v4100_v1  ;;  %7294 = vrcp.f32 %v10502_v26 }
 0x437   : > { %v4528_v35 = vmul.f32 %v10490_v9, %v4527_v55  ;;  %v4138_v30 = vadd.f32 %v4137_v51, %v4119_v28  ;;  %v10527_v13 = vpop.f32.mrf.mxu0  ;;  %v10529_v45 = vpop.f32.mrf.mxu1 }
 0x439   : > { %v7291_v56 = vpop.eup %7290  ;;  %v4529_v5 = vadd.f32 %v10490_v9, %v4528_v35  ;;  %v6760_v62 = vmul.f32 -1.442695, %v4138_v30 }
 0x43a   : > { %v10546_v48 = vpop.eup %7292  ;;  %v10556_v57 = vadd.f32 1.0, %v7291_v56 }
 0x43b   : > { %v4533_v46 = vsel %vm10552_vm10, %v10490_v9, %v4529_v5  ;;  %v4631_v38 = vmul.f32 %v10546_v48, %v10494_v17  ;;  %7296 = vpow2.f32 %v6760_v62 }
 0x43c   : > { %7378 = shalt.err (!%p7375_p3)
}
 0x43d   : > { %s7448_s15 = smov 128   ;;  %s7449_s22 = smov 8   ;;  %v4523_v32 = vsel %vm10510_vm5, %v4522_v24, %v4518_v41  ;;  %v4619_v34 = vadd.f32 %v10480_v7, %v4618_v11  ;;  %v4538_v54 = vsel %vm10561_vm11, %v4537_v16, %v4533_v46  ;;  %7298 = vrcp.f32 %v10556_v57  ;;  %v4187_v60 = vpop.f32.mrf.mxu2  ;;  %v4206_v31 = vpop.f32.mrf.mxu3 }
 0x43e   : > { %7181 = dma.vmem_to_hbm [thread:$0]  (%p7550_p5), %s10531_s13, 512, %s4972_s29, %s4939_s19, %s7448_s15, %s7448_s15, %s7449_s22   ;;  %v4722_v22 = vsub.f32 1.0, %v4721_v25  ;;  %v4901_v52 = vpack.c.bf16 %v4538_v54, %v4523_v32  ;;  %v4632_v0 = vsub.f32 1.0, %v4631_v38  ;;  %v10585_v58 = vpop.eup %7294  ;;  %vm4620_vm0 = vweird.f32 %v10468_v10 }
 0x43f   : > { %v4626_v36 = vand.u32 2147483648, %v10468_v10  ;;  %v4641_v61 = vand.u32 2147483648, %v10494_v17  ;;  %v4150_v4 = vadd.f32 %v10482_v59, %v10540_v39  ;;  %vm10594_vm12 = vmor %vm4620_vm0, %vm4621_vm9  ;;  %vm4636_vm13 = vweird.f32 %v10546_v48  ;;  %v10602_v29 = vpop.f32.mrf.mxu0  ;;  %v10604_v10 = vpop.f32.mrf.mxu1  ;;  %s7179_s29 = smul.u32 112, %s7533_s21  ;;  %s4952_s0 = sshll.u32 %s10387_s26, 4  ;;  %s4953_s0 = int_to_ptr.vmem [resolvable:$true] %s4952_s0 }
 0x440   : > { %4917 = vst [vmem:[%s10387_s26 + $0x8] sm:$0xff] %v4901_v52  ;;  %v4633_v37 = vmul.f32 %v10546_v48, %v4632_v0  ;;  %v4639_v27 = vand.u32 2147483647, %v10494_v17  ;;  %v4623_v59 = vsel %vm10594_vm12, %v10480_v7, %v4619_v34  ;;  %vm10609_vm14 = vcmp.eq.f32.partialorder %v4624_v42, 8.507059e+37  ;;  %s4934_s2 = scalar_lea.sflag [#allocation3], %s9000_s24  ;;  %s7399_s22 = scalar_lea.hbm %s10897_s10, 224 }
 0x441   : > { %v7297_v18 = vpop.eup %7296  ;;  %v4723_v53 = vmul.f32 %v10507_v33, %v4722_v22  ;;  %v4826_v2 = vmul.f32 %v10585_v58, %v10502_v26  ;;  %vm4635_vm15 = vweird.f32 %v10494_v17  ;;  %v4627_v50 = vor.u32 1.1754944e-38, %v4626_v36  ;;  %s4951_s16 = scalar_lea.hbm %s10897_s10, %s7179_s29 }
 0x442   : > { %v4634_v23 = vadd.f32 %v10546_v48, %v4633_v37  ;;  %vm4637_vm1 = vmor %vm4635_vm15, %vm4636_vm13  ;;  %v4642_v43 = vor.u32 1.1754944e-38, %v4641_v61  ;;  %v4169_v7 = vadd.f32 %v10484_v20, %v4150_v4  ;;  %v10619_v15 = vadd.f32 1.0, %v7297_v18  ;;  %s4954_s21 = sshll.u32 %s4951_s16, 4  ;;  %s4955_s21 = int_to_ptr.hbm [resolvable:$true] %s4954_s21 }
 0x443   : > { %v7299_v9 = vpop.eup %7298  ;;  %vm4726_vm2 = vweird.f32 %v10507_v33  ;;  %vm4640_vm3 = vcmp.eq.f32.partialorder %v4639_v27, 8.507059e+37  ;;  %v4628_v8 = vsel %vm10609_vm14, %v4627_v50, %v4623_v59  ;;  %v4724_v20 = vadd.f32 %v10507_v33, %v4723_v53  ;;  %s7393_s1 = sshra.s32 %s4955_s21, 4  ;;  %s7394_s1 = int_to_ptr.hbm [resolvable:$true] %s7393_s1 }
 0x444   : > { %v4638_v1 = vsel %vm4637_vm1, %v10546_v48, %v4634_v23  ;;  %v4736_v49 = vmul.f32 %v7299_v9, %v10556_v57  ;;  %7300 = vrcp.f32 %v10619_v15  ;;  %v4188_v19 = vadd.f32 %v4187_v60, %v4169_v7  ;;  %v10674_v23 = vld [vmem:[%s10896_s9] sm:$0x7f]  ;;  %s7395_s30 = scalar_lea.hbm %s7394_s1, 112  ;;  %p7400_p9 = scmp.lt.s32.totalorder %s7394_s1, %s10897_s10 }
 0x445   : > { %v4643_v17 = vsel %vm4640_vm3, %v4642_v43, %v4638_v1  ;;  %v4189_v51 = vpop.f32.mrf.mxu2  ;;  %v4208_v55 = vpop.f32.mrf.mxu3  ;;  %v4827_v28 = vsub.f32 1.0, %v4826_v2  ;;  %vm4725_vm4 = vweird.f32 %v10477_v3  ;;  %v4731_v44 = vand.u32 2147483648, %v10477_v3  ;;  %p7396_p4 = scmp.ne.s32.totalorder %s7394_s1, %s7395_s30  ;;  %p7401_p10 = scmp.lt.s32.totalorder %s7399_s22, %s7395_s30 }
 0x446   : > { %v4905_v40 = vpack.c.bf16 %v4643_v17, %v4628_v8  ;;  %v4737_v24 = vsub.f32 1.0, %v4736_v49  ;;  %v4746_v12 = vand.u32 2147483648, %v10556_v57  ;;  %v4729_v35 = vand.u32 2147483647, %v10477_v3  ;;  %vm10640_vm6 = vmor %vm4725_vm4, %vm4726_vm2 }
 0x447   : > { %vm4741_vm5 = vweird.f32 %v7299_v9  ;;  %v4744_v30 = vand.u32 2147483647, %v10556_v57  ;;  %v10634_v41 = vpop.f32.mrf.mxu0  ;;  %v10636_v11 = vpop.f32.mrf.mxu1  ;;  %v4152_v25 = vadd.f32 %v10527_v13, %v10540_v39  ;;  %v4207_v5 = vadd.f32 %v4206_v31, %v4188_v19  ;;  %p7397_p7 = pnand %p7396_p4, %p7550_p5  ;;  %p7402_p11 = por %p7401_p10, %p7400_p9 }
 0x448   : > { %4922 = vst [vmem:[%s10387_s26 + $0x24] sm:$0xff] %v4905_v40  ;;  %v4738_v14 = vmul.f32 %v7299_v9, %v4737_v24  ;;  %v4728_v3 = vsel %vm10640_vm6, %v10507_v33, %v4724_v20  ;;  %v4828_v62 = vmul.f32 %v10585_v58, %v4827_v28  ;;  %vm4740_vm7 = vweird.f32 %v10556_v57 }
 0x449   : > { %v4732_v47 = vor.u32 1.1754944e-38, %v4731_v44  ;;  %vm4742_vm8 = vmor %vm4740_vm7, %vm4741_vm5  ;;  %v4747_v16 = vor.u32 1.1754944e-38, %v4746_v12  ;;  %vm4730_vm9 = vcmp.eq.f32.partialorder %v4729_v35, 8.507059e+37  ;;  %vm4745_vm10 = vcmp.eq.f32.partialorder %v4744_v30, 8.507059e+37  ;;  %p7398_p8 = pneg %p7397_p7 }
 0x44a   : > { %v4739_v48 = vadd.f32 %v7299_v9, %v4738_v14  ;;  %v7301_v42 = vpop.eup %7300  ;;  %v4171_v32 = vadd.f32 %v10529_v45, %v4152_v25  ;;  %v6740_v33 = vmul.f32 -1.442695, %v4207_v5  ;;  %v4829_v60 = vadd.f32 %v10585_v58, %v4828_v62 }
 0x44b   : > { %v4841_v63 = vmul.f32 %v7301_v42, %v10619_v15  ;;  %v4733_v13 = vsel %vm4730_vm9, %v4732_v47, %v4728_v3  ;;  %vm4831_vm11 = vweird.f32 %v10585_v58  ;;  %vm4830_vm0 = vweird.f32 %v10502_v26  ;;  %p7403_p12 = pnand %p7402_p11, %p7398_p8 }
 0x44c   : > { %v4743_v46 = vsel %vm4742_vm8, %v7299_v9, %v4739_v48  ;;  %v4836_v22 = vand.u32 2147483648, %v10502_v26  ;;  %v4851_v52 = vand.u32 2147483648, %v10619_v15  ;;  %v4190_v0 = vadd.f32 %v4189_v51, %v4171_v32  ;;  %vm10661_vm13 = vmor %vm4830_vm0, %vm4831_vm11 }
 0x44d   : > { %v4748_v38 = vsel %vm4745_vm10, %v4747_v16, %v4743_v46  ;;  %v4192_v34 = vpop.f32.mrf.mxu2  ;;  %v4211_v54 = vpop.f32.mrf.mxu3  ;;  %v4842_v31 = vsub.f32 1.0, %v4841_v63  ;;  %v4834_v36 = vand.u32 2147483647, %v10502_v26  ;;  %vm4846_vm12 = vweird.f32 %v7301_v42 }
 0x44e   : > { %v4909_v57 = vpack.c.bf16 %v4748_v38, %v4733_v13  ;;  %v4849_v61 = vand.u32 2147483647, %v10619_v15  ;;  %7302 = vpow2.f32 %v6740_v33  ;;  %v4155_v27 = vadd.f32 %v10602_v29, %v10540_v39 }
 0x44f   : > { %v4843_v45 = vmul.f32 %v7301_v42, %v4842_v31  ;;  %v4225_v4 = vpop.f32.mrf.mxu0  ;;  %v4244_v6 = vpop.f32.mrf.mxu1  ;;  %v4833_v59 = vsel %vm10661_vm13, %v10585_v58, %v4829_v60  ;;  %vm4845_vm14 = vweird.f32 %v10619_v15  ;;  %v4837_v21 = vor.u32 1.1754944e-38, %v4836_v22 }
 0x450   : > { %4926 = vst [vmem:[%s10387_s26 + $0x40] sm:$0xff] %v4909_v57  ;;  %vm4847_vm15 = vmor %vm4845_vm14, %vm4846_vm12  ;;  %v4852_v18 = vor.u32 1.1754944e-38, %v4851_v52  ;;  %v4209_v53 = vadd.f32 %v4208_v55, %v4190_v0  ;;  %vm4835_vm1 = vcmp.eq.f32.partialorder %v4834_v36, 8.507059e+37  ;;  %vm4850_vm2 = vcmp.eq.f32.partialorder %v4849_v61, 8.507059e+37 }
 0x451   : > { %v4844_v26 = vadd.f32 %v7301_v42, %v4843_v45  ;;  %v10677_v29 = vperm.slane %v10674_v23, 5  ;;  %v4838_v58 = vsel %vm4835_vm1, %v4837_v21, %v4833_v59  ;;  %v4174_v50 = vadd.f32 %v10604_v10, %v4155_v27 }
 0x452   : > { %v6747_v49 = vmul.f32 -1.442695, %v4209_v53  ;;  %v4157_v55 = vadd.f32 %v10634_v41, %v10540_v39 }
 0x453   : > { %v4848_v2 = vsel %vm4847_vm15, %v7301_v42, %v4844_v26  ;;  %v4193_v8 = vadd.f32 %v4192_v34, %v4174_v50  ;;  %v4226_v17 = vadd.f32 %v4225_v4, %v10677_v29 }
 0x454   : > { %v4853_v9 = vsel %vm4850_vm2, %v4852_v18, %v4848_v2  ;;  %v7303_v1 = vpop.eup %7302  ;;  %7304 = vpow2.f32 %v6747_v49  ;;  %v4176_v10 = vadd.f32 %v10636_v11, %v4157_v55 }
 0x455   : > { %v4194_v43 = vpop.f32.mrf.mxu2  ;;  %v4213_v7 = vpop.f32.mrf.mxu3  ;;  %v4913_v15 = vpack.c.bf16 %v4853_v9, %v4838_v58  ;;  %v10684_v20 = vadd.f32 1.0, %v7303_v1  ;;  %v4212_v28 = vadd.f32 %v4211_v54, %v4193_v8  ;;  %v4245_v40 = vadd.f32 %v4244_v6, %v4226_v17 }
 0x456   : > { %v4195_v14 = vadd.f32 %v4194_v43, %v4176_v10 }
 0x457   : > { %4930 = vst [vmem:[%s10387_s26 + $0x5c] sm:$0xff] %v4913_v15  ;;  %v4227_v19 = vpop.f32.mrf.mxu0  ;;  %v4246_v51 = vpop.f32.mrf.mxu1  ;;  %7306 = vrcp.f32 %v10684_v20  ;;  %v6754_v35 = vmul.f32 -1.442695, %v4212_v28  ;;  %v4549_v18 = vand.u32 2147483647, %v10684_v20  ;;  %v4551_v53 = vand.u32 2147483648, %v10684_v20 }
 0x458   : > { %v4228_v30 = vadd.f32 %v4227_v19, %v10677_v29  ;;  %v4214_v3 = vadd.f32 %v4213_v7, %v4195_v14  ;;  %v10717_v7 = vperm.slane %v10674_v23, 6  ;;  %vm4545_vm4 = vweird.f32 %v10684_v20 }
 0x459   : > { %7308 = vpow2.f32 %v6754_v35  ;;  %vm10729_vm6 = vcmp.eq.f32.partialorder %v4549_v18, 8.507059e+37  ;;  %v4552_v23 = vor.u32 1.1754944e-38, %v4551_v53 }
 0x45a   : > { %v7305_v39 = vpop.eup %7304  ;;  %v4247_v11 = vadd.f32 %v4246_v51, %v4228_v30  ;;  %v6761_v63 = vmul.f32 -1.442695, %v4214_v3 }
 0x45b   : > { %v10691_v48 = vadd.f32 1.0, %v7305_v39 }
 0x45d   : > { %v4263_v24 = vpop.f32.mrf.mxu2  ;;  %v4282_v44 = vpop.f32.mrf.mxu3  ;;  %v4654_v10 = vand.u32 2147483647, %v10691_v48  ;;  %vm4650_vm0 = vweird.f32 %v10691_v48 }
 0x45e   : > { %v4264_v12 = vadd.f32 %v4263_v24, %v4245_v40  ;;  %v10689_v62 = vpop.eup %7306 }
 0x45f   : > { %v4230_v25 = vpop.f32.mrf.mxu0  ;;  %v4249_v5 = vpop.f32.mrf.mxu1  ;;  %v4541_v46 = vmul.f32 %v10689_v62, %v10684_v20  ;;  %vm4546_vm3 = vweird.f32 %v10689_v62  ;;  %vm10758_vm12 = vcmp.eq.f32.partialorder %v4654_v10, 8.507059e+37 }
 0x460   : > { %v4283_v56 = vadd.f32 %v4282_v44, %v4264_v12  ;;  %v4231_v13 = vadd.f32 %v4230_v25, %v10677_v29  ;;  %v7309_v33 = vpop.eup %7308  ;;  %vm10725_vm5 = vmor %vm4545_vm4, %vm4546_vm3  ;;  %v4656_v25 = vand.u32 2147483648, %v10691_v48 }
 0x461   : > { %v4542_v57 = vsub.f32 1.0, %v4541_v46  ;;  %v10699_v22 = vadd.f32 1.0, %v7309_v33 }
 0x462   : > { %v6741_v41 = vmul.f32 -1.442695, %v4283_v56  ;;  %v4250_v52 = vadd.f32 %v4249_v5, %v4231_v13 }
 0x463   : > { %v4543_v4 = vmul.f32 %v10689_v62, %v4542_v57  ;;  %v4761_v18 = vand.u32 2147483648, %v10699_v22  ;;  %vm4755_vm4 = vweird.f32 %v10699_v22 }
 0x464   : > { %7310 = vpow2.f32 %v6741_v41 }
 0x465   : > { %v4265_v42 = vpop.f32.mrf.mxu2  ;;  %v4284_v47 = vpop.f32.mrf.mxu3  ;;  %7312 = vrcp.f32 %v10691_v48  ;;  %v4544_v9 = vadd.f32 %v10689_v62, %v4543_v4 }
 0x466   : > { %v4266_v16 = vadd.f32 %v4265_v42, %v4247_v11  ;;  %7314 = vpow2.f32 %v6761_v63 }
 0x467   : > { %v4232_v32 = vpop.f32.mrf.mxu0  ;;  %v4251_v60 = vpop.f32.mrf.mxu1  ;;  %v4548_v40 = vsel %vm10725_vm5, %v10689_v62, %v4544_v9 }
 0x468   : > { %v4285_v38 = vadd.f32 %v4284_v47, %v4266_v16  ;;  %v4233_v6 = vadd.f32 %v4232_v32, %v10677_v29  ;;  %v4553_v11 = vsel %vm10729_vm6, %v4552_v23, %v4548_v40 }
 0x46a   : > { %v7311_v34 = vpop.eup %7310  ;;  %v6748_v54 = vmul.f32 -1.442695, %v4285_v38  ;;  %v4252_v43 = vadd.f32 %v4251_v60, %v4233_v6 }
 0x46b   : > { %v10697_v31 = vadd.f32 1.0, %v7311_v34  ;;  %v10702_v45 = vpop.eup %7312 }
 0x46c   : > { %7316 = vpow2.f32 %v6748_v54  ;;  %v7315_v59 = vpop.eup %7314  ;;  %v4646_v26 = vmul.f32 %v10702_v45, %v10691_v48  ;;  %vm4651_vm8 = vweird.f32 %v10702_v45 }
 0x46d   : > { %7318 = vrcp.f32 %v10697_v31  ;;  %v4268_v0 = vpop.f32.mrf.mxu2  ;;  %v4287_v36 = vpop.f32.mrf.mxu3  ;;  %v10720_v49 = vadd.f32 1.0, %v7315_v59  ;;  %v4564_v24 = vand.u32 2147483647, %v10697_v31  ;;  %v4566_v44 = vand.u32 2147483648, %v10697_v31  ;;  %vm10766_vm13 = vmor %vm4650_vm0, %vm4651_vm8 }
 0x46e   : > { %v4269_v61 = vadd.f32 %v4268_v0, %v4250_v52  ;;  %7320 = vrcp.f32 %v10699_v22  ;;  %v4647_v1 = vsub.f32 1.0, %v4646_v26  ;;  %vm4560_vm9 = vweird.f32 %v10697_v31 }
 0x46f   : > { %v4301_v27 = vpop.f32.mrf.mxu0  ;;  %v4320_v15 = vpop.f32.mrf.mxu1  ;;  %vm4565_vm11 = vcmp.eq.f32.partialorder %v4564_v24, 8.507059e+37  ;;  %v4567_v42 = vor.u32 1.1754944e-38, %v4566_v44  ;;  %v4657_v0 = vor.u32 1.1754944e-38, %v4656_v25  ;;  %vm4860_vm0 = vweird.f32 %v10720_v49 }
 0x470   : > { %v4288_v37 = vadd.f32 %v4287_v36, %v4269_v61  ;;  %v4302_v35 = vadd.f32 %v4301_v27, %v10717_v7  ;;  %v4648_v56 = vmul.f32 %v10702_v45, %v4647_v1 }
 0x472   : > { %v7317_v21 = vpop.eup %7316  ;;  %v6755_v2 = vmul.f32 -1.442695, %v4288_v37  ;;  %v4321_v63 = vadd.f32 %v4320_v15, %v4302_v35  ;;  %v4649_v13 = vadd.f32 %v10702_v45, %v4648_v56 }
 0x473   : > { %v7319_v58 = vpop.eup %7318  ;;  %v10713_v50 = vadd.f32 1.0, %v7317_v21  ;;  %v4759_v21 = vand.u32 2147483647, %v10699_v22 }
 0x474   : > { %v4556_v29 = vmul.f32 %v7319_v58, %v10697_v31  ;;  %7322 = vpow2.f32 %v6755_v2  ;;  %v10723_v19 = vpop.eup %7320  ;;  %vm4561_vm7 = vweird.f32 %v7319_v58  ;;  %v4653_v59 = vsel %vm10766_vm13, %v10702_v45, %v4649_v13 }
 0x475   : > { %7324 = vrcp.f32 %v10713_v50  ;;  %v4270_v8 = vpop.f32.mrf.mxu2  ;;  %v4289_v17 = vpop.f32.mrf.mxu3  ;;  %v4751_v5 = vmul.f32 %v10723_v19, %v10699_v22  ;;  %vm4562_vm10 = vmor %vm4560_vm9, %vm4561_vm7  ;;  %v4669_v36 = vand.u32 2147483647, %v10713_v50  ;;  %v4671_v61 = vand.u32 2147483648, %v10713_v50 }
 0x476   : > { %v4557_v28 = vsub.f32 1.0, %v4556_v29  ;;  %v4271_v20 = vadd.f32 %v4270_v8, %v4252_v43  ;;  %7326 = vrcp.f32 %v10720_v49  ;;  %vm4665_vm15 = vweird.f32 %v10713_v50 }
 0x477   : > { %v4303_v30 = vpop.f32.mrf.mxu0  ;;  %v4752_v38 = vsub.f32 1.0, %v4751_v5  ;;  %v4322_v4 = vpop.f32.mrf.mxu1  ;;  %vm4756_vm1 = vweird.f32 %v10723_v19  ;;  %vm4670_vm3 = vcmp.eq.f32.partialorder %v4669_v36, 8.507059e+37  ;;  %v4672_v45 = vor.u32 1.1754944e-38, %v4671_v61 }
 0x478   : > { %v4558_v12 = vmul.f32 %v7319_v58, %v4557_v28  ;;  %v4290_v14 = vadd.f32 %v4289_v17, %v4271_v20  ;;  %v4304_v37 = vadd.f32 %v4303_v30, %v10717_v7  ;;  %vm10795_vm5 = vmor %vm4755_vm4, %vm4756_vm1  ;;  %vm10804_vm7 = vcmp.eq.f32.partialorder %v4759_v21, 8.507059e+37 }
 0x479   : > { %v4753_v26 = vmul.f32 %v10723_v19, %v4752_v38  ;;  %v4762_v5 = vor.u32 1.1754944e-38, %v4761_v18  ;;  %v4866_v36 = vand.u32 2147483648, %v10720_v49 }
 0x47a   : > { %v7323_v39 = vpop.eup %7322  ;;  %v4559_v41 = vadd.f32 %v7319_v58, %v4558_v12  ;;  %v6762_v3 = vmul.f32 -1.442695, %v4290_v14  ;;  %v4323_v17 = vadd.f32 %v4322_v4, %v4304_v37 }
 0x47b   : > { %v7325_v62 = vpop.eup %7324  ;;  %v10750_v47 = vadd.f32 1.0, %v7323_v39  ;;  %v4754_v51 = vadd.f32 %v10723_v19, %v4753_v26 }
 0x47c   : > { %v4563_v16 = vsel %vm4562_vm10, %v7319_v58, %v4559_v41  ;;  %v4661_v46 = vmul.f32 %v7325_v62, %v10713_v50  ;;  %7328 = vpow2.f32 %v6762_v3  ;;  %v10756_v31 = vpop.eup %7326  ;;  %vm4666_vm14 = vweird.f32 %v7325_v62 }
 0x47d   : > { %v4568_v32 = vsel %vm4565_vm11, %v4567_v42, %v4563_v16  ;;  %7330 = vrcp.f32 %v10750_v47  ;;  %v4339_v33 = vpop.f32.mrf.mxu2  ;;  %v4358_v34 = vpop.f32.mrf.mxu3  ;;  %v4856_v2 = vmul.f32 %v10756_v31, %v10720_v49  ;;  %vm4667_vm2 = vmor %vm4665_vm15, %vm4666_vm14  ;;  %v4658_v50 = vsel %vm10758_vm12, %v4657_v0, %v4653_v59 }
 0x47e   : > { %v4902_v54 = vpack.c.bf16 %v4568_v32, %v4553_v11  ;;  %v4662_v60 = vsub.f32 1.0, %v4661_v46  ;;  %v4340_v57 = vadd.f32 %v4339_v33, %v4321_v63  ;;  %v4774_v44 = vand.u32 2147483647, %v10750_v47 }
 0x47f   : > { %v4306_v29 = vpop.f32.mrf.mxu0  ;;  %v4857_v20 = vsub.f32 1.0, %v4856_v2  ;;  %v4776_v12 = vand.u32 2147483648, %v10750_v47  ;;  %v4758_v22 = vsel %vm10795_vm5, %v10723_v19, %v4754_v51  ;;  %v4325_v39 = vpop.f32.mrf.mxu1  ;;  %vm4770_vm8 = vweird.f32 %v10750_v47 }
 0x480   : > { %4918 = vst [vmem:[%s10387_s26 + $0x10] sm:$0xff] %v4902_v54  ;;  %v4663_v48 = vmul.f32 %v7325_v62, %v4662_v60  ;;  %v4359_v27 = vadd.f32 %v4358_v34, %v4340_v57  ;;  %v4307_v30 = vadd.f32 %v4306_v29, %v10717_v7  ;;  %v4864_v16 = vand.u32 2147483647, %v10720_v49 }
 0x481   : > { %v4858_v3 = vmul.f32 %v10756_v31, %v4857_v20  ;;  %vm4775_vm10 = vcmp.eq.f32.partialorder %v4774_v44, 8.507059e+37  ;;  %v4777_v46 = vor.u32 1.1754944e-38, %v4776_v12  ;;  %v4763_v33 = vsel %vm10804_vm7, %v4762_v5, %v4758_v22 }
 0x482   : > { %v7329_v53 = vpop.eup %7328  ;;  %v4664_v58 = vadd.f32 %v7325_v62, %v4663_v48  ;;  %v6742_v9 = vmul.f32 -1.442695, %v4359_v27  ;;  %v4326_v38 = vadd.f32 %v4325_v39, %v4307_v30  ;;  %vm4861_vm11 = vweird.f32 %v10756_v31 }
 0x483   : > { %v7331_v43 = vpop.eup %7330  ;;  %v10783_v15 = vadd.f32 1.0, %v7329_v53  ;;  %v4859_v60 = vadd.f32 %v10756_v31, %v4858_v3  ;;  %vm10827_vm13 = vmor %vm4860_vm0, %vm4861_vm11  ;;  %vm10831_vm14 = vcmp.eq.f32.partialorder %v4864_v16, 8.507059e+37  ;;  %v4867_v53 = vor.u32 1.1754944e-38, %v4866_v36 }
 0x484   : > { %v4668_v1 = vsel %vm4667_vm2, %v7325_v62, %v4664_v58  ;;  %v4766_v8 = vmul.f32 %v7331_v43, %v10750_v47  ;;  %7332 = vpow2.f32 %v6742_v9  ;;  %vm4771_vm6 = vweird.f32 %v7331_v43 }
 0x485   : > { %v4673_v55 = vsel %vm4670_vm3, %v4672_v45, %v4668_v1  ;;  %7334 = vrcp.f32 %v10783_v15  ;;  %v4341_v23 = vpop.f32.mrf.mxu2  ;;  %v4360_v28 = vpop.f32.mrf.mxu3  ;;  %vm4772_vm9 = vmor %vm4770_vm8, %vm4771_vm6  ;;  %v4879_v61 = vand.u32 2147483647, %v10783_v15  ;;  %v4881_v4 = vand.u32 2147483648, %v10783_v15 }
 0x486   : > { %v4906_v40 = vpack.c.bf16 %v4673_v55, %v4658_v50  ;;  %v4767_v10 = vsub.f32 1.0, %v4766_v8  ;;  %v4342_v24 = vadd.f32 %v4341_v23, %v4323_v17  ;;  %v4863_v26 = vsel %vm10827_vm13, %v10756_v31, %v4859_v60 }
 0x487   : > { %v4308_v32 = vpop.f32.mrf.mxu0  ;;  %vm4875_vm15 = vweird.f32 %v10783_v15  ;;  %vm4880_vm2 = vcmp.eq.f32.partialorder %v4879_v61, 8.507059e+37  ;;  %v4882_v2 = vor.u32 1.1754944e-38, %v4881_v4  ;;  %v4327_v9 = vpop.f32.mrf.mxu1  ;;  %v4868_v31 = vsel %vm10831_vm14, %v4867_v53, %v4863_v26 }
 0x488   : > { %4923 = vst [vmem:[%s10387_s26 + $0x2c] sm:$0xff] %v4906_v40  ;;  %v4768_v14 = vmul.f32 %v7331_v43, %v4767_v10  ;;  %v4361_v56 = vadd.f32 %v4360_v28, %v4342_v24  ;;  %v4309_v48 = vadd.f32 %v4308_v32, %v10717_v7  ;;  %vm4919_vm7 = vcmask 125952  }
 0x48a   : > { %v7333_v41 = vpop.eup %7332  ;;  %v4769_v62 = vadd.f32 %v7331_v43, %v4768_v14  ;;  %v6749_v11 = vmul.f32 -1.442695, %v4361_v56  ;;  %v4328_v45 = vadd.f32 %v4327_v9, %v4309_v48 }
 0x48b   : > { %v7335_v42 = vpop.eup %7334  ;;  %v10811_v19 = vadd.f32 1.0, %v7333_v41 }
 0x48c   : > { %v4773_v63 = vsel %vm4772_vm9, %v7331_v43, %v4769_v62  ;;  %v4871_v13 = vmul.f32 %v7335_v42, %v10783_v15  ;;  %7336 = vpow2.f32 %v6749_v11  ;;  %vm4876_vm12 = vweird.f32 %v7335_v42 }
 0x48d   : > { %v4778_v47 = vsel %vm4775_vm10, %v4777_v46, %v4773_v63  ;;  %7338 = vrcp.f32 %v10811_v19  ;;  %v4344_v34 = vpop.f32.mrf.mxu2  ;;  %v4363_v54 = vpop.f32.mrf.mxu3  ;;  %vm4877_vm1 = vmor %vm4875_vm15, %vm4876_vm12  ;;  %v4581_v51 = vand.u32 2147483648, %v10811_v19  ;;  %v4579_v28 = vand.u32 2147483647, %v10811_v19 }
 0x48e   : > { %v4910_v57 = vpack.c.bf16 %v4778_v47, %v4763_v33  ;;  %v4872_v52 = vsub.f32 1.0, %v4871_v13  ;;  %v4345_v0 = vadd.f32 %v4344_v34, %v4326_v38  ;;  %vm4575_vm4 = vweird.f32 %v10811_v19 }
 0x48f   : > { %v4582_v12 = vor.u32 1.1754944e-38, %v4581_v51  ;;  %vm4580_vm6 = vcmp.eq.f32.partialorder %v4579_v28, 8.507059e+37 }
 0x490   : > { %4927 = vst [vmem:[%s10387_s26 + $0x48] sm:$0xff] %v4910_v57  ;;  %v4873_v6 = vmul.f32 %v7335_v42, %v4872_v52  ;;  %v4364_v37 = vadd.f32 %v4363_v54, %v4345_v0 }
 0x492   : > { %v7337_v49 = vpop.eup %7336  ;;  %v4874_v21 = vadd.f32 %v7335_v42, %v4873_v6  ;;  %v6756_v7 = vmul.f32 -1.442695, %v4364_v37 }
 0x493   : > { %v7339_v18 = vpop.eup %7338  ;;  %v4465_v58 = vadd.f32 1.0, %v7337_v49 }
 0x494   : > { %v4878_v29 = vsel %vm4877_vm1, %v7335_v42, %v4874_v21  ;;  %v4571_v43 = vmul.f32 %v7339_v18, %v10811_v19  ;;  %7340 = vpow2.f32 %v6756_v7  ;;  %vm4576_vm3 = vweird.f32 %v7339_v18 }
 0x495   : > { %v4883_v1 = vsel %vm4880_vm2, %v4882_v2, %v4878_v29  ;;  %7342 = vrcp.f32 %v4465_v58  ;;  %v4346_v15 = vpop.f32.mrf.mxu2  ;;  %v4365_v55 = vpop.f32.mrf.mxu3  ;;  %vm4577_vm5 = vmor %vm4575_vm4, %vm4576_vm3  ;;  %v4686_v5 = vand.u32 2147483648, %v4465_v58  ;;  %v4684_v41 = vand.u32 2147483647, %v4465_v58 }
 0x496   : > { %v4914_v8 = vpack.c.bf16 %v4883_v1, %v4868_v31  ;;  %v4572_v17 = vsub.f32 1.0, %v4571_v43  ;;  %v4347_v50 = vadd.f32 %v4346_v15, %v4328_v45  ;;  %vm4680_vm9 = vweird.f32 %v4465_v58 }
 0x497   : > { %v4687_v42 = vor.u32 1.1754944e-38, %v4686_v5  ;;  %vm4685_vm11 = vcmp.eq.f32.partialorder %v4684_v41, 8.507059e+37 }
 0x498   : > { %4931 = vst [vmem:[%s10387_s26 + $0x64] sm:$0xff] %v4914_v8  ;;  %v4573_v23 = vmul.f32 %v7339_v18, %v4572_v17  ;;  %v4366_v20 = vadd.f32 %v4365_v55, %v4347_v50 }
 0x49a   : > { %v7341_v40 = vpop.eup %7340  ;;  %v4574_v10 = vadd.f32 %v7339_v18, %v4573_v23  ;;  %v6763_v24 = vmul.f32 -1.442695, %v4366_v20 }
 0x49b   : > { %v7343_v44 = vpop.eup %7342  ;;  %v4472_v35 = vadd.f32 1.0, %v7341_v40 }
 0x49c   : > { %v4578_v14 = vsel %vm4577_vm5, %v7339_v18, %v4574_v10  ;;  %v4676_v30 = vmul.f32 %v7343_v44, %v4465_v58  ;;  %7344 = vpow2.f32 %v6763_v24  ;;  %vm4681_vm8 = vweird.f32 %v7343_v44 }
 0x49d   : > { %v4583_v56 = vsel %vm4580_vm6, %v4582_v12, %v4578_v14  ;;  %7346 = vrcp.f32 %v4472_v35  ;;  %vm4682_vm10 = vmor %vm4680_vm9, %vm4681_vm8  ;;  %v4791_v32 = vand.u32 2147483648, %v4472_v35  ;;  %v4789_v47 = vand.u32 2147483647, %v4472_v35 }
 0x49e   : > { %v4903_v22 = vpack.c.bf16 %v4583_v56, %v4583_v56  ;;  %v4677_v25 = vsub.f32 1.0, %v4676_v30  ;;  %vm4785_vm12 = vweird.f32 %v4472_v35 }
 0x49f   : > { %v4792_v60 = vor.u32 1.1754944e-38, %v4791_v32  ;;  %vm4790_vm14 = vcmp.eq.f32.partialorder %v4789_v47, 8.507059e+37 }
 0x4a0   : > { %4920 = vst.msk [vmem:[%s10387_s26 + $0x18] sm:$0xf] %vm4919_vm7, %v4903_v22  ;;  %v4678_v39 = vmul.f32 %v7343_v44, %v4677_v25 }
 0x4a2   : > { %v7345_v3 = vpop.eup %7344  ;;  %v4679_v62 = vadd.f32 %v7343_v44, %v4678_v39 }
 0x4a3   : > { %v7347_v11 = vpop.eup %7346  ;;  %v4479_v16 = vadd.f32 1.0, %v7345_v3 }
 0x4a4   : > { %v4683_v46 = vsel %vm4682_vm10, %v7343_v44, %v4679_v62  ;;  %v4781_v19 = vmul.f32 %v7347_v11, %v4472_v35  ;;  %vm4786_vm0 = vweird.f32 %v7347_v11 }
 0x4a5   : > { %v4688_v63 = vsel %vm4685_vm11, %v4687_v42, %v4683_v46  ;;  %7348 = vrcp.f32 %v4479_v16  ;;  %vm4787_vm13 = vmor %vm4785_vm12, %vm4786_vm0  ;;  %v4896_v4 = vand.u32 2147483648, %v4479_v16  ;;  %v4894_v48 = vand.u32 2147483647, %v4479_v16 }
 0x4a6   : > { %v4907_v13 = vpack.c.bf16 %v4688_v63, %v4688_v63  ;;  %v4782_v38 = vsub.f32 1.0, %v4781_v19  ;;  %vm4890_vm1 = vweird.f32 %v4479_v16 }
 0x4a7   : > { %v4897_v27 = vor.u32 1.1754944e-38, %v4896_v4  ;;  %vm4895_vm3 = vcmp.eq.f32.partialorder %v4894_v48, 8.507059e+37 }
 0x4a8   : > { %4924 = vst.msk [vmem:[%s10387_s26 + $0x34] sm:$0xf] %vm4919_vm7, %v4907_v13  ;;  %v4783_v33 = vmul.f32 %v7347_v11, %v4782_v38 }
 0x4aa   : > { %v4784_v34 = vadd.f32 %v7347_v11, %v4783_v33 }
 0x4ab   : > { %v7349_v54 = vpop.eup %7348 }
 0x4ac   : > { %v4788_v57 = vsel %vm4787_vm13, %v7347_v11, %v4784_v34  ;;  %v4886_v52 = vmul.f32 %v7349_v54, %v4479_v16  ;;  %vm4891_vm15 = vweird.f32 %v7349_v54 }
 0x4ad   : > { %v4793_v0 = vsel %vm4790_vm14, %v4792_v60, %v4788_v57  ;;  %vm4892_vm2 = vmor %vm4890_vm1, %vm4891_vm15 }
 0x4ae   : > { %v4911_v36 = vpack.c.bf16 %v4793_v0, %v4793_v0  ;;  %v4887_v61 = vsub.f32 1.0, %v4886_v52 }
 0x4b0   : > { %4928 = vst.msk [vmem:[%s10387_s26 + $0x50] sm:$0xf] %vm4919_vm7, %v4911_v36  ;;  %v4888_v6 = vmul.f32 %v7349_v54, %v4887_v61 }
 0x4b2   : > { %v4889_v37 = vadd.f32 %v7349_v54, %v4888_v6 }
 0x4b4   : > { %v4893_v59 = vsel %vm4892_vm2, %v7349_v54, %v4889_v37 }
 0x4b5   : > { %v4898_v49 = vsel %vm4895_vm3, %v4897_v27, %v4893_v59 }
 0x4b6   : > { %v4915_v26 = vpack.c.bf16 %v4898_v49, %v4898_v49 }
 0x4b8   : > { %4932 = vst.msk [vmem:[%s10387_s26 + $0x6c] sm:$0xf] %vm4919_vm7, %v4915_v26 }
 0x4b9   : > { %7406 = shalt.err (!%p7403_p12)
}
 0x4ba   : > { %s7450_s24 = smov 448   ;;  %s7451_s26 = smov 28  }
 0x4bb   : > { %7180 = dma.vmem_to_hbm [thread:$0]  (%p7550_p5), %s4953_s0, 1792, %s4955_s21, %s4934_s2, %s7450_s24, %s7450_s24, %s7451_s26  }
 0x4bc PF: > { %p7191_p13 = scmp.ge.s32.totalorder %s7445_s20, 2  ;;  %s4986_s29 = sand.u32 1, %s7433_s17  }
 0x4bd   : > { %s4987_s19 = scalar_lea.sflag [#allocation3], %s4986_s29 }
 0x4be   : > { %p7185_p0 = pnand %p7191_p13, %p7554_p6 }
 0x4c0   : > { %p7186_p1 = pneg %p7185_p0 }
 0x4c2   : > { %7424 = dma.done.wait (%p7186_p1), %s4987_s19, 1792  }
 0x4c3   : > { %7426 = vsyncadd (%p7186_p1), %s4987_s19, 4294965504  ;;  %s4997_s12 = scalar_lea.sflag [#allocation5], %s4986_s29 }
 0x4c4   : > { %7428 = dma.done.wait (%p7186_p1), %s4997_s12, 512  }
 0x4c5   : > { %7430 = vsyncadd (%p7186_p1), %s4997_s12, 4294966784  ;;  %s10950_s16 = sld [smem:[#allocation8_spill]]  ;;  %p25_p5 = scmp.ge.s32.totalorder %s7537_s23, 4  }
 0x4c6   : > { %s10951_s19 = sld [smem:[#allocation9_spill]]  ;;  %s10952_s17 = smov %s7437_s18 }
 0x4c7   : > { %s10954_s20 = smov %s7537_s23  ;;  %27 = sbr.rel (!%p25_p5) target bundleno = 9 (0x9), region = 115 }
 0x4cb   : > { %s10953_s18 = smov %s10950_s16 }
 0x4cc   :  { %5003 = vsyncpa [#allocation3], 1 }
 0x4cd   :  { %5005 = vsyncpa [#allocation3 + $0x1], 1 }
 0x4ce   :  { %5006 = vsyncpa [#allocation5], 1 }
 0x4cf   :  { %5008 = vsyncpa [#allocation5 + $0x1], 1 }

// kernel: tpu_custom_call.1
= control target key start
LH: loop header
LB: loop body
LE: loop exit
PB: predicated region body
PF: predicated region fallthrough
CT: control target
= control target key end

     0   :  { %s10887_s0 = inlined_call_operand.vmem [shape: f32[64,784], index: 0, kind: input, shape index: {}]   ;;  %s10888_s1 = inlined_call_operand.vmem [shape: f32[64,32], index: 1, kind: input, shape index: {}]   ;;  %s10889_s2 = inlined_call_operand.vmem [shape: bf16[784,400], index: 2, kind: input, shape index: {}]   ;;  %s10890_s3 = inlined_call_operand.vmem [shape: f32[1,400], index: 3, kind: input, shape index: {}]   ;;  %s10891_s4 = inlined_call_operand.vmem [shape: bf16[400,128], index: 4, kind: input, shape index: {}]   ;;  %s10892_s5 = inlined_call_operand.vmem [shape: f32[1,128], index: 5, kind: input, shape index: {}]   ;;  %s10893_s6 = inlined_call_operand.vmem [shape: bf16[32,400], index: 6, kind: input, shape index: {}]   ;;  %s10894_s7 = inlined_call_operand.vmem [shape: f32[1,400], index: 7, kind: input, shape index: {}]   ;;  %s10895_s8 = inlined_call_operand.vmem [shape: bf16[400,784], index: 8, kind: input, shape index: {}]   ;;  %s10896_s9 = inlined_call_operand.vmem [shape: f32[1,784], index: 9, kind: input, shape index: {}]   ;;  %s10897_s10 = inlined_call_operand.hbm [shape: bf16[64,784], index: 10, kind: output, shape index: {0}]   ;;  %s10898_s11 = inlined_call_operand.hbm [shape: f32[64,128], index: 11, kind: output, shape index: {1}]  }
   0x1   :  { %10900 = sst [smem:[#allocation10_spill]] %s10887_s0 }
   0x2   :  { %10901 = sst [smem:[#allocation11_spill]] %s10888_s1 }
   0x3   :  { %10902 = sst [smem:[#allocation12_spill]] %s10889_s2 }
   0x4   :  { %17 = vsyncpa [#allocation3], 0 }
   0x5   :  { %19 = vsyncpa [#allocation3 + $0x1], 0 }
   0x6   :  { %20 = vsyncpa [#allocation5], 0 }
   0x7   :  { %22 = vsyncpa [#allocation5 + $0x1], 0  ;;  %s7512_s17 = smov 0   ;;  %s7514_s18 = smov 0  }
   0x8   :  { %s7516_s19 = smov 0   ;;  %s7518_s20 = smov 0  }
   0x9 LB: > { %10903 = sst [smem:[#allocation8_spill]] %s7441_s19  ;;  %s7533_s21 = sadd.s32 4294967295, %s7445_s20   ;;  %s7445_s20 = sphi %s7518_s20, %s10954_s20   ;;  %s7441_s19 = sphi %s7516_s19, %s10951_s19   ;;  %s7437_s18 = sphi %s7514_s18, %s10953_s18   ;;  %s7433_s17 = sphi %s7512_s17, %s10952_s17  }
   0xa   : > { %s5079_s22 = sadd.s32 4294967294, %s7445_s20   ;;  %s7537_s23 = sadd.s32 1, %s7445_s20  }
   0xb   : > { %s255_s24 = sadd.s32 1, %s7441_s19  ;;  %s252_s25 = ssub.s32 %s7445_s20, %s7537_s23 }
   0xc   : > { %p265_p0 = scmp.ne.s32.totalorder %s7441_s19, %s7437_s18  ;;  %p253_p1 = scmp.eq.s32.totalorder %s252_s25, 0 }
   0xd   : > { %p266_p2 = scmp.eq.s32.totalorder %s7533_s21, 1  ;;  %p271_p3 = scmp.ne.s32.totalorder %s7437_s18, %s7433_s17 }
   0xe   : > { %p272_p4 = scmp.eq.s32.totalorder %s5079_s22, 1  ;;  %p5082_p7 = scmp.ge.s32.totalorder %s7445_s20, 1 }
   0xf   : > { %s7548_s26 = scalar_select %p253_p1, %s7441_s19, %s255_s24  }
  0x10   : > { %p7550_p5 = por %p266_p2, %p265_p0  ;;  %p7554_p6 = por %p272_p4, %p271_p3 }
  0x11   : > { %10904 = sst [smem:[#allocation9_spill]] %s7548_s26  ;;  %p359_p8 = scmp.lt.s32.totalorder %s7445_s20, 3 }
  0x13   : > { %p360_p9 = pnand %p5082_p7, %p359_p8 }
  0x14   : > { %s10907_s2 = sld [smem:[#allocation12_spill]] (!%p360_p9)  ;;  %s5084_s26 = sshll.u32 (!%p360_p9), %s7533_s21, 2 }
  0x15   : > { %363 = sbr.rel (%p360_p9) target bundleno = 1212 (0x4bc), region = 60  ;;  %p411_p10 = scmp.lt.s32.totalorder (!%p360_p9), %s5084_s26, 7 }
  0x16   : > { %s10908_s0 = sld [smem:[#allocation10_spill]] (!%p360_p9)  ;;  %s9000_s24 = sand.u32 (!%p360_p9), 1, %s7437_s18  }
  0x17   : > { %s5083_s19 = sshll.u32 (!%p360_p9), %s9000_s24, 5  ;;  %s7447_s12 = smov (!%p360_p9), 64  }
  0x18   : > { %s9005_s29 = scalar_lea.vmem (!%p360_p9), [#allocation4], %s5083_s19  ;;  %s10909_s1 = sld [smem:[#allocation11_spill]] (!%p360_p9) }
  0x19   : > { %s7176_s14 = sshll.u32 (!%p360_p9), %s7533_s21, 5  ;;  %s4939_s19 = scalar_lea.sflag (!%p360_p9), [#allocation5], %s9000_s24 }
  0x1a   : > { %v5202_v0 = vld [vmem:[%s10907_s2 + $0xe0] sm:$0xf]  ;;  %v6802_v1 = vld [vmem:[%s10907_s2 + $0xec] sm:$0xf0]  ;;  %s10956_s26 = smov (!%p411_p10, %s5084_s26), 7  ;;  %vm1654_vm0 = vcmask 130048  }
  0x1b   : > { %v5330_v2 = vld [vmem:[%s10907_s2 + $0x1e0] sm:$0xf]  ;;  %v5203_v3 = vor.u32 %v6802_v1, %v5202_v0  ;;  %v6834_v4 = vld [vmem:[%s10907_s2 + $0x1ec] sm:$0xf0]  ;;  %s7178_s25 = smul.u32 56, %s10956_s26  ;;  %s5087_s13 = sshll.u32 %s10956_s26, 3 }
  0x1c   : > { %v5458_v5 = vld [vmem:[%s10907_s2 + $0x2e0] sm:$0xf]  ;;  %v6866_v6 = vld [vmem:[%s10907_s2 + $0x2ec] sm:$0xf0]  ;;  %v5331_v7 = vor.u32 %v6834_v4, %v5330_v2  ;;  %vm2607_vm1 = vcmask 261120  }
  0x1d   : > { %v5459_v8 = vor.u32 %v6866_v6, %v5458_v5  ;;  %v5586_v9 = vld [vmem:[%s10907_s2 + $0x3e0] sm:$0xf]  ;;  %v6898_v10 = vld [vmem:[%s10907_s2 + $0x3ec] sm:$0xf0]  ;;  %1661 = vmatpush.bf16.msra.mxu0 %v5203_v3  ;;  %s7774_s30 = scalar_lea.vmem %s10908_s0, %s7178_s25  ;;  %s4968_s25 = scalar_lea.hbm %s10898_s11, %s7176_s14 }
  0x1e   : > { %v5186_v11 = vld [vmem:[%s10907_s2 + $0xc0] sm:$0xf]  ;;  %v5587_v12 = vor.u32 %v6898_v10, %v5586_v9  ;;  %v6798_v13 = vld [vmem:[%s10907_s2 + $0xcc] sm:$0xf0]  ;;  %1680 = vmatpush.bf16.msra.mxu1 %v5331_v7  ;;  %s9077_s16 = scalar_lea.vmem %s10909_s1, %s5087_s13  ;;  %s4969_s13 = sshll.u32 %s9005_s29, 4  ;;  %s10531_s13 = int_to_ptr.vmem [resolvable:$true] %s4969_s13 }
  0x1f   : > { %v5314_v14 = vld [vmem:[%s10907_s2 + $0x1c0] sm:$0xf]  ;;  %v6830_v15 = vld [vmem:[%s10907_s2 + $0x1cc] sm:$0xf0]  ;;  %1699 = vmatpush.bf16.msra.mxu2 %v5459_v8  ;;  %v5187_v16 = vor.u32 %v6798_v13, %v5186_v11  ;;  %s7371_s1 = scalar_lea.hbm %s10898_s11, 64 }
  0x20   : > { %v5315_v17 = vor.u32 %v6830_v15, %v5314_v14  ;;  %v5442_v18 = vld [vmem:[%s10907_s2 + $0x2c0] sm:$0xf]  ;;  %v6862_v19 = vld [vmem:[%s10907_s2 + $0x2cc] sm:$0xf0]  ;;  %1718 = vmatpush.bf16.msra.mxu3 %v5587_v12 }
  0x21   : > { %v5570_v20 = vld [vmem:[%s10907_s2 + $0x3c0] sm:$0xf]  ;;  %v5443_v21 = vor.u32 %v6862_v19, %v5442_v18  ;;  %v6894_v22 = vld [vmem:[%s10907_s2 + $0x3cc] sm:$0xf0]  ;;  %1662 = vmatpush.bf16.msra.mxu0 %v5187_v16 }
  0x22   : > { %v5170_v23 = vld [vmem:[%s10907_s2 + $0xa0] sm:$0xf]  ;;  %v6794_v24 = vld [vmem:[%s10907_s2 + $0xac] sm:$0xf0]  ;;  %v5571_v25 = vor.u32 %v6894_v22, %v5570_v20  ;;  %1681 = vmatpush.bf16.msra.mxu1 %v5315_v17 }
  0x23   : > { %v5298_v26 = vld [vmem:[%s10907_s2 + $0x1a0] sm:$0xf]  ;;  %v6826_v27 = vld [vmem:[%s10907_s2 + $0x1ac] sm:$0xf0]  ;;  %v5171_v29 = vor.u32 %v6794_v24, %v5170_v23  ;;  %1700 = vmatpush.bf16.msra.mxu2 %v5443_v21 }
  0x24   : > { %v5426_v28 = vld [vmem:[%s10907_s2 + $0x2a0] sm:$0xf]  ;;  %v6858_v30 = vld [vmem:[%s10907_s2 + $0x2ac] sm:$0xf0]  ;;  %v5299_v33 = vor.u32 %v6826_v27, %v5298_v26  ;;  %1719 = vmatpush.bf16.msra.mxu3 %v5571_v25 }
  0x25   : > { %v5554_v31 = vld [vmem:[%s10907_s2 + $0x3a0] sm:$0xf]  ;;  %v6890_v32 = vld [vmem:[%s10907_s2 + $0x3ac] sm:$0xf0]  ;;  %v5427_v34 = vor.u32 %v6858_v30, %v5426_v28  ;;  %1663 = vmatpush.bf16.msra.mxu0 %v5171_v29 }
  0x26   : > { %v5154_v35 = vld [vmem:[%s10907_s2 + $0x80] sm:$0xf]  ;;  %v6790_v36 = vld [vmem:[%s10907_s2 + $0x8c] sm:$0xf0]  ;;  %v5555_v38 = vor.u32 %v6890_v32, %v5554_v31  ;;  %1682 = vmatpush.bf16.msra.mxu1 %v5299_v33 }
  0x27   : > { %v5282_v37 = vld [vmem:[%s10907_s2 + $0x180] sm:$0xf]  ;;  %v6822_v39 = vld [vmem:[%s10907_s2 + $0x18c] sm:$0xf0]  ;;  %v5155_v44 = vor.u32 %v6790_v36, %v5154_v35  ;;  %1701 = vmatpush.bf16.msra.mxu2 %v5427_v34 }
  0x28   : > { %v5410_v40 = vld [vmem:[%s10907_s2 + $0x280] sm:$0xf]  ;;  %v6854_v41 = vld [vmem:[%s10907_s2 + $0x28c] sm:$0xf0]  ;;  %v5283_v45 = vor.u32 %v6822_v39, %v5282_v37  ;;  %1720 = vmatpush.bf16.msra.mxu3 %v5555_v38  ;;  %v6800_v37 = vld [vmem:[%s10907_s2 + $0xe4] sm:$0xf] }
  0x29   : > { %v5538_v42 = vld [vmem:[%s10907_s2 + $0x380] sm:$0xf]  ;;  %v6886_v43 = vld [vmem:[%s10907_s2 + $0x38c] sm:$0xf0]  ;;  %v5411_v46 = vor.u32 %v6854_v41, %v5410_v40  ;;  %1664 = vmatpush.bf16.msra.mxu0 %v5155_v44  ;;  %v5204_v38 = vld [vmem:[%s10907_s2 + $0xf0] sm:$0xf0] }
  0x2a   : > { %v5138_v47 = vld [vmem:[%s10907_s2 + $0x60] sm:$0xf]  ;;  %v6786_v48 = vld [vmem:[%s10907_s2 + $0x6c] sm:$0xf0]  ;;  %v5539_v50 = vor.u32 %v6886_v43, %v5538_v42  ;;  %1683 = vmatpush.bf16.msra.mxu1 %v5283_v45  ;;  %v433_v41 = vld [vmem:[%s7774_s30 + $0x38] sm:$0xff] }
  0x2b   : > { %v5266_v49 = vld [vmem:[%s10907_s2 + $0x160] sm:$0xf]  ;;  %v6818_v51 = vld [vmem:[%s10907_s2 + $0x16c] sm:$0xf0]  ;;  %v5139_v56 = vor.u32 %v6786_v48, %v5138_v47  ;;  %1702 = vmatpush.bf16.msra.mxu2 %v5411_v46  ;;  %v427_v42 = vld [vmem:[%s7774_s30 + $0x8] sm:$0xff] }
  0x2c   : > { %v5394_v52 = vld [vmem:[%s10907_s2 + $0x260] sm:$0xf]  ;;  %v6850_v53 = vld [vmem:[%s10907_s2 + $0x26c] sm:$0xf0]  ;;  %v5267_v57 = vor.u32 %v6818_v51, %v5266_v49  ;;  %1721 = vmatpush.bf16.msra.mxu3 %v5539_v50  ;;  %v435_v48 = vld [vmem:[%s7774_s30 + $0x48] sm:$0xff] }
  0x2d   : > { %v5522_v54 = vld [vmem:[%s10907_s2 + $0x360] sm:$0xf]  ;;  %v6882_v55 = vld [vmem:[%s10907_s2 + $0x36c] sm:$0xf0]  ;;  %v5395_v58 = vor.u32 %v6850_v53, %v5394_v52  ;;  %1665 = vmatpush.bf16.msra.mxu0 %v5139_v56  ;;  %v429_v52 = vld [vmem:[%s7774_s30 + $0x18] sm:$0xff] }
  0x2e   : > { %v5122_v59 = vld [vmem:[%s10907_s2 + $0x40] sm:$0xf]  ;;  %v6782_v60 = vld [vmem:[%s10907_s2 + $0x4c] sm:$0xf0]  ;;  %v5523_v62 = vor.u32 %v6882_v55, %v5522_v54  ;;  %1684 = vmatpush.bf16.msra.mxu1 %v5267_v57  ;;  %v5207_v57 = vor.u32 %v6800_v37, %v5204_v38 }
  0x2f   : > { %v5250_v61 = vld [vmem:[%s10907_s2 + $0x140] sm:$0xf]  ;;  %v6814_v63 = vld [vmem:[%s10907_s2 + $0x14c] sm:$0xf0]  ;;  %v5123_v4 = vor.u32 %v6782_v60, %v5122_v59  ;;  %1703 = vmatpush.bf16.msra.mxu2 %v5395_v58 }
  0x30   : > { %v5378_v0 = vld [vmem:[%s10907_s2 + $0x240] sm:$0xf]  ;;  %v6846_v1 = vld [vmem:[%s10907_s2 + $0x24c] sm:$0xf0]  ;;  %v5251_v6 = vor.u32 %v6814_v63, %v5250_v61  ;;  %1722 = vmatpush.bf16.msra.mxu3 %v5523_v62  ;;  %v6796_v61 = vld [vmem:[%s10907_s2 + $0xc4] sm:$0xf] }
  0x31   : > { %v5506_v2 = vld [vmem:[%s10907_s2 + $0x340] sm:$0xf]  ;;  %v6878_v3 = vld [vmem:[%s10907_s2 + $0x34c] sm:$0xf0]  ;;  %v5379_v7 = vor.u32 %v6846_v1, %v5378_v0  ;;  %1666 = vmatpush.bf16.msra.mxu0 %v5123_v4  ;;  %v5188_v62 = vld [vmem:[%s10907_s2 + $0xd0] sm:$0xf0] }
  0x32   : > { %v5106_v5 = vld [vmem:[%s10907_s2 + $0x20] sm:$0xf]  ;;  %v6778_v8 = vld [vmem:[%s10907_s2 + $0x2c] sm:$0xf0]  ;;  %v5507_v11 = vor.u32 %v6878_v3, %v5506_v2  ;;  %1685 = vmatpush.bf16.msra.mxu1 %v5251_v6  ;;  %v5191_v2 = vor.u32 %v6796_v61, %v5188_v62  ;;  %v6792_v6 = vld [vmem:[%s10907_s2 + $0xa4] sm:$0xf] }
  0x33   : > { %v5234_v9 = vld [vmem:[%s10907_s2 + $0x120] sm:$0xf]  ;;  %v6810_v10 = vld [vmem:[%s10907_s2 + $0x12c] sm:$0xf0]  ;;  %v5107_v16 = vor.u32 %v6778_v8, %v5106_v5  ;;  %1704 = vmatpush.bf16.msra.mxu2 %v5379_v7  ;;  %v5172_v7 = vld [vmem:[%s10907_s2 + $0xb0] sm:$0xf0] }
  0x34   : > { %v5362_v12 = vld [vmem:[%s10907_s2 + $0x220] sm:$0xf]  ;;  %v6842_v13 = vld [vmem:[%s10907_s2 + $0x22c] sm:$0xf0]  ;;  %v5235_v20 = vor.u32 %v6810_v10, %v5234_v9  ;;  %1723 = vmatpush.bf16.msra.mxu3 %v5507_v11  ;;  %v6776_v62 = vld [vmem:[%s10907_s2 + $0x24] sm:$0xf] }
  0x35   : > { %v5490_v14 = vld [vmem:[%s10907_s2 + $0x320] sm:$0xf]  ;;  %v6874_v15 = vld [vmem:[%s10907_s2 + $0x32c] sm:$0xf0]  ;;  %v5363_v21 = vor.u32 %v6842_v13, %v5362_v12  ;;  %1667 = vmatpush.bf16.msra.mxu0 %v5107_v16  ;;  %v5175_v12 = vor.u32 %v6792_v6, %v5172_v7 }
  0x36   : > { %v5090_v17 = vld [vmem:[%s10907_s2] sm:$0xf]  ;;  %v6774_v18 = vld [vmem:[%s10907_s2 + $0xc] sm:$0xf0]  ;;  %v5491_v24 = vor.u32 %v6874_v15, %v5490_v14  ;;  %1686 = vmatpush.bf16.msra.mxu1 %v5235_v20  ;;  %v6788_v14 = vld [vmem:[%s10907_s2 + $0x84] sm:$0xf] }
  0x37   : > { %v5218_v19 = vld [vmem:[%s10907_s2 + $0x100] sm:$0xf]  ;;  %v6806_v22 = vld [vmem:[%s10907_s2 + $0x10c] sm:$0xf0]  ;;  %v5091_v30 = vor.u32 %v6774_v18, %v5090_v17  ;;  %1705 = vmatpush.bf16.msra.mxu2 %v5363_v21  ;;  %v5156_v15 = vld [vmem:[%s10907_s2 + $0x90] sm:$0xf0] }
  0x38   : > { %v5346_v23 = vld [vmem:[%s10907_s2 + $0x200] sm:$0xf]  ;;  %v6838_v25 = vld [vmem:[%s10907_s2 + $0x20c] sm:$0xf0]  ;;  %v5219_v34 = vor.u32 %v6806_v22, %v5218_v19  ;;  %1724 = vmatpush.bf16.msra.mxu3 %v5491_v24  ;;  %v447_v18 = vld [vmem:[%s7774_s30 + $0xa8] sm:$0xff] }
  0x39   : > { %v5474_v26 = vld [vmem:[%s10907_s2 + $0x300] sm:$0xf]  ;;  %v6870_v27 = vld [vmem:[%s10907_s2 + $0x30c] sm:$0xf0]  ;;  %v5347_v35 = vor.u32 %v6838_v25, %v5346_v23  ;;  %1668 = vmatpush.bf16.msra.mxu0 %v5091_v30  ;;  %v441_v19 = vld [vmem:[%s7774_s30 + $0x78] sm:$0xff] }
  0x3a   : > { %v5858_v28 = vld [vmem:[%s10907_s2 + $0x600] sm:$0xf]  ;;  %v6966_v29 = vld [vmem:[%s10907_s2 + $0x60c] sm:$0xf0]  ;;  %v5475_v39 = vor.u32 %v6870_v27, %v5474_v26  ;;  %1687 = vmatpush.bf16.msra.mxu1 %v5219_v34  ;;  %v449_v25 = vld [vmem:[%s7774_s30 + $0xb8] sm:$0xff]  ;;  %v5159_v27 = vor.u32 %v6788_v14, %v5156_v15 }
  0x3b   : > { %v5714_v31 = vld [vmem:[%s10907_s2 + $0x4e0] sm:$0xf]  ;;  %v6962_v33 = vld [vmem:[%s10907_s2 + $0x5ec] sm:$0xf0]  ;;  %v5859_v43 = vor.u32 %v6966_v29, %v5858_v28  ;;  %1706 = vmatpush.bf16.msra.mxu2 %v5347_v35  ;;  %v443_v26 = vld [vmem:[%s7774_s30 + $0x88] sm:$0xff] }
  0x3c   : > { %v5842_v32 = vld [vmem:[%s10907_s2 + $0x5e0] sm:$0xf]  ;;  %v6930_v36 = vld [vmem:[%s10907_s2 + $0x4ec] sm:$0xf0]  ;;  %1725 = vmatpush.bf16.msra.mxu3 %v5475_v39  ;;  %v5140_v34 = vld [vmem:[%s10907_s2 + $0x70] sm:$0xf0] }
  0x3d   : > { %v426_v40 = vld [vmem:[%s7774_s30] sm:$0xff]  ;;  %v428_v47 = vld [vmem:[%s7774_s30 + $0x10] sm:$0xff]  ;;  %v5843_v49 = vor.u32 %v6962_v33, %v5842_v32  ;;  %v5715_v56 = vor.u32 %v6930_v36, %v5714_v31 }
  0x3e   : > { %v5826_v44 = vld [vmem:[%s10907_s2 + $0x5c0] sm:$0xf]  ;;  %v7791_v45 = vpack.c.bf16 %v433_v41, %v426_v40  ;;  %v7798_v51 = vpack.c.bf16 %v435_v48, %v428_v47  ;;  %v436_v53 = vld [vmem:[%s7774_s30 + $0x50] sm:$0xff]  ;;  %v6784_v33 = vld [vmem:[%s10907_s2 + $0x64] sm:$0xf] }
  0x3f   : > { %v434_v46 = vld [vmem:[%s7774_s30 + $0x40] sm:$0xff]  ;;  %v6958_v54 = vld [vmem:[%s10907_s2 + $0x5cc] sm:$0xf0]  ;;  %v7805_v55 = vpack.c.bf16 %v436_v53, %v429_v52  ;;  %1782 = vmatpush.bf16.msrb.mxu2 %v5859_v43  ;;  %1756 = vmatpush.bf16.msrb.mxu1 %v5843_v49  ;;  %v5588_v40 = vld [vmem:[%s10907_s2 + $0x3f0] sm:$0xf0]  ;;  %v5143_v43 = vor.u32 %v6784_v33, %v5140_v34 }
  0x40   : > { %v7796_v50 = vpack.c.bf16 %v434_v46, %v427_v42  ;;  %v5698_v58 = vld [vmem:[%s10907_s2 + $0x4c0] sm:$0xf]  ;;  %v6926_v59 = vld [vmem:[%s10907_s2 + $0x4cc] sm:$0xf0]  ;;  %1669 = vmatmul.bf16.vlgmr.msra.gmra.mxu0 %v7791_v45  ;;  %v5827_v60 = vor.u32 %v6958_v54, %v5826_v44  ;;  %1707 = vmatmul.bf16.vlgmr.msra.gmra.mxu2 %v7798_v51  ;;  %v6896_v35 = vld [vmem:[%s10907_s2 + $0x3e4] sm:$0xf] }
  0x41   : > { %v5810_v63 = vld [vmem:[%s10907_s2 + $0x5a0] sm:$0xf]  ;;  %v6954_v0 = vld [vmem:[%s10907_s2 + $0x5ac] sm:$0xf0]  ;;  %1726 = vmatmul.bf16.vlgmr.msra.gmra.mxu3 %v7805_v55  ;;  %1737 = vmatpush.bf16.msrb.mxu0 %v5715_v56  ;;  %v5699_v1 = vor.u32 %v6926_v59, %v5698_v58  ;;  %v6780_v47 = vld [vmem:[%s10907_s2 + $0x44] sm:$0xf]  ;;  %v5591_v48 = vor.u32 %v6896_v35, %v5588_v40 }
  0x42   : > { %1688 = vmatmul.bf16.vlgmr.msra.gmra.mxu1 %v7796_v50  ;;  %1794 = vmatpush.bf16.msrb.mxu3 %v5207_v57  ;;  %v5682_v3 = vld [vmem:[%s10907_s2 + $0x4a0] sm:$0xf]  ;;  %v6922_v4 = vld [vmem:[%s10907_s2 + $0x4ac] sm:$0xf0]  ;;  %v5811_v5 = vor.u32 %v6954_v0, %v5810_v63  ;;  %v5124_v52 = vld [vmem:[%s10907_s2 + $0x50] sm:$0xf0] }
  0x43   : > { %1757 = vmatpush.bf16.msrb.mxu1 %v5827_v60  ;;  %v5794_v8 = vld [vmem:[%s10907_s2 + $0x580] sm:$0xf]  ;;  %v6950_v9 = vld [vmem:[%s10907_s2 + $0x58c] sm:$0xf0]  ;;  %v5683_v10 = vor.u32 %v6922_v4, %v5682_v3  ;;  %v6892_v53 = vld [vmem:[%s10907_s2 + $0x3c4] sm:$0xf]  ;;  %v5127_v59 = vor.u32 %v6780_v47, %v5124_v52  ;;  %1851 = vmatpush.bf16.msra.mxu2 %v5591_v48 }
  0x44   : > { %v5666_v11 = vld [vmem:[%s10907_s2 + $0x480] sm:$0xf]  ;;  %v6918_v13 = vld [vmem:[%s10907_s2 + $0x48c] sm:$0xf0]  ;;  %v5795_v16 = vor.u32 %v6950_v9, %v5794_v8  ;;  %v5572_v54 = vld [vmem:[%s10907_s2 + $0x3d0] sm:$0xf0] }
  0x45   : > { %1738 = vmatpush.bf16.msrb.mxu0 %v5699_v1  ;;  %v440_v17 = vld [vmem:[%s7774_s30 + $0x70] sm:$0xff]  ;;  %v5778_v21 = vld [vmem:[%s10907_s2 + $0x560] sm:$0xf]  ;;  %v5667_v23 = vor.u32 %v6918_v13, %v5666_v11  ;;  %v5575_v63 = vor.u32 %v6892_v53, %v5572_v54  ;;  %v6864_v8 = vld [vmem:[%s10907_s2 + $0x2e4] sm:$0xf] }
  0x46   : > { %1795 = vmatpush.bf16.msrb.mxu3 %v5191_v2  ;;  %v448_v20 = vld [vmem:[%s7774_s30 + $0xb0] sm:$0xff]  ;;  %v442_v24 = vld [vmem:[%s7774_s30 + $0x80] sm:$0xff]  ;;  %v7879_v31 = vpack.c.bf16 %v447_v18, %v440_v17  ;;  %v437_v17 = vld [vmem:[%s7774_s30 + $0x58] sm:$0xff] }
  0x47   : > { %1758 = vmatpush.bf16.msrb.mxu1 %v5811_v5  ;;  %v6946_v22 = vld [vmem:[%s10907_s2 + $0x56c] sm:$0xf0]  ;;  %v450_v28 = vld [vmem:[%s7774_s30 + $0xc0] sm:$0xff]  ;;  %v7890_v36 = vpack.c.bf16 %v448_v20, %v441_v19  ;;  %v7892_v37 = vpack.c.bf16 %v449_v25, %v442_v24  ;;  %v5108_v1 = vld [vmem:[%s10907_s2 + $0x30] sm:$0xf0]  ;;  %1852 = vmatpush.bf16.msra.mxu2 %v5575_v63 }
  0x48   : > { %v5650_v29 = vld [vmem:[%s10907_s2 + $0x460] sm:$0xf]  ;;  %v6914_v30 = vld [vmem:[%s10907_s2 + $0x46c] sm:$0xf0]  ;;  %v5779_v32 = vor.u32 %v6946_v22, %v5778_v21  ;;  %v7903_v41 = vpack.c.bf16 %v450_v28, %v443_v26  ;;  %v6888_v2 = vld [vmem:[%s10907_s2 + $0x3a4] sm:$0xf] }
  0x49   : > { %1739 = vmatpush.bf16.msrb.mxu0 %v5683_v10  ;;  %v5762_v38 = vld [vmem:[%s10907_s2 + $0x540] sm:$0xf]  ;;  %v6942_v39 = vld [vmem:[%s10907_s2 + $0x54c] sm:$0xf0]  ;;  %v5651_v42 = vor.u32 %v6914_v30, %v5650_v29  ;;  %v5556_v3 = vld [vmem:[%s10907_s2 + $0x3b0] sm:$0xf0]  ;;  %v5111_v10 = vor.u32 %v6776_v62, %v5108_v1 }
  0x4a   : > { %1796 = vmatpush.bf16.msrb.mxu3 %v5175_v12  ;;  %v5634_v44 = vld [vmem:[%s10907_s2 + $0x440] sm:$0xf]  ;;  %v6910_v46 = vld [vmem:[%s10907_s2 + $0x44c] sm:$0xf0]  ;;  %v5763_v49 = vor.u32 %v6942_v39, %v5762_v38  ;;  %v5460_v9 = vld [vmem:[%s10907_s2 + $0x2f0] sm:$0xf0]  ;;  %v5559_v14 = vor.u32 %v6888_v2, %v5556_v3 }
  0x4b   : > { %1759 = vmatpush.bf16.msrb.mxu1 %v5795_v16  ;;  %v5746_v56 = vld [vmem:[%s10907_s2 + $0x520] sm:$0xf]  ;;  %v6938_v57 = vld [vmem:[%s10907_s2 + $0x52c] sm:$0xf0]  ;;  %v5635_v58 = vor.u32 %v6910_v46, %v5634_v44  ;;  %v6772_v12 = vld [vmem:[%s10907_s2 + $0x4] sm:$0xf]  ;;  %v5463_v21 = vor.u32 %v6864_v8, %v5460_v9 }
  0x4c   : > { %v5618_v60 = vld [vmem:[%s10907_s2 + $0x420] sm:$0xf]  ;;  %v6906_v61 = vld [vmem:[%s10907_s2 + $0x42c] sm:$0xf0]  ;;  %v5747_v0 = vor.u32 %v6938_v57, %v5746_v56  ;;  %v5092_v13 = vld [vmem:[%s10907_s2 + $0x10] sm:$0xf0]  ;;  %1853 = vmatpush.bf16.msra.mxu2 %v5559_v14 }
  0x4d   : > { %1740 = vmatpush.bf16.msrb.mxu0 %v5667_v23  ;;  %v5730_v4 = vld [vmem:[%s10907_s2 + $0x500] sm:$0xf]  ;;  %v6934_v5 = vld [vmem:[%s10907_s2 + $0x50c] sm:$0xf0]  ;;  %v5619_v6 = vor.u32 %v6906_v61, %v5618_v60  ;;  %v6832_v18 = vld [vmem:[%s10907_s2 + $0x1e4] sm:$0xf]  ;;  %v5095_v29 = vor.u32 %v6772_v12, %v5092_v13 }
  0x4e   : > { %1797 = vmatpush.bf16.msrb.mxu3 %v5159_v27  ;;  %v5602_v7 = vld [vmem:[%s10907_s2 + $0x400] sm:$0xf]  ;;  %v6902_v11 = vld [vmem:[%s10907_s2 + $0x40c] sm:$0xf0]  ;;  %v5731_v15 = vor.u32 %v6934_v5, %v5730_v4  ;;  %v5332_v19 = vld [vmem:[%s10907_s2 + $0x1f0] sm:$0xf0] }
  0x4f   : > { %1760 = vmatpush.bf16.msrb.mxu1 %v5779_v32  ;;  %v430_v16 = vld [vmem:[%s7774_s30 + $0x20] sm:$0xff]  ;;  %v5716_v22 = vld [vmem:[%s10907_s2 + $0x4f0] sm:$0xf0]  ;;  %v5603_v25 = vor.u32 %v6902_v11, %v5602_v7  ;;  %v431_v26 = vld [vmem:[%s7774_s30 + $0x28] sm:$0xff]  ;;  %v5335_v32 = vor.u32 %v6832_v18, %v5332_v19 }
  0x50   : > { %1674 = vmatmul.bf16.gmra.mxu0 %v7879_v31  ;;  %1712 = vmatmul.bf16.gmra.mxu2 %v7892_v37  ;;  %v6928_v20 = vld [vmem:[%s10907_s2 + $0x4e4] sm:$0xf]  ;;  %v5540_v24 = vld [vmem:[%s10907_s2 + $0x390] sm:$0xf0]  ;;  %v439_v30 = vld [vmem:[%s7774_s30 + $0x68] sm:$0xff] }
  0x51   : > { %1731 = vmatmul.bf16.gmra.mxu3 %v7903_v41  ;;  %1741 = vmatpush.bf16.msrb.mxu0 %v5651_v42  ;;  %v6884_v23 = vld [vmem:[%s10907_s2 + $0x384] sm:$0xf]  ;;  %v432_v28 = vld [vmem:[%s7774_s30 + $0x30] sm:$0xff]  ;;  %v5719_v35 = vor.u32 %v6928_v20, %v5716_v22  ;;  %v451_v19 = vld [vmem:[%s7774_s30 + $0xc8] sm:$0xff] }
  0x52   : > { %1693 = vmatmul.bf16.gmra.mxu1 %v7890_v36  ;;  %1798 = vmatpush.bf16.msrb.mxu3 %v5143_v43  ;;  %v438_v27 = vld [vmem:[%s7774_s30 + $0x60] sm:$0xff]  ;;  %v5316_v34 = vld [vmem:[%s10907_s2 + $0x1d0] sm:$0xf0]  ;;  %v5543_v42 = vor.u32 %v6884_v23, %v5540_v24  ;;  %v8014_v43 = vpack.c.bf16 %v437_v17, %v430_v16  ;;  %v445_v20 = vld [vmem:[%s7774_s30 + $0x98] sm:$0xff] }
  0x53   : > { %1761 = vmatpush.bf16.msrb.mxu1 %v5763_v49  ;;  %v6828_v33 = vld [vmem:[%s10907_s2 + $0x1c4] sm:$0xf]  ;;  %v5444_v39 = vld [vmem:[%s10907_s2 + $0x2d0] sm:$0xf0]  ;;  %v8016_v44 = vpack.c.bf16 %v438_v27, %v431_v26  ;;  %v8027_v49 = vpack.c.bf16 %v439_v30, %v432_v28  ;;  %v453_v30 = vld [vmem:[%s7774_s30 + $0xd8] sm:$0xff] }
  0x54   : > { %v6860_v38 = vld [vmem:[%s10907_s2 + $0x2c4] sm:$0xf]  ;;  %v5700_v46 = vld [vmem:[%s10907_s2 + $0x4d0] sm:$0xf0]  ;;  %v5319_v52 = vor.u32 %v6828_v33, %v5316_v34  ;;  %1854 = vmatpush.bf16.msra.mxu2 %v5543_v42 }
  0x55   : > { %1742 = vmatpush.bf16.msrb.mxu0 %v5635_v58  ;;  %v6924_v40 = vld [vmem:[%s10907_s2 + $0x4c4] sm:$0xf]  ;;  %v5524_v48 = vld [vmem:[%s10907_s2 + $0x370] sm:$0xf0]  ;;  %v5447_v53 = vor.u32 %v6860_v38, %v5444_v39 }
  0x56   : > { %1799 = vmatpush.bf16.msrb.mxu3 %v5127_v59  ;;  %v6880_v47 = vld [vmem:[%s10907_s2 + $0x364] sm:$0xf]  ;;  %v5300_v56 = vld [vmem:[%s10907_s2 + $0x1b0] sm:$0xf0]  ;;  %v5703_v57 = vor.u32 %v6924_v40, %v5700_v46 }
  0x57   : > { %1762 = vmatpush.bf16.msrb.mxu1 %v5747_v0  ;;  %v6824_v54 = vld [vmem:[%s10907_s2 + $0x1a4] sm:$0xf]  ;;  %v5428_v59 = vld [vmem:[%s10907_s2 + $0x2b0] sm:$0xf0]  ;;  %v5527_v61 = vor.u32 %v6880_v47, %v5524_v48 }
  0x58   : > { %v6856_v58 = vld [vmem:[%s10907_s2 + $0x2a4] sm:$0xf]  ;;  %v5684_v62 = vld [vmem:[%s10907_s2 + $0x4b0] sm:$0xf0]  ;;  %v5303_v1 = vor.u32 %v6824_v54, %v5300_v56  ;;  %v6803_v54 = vld [vmem:[%s10907_s2 + $0xf4] sm:$0xf0] }
  0x59   : > { %1743 = vmatpush.bf16.msrb.mxu0 %v5619_v6  ;;  %v6920_v60 = vld [vmem:[%s10907_s2 + $0x4a4] sm:$0xf]  ;;  %v5508_v0 = vld [vmem:[%s10907_s2 + $0x350] sm:$0xf0]  ;;  %v5431_v2 = vor.u32 %v6856_v58, %v5428_v59  ;;  %1855 = vmatpush.bf16.msra.mxu2 %v5527_v61 }
  0x5a   : > { %1800 = vmatpush.bf16.msrb.mxu3 %v5111_v10  ;;  %v6876_v63 = vld [vmem:[%s10907_s2 + $0x344] sm:$0xf]  ;;  %v5284_v4 = vld [vmem:[%s10907_s2 + $0x190] sm:$0xf0]  ;;  %v5687_v5 = vor.u32 %v6920_v60, %v5684_v62 }
  0x5b   : > { %1763 = vmatpush.bf16.msrb.mxu1 %v5731_v15  ;;  %v6820_v3 = vld [vmem:[%s10907_s2 + $0x184] sm:$0xf]  ;;  %v5412_v7 = vld [vmem:[%s10907_s2 + $0x290] sm:$0xf0]  ;;  %v5511_v9 = vor.u32 %v6876_v63, %v5508_v0 }
  0x5c   : > { %v6852_v6 = vld [vmem:[%s10907_s2 + $0x284] sm:$0xf]  ;;  %v5668_v10 = vld [vmem:[%s10907_s2 + $0x490] sm:$0xf0]  ;;  %v5287_v13 = vor.u32 %v6820_v3, %v5284_v4  ;;  %v5194_v3 = vld [vmem:[%s10907_s2 + $0xc8] sm:$0xf] }
  0x5d   : > { %1744 = vmatpush.bf16.msrb.mxu0 %v5603_v25  ;;  %v6916_v8 = vld [vmem:[%s10907_s2 + $0x484] sm:$0xf]  ;;  %v5492_v12 = vld [vmem:[%s10907_s2 + $0x330] sm:$0xf0]  ;;  %v5415_v14 = vor.u32 %v6852_v6, %v5412_v7  ;;  %1856 = vmatpush.bf16.msra.mxu2 %v5511_v9  ;;  %v6799_v4 = vld [vmem:[%s10907_s2 + $0xd4] sm:$0xf0] }
  0x5e   : > { %1801 = vmatpush.bf16.msrb.mxu3 %v5095_v29  ;;  %v6872_v11 = vld [vmem:[%s10907_s2 + $0x324] sm:$0xf]  ;;  %v5268_v16 = vld [vmem:[%s10907_s2 + $0x170] sm:$0xf0]  ;;  %v5671_v17 = vor.u32 %v6916_v8, %v5668_v10 }
  0x5f   : > { %1832 = vmatpush.bf16.msra.mxu1 %v5463_v21  ;;  %v6816_v15 = vld [vmem:[%s10907_s2 + $0x164] sm:$0xf]  ;;  %v444_v18 = vld [vmem:[%s7774_s30 + $0x90] sm:$0xff]  ;;  %v5495_v24 = vor.u32 %v6872_v11, %v5492_v12 }
  0x60   : > { %1745 = vmatmul.bf16.vlgmr.msrb.gmra.mxu0 %v8014_v43  ;;  %5872 = vmatmul.msk.bf16.vlgmr.msrb.gmra.mxu2 %vm1654_vm0, %v8027_v49  ;;  %v6848_v21 = vld [vmem:[%s10907_s2 + $0x264] sm:$0xf]  ;;  %v5396_v22 = vld [vmem:[%s10907_s2 + $0x270] sm:$0xf0]  ;;  %v8127_v47 = vpack.c.bf16 %v451_v19, %v444_v18  ;;  %v6835_v18 = vld [vmem:[%s10907_s2 + $0x1f4] sm:$0xf0] }
  0x61   : > { %1813 = vmatpush.bf16.msra.mxu0 %v5335_v32  ;;  %1802 = vmatmul.bf16.vlgmr.msrb.gmra.mxu3 %v7791_v45  ;;  %v6912_v23 = vld [vmem:[%s10907_s2 + $0x464] sm:$0xf]  ;;  %v5652_v25 = vld [vmem:[%s10907_s2 + $0x470] sm:$0xf0]  ;;  %v5271_v32 = vor.u32 %v6816_v15, %v5268_v16  ;;  %v5399_v33 = vor.u32 %v6848_v21, %v5396_v22 }
  0x62   : > { %1870 = vmatpush.bf16.msra.mxu3 %v5719_v35  ;;  %1764 = vmatmul.bf16.vlgmr.msrb.gmra.mxu1 %v8016_v44  ;;  %v6868_v26 = vld [vmem:[%s10907_s2 + $0x304] sm:$0xf]  ;;  %v5476_v27 = vld [vmem:[%s10907_s2 + $0x310] sm:$0xf0]  ;;  %v5655_v39 = vor.u32 %v6912_v23, %v5652_v25  ;;  %v5178_v23 = vld [vmem:[%s10907_s2 + $0xa8] sm:$0xf] }
  0x63   : > { %1833 = vmatpush.bf16.msra.mxu1 %v5447_v53  ;;  %v452_v28 = vld [vmem:[%s7774_s30 + $0xd0] sm:$0xff]  ;;  %v446_v29 = vld [vmem:[%s7774_s30 + $0xa0] sm:$0xff]  ;;  %1857 = vmatpush.bf16.msra.mxu2 %v5495_v24  ;;  %v5479_v46 = vor.u32 %v6868_v26, %v5476_v27  ;;  %v5210_v53 = vld [vmem:[%s10907_s2 + $0xe8] sm:$0xf]  ;;  %s7177_s30 = smul.u32 112, %s9000_s24 }
  0x64   : > { %v6812_v34 = vld [vmem:[%s10907_s2 + $0x144] sm:$0xf]  ;;  %v5252_v35 = vld [vmem:[%s10907_s2 + $0x150] sm:$0xf0]  ;;  %v8129_v48 = vpack.c.bf16 %v452_v28, %v445_v20  ;;  %v8140_v56 = vpack.c.bf16 %v453_v30, %v446_v29  ;;  %v6795_v24 = vld [vmem:[%s10907_s2 + $0xb4] sm:$0xf0] }
  0x65   : > { %1814 = vmatpush.bf16.msra.mxu0 %v5319_v52  ;;  %v6844_v38 = vld [vmem:[%s10907_s2 + $0x244] sm:$0xf]  ;;  %v5380_v40 = vld [vmem:[%s10907_s2 + $0x250] sm:$0xf0]  ;;  %s10387_s26 = scalar_lea.vmem [#allocation2], %s7177_s30 }
  0x66   : > { %1871 = vmatpush.bf16.msra.mxu3 %v5703_v57  ;;  %v6908_v42 = vld [vmem:[%s10907_s2 + $0x444] sm:$0xf]  ;;  %v5636_v52 = vld [vmem:[%s10907_s2 + $0x450] sm:$0xf0]  ;;  %v5255_v57 = vor.u32 %v6812_v34, %v5252_v35  ;;  %v5383_v58 = vor.u32 %v6844_v38, %v5380_v40  ;;  %v6831_v35 = vld [vmem:[%s10907_s2 + $0x1d4] sm:$0xf0] }
  0x67   : > { %1834 = vmatpush.bf16.msra.mxu1 %v5431_v2  ;;  %v6808_v59 = vld [vmem:[%s10907_s2 + $0x124] sm:$0xf]  ;;  %v5236_v60 = vld [vmem:[%s10907_s2 + $0x130] sm:$0xf0]  ;;  %v5639_v61 = vor.u32 %v6908_v42, %v5636_v52  ;;  %1858 = vmatpush.bf16.msra.mxu2 %v5479_v46  ;;  %v5162_v38 = vld [vmem:[%s10907_s2 + $0x88] sm:$0xf] }
  0x68   : > { %v6840_v62 = vld [vmem:[%s10907_s2 + $0x224] sm:$0xf]  ;;  %v5364_v63 = vld [vmem:[%s10907_s2 + $0x230] sm:$0xf0]  ;;  %v5306_v52 = vld [vmem:[%s10907_s2 + $0x1a8] sm:$0xf] }
  0x69   : > { %1815 = vmatpush.bf16.msra.mxu0 %v5303_v1  ;;  %v6904_v0 = vld [vmem:[%s10907_s2 + $0x424] sm:$0xf]  ;;  %v5211_v1 = vor.u32 %v6803_v54, %v5210_v53  ;;  %v5620_v2 = vld [vmem:[%s10907_s2 + $0x430] sm:$0xf0]  ;;  %v5367_v6 = vor.u32 %v6840_v62, %v5364_v63  ;;  %v6827_v53 = vld [vmem:[%s10907_s2 + $0x1b4] sm:$0xf0] }
  0x6a   : > { %1872 = vmatpush.bf16.msra.mxu3 %v5687_v5  ;;  %v5239_v5 = vor.u32 %v6808_v59, %v5236_v60  ;;  %v6804_v7 = vld [vmem:[%s10907_s2 + $0x104] sm:$0xf]  ;;  %v5220_v8 = vld [vmem:[%s10907_s2 + $0x110] sm:$0xf0]  ;;  %v5623_v10 = vor.u32 %v6904_v0, %v5620_v2  ;;  %v5146_v59 = vld [vmem:[%s10907_s2 + $0x68] sm:$0xf] }
  0x6b   : > { %1835 = vmatpush.bf16.msra.mxu1 %v5415_v14  ;;  %v6836_v9 = vld [vmem:[%s10907_s2 + $0x204] sm:$0xf]  ;;  %v5348_v11 = vld [vmem:[%s10907_s2 + $0x210] sm:$0xf0]  ;;  %1927 = vmatpush.bf16.msrb.mxu2 %v5211_v1  ;;  %v5195_v14 = vor.u32 %v6799_v4, %v5194_v3  ;;  %v5223_v21 = vor.u32 %v6804_v7, %v5220_v8  ;;  %v6787_v60 = vld [vmem:[%s10907_s2 + $0x74] sm:$0xf0]  ;;  %v5307_v1 = vor.u32 %v6827_v53, %v5306_v52 }
  0x6c   : > { %v6900_v12 = vld [vmem:[%s10907_s2 + $0x404] sm:$0xf]  ;;  %v5844_v16 = vld [vmem:[%s10907_s2 + $0x5f0] sm:$0xf0]  ;;  %v5351_v22 = vor.u32 %v6836_v9, %v5348_v11  ;;  %v5594_v62 = vld [vmem:[%s10907_s2 + $0x3e8] sm:$0xf]  ;;  %v5147_v4 = vor.u32 %v6787_v60, %v5146_v59 }
  0x6d   : > { %1816 = vmatpush.bf16.msra.mxu0 %v5287_v13  ;;  %v5604_v13 = vld [vmem:[%s10907_s2 + $0x410] sm:$0xf0]  ;;  %v6960_v15 = vld [vmem:[%s10907_s2 + $0x5e4] sm:$0xf]  ;;  %v6899_v63 = vld [vmem:[%s10907_s2 + $0x3f4] sm:$0xf0] }
  0x6e   : > { %1873 = vmatpush.bf16.msra.mxu3 %v5671_v17  ;;  %v5338_v17 = vld [vmem:[%s10907_s2 + $0x1e8] sm:$0xf]  ;;  %v6964_v19 = vld [vmem:[%s10907_s2 + $0x604] sm:$0xf]  ;;  %v5860_v20 = vld [vmem:[%s10907_s2 + $0x610] sm:$0xf0]  ;;  %v5607_v25 = vor.u32 %v6900_v12, %v5604_v13  ;;  %v5847_v26 = vor.u32 %v6960_v15, %v5844_v16  ;;  %v5595_v0 = vor.u32 %v6899_v63, %v5594_v62 }
  0x6f   : > { %1836 = vmatpush.bf16.msra.mxu1 %v5399_v33  ;;  %1928 = vmatpush.bf16.msrb.mxu2 %v5195_v14  ;;  %v5339_v27 = vor.u32 %v6835_v18, %v5338_v17  ;;  %v5863_v28 = vor.u32 %v6964_v19, %v5860_v20  ;;  %v6956_v29 = vld [vmem:[%s10907_s2 + $0x5c4] sm:$0xf]  ;;  %v5828_v30 = vld [vmem:[%s10907_s2 + $0x5d0] sm:$0xf0]  ;;  %v5322_v33 = vld [vmem:[%s10907_s2 + $0x1c8] sm:$0xf] }
  0x70   : > { %1750 = vmatmul.bf16.gmra.mxu0 %v8127_v47  ;;  %5873 = vmatmul.msk.bf16.gmra.mxu2 %vm1654_vm0, %v8140_v56  ;;  %v5831_v34 = vor.u32 %v6956_v29, %v5828_v30  ;;  %v6952_v40 = vld [vmem:[%s10907_s2 + $0x5a4] sm:$0xf]  ;;  %v5812_v42 = vld [vmem:[%s10907_s2 + $0x5b0] sm:$0xf0]  ;;  %v5323_v46 = vor.u32 %v6831_v35, %v5322_v33  ;;  %v5290_v2 = vld [vmem:[%s10907_s2 + $0x188] sm:$0xf] }
  0x71   : > { %1817 = vmatpush.bf16.msra.mxu0 %v5271_v32  ;;  %1807 = vmatmul.bf16.gmra.mxu3 %v7879_v31  ;;  %v5179_v32 = vor.u32 %v6795_v24, %v5178_v23  ;;  %v6823_v3 = vld [vmem:[%s10907_s2 + $0x194] sm:$0xf0]  ;;  %v5578_v8 = vld [vmem:[%s10907_s2 + $0x3c8] sm:$0xf]  ;;  %v5780_v11 = vld [vmem:[%s10907_s2 + $0x570] sm:$0xf0] }
  0x72   : > { %1874 = vmatpush.bf16.msra.mxu3 %v5655_v39  ;;  %1769 = vmatmul.bf16.gmra.mxu1 %v8129_v48  ;;  %v6791_v39 = vld [vmem:[%s10907_s2 + $0x94] sm:$0xf0]  ;;  %v5562_v13 = vld [vmem:[%s10907_s2 + $0x3a8] sm:$0xf]  ;;  %v5291_v14 = vor.u32 %v6823_v3, %v5290_v2  ;;  %v6940_v20 = vld [vmem:[%s10907_s2 + $0x544] sm:$0xf] }
  0x73   : > { %1837 = vmatpush.bf16.msra.mxu1 %v5383_v58  ;;  %1929 = vmatpush.bf16.msrb.mxu2 %v5179_v32  ;;  %v5163_v54 = vor.u32 %v6791_v39, %v5162_v38  ;;  %v6948_v58 = vld [vmem:[%s10907_s2 + $0x584] sm:$0xf]  ;;  %v6783_v7 = vld [vmem:[%s10907_s2 + $0x54] sm:$0xf0]  ;;  %v5274_v15 = vld [vmem:[%s10907_s2 + $0x168] sm:$0xf] }
  0x74   : > { %v6895_v9 = vld [vmem:[%s10907_s2 + $0x3d4] sm:$0xf0]  ;;  %v5764_v24 = vld [vmem:[%s10907_s2 + $0x550] sm:$0xf0]  ;;  %v6936_v33 = vld [vmem:[%s10907_s2 + $0x524] sm:$0xf] }
  0x75   : > { %1818 = vmatpush.bf16.msra.mxu0 %v5255_v57  ;;  %v5815_v57 = vor.u32 %v6952_v40, %v5812_v42  ;;  %v5579_v12 = vor.u32 %v6895_v9, %v5578_v8  ;;  %v6819_v16 = vld [vmem:[%s10907_s2 + $0x174] sm:$0xf0]  ;;  %v5767_v32 = vor.u32 %v6940_v20, %v5764_v24  ;;  %v5748_v39 = vld [vmem:[%s10907_s2 + $0x530] sm:$0xf0]  ;;  %v5722_v40 = vld [vmem:[%s10907_s2 + $0x4e8] sm:$0xf] }
  0x76   : > { %1875 = vmatpush.bf16.msra.mxu3 %v5639_v61  ;;  %v5796_v61 = vld [vmem:[%s10907_s2 + $0x590] sm:$0xf0]  ;;  %v6891_v18 = vld [vmem:[%s10907_s2 + $0x3b4] sm:$0xf0]  ;;  %v5242_v52 = vld [vmem:[%s10907_s2 + $0x128] sm:$0xf] }
  0x77   : > { %1838 = vmatpush.bf16.msra.mxu1 %v5367_v6  ;;  %1930 = vmatpush.bf16.msrb.mxu2 %v5163_v54  ;;  %v5799_v6 = vor.u32 %v6948_v58, %v5796_v61  ;;  %v5563_v23 = vor.u32 %v6891_v18, %v5562_v13  ;;  %v6815_v29 = vld [vmem:[%s10907_s2 + $0x154] sm:$0xf0]  ;;  %v6932_v58 = vld [vmem:[%s10907_s2 + $0x504] sm:$0xf]  ;;  %v5732_v59 = vld [vmem:[%s10907_s2 + $0x510] sm:$0xf0] }
  0x78   : > { %v6775_v35 = vld [vmem:[%s10907_s2 + $0x14] sm:$0xf0]  ;;  %v5706_v61 = vld [vmem:[%s10907_s2 + $0x4c8] sm:$0xf] }
  0x79   : > { %1819 = vmatpush.bf16.msra.mxu0 %v5239_v5  ;;  %v5130_v5 = vld [vmem:[%s10907_s2 + $0x48] sm:$0xf]  ;;  %v6931_v42 = vld [vmem:[%s10907_s2 + $0x4f4] sm:$0xf0] }
  0x7a   : > { %1876 = vmatpush.bf16.msra.mxu3 %v5623_v10  ;;  %v6944_v10 = vld [vmem:[%s10907_s2 + $0x564] sm:$0xf]  ;;  %v5131_v17 = vor.u32 %v6783_v7, %v5130_v5  ;;  %v6811_v53 = vld [vmem:[%s10907_s2 + $0x134] sm:$0xf0]  ;;  %v5723_v60 = vor.u32 %v6931_v42, %v5722_v40  ;;  %v5530_v63 = vld [vmem:[%s10907_s2 + $0x368] sm:$0xf]  ;;  %v5735_v7 = vor.u32 %v6932_v58, %v5732_v59 }
  0x7b   : > { %1839 = vmatpush.bf16.msra.mxu1 %v5351_v22  ;;  %1931 = vmatpush.bf16.msrb.mxu2 %v5147_v4  ;;  %v5783_v19 = vor.u32 %v6944_v10, %v5780_v11  ;;  %v6779_v22 = vld [vmem:[%s10907_s2 + $0x34] sm:$0xf0]  ;;  %v5243_v4 = vor.u32 %v6811_v53, %v5242_v52  ;;  %v5226_v5 = vld [vmem:[%s10907_s2 + $0x108] sm:$0xf] }
  0x7c   : > { %v6927_v62 = vld [vmem:[%s10907_s2 + $0x4d4] sm:$0xf0]  ;;  %v5850_v8 = vld [vmem:[%s10907_s2 + $0x5e8] sm:$0xf] }
  0x7d   : > { %1820 = vmatpush.bf16.msra.mxu0 %v5223_v21  ;;  %v5114_v21 = vld [vmem:[%s10907_s2 + $0x28] sm:$0xf]  ;;  %v6867_v2 = vld [vmem:[%s10907_s2 + $0x2f4] sm:$0xf0]  ;;  %v5707_v9 = vor.u32 %v6927_v62, %v5706_v61  ;;  %v6801_v62 = vld [vmem:[%s10907_s2 + $0xec] sm:$0xf] }
  0x7e   : > { %1877 = vmatpush.bf16.msra.mxu3 %v5607_v25  ;;  %v5546_v25 = vld [vmem:[%s10907_s2 + $0x388] sm:$0xf]  ;;  %v5115_v30 = vor.u32 %v6779_v22, %v5114_v21  ;;  %v6879_v11 = vld [vmem:[%s10907_s2 + $0x354] sm:$0xf0] }
  0x7f   : > { %1915 = vmatpush.bf16.msrb.mxu1 %v5863_v28  ;;  %1932 = vmatpush.bf16.msrb.mxu2 %v5131_v17  ;;  %v5258_v28 = vld [vmem:[%s10907_s2 + $0x148] sm:$0xf]  ;;  %v6963_v13 = vld [vmem:[%s10907_s2 + $0x5f4] sm:$0xf0] }
  0x80   : > { %1821 = vmatmul.bf16.vlgmr.msra.gmra.mxu0 %v7796_v50  ;;  %1859 = vmatmul.bf16.vlgmr.msra.gmra.mxu2 %v7805_v55  ;;  %v5514_v10 = vld [vmem:[%s10907_s2 + $0x348] sm:$0xf]  ;;  %v6863_v18 = vld [vmem:[%s10907_s2 + $0x2d4] sm:$0xf0]  ;;  %v5851_v22 = vor.u32 %v6963_v13, %v5850_v8  ;;  %v5196_v13 = vld [vmem:[%s10907_s2 + $0xd8] sm:$0xf0] }
  0x81   : > { %1889 = vmatpush.bf16.msrb.mxu0 %v5847_v26  ;;  %1878 = vmatmul.bf16.vlgmr.msra.gmra.mxu3 %v8014_v43  ;;  %v6887_v26 = vld [vmem:[%s10907_s2 + $0x394] sm:$0xf0]  ;;  %v5450_v17 = vld [vmem:[%s10907_s2 + $0x2c8] sm:$0xf] }
  0x82   : > { %1946 = vmatpush.bf16.msrb.mxu3 %v5339_v27  ;;  %1840 = vmatmul.bf16.vlgmr.msra.gmra.mxu1 %v7798_v51  ;;  %v5275_v27 = vor.u32 %v6819_v16, %v5274_v15  ;;  %v5547_v38 = vor.u32 %v6887_v26, %v5546_v25  ;;  %v6923_v15 = vld [vmem:[%s10907_s2 + $0x4b4] sm:$0xf0]  ;;  %v5515_v16 = vor.u32 %v6879_v11, %v5514_v10  ;;  %v5658_v40 = vld [vmem:[%s10907_s2 + $0x468] sm:$0xf]  ;;  %v6797_v10 = vld [vmem:[%s10907_s2 + $0xcc] sm:$0xf] }
  0x83   : > { %1984 = vmatpush.bf16.msra.mxu1 %v5595_v0  ;;  %1933 = vmatpush.bf16.msrb.mxu2 %v5115_v30  ;;  %v6883_v0 = vld [vmem:[%s10907_s2 + $0x374] sm:$0xf0]  ;;  %v5451_v25 = vor.u32 %v6863_v18, %v5450_v17  ;;  %v5434_v30 = vld [vmem:[%s10907_s2 + $0x2a8] sm:$0xf] }
  0x84   : > { %v5531_v3 = vor.u32 %v6883_v0, %v5530_v63  ;;  %v6875_v21 = vld [vmem:[%s10907_s2 + $0x334] sm:$0xf0]  ;;  %v5418_v53 = vld [vmem:[%s10907_s2 + $0x288] sm:$0xf] }
  0x85   : > { %1890 = vmatpush.bf16.msrb.mxu0 %v5831_v34  ;;  %v5098_v34 = vld [vmem:[%s10907_s2 + $0x8] sm:$0xf]  ;;  %v6959_v26 = vld [vmem:[%s10907_s2 + $0x5d4] sm:$0xf0] }
  0x86   : > { %1947 = vmatpush.bf16.msrb.mxu3 %v5323_v46  ;;  %v5259_v46 = vor.u32 %v6815_v29, %v5258_v28  ;;  %v5099_v54 = vor.u32 %v6775_v35, %v5098_v34  ;;  %v6919_v28 = vld [vmem:[%s10907_s2 + $0x494] sm:$0xf0]  ;;  %v5818_v34 = vld [vmem:[%s10907_s2 + $0x5a8] sm:$0xf] }
  0x87   : > { %1985 = vmatpush.bf16.msra.mxu1 %v5579_v12  ;;  %v6955_v35 = vld [vmem:[%s10907_s2 + $0x5b4] sm:$0xf0]  ;;  %v5802_v59 = vld [vmem:[%s10907_s2 + $0x588] sm:$0xf] }
  0x88   : > { %1934 = vmatpush.bf16.msrb.mxu2 %v5099_v54  ;;  %v6915_v42 = vld [vmem:[%s10907_s2 + $0x474] sm:$0xf0]  ;;  %v5819_v58 = vor.u32 %v6955_v35, %v5818_v34  ;;  %v5642_v63 = vld [vmem:[%s10907_s2 + $0x448] sm:$0xf]  ;;  %v6833_v34 = vld [vmem:[%s10907_s2 + $0x1ec] sm:$0xf] }
  0x89   : > { %1891 = vmatpush.bf16.msrb.mxu0 %v5815_v57  ;;  %v5751_v57 = vor.u32 %v6936_v33, %v5748_v39  ;;  %v5482_v39 = vld [vmem:[%s10907_s2 + $0x308] sm:$0xf]  ;;  %v6855_v54 = vld [vmem:[%s10907_s2 + $0x294] sm:$0xf0]  ;;  %v5659_v61 = vor.u32 %v6915_v42, %v5658_v40  ;;  %v5340_v35 = vld [vmem:[%s10907_s2 + $0x1f8] sm:$0xf0] }
  0x8a   : > { %1948 = vmatpush.bf16.msrb.mxu3 %v5307_v1  ;;  %v5466_v1 = vld [vmem:[%s10907_s2 + $0x2e8] sm:$0xf]  ;;  %v6911_v0 = vld [vmem:[%s10907_s2 + $0x454] sm:$0xf0]  ;;  %v5164_v40 = vld [vmem:[%s10907_s2 + $0x98] sm:$0xf0] }
  0x8b   : > { %1986 = vmatpush.bf16.msra.mxu1 %v5563_v23  ;;  %v5467_v12 = vor.u32 %v6867_v2, %v5466_v1  ;;  %v5834_v23 = vld [vmem:[%s10907_s2 + $0x5c8] sm:$0xf]  ;;  %v5212_v1 = vld [vmem:[%s10907_s2 + $0xf8] sm:$0xf0]  ;;  %v6947_v8 = vld [vmem:[%s10907_s2 + $0x574] sm:$0xf0] }
  0x8c   : > { %2003 = vmatpush.bf16.msra.mxu2 %v5723_v60  ;;  %v5835_v33 = vor.u32 %v6959_v26, %v5834_v23  ;;  %v6951_v60 = vld [vmem:[%s10907_s2 + $0x594] sm:$0xf0]  ;;  %v5215_v2 = vor.u32 %v6801_v62, %v5212_v1  ;;  %v5626_v11 = vld [vmem:[%s10907_s2 + $0x428] sm:$0xf]  ;;  %v6865_v62 = vld [vmem:[%s10907_s2 + $0x2ec] sm:$0xf] }
  0x8d   : > { %1892 = vmatpush.bf16.msrb.mxu0 %v5799_v6  ;;  %v6807_v6 = vld [vmem:[%s10907_s2 + $0x114] sm:$0xf0]  ;;  %v5610_v23 = vld [vmem:[%s10907_s2 + $0x408] sm:$0xf]  ;;  %v5468_v1 = vld [vmem:[%s10907_s2 + $0x2f8] sm:$0xf0] }
  0x8e   : > { %1949 = vmatpush.bf16.msrb.mxu3 %v5291_v14  ;;  %v5690_v14 = vld [vmem:[%s10907_s2 + $0x4a8] sm:$0xf]  ;;  %v5227_v20 = vor.u32 %v6807_v6, %v5226_v5  ;;  %v6851_v5 = vld [vmem:[%s10907_s2 + $0x274] sm:$0xf0]  ;;  %v5803_v6 = vor.u32 %v6951_v60, %v5802_v59  ;;  %v6829_v59 = vld [vmem:[%s10907_s2 + $0x1cc] sm:$0xf] }
  0x8f   : > { %1987 = vmatpush.bf16.msra.mxu1 %v5547_v38  ;;  %v5691_v24 = vor.u32 %v6923_v15, %v5690_v14  ;;  %v5199_v14 = vor.u32 %v6797_v10, %v5196_v13  ;;  %v6847_v17 = vld [vmem:[%s10907_s2 + $0x254] sm:$0xf0]  ;;  %v5324_v60 = vld [vmem:[%s10907_s2 + $0x1d8] sm:$0xf0]  ;;  %v5471_v10 = vor.u32 %v6865_v62, %v5468_v1 }
  0x90   : > { %1826 = vmatmul.bf16.gmra.mxu0 %v7890_v36  ;;  %1864 = vmatmul.bf16.gmra.mxu2 %v7903_v41  ;;  %v5452_v13 = vld [vmem:[%s10907_s2 + $0x2d8] sm:$0xf0] }
  0x91   : > { %1893 = vmatpush.bf16.msrb.mxu0 %v5783_v19  ;;  %1883 = vmatmul.bf16.gmra.mxu3 %v8127_v47  ;;  %v5498_v19 = vld [vmem:[%s10907_s2 + $0x328] sm:$0xf] }
  0x92   : > { %1950 = vmatpush.bf16.msrb.mxu3 %v5275_v27  ;;  %1845 = vmatmul.bf16.gmra.mxu1 %v7892_v37  ;;  %v5674_v27 = vld [vmem:[%s10907_s2 + $0x488] sm:$0xf]  ;;  %v5499_v29 = vor.u32 %v6875_v21, %v5498_v19 }
  0x93   : > { %1988 = vmatpush.bf16.msra.mxu1 %v5531_v3  ;;  %2004 = vmatpush.bf16.msra.mxu2 %v5707_v9  ;;  %v5675_v38 = vor.u32 %v6919_v28, %v5674_v27  ;;  %v5419_v3 = vor.u32 %v6855_v54, %v5418_v53  ;;  %v5643_v9 = vor.u32 %v6911_v0, %v5642_v63  ;;  %v5770_v19 = vld [vmem:[%s10907_s2 + $0x548] sm:$0xf]  ;;  %v6967_v0 = vld [vmem:[%s10907_s2 + $0x614] sm:$0xf0] }
  0x94   : > { %v5370_v28 = vld [vmem:[%s10907_s2 + $0x228] sm:$0xf]  ;;  %v5343_v54 = vor.u32 %v6833_v34, %v5340_v35  ;;  %v6853_v35 = vld [vmem:[%s10907_s2 + $0x28c] sm:$0xf] }
  0x95   : > { %1894 = vmatpush.bf16.msrb.mxu0 %v5767_v32  ;;  %v6859_v32 = vld [vmem:[%s10907_s2 + $0x2b4] sm:$0xf0]  ;;  %v5738_v53 = vld [vmem:[%s10907_s2 + $0x508] sm:$0xf] }
  0x96   : > { %1951 = vmatpush.bf16.msrb.mxu3 %v5259_v46  ;;  %v6871_v46 = vld [vmem:[%s10907_s2 + $0x314] sm:$0xf0]  ;;  %v5435_v52 = vor.u32 %v6859_v32, %v5434_v30  ;;  %v5754_v32 = vld [vmem:[%s10907_s2 + $0x528] sm:$0xf] }
  0x97   : > { %1989 = vmatpush.bf16.msra.mxu1 %v5515_v16  ;;  %2005 = vmatpush.bf16.msra.mxu2 %v5691_v24  ;;  %v5386_v16 = vld [vmem:[%s10907_s2 + $0x248] sm:$0xf]  ;;  %v6903_v24 = vld [vmem:[%s10907_s2 + $0x414] sm:$0xf0] }
  0x98   : > { %v5387_v27 = vor.u32 %v6847_v17, %v5386_v16  ;;  %v5866_v63 = vld [vmem:[%s10907_s2 + $0x608] sm:$0xf]  ;;  %v8612_v16 = vld [vmem:[%s10890_s3] sm:$0xf] }
  0x99   : > { %1895 = vmatpush.bf16.msrb.mxu0 %v5751_v57  ;;  %v5483_v57 = vor.u32 %v6871_v46, %v5482_v39  ;;  %v6789_v39 = vld [vmem:[%s10907_s2 + $0x8c] sm:$0xf]  ;;  %v5354_v46 = vld [vmem:[%s10907_s2 + $0x208] sm:$0xf] }
  0x9a   : > { %1952 = vmatpush.bf16.msrb.mxu3 %v5243_v4  ;;  %v5402_v4 = vld [vmem:[%s10907_s2 + $0x268] sm:$0xf] }
  0x9b   : > { %1990 = vmatpush.bf16.msra.mxu1 %v5499_v29  ;;  %2006 = vmatpush.bf16.msra.mxu2 %v5675_v38  ;;  %v5403_v15 = vor.u32 %v6851_v5, %v5402_v4  ;;  %v6843_v29 = vld [vmem:[%s10907_s2 + $0x234] sm:$0xf0]  ;;  %v5327_v5 = vor.u32 %v6829_v59, %v5324_v60  ;;  %v6929_v60 = vld [vmem:[%s10907_s2 + $0x4ec] sm:$0xf] }
  0x9c   : > { %v6939_v38 = vld [vmem:[%s10907_s2 + $0x534] sm:$0xf0]  ;;  %v5371_v42 = vor.u32 %v6843_v29, %v5370_v28  ;;  %v6777_v29 = vld [vmem:[%s10907_s2 + $0x2c] sm:$0xf] }
  0x9d   : > { %1896 = vmatpush.bf16.msrb.mxu0 %v5735_v7  ;;  %v5786_v7 = vld [vmem:[%s10907_s2 + $0x568] sm:$0xf] }
  0x9e   : > { %1953 = vmatpush.bf16.msrb.mxu3 %v5227_v20  ;;  %v5787_v18 = vor.u32 %v6947_v8, %v5786_v7  ;;  %v6943_v20 = vld [vmem:[%s10907_s2 + $0x554] sm:$0xf0]  ;;  %v5867_v7 = vor.u32 %v6967_v0, %v5866_v63  ;;  %v6825_v8 = vld [vmem:[%s10907_s2 + $0x1ac] sm:$0xf]  ;;  %v5404_v0 = vld [vmem:[%s10907_s2 + $0x278] sm:$0xf0] }
  0x9f   : > { %1991 = vmatpush.bf16.msra.mxu1 %v5483_v57  ;;  %2007 = vmatpush.bf16.msra.mxu2 %v5659_v61  ;;  %v5771_v30 = vor.u32 %v6943_v20, %v5770_v19  ;;  %v5755_v57 = vor.u32 %v6939_v38, %v5754_v32  ;;  %v5167_v61 = vor.u32 %v6789_v39, %v5164_v40  ;;  %v5292_v19 = vld [vmem:[%s10907_s2 + $0x198] sm:$0xf0]  ;;  %v6849_v63 = vld [vmem:[%s10907_s2 + $0x26c] sm:$0xf] }
  0xa0   : > { %1897 = vmatmul.bf16.vlgmr.msrb.gmra.mxu0 %v8016_v44  ;;  %1935 = vmatmul.bf16.vlgmr.msrb.gmra.mxu2 %v7791_v45  ;;  %v5420_v38 = vld [vmem:[%s10907_s2 + $0x298] sm:$0xf0] }
  0xa1   : > { %1965 = vmatpush.bf16.msra.mxu0 %v5467_v12  ;;  %1954 = vmatmul.bf16.vlgmr.msrb.gmra.mxu3 %v7796_v50  ;;  %v6907_v12 = vld [vmem:[%s10907_s2 + $0x434] sm:$0xf0]  ;;  %v5423_v62 = vor.u32 %v6853_v35, %v5420_v38  ;;  %v6841_v35 = vld [vmem:[%s10907_s2 + $0x22c] sm:$0xf]  ;;  %v5372_v38 = vld [vmem:[%s10907_s2 + $0x238] sm:$0xf0] }
  0xa2   : > { %2022 = vmatpush.bf16.msra.mxu3 %v5851_v22  ;;  %5874 = vmatmul.msk.bf16.vlgmr.msrb.gmra.mxu1 %vm1654_vm0, %v8027_v49  ;;  %v5627_v21 = vor.u32 %v6907_v12, %v5626_v11  ;;  %v6793_v22 = vld [vmem:[%s10907_s2 + $0xac] sm:$0xf] }
  0xa3   : > { %2060 = vmatpush.bf16.msrb.mxu1 %v5215_v2  ;;  %2008 = vmatpush.bf16.msra.mxu2 %v5643_v9  ;;  %v6785_v2 = vld [vmem:[%s10907_s2 + $0x6c] sm:$0xf]  ;;  %v5308_v9 = vld [vmem:[%s10907_s2 + $0x1b8] sm:$0xf0] }
  0xa4   : > { %v6861_v11 = vld [vmem:[%s10907_s2 + $0x2cc] sm:$0xf]  ;;  %v5311_v17 = vor.u32 %v6825_v8, %v5308_v9 }
  0xa5   : > { %1966 = vmatpush.bf16.msra.mxu0 %v5451_v25  ;;  %v5180_v25 = vld [vmem:[%s10907_s2 + $0xb8] sm:$0xf0]  ;;  %v5455_v20 = vor.u32 %v6861_v11, %v5452_v13 }
  0xa6   : > { %2023 = vmatpush.bf16.msra.mxu3 %v5835_v33  ;;  %v5183_v26 = vor.u32 %v6793_v22, %v5180_v25  ;;  %v5611_v33 = vor.u32 %v6903_v24, %v5610_v23  ;;  %v8621_v22 = vperm.slane %v8612_v16, 0  ;;  %v6857_v23 = vld [vmem:[%s10907_s2 + $0x2ac] sm:$0xf]  ;;  %v5436_v25 = vld [vmem:[%s10907_s2 + $0x2b8] sm:$0xf0] }
  0xa7   : > { %2061 = vmatpush.bf16.msrb.mxu1 %v5199_v14  ;;  %2009 = vmatpush.bf16.msra.mxu2 %v5627_v21  ;;  %v6781_v14 = vld [vmem:[%s10907_s2 + $0x4c] sm:$0xf]  ;;  %v5439_v34 = vor.u32 %v6857_v23, %v5436_v25  ;;  %v5580_v11 = vld [vmem:[%s10907_s2 + $0x3d8] sm:$0xf0] }
  0xa8   : > { %v6805_v25 = vld [vmem:[%s10907_s2 + $0x10c] sm:$0xf] }
  0xa9   : > { %1967 = vmatpush.bf16.msra.mxu0 %v5435_v52  ;;  %v6839_v52 = vld [vmem:[%s10907_s2 + $0x214] sm:$0xf0] }
  0xaa   : > { %2024 = vmatpush.bf16.msra.mxu3 %v5819_v58  ;;  %v6935_v58 = vld [vmem:[%s10907_s2 + $0x514] sm:$0xf0]  ;;  %v5355_v4 = vor.u32 %v6839_v52, %v5354_v46  ;;  %v5260_v46 = vld [vmem:[%s10907_s2 + $0x158] sm:$0xf0] }
  0xab   : > { %2062 = vmatpush.bf16.msrb.mxu1 %v5183_v26  ;;  %2010 = vmatpush.bf16.msra.mxu2 %v5611_v33  ;;  %v6817_v26 = vld [vmem:[%s10907_s2 + $0x16c] sm:$0xf] }
  0xad   : > { %1968 = vmatpush.bf16.msra.mxu0 %v5419_v3  ;;  %v5148_v3 = vld [vmem:[%s10907_s2 + $0x78] sm:$0xf0] }
  0xae   : > { %2025 = vmatpush.bf16.msra.mxu3 %v5803_v6  ;;  %v5739_v6 = vor.u32 %v6935_v58, %v5738_v53  ;;  %v5151_v12 = vor.u32 %v6785_v2, %v5148_v3  ;;  %v6897_v53 = vld [vmem:[%s10907_s2 + $0x3ec] sm:$0xf]  ;;  %v5596_v58 = vld [vmem:[%s10907_s2 + $0x3f8] sm:$0xf0] }
  0xaf   : > { %2079 = vmatpush.bf16.msrb.mxu2 %v5343_v54  ;;  %2063 = vmatpush.bf16.msrb.mxu1 %v5167_v61  ;;  %v6773_v54 = vld [vmem:[%s10907_s2 + $0xc] sm:$0xf]  ;;  %v5599_v59 = vor.u32 %v6897_v53, %v5596_v58  ;;  %v5724_v61 = vld [vmem:[%s10907_s2 + $0x4f8] sm:$0xf0] }
  0xb0   : > { %1902 = vmatmul.bf16.gmra.mxu0 %v8129_v48  ;;  %1940 = vmatmul.bf16.gmra.mxu2 %v7879_v31  ;;  %v6809_v3 = vld [vmem:[%s10907_s2 + $0x12c] sm:$0xf] }
  0xb1   : > { %1969 = vmatpush.bf16.msra.mxu0 %v5403_v15  ;;  %1959 = vmatmul.bf16.gmra.mxu3 %v7890_v36  ;;  %v5132_v15 = vld [vmem:[%s10907_s2 + $0x58] sm:$0xf0]  ;;  %v6885_v53 = vld [vmem:[%s10907_s2 + $0x38c] sm:$0xf] }
  0xb2   : > { %2026 = vmatpush.bf16.msra.mxu3 %v5787_v18  ;;  %5875 = vmatmul.msk.bf16.gmra.mxu1 %vm1654_vm0, %v8140_v56  ;;  %v6821_v18 = vld [vmem:[%s10907_s2 + $0x18c] sm:$0xf]  ;;  %v5135_v21 = vor.u32 %v6781_v14, %v5132_v15 }
  0xb3   : > { %2080 = vmatpush.bf16.msrb.mxu2 %v5327_v5  ;;  %2064 = vmatpush.bf16.msrb.mxu1 %v5151_v12  ;;  %v5295_v24 = vor.u32 %v6821_v18, %v5292_v19  ;;  %v6925_v15 = vld [vmem:[%s10907_s2 + $0x4cc] sm:$0xf]  ;;  %v5407_v19 = vor.u32 %v6849_v63, %v5404_v0 }
  0xb4   : > { %v6837_v0 = vld [vmem:[%s10907_s2 + $0x20c] sm:$0xf] }
  0xb5   : > { %1970 = vmatpush.bf16.msra.mxu0 %v5387_v27  ;;  %v5276_v27 = vld [vmem:[%s10907_s2 + $0x178] sm:$0xf0] }
  0xb6   : > { %2027 = vmatpush.bf16.msra.mxu3 %v5771_v30  ;;  %v5116_v30 = vld [vmem:[%s10907_s2 + $0x38] sm:$0xf0]  ;;  %v5279_v39 = vor.u32 %v6817_v26, %v5276_v27  ;;  %v6889_v27 = vld [vmem:[%s10907_s2 + $0x3ac] sm:$0xf] }
  0xb7   : > { %2081 = vmatpush.bf16.msrb.mxu2 %v5311_v17  ;;  %2065 = vmatpush.bf16.msrb.mxu1 %v5135_v21  ;;  %v5119_v52 = vor.u32 %v6777_v29, %v5116_v30  ;;  %v5708_v17 = vld [vmem:[%s10907_s2 + $0x4d8] sm:$0xf0] }
  0xb8   : > { %v5388_v21 = vld [vmem:[%s10907_s2 + $0x258] sm:$0xf0]  ;;  %v5711_v30 = vor.u32 %v6925_v15, %v5708_v17 }
  0xb9   : > { %1971 = vmatpush.bf16.msra.mxu0 %v5371_v42  ;;  %v6813_v42 = vld [vmem:[%s10907_s2 + $0x14c] sm:$0xf]  ;;  %v5228_v26 = vld [vmem:[%s10907_s2 + $0x118] sm:$0xf0] }
  0xba   : > { %2028 = vmatpush.bf16.msra.mxu3 %v5755_v57  ;;  %v5100_v57 = vld [vmem:[%s10907_s2 + $0x18] sm:$0xf0]  ;;  %v5263_v1 = vor.u32 %v6813_v42, %v5260_v46  ;;  %v6921_v46 = vld [vmem:[%s10907_s2 + $0x4ac] sm:$0xf] }
  0xbb   : > { %2082 = vmatpush.bf16.msrb.mxu2 %v5295_v24  ;;  %2066 = vmatpush.bf16.msrb.mxu1 %v5119_v52  ;;  %v5103_v5 = vor.u32 %v6773_v54, %v5100_v57  ;;  %v5852_v29 = vld [vmem:[%s10907_s2 + $0x5f8] sm:$0xf0] }
  0xbc   : > { %v5692_v52 = vld [vmem:[%s10907_s2 + $0x4b8] sm:$0xf0] }
  0xbd   : > { %1972 = vmatpush.bf16.msra.mxu0 %v5355_v4  ;;  %v1670_v28 = vpop.f32.mrf.mxu0  ;;  %v5244_v4 = vld [vmem:[%s10907_s2 + $0x138] sm:$0xf0] }
  0xbe   : > { %2029 = vmatpush.bf16.msra.mxu3 %v5739_v6  ;;  %v1671_v32 = vadd.f32 %v1670_v28, %v8621_v22  ;;  %v6893_v6 = vld [vmem:[%s10907_s2 + $0x3cc] sm:$0xf]  ;;  %v5247_v23 = vor.u32 %v6809_v3, %v5244_v4  ;;  %v5375_v3 = vor.u32 %v6841_v35, %v5372_v38  ;;  %v5356_v4 = vld [vmem:[%s10907_s2 + $0x218] sm:$0xf0] }
  0xbf   : > { %v1689_v33 = vpop.f32.mrf.mxu1  ;;  %2083 = vmatpush.bf16.msrb.mxu2 %v5279_v39  ;;  %v5583_v14 = vor.u32 %v6893_v6, %v5580_v11  ;;  %2067 = vmatpush.bf16.msrb.mxu1 %v5103_v5  ;;  %v6961_v28 = vld [vmem:[%s10907_s2 + $0x5ec] sm:$0xf]  ;;  %v5231_v39 = vor.u32 %v6805_v25, %v5228_v26  ;;  %v5868_v6 = vld [vmem:[%s10907_s2 + $0x618] sm:$0xf0] }
  0xc0   : > { %v1690_v40 = vadd.f32 %v1689_v33, %v1671_v32  ;;  %1973 = vmatmul.bf16.vlgmr.msra.gmra.mxu0 %v7798_v51  ;;  %2011 = vmatmul.bf16.vlgmr.msra.gmra.mxu2 %v8014_v43  ;;  %v5564_v32 = vld [vmem:[%s10907_s2 + $0x3b8] sm:$0xf0]  ;;  %v5855_v42 = vor.u32 %v6961_v28, %v5852_v29  ;;  %v6965_v5 = vld [vmem:[%s10907_s2 + $0x60c] sm:$0xf] }
  0xc1   : > { %2048 = vmatpush.bf16.msrb.mxu0 %v5867_v7  ;;  %2030 = vmatmul.bf16.vlgmr.msra.gmra.mxu3 %v8016_v44  ;;  %v5567_v33 = vor.u32 %v6889_v27, %v5564_v32  ;;  %v5676_v11 = vld [vmem:[%s10907_s2 + $0x498] sm:$0xf0]  ;;  %v6913_v25 = vld [vmem:[%s10907_s2 + $0x46c] sm:$0xf] }
  0xc2   : > { %2098 = vmatpush.bf16.msrb.mxu3 %v5471_v10  ;;  %1992 = vmatmul.bf16.vlgmr.msra.gmra.mxu1 %v7805_v55  ;;  %v5727_v10 = vor.u32 %v6929_v60, %v5724_v61  ;;  %v5836_v60 = vld [vmem:[%s10907_s2 + $0x5d8] sm:$0xf0]  ;;  %v6877_v27 = vld [vmem:[%s10907_s2 + $0x34c] sm:$0xf] }
  0xc3   : > { %v1708_v2 = vpop.f32.mrf.mxu2  ;;  %2084 = vmatpush.bf16.msrb.mxu2 %v5263_v1  ;;  %v5548_v61 = vld [vmem:[%s10907_s2 + $0x398] sm:$0xf0]  ;;  %v6949_v32 = vld [vmem:[%s10907_s2 + $0x58c] sm:$0xf] }
  0xc4   : > { %v1709_v7 = vadd.f32 %v1708_v2, %v1690_v40  ;;  %v1727_v8 = vpop.f32.mrf.mxu3  ;;  %2136 = vmatpush.bf16.msra.mxu1 %v5727_v10  ;;  %v5551_v1 = vor.u32 %v6885_v53, %v5548_v61  ;;  %v6917_v10 = vld [vmem:[%s10907_s2 + $0x48c] sm:$0xf]  ;;  %v5532_v15 = vld [vmem:[%s10907_s2 + $0x378] sm:$0xf0] }
  0xc5   : > { %2117 = vmatpush.bf16.msra.mxu0 %v5599_v59  ;;  %v1672_v9 = vpop.f32.mrf.mxu0  ;;  %v6957_v59 = vld [vmem:[%s10907_s2 + $0x5cc] sm:$0xf]  ;;  %v5660_v26 = vld [vmem:[%s10907_s2 + $0x478] sm:$0xf0] }
  0xc6   : > { %2099 = vmatpush.bf16.msrb.mxu3 %v5455_v20  ;;  %v1673_v12 = vadd.f32 %v1672_v9, %v8621_v22  ;;  %v8701_v18 = vadd.f32 %v1727_v8, %v1709_v7  ;;  %v6845_v20 = vld [vmem:[%s10907_s2 + $0x24c] sm:$0xf]  ;;  %v5695_v7 = vor.u32 %v6921_v46, %v5692_v52  ;;  %v5839_v9 = vor.u32 %v6957_v59, %v5836_v60  ;;  %v5500_v59 = vld [vmem:[%s10907_s2 + $0x338] sm:$0xf0] }
  0xc7   : > { %v1691_v13 = vpop.f32.mrf.mxu1  ;;  %2085 = vmatpush.bf16.msrb.mxu2 %v5247_v23  ;;  %v5871_v23 = vor.u32 %v6965_v5, %v5868_v6  ;;  %v6909_v53 = vld [vmem:[%s10907_s2 + $0x44c] sm:$0xf] }
  0xc8   : > { %v1692_v24 = vadd.f32 %v1691_v13, %v1673_v12  ;;  %2137 = vmatpush.bf16.msra.mxu1 %v5711_v30  ;;  %v6881_v12 = vld [vmem:[%s10907_s2 + $0x36c] sm:$0xf] }
  0xc9   : > { %2118 = vmatpush.bf16.msra.mxu0 %v5583_v14  ;;  %v6953_v13 = vld [vmem:[%s10907_s2 + $0x5ac] sm:$0xf]  ;;  %v5820_v14 = vld [vmem:[%s10907_s2 + $0x5b8] sm:$0xf0]  ;;  %v5535_v17 = vor.u32 %v6881_v12, %v5532_v15 }
  0xca   : > { %2100 = vmatpush.bf16.msrb.mxu3 %v5439_v34  ;;  %v5391_v34 = vor.u32 %v6845_v20, %v5388_v21  ;;  %v5679_v20 = vor.u32 %v6917_v10, %v5676_v11  ;;  %v6941_v6 = vld [vmem:[%s10907_s2 + $0x54c] sm:$0xf] }
  0xcb   : > { %v1710_v40 = vpop.f32.mrf.mxu2  ;;  %2086 = vmatpush.bf16.msrb.mxu2 %v5231_v39  ;;  %v6901_v15 = vld [vmem:[%s10907_s2 + $0x40c] sm:$0xf] }
  0xcc   : > { %v1711_v54 = vadd.f32 %v1710_v40, %v1692_v24  ;;  %v1729_v57 = vpop.f32.mrf.mxu3  ;;  %2138 = vmatpush.bf16.msra.mxu1 %v5695_v7  ;;  %v5823_v24 = vor.u32 %v6953_v13, %v5820_v14  ;;  %v5772_v7 = vld [vmem:[%s10907_s2 + $0x558] sm:$0xf0] }
  0xcd   : > { %2119 = vmatpush.bf16.msra.mxu0 %v5567_v33  ;;  %v1675_v58 = vpop.f32.mrf.mxu0  ;;  %v5804_v33 = vld [vmem:[%s10907_s2 + $0x598] sm:$0xf0]  ;;  %v5775_v14 = vor.u32 %v6941_v6, %v5772_v7 }
  0xce   : > { %2101 = vmatpush.bf16.msrb.mxu3 %v5423_v62  ;;  %v1676_v62 = vadd.f32 %v1675_v58, %v8621_v22  ;;  %v8755_v2 = vadd.f32 %v1729_v57, %v1711_v54  ;;  %v5807_v52 = vor.u32 %v6949_v32, %v5804_v33  ;;  %v5644_v54 = vld [vmem:[%s10907_s2 + $0x458] sm:$0xf0]  ;;  %v6945_v57 = vld [vmem:[%s10907_s2 + $0x56c] sm:$0xf] }
  0xcf   : > { %v1694_v63 = vpop.f32.mrf.mxu1  ;;  %2155 = vmatpush.bf16.msra.mxu2 %v5855_v42  ;;  %v5663_v42 = vor.u32 %v6913_v25, %v5660_v26  ;;  %v5788_v58 = vld [vmem:[%s10907_s2 + $0x578] sm:$0xf0]  ;;  %v5647_v61 = vor.u32 %v6909_v53, %v5644_v54  ;;  %v6933_v26 = vld [vmem:[%s10907_s2 + $0x50c] sm:$0xf] }
  0xd0   : > { %v1695_v8 = vadd.f32 %v1694_v63, %v1676_v62  ;;  %1978 = vmatmul.bf16.gmra.mxu0 %v7892_v37  ;;  %2016 = vmatmul.bf16.gmra.mxu2 %v8127_v47  ;;  %v5791_v63 = vor.u32 %v6945_v57, %v5788_v58  ;;  %v6973_v33 = vld [vmem:[%s10891_s4 + $0x28] sm:$0xff]  ;;  %v6983_v53 = vld [vmem:[%s10891_s4 + $0x78] sm:$0xff] }
  0xd1   : > { %2120 = vmatpush.bf16.msra.mxu0 %v5551_v1  ;;  %2035 = vmatmul.bf16.gmra.mxu3 %v8129_v48  ;;  %v5628_v1 = vld [vmem:[%s10907_s2 + $0x438] sm:$0xf0] }
  0xd2   : > { %2102 = vmatpush.bf16.msrb.mxu3 %v5407_v19  ;;  %1997 = vmatmul.bf16.gmra.mxu1 %v7903_v41  ;;  %v5359_v19 = vor.u32 %v6837_v0, %v5356_v4  ;;  %v6905_v0 = vld [vmem:[%s10907_s2 + $0x42c] sm:$0xf]  ;;  %v6971_v57 = vld [vmem:[%s10891_s4 + $0x18] sm:$0xff] }
  0xd3   : > { %v1713_v21 = vpop.f32.mrf.mxu2  ;;  %2156 = vmatpush.bf16.msra.mxu2 %v5839_v9  ;;  %2139 = vmatpush.bf16.msra.mxu1 %v5679_v20  ;;  %v5631_v12 = vor.u32 %v6905_v0, %v5628_v1  ;;  %v5756_v20 = vld [vmem:[%s10907_s2 + $0x538] sm:$0xf0]  ;;  %v6969_v1 = vld [vmem:[%s10891_s4 + $0x8] sm:$0xff] }
  0xd4   : > { %v1714_v28 = vadd.f32 %v1713_v21, %v1695_v8  ;;  %v1732_v29 = vpop.f32.mrf.mxu3  ;;  %v5484_v8 = vld [vmem:[%s10907_s2 + $0x318] sm:$0xf0] }
  0xd5   : > { %2121 = vmatpush.bf16.msra.mxu0 %v5535_v17  ;;  %v1677_v30 = vpop.f32.mrf.mxu0  ;;  %v5612_v17 = vld [vmem:[%s10907_s2 + $0x418] sm:$0xf0] }
  0xd6   : > { %2103 = vmatpush.bf16.msrb.mxu3 %v5391_v34  ;;  %v5516_v34 = vld [vmem:[%s10907_s2 + $0x358] sm:$0xf0]  ;;  %v1678_v35 = vadd.f32 %v1677_v30, %v8621_v22  ;;  %v8807_v40 = vadd.f32 %v1732_v29, %v1714_v28  ;;  %v6873_v22 = vld [vmem:[%s10907_s2 + $0x32c] sm:$0xf] }
  0xd7   : > { %v1696_v38 = vpop.f32.mrf.mxu1  ;;  %v5519_v39 = vor.u32 %v6877_v27, %v5516_v34  ;;  %2157 = vmatpush.bf16.msra.mxu2 %v5823_v24  ;;  %v5503_v60 = vor.u32 %v6873_v22, %v5500_v59  ;;  %2140 = vmatpush.bf16.msra.mxu1 %v5663_v42  ;;  %v6975_v21 = vld [vmem:[%s10891_s4 + $0x38] sm:$0xff]  ;;  %v6982_v59 = vld [vmem:[%s10891_s4 + $0x70] sm:$0xff] }
  0xd8   : > { %v1697_v46 = vadd.f32 %v1696_v38, %v1678_v35  ;;  %v5740_v27 = vld [vmem:[%s10907_s2 + $0x518] sm:$0xf0] }
  0xd9   : > { %2122 = vmatpush.bf16.msra.mxu0 %v5519_v39  ;;  %v5743_v32 = vor.u32 %v6933_v26, %v5740_v27  ;;  %v667_v26 = vperm.slane %v8612_v16, 1 }
  0xda   : > { %2104 = vmatpush.bf16.msrb.mxu3 %v5375_v3  ;;  %v6869_v3 = vld [vmem:[%s10907_s2 + $0x30c] sm:$0xf] }
  0xdb   : > { %v1715_v62 = vpop.f32.mrf.mxu2  ;;  %2158 = vmatpush.bf16.msra.mxu2 %v5807_v52  ;;  %2141 = vmatpush.bf16.msra.mxu1 %v5647_v61  ;;  %v5487_v13 = vor.u32 %v6869_v3, %v5484_v8  ;;  %v6968_v8 = vld [vmem:[%s10891_s4] sm:$0xff] }
  0xdc   : > { %v1716_v4 = vadd.f32 %v1715_v62, %v1697_v46  ;;  %v1734_v5 = vpop.f32.mrf.mxu3 }
  0xdd   : > { %2123 = vmatpush.bf16.msra.mxu0 %v5503_v60  ;;  %v1746_v9 = vpop.f32.mrf.mxu0 }
  0xde   : > { %2105 = vmatpush.bf16.msrb.mxu3 %v5359_v19  ;;  %v8845_v11 = vadd.f32 %v1734_v5, %v1716_v4  ;;  %v6937_v19 = vld [vmem:[%s10907_s2 + $0x52c] sm:$0xf] }
  0xdf   : > { %v1765_v10 = vpop.f32.mrf.mxu1  ;;  %2159 = vmatpush.bf16.msra.mxu2 %v5791_v63  ;;  %2142 = vmatpush.bf16.msra.mxu1 %v5631_v12  ;;  %v6979_v12 = vld [vmem:[%s10891_s4 + $0x58] sm:$0xff] }
  0xe0   : > { %5876 = vmatmul.msk.bf16.vlgmr.msrb.gmra.mxu0 %vm1654_vm0, %v8027_v49  ;;  %2087 = vmatmul.bf16.vlgmr.msrb.gmra.mxu2 %v7796_v50  ;;  %v6974_v50 = vld [vmem:[%s10891_s4 + $0x30] sm:$0xff] }
  0xe1   : > { %2106 = vmatmul.bf16.vlgmr.msrb.gmra.mxu3 %v7798_v51  ;;  %2124 = vmatpush.bf16.msra.mxu0 %v5487_v13  ;;  %v1747_v51 = vadd.f32 %v1746_v9, %v8701_v18  ;;  %v6972_v18 = vld [vmem:[%s10891_s4 + $0x20] sm:$0xff] }
  0xe2   : > { %2181 = vmatpush.bf16.msra.mxu3 %v5871_v23  ;;  %2068 = vmatmul.bf16.vlgmr.msrb.gmra.mxu1 %v7791_v45  ;;  %v5615_v23 = vor.u32 %v6901_v15, %v5612_v17  ;;  %v5759_v45 = vor.u32 %v6937_v19, %v5756_v20  ;;  %v6978_v17 = vld [vmem:[%s10891_s4 + $0x50] sm:$0xff] }
  0xe3   : > { %2160 = vmatpush.bf16.msra.mxu2 %v5775_v14  ;;  %v1784_v24 = vpop.f32.mrf.mxu2  ;;  %v1766_v34 = vadd.f32 %v1765_v10, %v1747_v51 }
  0xe4   : > { %v8867_v25 = vpop.f32.mrf.mxu3  ;;  %2143 = vmatpush.bf16.msra.mxu1 %v5615_v23 }
  0xe5   : > { %2427 = vmatpush.bf16.msrb.mxu0 %v6975_v21  ;;  %v1748_v28 = vpop.f32.mrf.mxu0  ;;  %v1785_v35 = vadd.f32 %v1784_v24, %v1766_v34  ;;  %v1804_v27 = vadd.f32 %v8867_v25, %v667_v26 }
  0xe6   : > { %v1749_v30 = vadd.f32 %v1748_v28, %v8755_v2 }
  0xe7   : > { %v1767_v29 = vpop.f32.mrf.mxu1  ;;  %2161 = vmatpush.bf16.msra.mxu2 %v5759_v45  ;;  %v2193_v54 = vmax.f32 %v1785_v35, 0.0 }
  0xe8   : > { %v1768_v38 = vadd.f32 %v1767_v29, %v1749_v30  ;;  %2446 = vmatpush.bf16.msrb.mxu1 %v6983_v53 }
  0xe9   : > { %2428 = vmatpush.bf16.msrb.mxu0 %v6974_v50 }
  0xeb   : > { %2162 = vmatpush.bf16.msra.mxu2 %v5743_v32  ;;  %v1786_v39 = vpop.f32.mrf.mxu2 }
  0xec   : > { %v8883_v42 = vpop.f32.mrf.mxu3  ;;  %v1787_v2 = vadd.f32 %v1786_v39, %v1768_v38  ;;  %2447 = vmatpush.bf16.msrb.mxu1 %v6982_v59 }
  0xed   : > { %2429 = vmatpush.bf16.msrb.mxu0 %v6973_v33  ;;  %v1751_v46 = vpop.f32.mrf.mxu0  ;;  %v1806_v32 = vadd.f32 %v8883_v42, %v667_v26 }
  0xee   : > { %v2197_v22 = vmax.f32 %v1787_v2, 0.0  ;;  %v1752_v62 = vadd.f32 %v1751_v46, %v8807_v40  ;;  %v6980_v40 = vld [vmem:[%s10891_s4 + $0x60] sm:$0xff] }
  0xef   : > { %v1770_v52 = vpop.f32.mrf.mxu1 }
  0xf0   : > { %5877 = vmatmul.msk.bf16.gmra.mxu0 %vm1654_vm0, %v8140_v56  ;;  %v8897_v58 = vpack.c.bf16 %v2197_v22, %v2193_v54  ;;  %2092 = vmatmul.bf16.gmra.mxu2 %v7890_v36  ;;  %v6981_v36 = vld [vmem:[%s10891_s4 + $0x68] sm:$0xff]  ;;  %v1771_v3 = vadd.f32 %v1770_v52, %v1752_v62 }
  0xf1   : > { %2430 = vmatpush.bf16.msrb.mxu0 %v6972_v18  ;;  %2111 = vmatmul.bf16.gmra.mxu3 %v7892_v37 }
  0xf2   : > { %2073 = vmatmul.bf16.gmra.mxu1 %v7879_v31  ;;  %v6970_v31 = vld [vmem:[%s10891_s4 + $0x10] sm:$0xff] }
  0xf3   : > { %v1789_v60 = vpop.f32.mrf.mxu2  ;;  %2448 = vmatpush.bf16.msrb.mxu1 %v6981_v36 }
  0xf4   : > { %v8904_v61 = vpop.f32.mrf.mxu3  ;;  %v1790_v4 = vadd.f32 %v1789_v60, %v1771_v3  ;;  %v6991_v3 = vld [vmem:[%s10891_s4 + $0xb8] sm:$0xff] }
  0xf5   : > { %2431 = vmatpush.bf16.msrb.mxu0 %v6971_v57  ;;  %v1753_v63 = vpop.f32.mrf.mxu0  ;;  %v1809_v25 = vadd.f32 %v8904_v61, %v667_v26  ;;  %2465 = vmatpush.bf16.msrb.mxu2 %v6991_v3 }
  0xf6   : > { %v1754_v37 = vadd.f32 %v1753_v63, %v8845_v11  ;;  %v2201_v13 = vmax.f32 %v1790_v4, 0.0 }
  0xf7   : > { %v1772_v0 = vpop.f32.mrf.mxu1  ;;  %2449 = vmatpush.bf16.msrb.mxu1 %v6980_v40 }
  0xf8   : > { %v1773_v5 = vadd.f32 %v1772_v0, %v1754_v37 }
  0xf9   : > { %2432 = vmatpush.bf16.msrb.mxu0 %v6970_v31 }
  0xfb   : > { %v1791_v6 = vpop.f32.mrf.mxu2  ;;  %2450 = vmatpush.bf16.msrb.mxu1 %v6979_v12 }
  0xfc   : > { %v8920_v7 = vpop.f32.mrf.mxu3  ;;  %v1792_v9 = vadd.f32 %v1791_v6, %v1773_v5 }
  0xfd   : > { %2433 = vmatpush.bf16.msrb.mxu0 %v6969_v1  ;;  %v1822_v10 = vpop.f32.mrf.mxu0  ;;  %v1811_v60 = vadd.f32 %v8920_v7, %v667_v26 }
  0xfe   : > { %v2205_v14 = vmax.f32 %v1792_v9, 0.0  ;;  %v1823_v30 = vadd.f32 %v1822_v10, %v1804_v27  ;;  %v6986_v27 = vld [vmem:[%s10891_s4 + $0x90] sm:$0xff] }
  0xff   : > { %v1841_v11 = vpop.f32.mrf.mxu1  ;;  %2451 = vmatpush.bf16.msrb.mxu1 %v6978_v17 }
 0x100   : > { %2125 = vmatmul.bf16.vlgmr.msra.gmra.mxu0 %v7805_v55  ;;  %2163 = vmatmul.bf16.vlgmr.msra.gmra.mxu2 %v8016_v44  ;;  %v8933_v15 = vpack.c.bf16 %v2205_v14, %v2201_v13  ;;  %v6977_v55 = vld [vmem:[%s10891_s4 + $0x48] sm:$0xff]  ;;  %v1842_v33 = vadd.f32 %v1841_v11, %v1823_v30 }
 0x101   : > { %2434 = vmatpush.bf16.msrb.mxu0 %v6968_v8  ;;  %5878 = vmatmul.msk.bf16.vlgmr.msra.gmra.mxu3 %vm1654_vm0, %v8027_v49  ;;  %v6990_v8 = vld [vmem:[%s10891_s4 + $0xb0] sm:$0xff]  ;;  %v6989_v13 = vld [vmem:[%s10891_s4 + $0xa8] sm:$0xff] }
 0x102   : > { %2144 = vmatmul.bf16.vlgmr.msra.gmra.mxu1 %v8014_v43  ;;  %v6976_v43 = vld [vmem:[%s10891_s4 + $0x40] sm:$0xff]  ;;  %2466 = vmatpush.bf16.msrb.mxu2 %v6990_v8 }
 0x103   : > { %v1860_v19 = vpop.f32.mrf.mxu2  ;;  %2452 = vmatpush.bf16.msrb.mxu1 %v6977_v55 }
 0x104   : > { %v1879_v20 = vpop.f32.mrf.mxu3  ;;  %v1861_v35 = vadd.f32 %v1860_v19, %v1842_v33 }
 0x105   : > { %v1824_v21 = vpop.f32.mrf.mxu0 }
 0x106   : > { %v1825_v34 = vadd.f32 %v1824_v21, %v1806_v32  ;;  %v1880_v18 = vadd.f32 %v1879_v20, %v1861_v35  ;;  %2467 = vmatpush.bf16.msrb.mxu2 %v6989_v13  ;;  %v6988_v21 = vld [vmem:[%s10891_s4 + $0xa0] sm:$0xff] }
 0x107   : > { %v1843_v23 = vpop.f32.mrf.mxu1  ;;  %2453 = vmatpush.bf16.msrb.mxu1 %v6976_v43  ;;  %v6984_v32 = vld [vmem:[%s10891_s4 + $0x80] sm:$0xff] }
 0x10a   : > { %2468 = vmatpush.bf16.msrb.mxu2 %v6988_v21 }
 0x10b   : > { %v1862_v44 = vpop.f32.mrf.mxu2 }
 0x10c   : > { %v1881_v49 = vpop.f32.mrf.mxu3 }
 0x10d   : > { %v1827_v45 = vpop.f32.mrf.mxu0 }
 0x10e   : > { %v1828_v22 = vadd.f32 %v1827_v45, %v1809_v25  ;;  %v6987_v45 = vld [vmem:[%s10891_s4 + $0x98] sm:$0xff] }
 0x10f   : > { %v1846_v24 = vpop.f32.mrf.mxu1  ;;  %2469 = vmatpush.bf16.msrb.mxu2 %v6987_v45 }
 0x110   : > { %2130 = vmatmul.bf16.gmra.mxu0 %v7903_v41  ;;  %2168 = vmatmul.bf16.gmra.mxu2 %v8129_v48  ;;  %v1844_v48 = vadd.f32 %v1843_v23, %v1825_v34  ;;  %v1847_v62 = vadd.f32 %v1846_v24, %v1828_v22 }
 0x111   : > { %5879 = vmatmul.msk.bf16.gmra.mxu3 %vm1654_vm0, %v8140_v56 }
 0x112   : > { %2149 = vmatmul.bf16.gmra.mxu1 %v8127_v47  ;;  %v1863_v2 = vadd.f32 %v1862_v44, %v1844_v48 }
 0x113   : > { %v1865_v50 = vpop.f32.mrf.mxu2  ;;  %2470 = vmatpush.bf16.msrb.mxu2 %v6986_v27 }
 0x114   : > { %v1884_v51 = vpop.f32.mrf.mxu3  ;;  %v1882_v46 = vadd.f32 %v1881_v49, %v1863_v2  ;;  %v1866_v36 = vadd.f32 %v1865_v50, %v1847_v62 }
 0x115   : > { %v1829_v28 = vpop.f32.mrf.mxu0 }
 0x116   : > { %v1830_v63 = vadd.f32 %v1829_v28, %v1811_v60  ;;  %v1885_v6 = vadd.f32 %v1884_v51, %v1866_v36  ;;  %v6985_v28 = vld [vmem:[%s10891_s4 + $0x88] sm:$0xff] }
 0x117   : > { %v1848_v29 = vpop.f32.mrf.mxu1  ;;  %2471 = vmatpush.bf16.msrb.mxu2 %v6985_v28 }
 0x118   : > { %v1849_v5 = vadd.f32 %v1848_v29, %v1830_v63 }
 0x11b   : > { %v1867_v41 = vpop.f32.mrf.mxu2  ;;  %2472 = vmatpush.bf16.msrb.mxu2 %v6984_v32 }
 0x11c   : > { %v1886_v38 = vpop.f32.mrf.mxu3  ;;  %v1868_v7 = vadd.f32 %v1867_v41, %v1849_v5 }
 0x11d   : > { %v1898_v47 = vpop.f32.mrf.mxu0 }
 0x11e   : > { %v1899_v56 = vadd.f32 %v1898_v47, %v1880_v18  ;;  %v1887_v10 = vadd.f32 %v1886_v38, %v1868_v7  ;;  %v668_v38 = vperm.slane %v8612_v16, 2 }
 0x11f   : > { %v1917_v39 = vpop.f32.mrf.mxu1 }
 0x120   : > { %2435 = vmatmul.bf16.vlgmr.msrb.gmra.mxu0 %v8897_v58  ;;  %v1918_v57 = vadd.f32 %v1917_v39, %v1899_v56 }
 0x122   : > { %v2194_v0 = vmax.f32 %v1918_v57, 0.0 }
 0x123   : > { %v8954_v52 = vpop.f32.mrf.mxu2 }
 0x124   : > { %v8956_v53 = vpop.f32.mrf.mxu3  ;;  %v1937_v47 = vadd.f32 %v8954_v52, %v668_v38 }
 0x125   : > { %v1900_v42 = vpop.f32.mrf.mxu0 }
 0x126   : > { %v1901_v59 = vadd.f32 %v1900_v42, %v1882_v46  ;;  %v1956_v25 = vadd.f32 %v8956_v53, %v1937_v47  ;;  %v6992_v46 = vld [vmem:[%s10891_s4 + $0xc0] sm:$0xff] }
 0x127   : > { %v1919_v54 = vpop.f32.mrf.mxu1  ;;  %2491 = vmatpush.bf16.msrb.mxu3 %v6992_v46 }
 0x128   : > { %v1920_v31 = vadd.f32 %v1919_v54, %v1901_v59 }
 0x12a   : > { %v2198_v58 = vmax.f32 %v1920_v31, 0.0 }
 0x12b   : > { %v1938_v61 = vpop.f32.mrf.mxu2 }
 0x12c   : > { %v2210_v37 = vpack.c.bf16 %v2198_v58, %v2194_v0  ;;  %v1957_v1 = vpop.f32.mrf.mxu3  ;;  %v1939_v39 = vadd.f32 %v1938_v61, %v668_v38 }
 0x12d   : > { %v1903_v40 = vpop.f32.mrf.mxu0 }
 0x12e   : > { %2454 = vmatmul.bf16.vlgmr.msrb.gmra.mxu1 %v2210_v37  ;;  %v1904_v9 = vadd.f32 %v1903_v40, %v1885_v6  ;;  %v1958_v42 = vadd.f32 %v1957_v1, %v1939_v39 }
 0x12f   : > { %v1922_v4 = vpop.f32.mrf.mxu1 }
 0x130   : > { %2440 = vmatmul.bf16.gmra.mxu0 %v8933_v15  ;;  %v1923_v19 = vadd.f32 %v1922_v4, %v1904_v9 }
 0x132   : > { %v2202_v23 = vmax.f32 %v1923_v19, 0.0 }
 0x133   : > { %v1941_v11 = vpop.f32.mrf.mxu2 }
 0x134   : > { %v8966_v12 = vpop.f32.mrf.mxu3  ;;  %v1942_v58 = vadd.f32 %v1941_v11, %v668_v38 }
 0x135   : > { %v1905_v14 = vpop.f32.mrf.mxu0 }
 0x136   : > { %v1906_v20 = vadd.f32 %v1905_v14, %v1887_v10  ;;  %v1961_v5 = vadd.f32 %v8966_v12, %v1942_v58 }
 0x137   : > { %v1924_v17 = vpop.f32.mrf.mxu1 }
 0x138   : > { %v1925_v15 = vadd.f32 %v1924_v17, %v1906_v20 }
 0x13a   : > { %v2206_v55 = vmax.f32 %v1925_v15, 0.0 }
 0x13b   : > { %v1943_v43 = vpop.f32.mrf.mxu2 }
 0x13c   : > { %v1962_v44 = vpop.f32.mrf.mxu3  ;;  %v2214_v49 = vpack.c.bf16 %v2206_v55, %v2202_v23  ;;  %v1944_v37 = vadd.f32 %v1943_v43, %v668_v38 }
 0x13d   : > { %v1974_v24 = vpop.f32.mrf.mxu0 }
 0x13e   : > { %2459 = vmatmul.bf16.gmra.mxu1 %v2214_v49  ;;  %v1975_v54 = vadd.f32 %v1974_v24, %v1956_v25  ;;  %v1963_v7 = vadd.f32 %v1962_v44, %v1944_v37  ;;  %v669_v44 = vperm.slane %v8612_v16, 3 }
 0x13f   : > { %v1993_v26 = vpop.f32.mrf.mxu1 }
 0x140   : > { %v1994_v57 = vadd.f32 %v1993_v26, %v1975_v54 }
 0x143   : > { %v2012_v50 = vpop.f32.mrf.mxu2 }
 0x144   : > { %v2031_v51 = vpop.f32.mrf.mxu3  ;;  %v2013_v62 = vadd.f32 %v2012_v50, %v1994_v57 }
 0x145   : > { %v1976_v29 = vpop.f32.mrf.mxu0 }
 0x146   : > { %v1977_v22 = vadd.f32 %v1976_v29, %v1958_v42  ;;  %v2032_v36 = vadd.f32 %v2031_v51, %v2013_v62 }
 0x147   : > { %v1995_v30 = vpop.f32.mrf.mxu1 }
 0x148   : > { %v1996_v63 = vadd.f32 %v1995_v30, %v1977_v22 }
 0x14b   : > { %v2014_v33 = vpop.f32.mrf.mxu2 }
 0x14c   : > { %v2033_v34 = vpop.f32.mrf.mxu3  ;;  %v2015_v0 = vadd.f32 %v2014_v33, %v1996_v63 }
 0x14d   : > { %v1979_v35 = vpop.f32.mrf.mxu0 }
 0x14e   : > { %v2034_v53 = vadd.f32 %v2033_v34, %v2015_v0  ;;  %v1980_v8 = vadd.f32 %v1979_v35, %v1961_v5 }
 0x14f   : > { %v1998_v41 = vpop.f32.mrf.mxu1 }
 0x150   : > { %v1999_v17 = vadd.f32 %v1998_v41, %v1980_v8 }
 0x153   : > { %v2017_v48 = vpop.f32.mrf.mxu2 }
 0x154   : > { %v2036_v18 = vpop.f32.mrf.mxu3  ;;  %v2018_v21 = vadd.f32 %v2017_v48, %v1999_v17 }
 0x155   : > { %v1981_v2 = vpop.f32.mrf.mxu0 }
 0x156   : > { %v1982_v13 = vadd.f32 %v1981_v2, %v1963_v7  ;;  %v2037_v43 = vadd.f32 %v2036_v18, %v2018_v21 }
 0x157   : > { %v2000_v56 = vpop.f32.mrf.mxu1 }
 0x158   : > { %v2001_v23 = vadd.f32 %v2000_v56, %v1982_v13 }
 0x15b   : > { %v2019_v59 = vpop.f32.mrf.mxu2 }
 0x15c   : > { %v2038_v60 = vpop.f32.mrf.mxu3  ;;  %v2020_v55 = vadd.f32 %v2019_v59, %v2001_v23 }
 0x15d   : > { %v2050_v31 = vpop.f32.mrf.mxu0 }
 0x15e   : > { %v2051_v61 = vadd.f32 %v2050_v31, %v2032_v36  ;;  %v2039_v49 = vadd.f32 %v2038_v60, %v2020_v55 }
 0x15f   : > { %v2069_v52 = vpop.f32.mrf.mxu1 }
 0x160   : > { %v2195_v9 = vmax.f32 %v2051_v61, 0.0  ;;  %v2070_v29 = vadd.f32 %v2069_v52, %v669_v44 }
 0x163   : > { %v2088_v3 = vpop.f32.mrf.mxu2 }
 0x164   : > { %v2107_v40 = vpop.f32.mrf.mxu3  ;;  %v2089_v34 = vadd.f32 %v2088_v3, %v2070_v29 }
 0x165   : > { %v2052_v4 = vpop.f32.mrf.mxu0 }
 0x166   : > { %v2053_v6 = vadd.f32 %v2052_v4, %v2034_v53  ;;  %v2108_v47 = vadd.f32 %v2107_v40, %v2089_v34 }
 0x167   : > { %v2071_v1 = vpop.f32.mrf.mxu1 }
 0x168   : > { %v2199_v10 = vmax.f32 %v2053_v6, 0.0  ;;  %v2072_v38 = vadd.f32 %v2071_v1, %v669_v44 }
 0x16a   : > { %v2211_v14 = vpack.c.bf16 %v2199_v10, %v2195_v9 }
 0x16b   : > { %v2090_v19 = vpop.f32.mrf.mxu2 }
 0x16c   : > { %v2109_v11 = vpop.f32.mrf.mxu3  ;;  %2473 = vmatmul.bf16.vlgmr.msrb.gmra.mxu2 %v2211_v14  ;;  %v2091_v39 = vadd.f32 %v2090_v19, %v2072_v38  ;;  %v7000_v38 = vld [vmem:[%s10893_s6 + $0x34] sm:$0xf0] }
 0x16d   : > { %v2055_v20 = vpop.f32.mrf.mxu0 }
 0x16e   : > { %v2056_v45 = vadd.f32 %v2055_v20, %v2037_v43  ;;  %v2110_v16 = vadd.f32 %v2109_v11, %v2091_v39 }
 0x16f   : > { %v2074_v15 = vpop.f32.mrf.mxu1 }
 0x170   : > { %v2203_v51 = vmax.f32 %v2056_v45, 0.0  ;;  %v2075_v54 = vadd.f32 %v2074_v15, %v669_v44 }
 0x173   : > { %v2093_v12 = vpop.f32.mrf.mxu2 }
 0x174   : > { %v2112_v24 = vpop.f32.mrf.mxu3  ;;  %v2094_v31 = vadd.f32 %v2093_v12, %v2075_v54  ;;  %v7229_v12 = vld [vmem:[%s10892_s5] ss:$0 sm:$0xff]  ;;  %v6997_v54 = vld [vmem:[%s10893_s6 + $0x24] sm:$0xf] }
 0x175   : > { %v2057_v26 = vpop.f32.mrf.mxu0 }
 0x176   : > { %v2058_v50 = vadd.f32 %v2057_v26, %v2039_v49  ;;  %v2113_v37 = vadd.f32 %v2112_v24, %v2094_v31  ;;  %v6996_v31 = vld [vmem:[%s10893_s6 + $0x14] sm:$0xf0] }
 0x177   : > { %v2076_v27 = vpop.f32.mrf.mxu1 }
 0x178   : > { %v2207_v28 = vmax.f32 %v2058_v50, 0.0  ;;  %v2077_v0 = vadd.f32 %v2076_v27, %v669_v44 }
 0x17a   : > { %v2215_v30 = vpack.c.bf16 %v2207_v28, %v2203_v51 }
 0x17b   : > { %v2095_v32 = vpop.f32.mrf.mxu2 }
 0x17c   : > { %v2114_v33 = vpop.f32.mrf.mxu3  ;;  %2478 = vmatmul.bf16.gmra.mxu2 %v2215_v30  ;;  %v2096_v53 = vadd.f32 %v2095_v32, %v2077_v0 }
 0x17d   : > { %v2126_v35 = vpop.f32.mrf.mxu0 }
 0x17e   : > { %v2127_v48 = vadd.f32 %v2126_v35, %v2108_v47  ;;  %v2115_v6 = vadd.f32 %v2114_v33, %v2096_v53  ;;  %v6998_v47 = vld [vmem:[%s10893_s6 + $0x2c] sm:$0xf] }
 0x17f   : > { %v2145_v41 = vpop.f32.mrf.mxu1 }
 0x180   : > { %v2146_v46 = vadd.f32 %v2145_v41, %v2127_v48  ;;  %v6008_v41 = vld [vmem:[%s10893_s6 + $0x28] sm:$0xf] }
 0x181   : > { %v6009_v48 = vor.u32 %v7000_v38, %v6008_v41  ;;  %v7102_v41 = vld [vmem:[%s10895_s8 + $0x328] sm:$0xf0]  ;;  %v6668_v38 = vld [vmem:[%s10895_s8 + $0x508] sm:$0xf] }
 0x183   : > { %v2164_v18 = vpop.f32.mrf.mxu2  ;;  %2658 = vmatpush.bf16.msra.mxu2 %v6009_v48  ;;  %v6696_v48 = vld [vmem:[%s10895_s8 + $0x540] sm:$0xf] }
 0x184   : > { %v2183_v2 = vpop.f32.mrf.mxu3  ;;  %v2165_v22 = vadd.f32 %v2164_v18, %v2146_v46  ;;  %v6010_v18 = vld [vmem:[%s10893_s6 + $0x38] sm:$0xf0] }
 0x185   : > { %v2128_v56 = vpop.f32.mrf.mxu0  ;;  %v6013_v46 = vor.u32 %v6998_v47, %v6010_v18  ;;  %v7172_v18 = vld [vmem:[%s10895_s8 + $0x558] sm:$0xf0] }
 0x186   : > { %v2129_v42 = vadd.f32 %v2128_v56, %v2110_v16  ;;  %v2184_v52 = vadd.f32 %v2183_v2, %v2165_v22  ;;  %v6000_v2 = vld [vmem:[%s10893_s6 + $0x20] sm:$0xf]  ;;  %v6999_v16 = vld [vmem:[%s10893_s6 + $0x2c] sm:$0xf0]  ;;  %v6002_v22 = vld [vmem:[%s10893_s6 + $0x30] sm:$0xf0] }
 0x187   : > { %v2147_v25 = vpop.f32.mrf.mxu1  ;;  %2677 = vmatpush.bf16.msra.mxu3 %v6013_v46  ;;  %v7039_v46 = vld [vmem:[%s10895_s8 + $0x130] sm:$0xf0] }
 0x188   : > { %v2148_v57 = vadd.f32 %v2147_v25, %v2129_v42  ;;  %v2196_v61 = vmax.f32 %v2184_v52, 0.0  ;;  %v6001_v42 = vor.u32 %v6999_v16, %v6000_v2 }
 0x18a   : > { %2620 = vmatpush.bf16.msra.mxu0 %v6001_v42  ;;  %v6388_v42 = vld [vmem:[%s10895_s8 + $0x2d8] sm:$0xf] }
 0x18b   : > { %v2166_v59 = vpop.f32.mrf.mxu2 }
 0x18c   : > { %v2185_v60 = vpop.f32.mrf.mxu3  ;;  %v2167_v62 = vadd.f32 %v2166_v59, %v2148_v57  ;;  %v5992_v57 = vld [vmem:[%s10893_s6 + $0x8] sm:$0xf] }
 0x18d   : > { %v2131_v63 = vpop.f32.mrf.mxu0 }
 0x18e   : > { %v2186_v58 = vadd.f32 %v2185_v60, %v2167_v62  ;;  %v2132_v4 = vadd.f32 %v2131_v63, %v2113_v37  ;;  %v6005_v60 = vor.u32 %v6997_v54, %v6002_v22  ;;  %v5993_v62 = vor.u32 %v6996_v31, %v5992_v57  ;;  %v7095_v54 = vld [vmem:[%s10895_s8 + $0x2f0] sm:$0xf0]  ;;  %v6640_v22 = vld [vmem:[%s10895_s8 + $0x4d0] sm:$0xf]  ;;  %v7158_v57 = vld [vmem:[%s10895_s8 + $0x4e8] sm:$0xf0] }
 0x18f   : > { %v2150_v36 = vpop.f32.mrf.mxu1  ;;  %v6641_v31 = vor.u32 %v7158_v57, %v6640_v22  ;;  %v7123_v22 = vld [vmem:[%s10895_s8 + $0x3d0] sm:$0xf0] }
 0x190   : > { %v2200_v3 = vmax.f32 %v2186_v58, 0.0  ;;  %v2151_v8 = vadd.f32 %v2150_v36, %v2132_v4  ;;  %2639 = vmatpush.bf16.msra.mxu1 %v6005_v60  ;;  %2659 = vmatpush.bf16.msra.mxu2 %v5993_v62  ;;  %v2508_v60 = vld [vmem:[%s9077_s16 + $0x8] sm:$0xff] }
 0x192   : > { %v2212_v40 = vpack.c.bf16 %v2200_v3, %v2196_v61 }
 0x193   : > { %v2169_v1 = vpop.f32.mrf.mxu2 }
 0x194   : > { %v2188_v5 = vpop.f32.mrf.mxu3  ;;  %5980 = vmatmul.msk.bf16.vlgmr.msrb.gmra.mxu3 %vm1654_vm0, %v2212_v40  ;;  %v2170_v10 = vadd.f32 %v2169_v1, %v2151_v8 }
 0x195   : > { %v2133_v7 = vpop.f32.mrf.mxu0 }
 0x196   : > { %v2134_v9 = vadd.f32 %v2133_v7, %v2115_v6  ;;  %v2189_v19 = vadd.f32 %v2188_v5, %v2170_v10 }
 0x197   : > { %v2152_v13 = vpop.f32.mrf.mxu1 }
 0x198   : > { %v2153_v14 = vadd.f32 %v2152_v13, %v2134_v9  ;;  %v2204_v21 = vmax.f32 %v2189_v19, 0.0 }
 0x19b   : > { %v2171_v17 = vpop.f32.mrf.mxu2 }
 0x19c   : > { %v2172_v11 = vadd.f32 %v2171_v17, %v2153_v14  ;;  %v2190_v20 = vpop.f32.mrf.mxu3 }
 0x19d   : > { %v2436_v43 = vpop.f32.mrf.mxu0 }
 0x19e   : > { %v2191_v15 = vadd.f32 %v2190_v20, %v2172_v11  ;;  %v2437_v24 = vadd.f32 %v7229_v12, %v2436_v43  ;;  %v6995_v43 = vld [vmem:[%s10893_s6 + $0xc] sm:$0xf0] }
 0x1a0   : > { %v2208_v23 = vmax.f32 %v2191_v15, 0.0  ;;  %v6994_v15 = vld [vmem:[%s10893_s6 + $0xc] sm:$0xf] }
 0x1a2   : > { %v2216_v55 = vpack.c.bf16 %v2208_v23, %v2204_v21  ;;  %v5994_v21 = vld [vmem:[%s10893_s6 + $0x18] sm:$0xf0]  ;;  %v5984_v23 = vld [vmem:[%s10893_s6] sm:$0xf] }
 0x1a4   : > { %5981 = vmatmul.msk.bf16.gmra.mxu3 %vm1654_vm0, %v2216_v55  ;;  %v5997_v55 = vor.u32 %v6994_v15, %v5994_v21  ;;  %v6108_v21 = vld [vmem:[%s10895_s8 + $0xa8] sm:$0xf] }
 0x1a5   : > { %v2438_v44 = vpop.f32.mrf.mxu0 }
 0x1a6   : > { %v2439_v30 = vadd.f32 %v7229_v12, %v2438_v44  ;;  %2678 = vmatpush.bf16.msra.mxu3 %v5997_v55  ;;  %v7081_v55 = vld [vmem:[%s10895_s8 + $0x280] sm:$0xf0] }
 0x1ab   : > { %v2455_v49 = vpop.f32.mrf.mxu1 }
 0x1ac   : > { %v2456_v26 = vadd.f32 %v2455_v49, %v2437_v24  ;;  %v5985_v49 = vor.u32 %v6995_v43, %v5984_v23  ;;  %v7025_v23 = vld [vmem:[%s10895_s8 + $0xc0] sm:$0xf0] }
 0x1ad   : > { %v2441_v35 = vpop.f32.mrf.mxu0 }
 0x1ae   : > { %v2442_v63 = vadd.f32 %v7229_v12, %v2441_v35  ;;  %2621 = vmatpush.bf16.msra.mxu0 %v5985_v49  ;;  %v6416_v35 = vld [vmem:[%s10895_s8 + $0x310] sm:$0xf]  ;;  %v6584_v49 = vld [vmem:[%s10895_s8 + $0x460] sm:$0xf] }
 0x1af   : > { %v6417_v2 = vor.u32 %v7102_v41, %v6416_v35  ;;  %v6276_v41 = vld [vmem:[%s10895_s8 + $0x1f8] sm:$0xf] }
 0x1b3   : > { %v2457_v27 = vpop.f32.mrf.mxu1 }
 0x1b4   : > { %v2458_v33 = vadd.f32 %v2457_v27, %v2439_v30  ;;  %v7053_v27 = vld [vmem:[%s10895_s8 + $0x1a0] sm:$0xf0]  ;;  %v6192_v30 = vld [vmem:[%s10895_s8 + $0x150] sm:$0xf] }
 0x1b5   : > { %v2443_v61 = vpop.f32.mrf.mxu0 }
 0x1b6   : > { %v2444_v1 = vadd.f32 %v7229_v12, %v2443_v61  ;;  %v5986_v12 = vld [vmem:[%s10893_s6 + $0x10] sm:$0xf0]  ;;  %v7032_v61 = vld [vmem:[%s10895_s8 + $0xf8] sm:$0xf0] }
 0x1bb   : > { %v2460_v56 = vpop.f32.mrf.mxu1 }
 0x1bc   : > { %v2461_v36 = vadd.f32 %v2460_v56, %v2442_v63  ;;  %v6697_v56 = vor.u32 %v7172_v18, %v6696_v48  ;;  %v6612_v63 = vld [vmem:[%s10895_s8 + $0x498] sm:$0xf]  ;;  %v7130_v48 = vld [vmem:[%s10895_s8 + $0x408] sm:$0xf0] }
 0x1be   : > { %3900 = vmatpush.bf16.msrb.mxu3 %v6697_v56  ;;  %v6248_v56 = vld [vmem:[%s10895_s8 + $0x1c0] sm:$0xf] }
 0x1c3   : > { %v2462_v4 = vpop.f32.mrf.mxu1 }
 0x1c4   : > { %v2463_v8 = vadd.f32 %v2462_v4, %v2444_v1  ;;  %v7088_v4 = vld [vmem:[%s10895_s8 + $0x2b8] sm:$0xf0] }
 0x1ef   : > { %v2474_v45 = vpop.f32.mrf.mxu2 }
 0x1f0   : > { %v2475_v50 = vadd.f32 %v2474_v45, %v2456_v26  ;;  %v6993_v45 = vld [vmem:[%s10893_s6 + $0x4] sm:$0xf]  ;;  %v6220_v26 = vld [vmem:[%s10895_s8 + $0x188] sm:$0xf] }
 0x1f1   : > { %v5989_v24 = vor.u32 %v6993_v45, %v5986_v12  ;;  %v7144_v45 = vld [vmem:[%s10895_s8 + $0x478] sm:$0xf0] }
 0x1f2   : > { %v6585_v12 = vor.u32 %v7144_v45, %v6584_v49 }
 0x1f3   : > { %2640 = vmatpush.bf16.msra.mxu1 %v5989_v24  ;;  %v6080_v24 = vld [vmem:[%s10895_s8 + $0x70] sm:$0xf] }
 0x1f7   : > { %v2476_v51 = vpop.f32.mrf.mxu2 }
 0x1f8   : > { %v2477_v39 = vadd.f32 %v2476_v51, %v2458_v33  ;;  %v6221_v51 = vor.u32 %v7053_v27, %v6220_v26  ;;  %v2507_v33 = vld [vmem:[%s9077_s16] sm:$0xff]  ;;  %v6304_v26 = vld [vmem:[%s10895_s8 + $0x230] sm:$0xf] }
 0x1fa   : > { %3836 = vmatpush.bf16.msrb.mxu0 %v6221_v51  ;;  %v6556_v51 = vld [vmem:[%s10895_s8 + $0x428] sm:$0xf] }
 0x1ff   : > { %v2479_v52 = vpop.f32.mrf.mxu2 }
 0x200   : > { %v2480_v53 = vadd.f32 %v2479_v52, %v2461_v36  ;;  %v6389_v36 = vor.u32 %v7095_v54, %v6388_v42  ;;  %v6500_v54 = vld [vmem:[%s10895_s8 + $0x3b8] sm:$0xf] }
 0x201   : > { %v6501_v57 = vor.u32 %v7123_v22, %v6500_v54  ;;  %v7008_v22 = vld [vmem:[%s10895_s8 + $0x3c] sm:$0xf] }
 0x207   : > { %v2481_v6 = vpop.f32.mrf.mxu2 }
 0x208   : > { %v2482_v10 = vadd.f32 %v2481_v6, %v2463_v8 }
 0x217   : > { %v2493_v28 = vpop.f32.mrf.mxu3 }
 0x218   : > { %v9003_v29 = vadd.f32 %v2493_v28, %v2475_v50  ;;  %v6444_v50 = vld [vmem:[%s10895_s8 + $0x348] sm:$0xf]  ;;  %v7109_v28 = vld [vmem:[%s10895_s8 + $0x360] sm:$0xf0] }
 0x21a   : > { %2503 = vst [vmem:[%s9005_s29] sm:$0xff] %v9003_v29  ;;  %v2511_v32 = vmul.f32 0.5, %v9003_v29 }
 0x21c   : > { %v2515_v34 = vmul.f32 1.442695, %v2511_v32  ;;  %v7046_v32 = vld [vmem:[%s10895_s8 + $0x168] sm:$0xf0] }
 0x21d   : > { %v6193_v47 = vor.u32 %v7046_v32, %v6192_v30 }
 0x21e   : > { %7230 = vpow2.f32 %v2515_v34  ;;  %v6445_v34 = vor.u32 %v7109_v28, %v6444_v50  ;;  %v7074_v50 = vld [vmem:[%s10895_s8 + $0x248] sm:$0xf0]  ;;  %v7137_v28 = vld [vmem:[%s10895_s8 + $0x440] sm:$0xf0] }
 0x21f   : > { %v2495_v25 = vpop.f32.mrf.mxu3  ;;  %3837 = vmatpush.bf16.msrb.mxu0 %v6193_v47  ;;  %v6305_v30 = vor.u32 %v7074_v50, %v6304_v26  ;;  %v6557_v32 = vor.u32 %v7137_v28, %v6556_v51  ;;  %v7022_v26 = vld [vmem:[%s10895_s8 + $0xac] sm:$0xf]  ;;  %v6334_v28 = vld [vmem:[%s10895_s8 + $0x284] sm:$0xf0] }
 0x220   : > { %v9037_v59 = vadd.f32 %v2495_v25, %v2477_v39  ;;  %v7165_v39 = vld [vmem:[%s10895_s8 + $0x520] sm:$0xf0]  ;;  %3855 = vmatpush.bf16.msrb.mxu1 %v6445_v34  ;;  %v6164_v25 = vld [vmem:[%s10895_s8 + $0x118] sm:$0xf]  ;;  %v7011_v34 = vld [vmem:[%s10895_s8 + $0x50] sm:$0xf0] }
 0x221   : > { %v6669_v16 = vor.u32 %v7165_v39, %v6668_v38  ;;  %v6165_v62 = vor.u32 %v7039_v46, %v6164_v25  ;;  %v7067_v38 = vld [vmem:[%s10895_s8 + $0x210] sm:$0xf0]  ;;  %v6528_v39 = vld [vmem:[%s10895_s8 + $0x3f0] sm:$0xf]  ;;  %v7060_v46 = vld [vmem:[%s10895_s8 + $0x1d8] sm:$0xf0] }
 0x222   : > { %2504 = vst [vmem:[%s9005_s29 + $0x8] sm:$0xff] %v9037_v59  ;;  %v2512_v0 = vmul.f32 0.5, %v9037_v59  ;;  %v6277_v47 = vor.u32 %v7067_v38, %v6276_v41  ;;  %v6529_v18 = vor.u32 %v7130_v48, %v6528_v39  ;;  %v6249_v42 = vor.u32 %v7060_v46, %v6248_v56  ;;  %v7078_v50 = vld [vmem:[%s10895_s8 + $0x26c] sm:$0xf]  ;;  %v6586_v41 = vld [vmem:[%s10895_s8 + $0x47c] sm:$0xf0] }
 0x223   : > { %3874 = vmatpush.bf16.msrb.mxu2 %v6669_v16  ;;  %3838 = vmatpush.bf16.msrb.mxu0 %v6165_v62  ;;  %v7004_v16 = vld [vmem:[%s10895_s8 + $0x18] sm:$0xf0]  ;;  %v6082_v39 = vld [vmem:[%s10895_s8 + $0x8c] sm:$0xf0]  ;;  %v7071_v48 = vld [vmem:[%s10895_s8 + $0x234] sm:$0xf] }
 0x224   : > { %v7231_v58 = vpop.eup %7230  ;;  %v2517_v37 = vmul.f32 1.442695, %v2512_v0  ;;  %v7151_v0 = vld [vmem:[%s10895_s8 + $0x4b0] sm:$0xf0]  ;;  %3856 = vmatpush.bf16.msrb.mxu1 %v6417_v2  ;;  %v6024_v2 = vld [vmem:[%s10895_s8] sm:$0xf] }
 0x225   : > { %2527 = vrot.lane.b32.xlu0 %v7231_v58, %s7447_s12  ;;  %v6613_v1 = vor.u32 %v7151_v0, %v6612_v63  ;;  %v6025_v25 = vor.u32 %v7004_v16, %v6024_v2  ;;  %v6446_v63 = vld [vmem:[%s10895_s8 + $0x364] sm:$0xf0]  ;;  %v6306_v56 = vld [vmem:[%s10895_s8 + $0x24c] sm:$0xf0]  ;;  %v7134_v46 = vld [vmem:[%s10895_s8 + $0x42c] sm:$0xf] }
 0x226   : > { %7232 = vpow2.f32 %v2517_v37 }
 0x227   : > { %v2498_v3 = vpop.f32.mrf.mxu3  ;;  %3875 = vmatpush.bf16.msrb.mxu2 %v6641_v31  ;;  %v6222_v31 = vld [vmem:[%s10895_s8 + $0x1a4] sm:$0xf0] }
 0x228   : > { %v9045_v40 = vadd.f32 %v2498_v3, %v2480_v53  ;;  %v6136_v53 = vld [vmem:[%s10895_s8 + $0xe0] sm:$0xf]  ;;  %3857 = vmatpush.bf16.msrb.mxu1 %v6389_v36  ;;  %v7116_v36 = vld [vmem:[%s10895_s8 + $0x398] sm:$0xf0] }
 0x229   : > { %v6360_v3 = vld [vmem:[%s10895_s8 + $0x2a0] sm:$0xf]  ;;  %v6137_v8 = vor.u32 %v7032_v61, %v6136_v53  ;;  %v7043_v53 = vld [vmem:[%s10895_s8 + $0x154] sm:$0xf]  ;;  %v6194_v61 = vld [vmem:[%s10895_s8 + $0x16c] sm:$0xf0] }
 0x22a   : > { %2505 = vst [vmem:[%s9005_s29 + $0x10] sm:$0xff] %v9045_v40  ;;  %v2513_v5 = vmul.f32 0.5, %v9045_v40 }
 0x22b   : > { %3876 = vmatpush.bf16.msrb.mxu2 %v6613_v1  ;;  %3839 = vmatpush.bf16.msrb.mxu0 %v6137_v8  ;;  %v6418_v1 = vld [vmem:[%s10895_s8 + $0x32c] sm:$0xf0] }
 0x22c   : > { %v7233_v7 = vpop.eup %7232  ;;  %v2519_v9 = vmul.f32 1.442695, %v2513_v5 }
 0x22d   : > { %2529 = vrot.lane.b32.xlu0 %v7233_v7, %s7447_s12 }
 0x22e   : > { %7234 = vpow2.f32 %v2519_v9  ;;  %v6361_v9 = vor.u32 %v7088_v4, %v6360_v3  ;;  %v7099_v3 = vld [vmem:[%s10895_s8 + $0x314] sm:$0xf]  ;;  %v6197_v4 = vor.u32 %v7043_v53, %v6194_v61 }
 0x22f   : > { %v2500_v13 = vpop.f32.mrf.mxu3  ;;  %3877 = vmatpush.bf16.msrb.mxu2 %v6585_v12  ;;  %v7148_v12 = vld [vmem:[%s10895_s8 + $0x49c] sm:$0xf] }
 0x230   : > { %v9050_v14 = vadd.f32 %v2500_v13, %v2482_v10  ;;  %3858 = vmatpush.bf16.msrb.mxu1 %v6361_v9  ;;  %v2510_v10 = vld [vmem:[%s9077_s16 + $0x18] sm:$0xff] }
 0x231   : > { %v7036_v9 = vld [vmem:[%s10895_s8 + $0x11c] sm:$0xf] }
 0x232   : > { %2506 = vst [vmem:[%s9005_s29 + $0x18] sm:$0xff] %v9050_v14  ;;  %v2514_v17 = vmul.f32 0.5, %v9050_v14  ;;  %s4971_s29 = sshll.u32 %s4968_s25, 4  ;;  %s4972_s29 = int_to_ptr.hbm [resolvable:$true] %s4971_s29 }
 0x233   : > { %3878 = vmatpush.bf16.msrb.mxu2 %v6557_v32 }
 0x234   : > { %v7235_v19 = vpop.eup %7234  ;;  %v2521_v11 = vmul.f32 1.442695, %v2514_v17 }
 0x235   : > { %2531 = vrot.lane.b32.xlu1 %v7235_v19, %s7447_s12 }
 0x236   : > { %7236 = vpow2.f32 %v2521_v11 }
 0x237   : > { %3879 = vmatpush.bf16.msrb.mxu2 %v6529_v18 }
 0x23b   : > { %3880 = vmatpush.bf16.msrb.mxu2 %v6501_v57  ;;  %v6054_v57 = vld [vmem:[%s10895_s8 + $0x54] sm:$0xf0] }
 0x23c   : > { %v7237_v20 = vpop.eup %7236 }
 0x23d   : > { %2533 = vrot.lane.b32.xlu1 %v7237_v20, %s7447_s12  ;;  %s7365_s12 = sshra.s32 %s4972_s29, 4  ;;  %s7366_s12 = int_to_ptr.hbm [resolvable:$true] %s7365_s12 }
 0x23e   : > { %p7372_p0 = scmp.lt.s32.totalorder %s7366_s12, %s10898_s11 }
 0x297   : > { %v2528_v44 = vpop.permute.xlu0 %2527 }
 0x298   : > { %v2539_v52 = vmul.f32 %v2528_v44, %v2507_v33  ;;  %v7018_v44 = vld [vmem:[%s10895_s8 + $0x88] sm:$0xf0]  ;;  %v6052_v33 = vld [vmem:[%s10895_s8 + $0x38] sm:$0xf] }
 0x299   : > { %v6081_v27 = vor.u32 %v7018_v44, %v6080_v24  ;;  %v6053_v35 = vor.u32 %v7011_v34, %v6052_v33  ;;  %v6614_v24 = vld [vmem:[%s10895_s8 + $0x4b4] sm:$0xf0]  ;;  %v6337_v34 = vor.u32 %v7078_v50, %v6334_v28  ;;  %v7113_v50 = vld [vmem:[%s10895_s8 + $0x384] sm:$0xf] }
 0x29a   : > { %v2543_v5 = vadd.f32 %v2539_v52, %v9003_v29  ;;  %v7106_v52 = vld [vmem:[%s10895_s8 + $0x34c] sm:$0xf]  ;;  %v6617_v44 = vor.u32 %v7148_v12, %v6614_v24  ;;  %v6452_v12 = vld [vmem:[%s10895_s8 + $0x350] sm:$0xf] }
 0x29b   : > { %v6449_v0 = vor.u32 %v7106_v52, %v6446_v63 }
 0x29f   : > { %v2530_v58 = vpop.permute.xlu0 %2529 }
 0x2a0   : > { %v2540_v37 = vmul.f32 %v2530_v58, %v2508_v60  ;;  %v7050_v60 = vld [vmem:[%s10895_s8 + $0x18c] sm:$0xf]  ;;  %v6472_v58 = vld [vmem:[%s10895_s8 + $0x380] sm:$0xf] }
 0x2a1   : > { %v6225_v62 = vor.u32 %v7050_v60, %v6222_v31  ;;  %v7064_v60 = vld [vmem:[%s10895_s8 + $0x1fc] sm:$0xf] }
 0x2a2   : > { %v2544_v6 = vadd.f32 %v2540_v37, %v9037_v59  ;;  %v2509_v59 = vld [vmem:[%s9077_s16 + $0x10] sm:$0xff]  ;;  %v6473_v37 = vor.u32 %v7116_v36, %v6472_v58  ;;  %v6278_v58 = vld [vmem:[%s10895_s8 + $0x214] sm:$0xf0]  ;;  %s7367_s16 = scalar_lea.hbm %s7366_s12, 32 }
 0x2a3   : > { %v7127_v36 = vld [vmem:[%s10895_s8 + $0x3f4] sm:$0xf]  ;;  %p7368_p11 = scmp.ne.s32.totalorder %s7366_s12, %s7367_s16  ;;  %p7373_p1 = scmp.lt.s32.totalorder %s7371_s1, %s7367_s16 }
 0x2a4   : > { %v2547_v7 = vpack.c.bf16 %v2544_v6, %v2543_v5  ;;  %3881 = vmatpush.bf16.msrb.mxu2 %v6473_v37  ;;  %v6421_v5 = vor.u32 %v7099_v3, %v6418_v1  ;;  %v7162_v6 = vld [vmem:[%s10895_s8 + $0x50c] sm:$0xf]  ;;  %v6530_v37 = vld [vmem:[%s10895_s8 + $0x40c] sm:$0xf0]  ;;  %v6281_v3 = vor.u32 %v7064_v60, %v6278_v58  ;;  %v7001_v1 = vld [vmem:[%s10895_s8 + $0x4] sm:$0xf] }
 0x2a5   : > { %v7166_v60 = vld [vmem:[%s10895_s8 + $0x528] sm:$0xf0]  ;;  %p7369_p12 = pnand %p7368_p11, %p7550_p5  ;;  %p7374_p2 = por %p7373_p1, %p7372_p0 }
 0x2a6   : > { %6014 = vmatmul.msk.bf16.vlgmr.msra.gmra.mxu0 %vm2607_vm1, %v2547_v7  ;;  %6016 = vmatmul.msk.bf16.vlgmr.msra.gmra.mxu1 %vm2607_vm1, %v2547_v7 }
 0x2a7   : > { %6018 = vmatmul.msk.bf16.vlgmr.msra.gmra.mxu2 %vm2607_vm1, %v2547_v7  ;;  %6020 = vmatmul.msk.bf16.vlgmr.msra.gmra.mxu3 %vm2607_vm1, %v2547_v7  ;;  %v2532_v29 = vpop.permute.xlu1 %2531  ;;  %v6670_v7 = vld [vmem:[%s10895_s8 + $0x524] sm:$0xf0]  ;;  %p7370_p13 = pneg %p7369_p12 }
 0x2a8   : > { %v2541_v13 = vmul.f32 %v2532_v29, %v2509_v59  ;;  %v6673_v8 = vor.u32 %v7162_v6, %v6670_v7  ;;  %v6166_v29 = vld [vmem:[%s10895_s8 + $0x134] sm:$0xf0]  ;;  %v7092_v59 = vld [vmem:[%s10895_s8 + $0x2dc] sm:$0xf]  ;;  %v7057_v6 = vld [vmem:[%s10895_s8 + $0x1c4] sm:$0xf] }
 0x2a9   : > { %p7375_p3 = pnand %p7374_p2, %p7370_p13 }
 0x2aa   : > { %v2545_v11 = vadd.f32 %v2541_v13, %v9045_v40  ;;  %v6332_v40 = vld [vmem:[%s10895_s8 + $0x268] sm:$0xf]  ;;  %3950 = vmatpush.bf16.msra.mxu2 %v6673_v8  ;;  %v6390_v13 = vld [vmem:[%s10895_s8 + $0x2f4] sm:$0xf0] }
 0x2ab   : > { %v6333_v43 = vor.u32 %v7081_v55, %v6332_v40  ;;  %v7085_v55 = vld [vmem:[%s10895_s8 + $0x2a4] sm:$0xf] }
 0x2ad   : > { %3859 = vmatpush.bf16.msrb.mxu1 %v6333_v43  ;;  %v6362_v43 = vld [vmem:[%s10895_s8 + $0x2bc] sm:$0xf0] }
 0x2ae   : > { %v6365_v45 = vor.u32 %v7085_v55, %v6362_v43 }
 0x2af   : > { %v2534_v17 = vpop.permute.xlu1 %2533 }
 0x2b0   : > { %v2542_v19 = vmul.f32 %v2534_v17, %v2510_v10  ;;  %v6169_v10 = vor.u32 %v7036_v9, %v6166_v29  ;;  %v6393_v17 = vor.u32 %v7092_v59, %v6390_v13  ;;  %v6250_v9 = vld [vmem:[%s10895_s8 + $0x1dc] sm:$0xf0]  ;;  %v7120_v29 = vld [vmem:[%s10895_s8 + $0x3bc] sm:$0xf]  ;;  %v6502_v59 = vld [vmem:[%s10895_s8 + $0x3d4] sm:$0xf0] }
 0x2b1   : > { %3860 = vmatpush.bf16.msrb.mxu1 %v6305_v30  ;;  %v2557_v30 = vld [vmem:[%s10894_s7] sm:$0xf] }
 0x2b2   : > { %v2546_v20 = vadd.f32 %v2542_v19, %v9050_v14  ;;  %v6109_v14 = vor.u32 %v7025_v23, %v6108_v21  ;;  %v7155_v19 = vld [vmem:[%s10895_s8 + $0x4d4] sm:$0xf]  ;;  %v6698_v21 = vld [vmem:[%s10895_s8 + $0x55c] sm:$0xf0]  ;;  %v7029_v23 = vld [vmem:[%s10895_s8 + $0xe4] sm:$0xf] }
 0x2b3   : > { %v9347_v18 = vperm.slane %v2557_v30, 0  ;;  %v9349_v2 = vperm.slane %v2557_v30, 1  ;;  %v9402_v13 = vperm.slane %v2557_v30, 3 }
 0x2b4   : > { %v2548_v15 = vpack.c.bf16 %v2546_v20, %v2545_v11  ;;  %3840 = vmatpush.bf16.msrb.mxu0 %v6109_v14  ;;  %v6642_v11 = vld [vmem:[%s10895_s8 + $0x4ec] sm:$0xf0]  ;;  %v6138_v14 = vld [vmem:[%s10895_s8 + $0xfc] sm:$0xf0] }
 0x2b5   : > { %3861 = vmatpush.bf16.msrb.mxu1 %v6277_v47  ;;  %v6645_v20 = vor.u32 %v7155_v19, %v6642_v11  ;;  %v6141_v49 = vor.u32 %v7029_v23, %v6138_v14  ;;  %v7015_v47 = vld [vmem:[%s10895_s8 + $0x74] sm:$0xf]  ;;  %v6253_v19 = vor.u32 %v7057_v6, %v6250_v9  ;;  %v6505_v23 = vor.u32 %v7120_v29, %v6502_v59  ;;  %v6144_v29 = vld [vmem:[%s10895_s8 + $0xe8] sm:$0xf] }
 0x2b6   : > { %6015 = vmatmul.msk.bf16.gmra.mxu0 %vm2607_vm1, %v2548_v15  ;;  %6017 = vmatmul.msk.bf16.gmra.mxu1 %vm2607_vm1, %v2548_v15  ;;  %v6085_v16 = vor.u32 %v7015_v47, %v6082_v39  ;;  %v6424_v47 = vld [vmem:[%s10895_s8 + $0x318] sm:$0xf]  ;;  %v7159_v9 = vld [vmem:[%s10895_s8 + $0x4f0] sm:$0xf0] }
 0x2b7   : > { %6019 = vmatmul.msk.bf16.gmra.mxu2 %vm2607_vm1, %v2548_v15  ;;  %6021 = vmatmul.msk.bf16.gmra.mxu3 %vm2607_vm1, %v2548_v15  ;;  %v7169_v15 = vld [vmem:[%s10895_s8 + $0x544] sm:$0xf] }
 0x2b8   : > { %3841 = vmatpush.bf16.msrb.mxu0 %v6081_v27  ;;  %v6701_v40 = vor.u32 %v7169_v15, %v6698_v21  ;;  %3951 = vmatpush.bf16.msra.mxu2 %v6645_v20  ;;  %v6110_v27 = vld [vmem:[%s10895_s8 + $0xc4] sm:$0xf0] }
 0x2b9   : > { %3862 = vmatpush.bf16.msrb.mxu1 %v6249_v42  ;;  %v6113_v51 = vor.u32 %v7022_v26, %v6110_v27  ;;  %v6558_v42 = vld [vmem:[%s10895_s8 + $0x444] sm:$0xf0]  ;;  %v7110_v27 = vld [vmem:[%s10895_s8 + $0x368] sm:$0xf0] }
 0x2ba   : > { %3976 = vmatpush.bf16.msra.mxu3 %v6701_v40  ;;  %v6561_v54 = vor.u32 %v7134_v46, %v6558_v42 }
 0x2bc   : > { %3842 = vmatpush.bf16.msrb.mxu0 %v6053_v35  ;;  %3952 = vmatpush.bf16.msra.mxu2 %v6617_v44  ;;  %v7141_v35 = vld [vmem:[%s10895_s8 + $0x464] sm:$0xf] }
 0x2bd   : > { %3931 = vmatpush.bf16.msra.mxu1 %v6449_v0  ;;  %v6589_v38 = vor.u32 %v7141_v35, %v6586_v41  ;;  %v6057_v0 = vor.u32 %v7008_v22, %v6054_v57  ;;  %v6200_v41 = vld [vmem:[%s10895_s8 + $0x158] sm:$0xf]  ;;  %v6676_v57 = vld [vmem:[%s10895_s8 + $0x510] sm:$0xf] }
 0x2c0   : > { %3843 = vmatpush.bf16.msrb.mxu0 %v6025_v25  ;;  %3953 = vmatpush.bf16.msra.mxu2 %v6589_v38  ;;  %v6309_v25 = vor.u32 %v7071_v48, %v6306_v56  ;;  %v7047_v38 = vld [vmem:[%s10895_s8 + $0x170] sm:$0xf0] }
 0x2c1   : > { %3932 = vmatpush.bf16.msra.mxu1 %v6421_v5  ;;  %v6026_v5 = vld [vmem:[%s10895_s8 + $0x1c] sm:$0xf0]  ;;  %v6201_v39 = vor.u32 %v7047_v38, %v6200_v41  ;;  %v7103_v48 = vld [vmem:[%s10895_s8 + $0x330] sm:$0xf0]  ;;  %v7145_v41 = vld [vmem:[%s10895_s8 + $0x480] sm:$0xf0] }
 0x2c2   : > { %v6425_v42 = vor.u32 %v7103_v48, %v6424_v47  ;;  %v6088_v48 = vld [vmem:[%s10895_s8 + $0x78] sm:$0xf] }
 0x2c4   : > { %3912 = vmatpush.bf16.msra.mxu0 %v6225_v62  ;;  %3954 = vmatpush.bf16.msra.mxu2 %v6561_v54 }
 0x2c5   : > { %3933 = vmatpush.bf16.msra.mxu1 %v6393_v17  ;;  %v6029_v17 = vor.u32 %v7001_v1, %v6026_v5 }
 0x2c8   : > { %3913 = vmatpush.bf16.msra.mxu0 %v6197_v4  ;;  %v6533_v4 = vor.u32 %v7127_v36, %v6530_v37 }
 0x2c9   : > { %3934 = vmatpush.bf16.msra.mxu1 %v6365_v45  ;;  %v7054_v45 = vld [vmem:[%s10895_s8 + $0x1a8] sm:$0xf0] }
 0x2ca   : > { %3955 = vmatpush.bf16.msra.mxu2 %v6533_v4  ;;  %v7096_v4 = vld [vmem:[%s10895_s8 + $0x2f8] sm:$0xf0] }
 0x2cc   : > { %3914 = vmatpush.bf16.msra.mxu0 %v6169_v10  ;;  %v9400_v10 = vperm.slane %v2557_v30, 2 }
 0x2cd   : > { %3935 = vmatpush.bf16.msra.mxu1 %v6337_v34  ;;  %v6453_v34 = vor.u32 %v7110_v27, %v6452_v12 }
 0x2ce   : > { %3956 = vmatpush.bf16.msra.mxu2 %v6505_v23 }
 0x2d0   : > { %3915 = vmatpush.bf16.msra.mxu0 %v6141_v49  ;;  %v6228_v49 = vld [vmem:[%s10895_s8 + $0x190] sm:$0xf] }
 0x2d1   : > { %3936 = vmatpush.bf16.msra.mxu1 %v6309_v25  ;;  %v6229_v26 = vor.u32 %v7054_v45, %v6228_v49 }
 0x2d4   : > { %3916 = vmatpush.bf16.msra.mxu0 %v6113_v51  ;;  %v6474_v51 = vld [vmem:[%s10895_s8 + $0x39c] sm:$0xf0] }
 0x2d5   : > { %3937 = vmatpush.bf16.msra.mxu1 %v6281_v3  ;;  %v6477_v35 = vor.u32 %v7113_v50, %v6474_v51  ;;  %v6396_v3 = vld [vmem:[%s10895_s8 + $0x2e0] sm:$0xf]  ;;  %v6116_v50 = vld [vmem:[%s10895_s8 + $0xb0] sm:$0xf]  ;;  %v7026_v51 = vld [vmem:[%s10895_s8 + $0xc8] sm:$0xf0] }
 0x2d7   : > { %3957 = vmatpush.bf16.msra.mxu2 %v6477_v35  ;;  %v6592_v35 = vld [vmem:[%s10895_s8 + $0x468] sm:$0xf] }
 0x2d8   : > { %3917 = vmatpush.bf16.msra.mxu0 %v6085_v16 }
 0x2d9   : > { %3938 = vmatpush.bf16.msra.mxu1 %v6253_v19 }
 0x2dc   : > { %3918 = vmatpush.bf16.msra.mxu0 %v6057_v0 }
 0x2e0   : > { %3919 = vmatpush.bf16.msra.mxu0 %v6029_v17 }
 0x323   : > { %v2623_v32 = vpop.f32.mrf.mxu0  ;;  %v2642_v33 = vpop.f32.mrf.mxu1 }
 0x324   : > { %v2624_v31 = vadd.f32 %v2623_v32, %v9347_v18  ;;  %v2643_v52 = vadd.f32 %v2642_v33, %v9349_v2 }
 0x326   : > { %v2690_v11 = vmax.f32 %v2624_v31, 0.0  ;;  %v2691_v20 = vmax.f32 %v2643_v52, 0.0  ;;  %v6677_v31 = vor.u32 %v7166_v60, %v6676_v57  ;;  %v6704_v52 = vld [vmem:[%s10895_s8 + $0x548] sm:$0xf] }
 0x32a   : > { %v2661_v62 = vpop.f32.mrf.mxu2  ;;  %v2680_v63 = vpop.f32.mrf.mxu3 }
 0x32b   : > { %v2625_v53 = vpop.f32.mrf.mxu0  ;;  %v2644_v61 = vpop.f32.mrf.mxu1  ;;  %v2662_v55 = vadd.f32 %v2661_v62, %v9400_v10  ;;  %v2681_v43 = vadd.f32 %v2680_v63, %v9402_v13  ;;  %v7173_v62 = vld [vmem:[%s10895_s8 + $0x560] sm:$0xf0]  ;;  %v6172_v63 = vld [vmem:[%s10895_s8 + $0x120] sm:$0xf] }
 0x32c   : > { %v2626_v7 = vadd.f32 %v2625_v53, %v9347_v18  ;;  %v2645_v8 = vadd.f32 %v2644_v61, %v9349_v2  ;;  %v6705_v53 = vor.u32 %v7173_v62, %v6704_v52  ;;  %v7040_v61 = vld [vmem:[%s10895_s8 + $0x138] sm:$0xf0] }
 0x32d   : > { %v2692_v16 = vmax.f32 %v2662_v55, 0.0  ;;  %v2693_v56 = vmax.f32 %v2681_v43, 0.0  ;;  %v6173_v6 = vor.u32 %v7040_v61, %v6172_v63  ;;  %v6564_v63 = vld [vmem:[%s10895_s8 + $0x430] sm:$0xf] }
 0x32e   : > { %v2694_v15 = vmax.f32 %v2626_v7, 0.0  ;;  %v2695_v21 = vmax.f32 %v2645_v8, 0.0  ;;  %v6397_v7 = vor.u32 %v7096_v4, %v6396_v3  ;;  %v6648_v8 = vld [vmem:[%s10895_s8 + $0x4d8] sm:$0xf]  ;;  %v7068_v3 = vld [vmem:[%s10895_s8 + $0x218] sm:$0xf0] }
 0x32f   : > { %v6649_v19 = vor.u32 %v7159_v9, %v6648_v8  ;;  %v6536_v4 = vld [vmem:[%s10895_s8 + $0x3f8] sm:$0xf]  ;;  %v7005_v8 = vld [vmem:[%s10895_s8 + $0x20] sm:$0xf0]  ;;  %v6256_v9 = vld [vmem:[%s10895_s8 + $0x1c8] sm:$0xf] }
 0x330   : > { %v9404_v40 = vpack.c.bf16 %v2694_v15, %v2690_v11  ;;  %v9406_v14 = vpack.c.bf16 %v2695_v21, %v2691_v20  ;;  %v7033_v11 = vld [vmem:[%s10895_s8 + $0x100] sm:$0xf0]  ;;  %v6368_v20 = vld [vmem:[%s10895_s8 + $0x2a8] sm:$0xf] }
 0x331   : > { %v7089_v15 = vld [vmem:[%s10895_s8 + $0x2c0] sm:$0xf0]  ;;  %v6145_v21 = vor.u32 %v7033_v11, %v6144_v29 }
 0x332   : > { %v2663_v24 = vpop.f32.mrf.mxu2  ;;  %v2682_v44 = vpop.f32.mrf.mxu3  ;;  %3844 = vmatmul.bf16.vlgmr.msrb.gmra.mxu0 %v9404_v40  ;;  %3863 = vmatmul.bf16.vlgmr.msrb.gmra.mxu1 %v9406_v14  ;;  %v6369_v45 = vor.u32 %v7089_v15, %v6368_v20  ;;  %v7061_v29 = vld [vmem:[%s10895_s8 + $0x1e0] sm:$0xf0]  ;;  %v7051_v15 = vld [vmem:[%s10895_s8 + $0x194] sm:$0xf] }
 0x333   : > { %v2664_v28 = vadd.f32 %v2663_v24, %v9400_v10  ;;  %v2683_v30 = vadd.f32 %v2682_v44, %v9402_v13  ;;  %v2628_v32 = vpop.f32.mrf.mxu0  ;;  %v2647_v33 = vpop.f32.mrf.mxu1  ;;  %3988 = vmatpush.bf16.msrb.mxu0 %v6229_v26  ;;  %4007 = vmatpush.bf16.msrb.mxu1 %v6453_v34  ;;  %v7082_v34 = vld [vmem:[%s10895_s8 + $0x288] sm:$0xf0]  ;;  %v6257_v11 = vor.u32 %v7061_v29, %v6256_v9  ;;  %v6090_v9 = vld [vmem:[%s10895_s8 + $0x94] sm:$0xf0]  ;;  %v7072_v29 = vld [vmem:[%s10895_s8 + $0x23c] sm:$0xf] }
 0x334   : > { %v2629_v0 = vadd.f32 %v2628_v32, %v9347_v18  ;;  %v2648_v58 = vadd.f32 %v2647_v33, %v9349_v2  ;;  %v6117_v33 = vor.u32 %v7026_v51, %v6116_v50  ;;  %v6426_v51 = vld [vmem:[%s10895_s8 + $0x334] sm:$0xf0] }
 0x335   : > { %v2696_v25 = vmax.f32 %v2664_v28, 0.0  ;;  %v2697_v46 = vmax.f32 %v2683_v30, 0.0  ;;  %v6340_v28 = vld [vmem:[%s10895_s8 + $0x270] sm:$0xf] }
 0x336   : > { %v2698_v23 = vmax.f32 %v2629_v0, 0.0  ;;  %v2699_v55 = vmax.f32 %v2648_v58, 0.0  ;;  %v7138_v0 = vld [vmem:[%s10895_s8 + $0x448] sm:$0xf0] }
 0x337   : > { %v9444_v54 = vpack.c.bf16 %v2696_v25, %v2692_v16  ;;  %v9446_v22 = vpack.c.bf16 %v2697_v46, %v2693_v56  ;;  %3989 = vmatpush.bf16.msrb.mxu0 %v6201_v39  ;;  %4008 = vmatpush.bf16.msrb.mxu1 %v6425_v42  ;;  %v6341_v39 = vor.u32 %v7082_v34, %v6340_v28  ;;  %v7019_v16 = vld [vmem:[%s10895_s8 + $0x90] sm:$0xf0]  ;;  %v6312_v25 = vld [vmem:[%s10895_s8 + $0x238] sm:$0xf]  ;;  %v7170_v34 = vld [vmem:[%s10895_s8 + $0x54c] sm:$0xf] }
 0x338   : > { %v6593_v56 = vor.u32 %v7145_v41, %v6592_v35  ;;  %v6089_v60 = vor.u32 %v7019_v16, %v6088_v48  ;;  %v6565_v58 = vor.u32 %v7138_v0, %v6564_v63  ;;  %v6706_v35 = vld [vmem:[%s10895_s8 + $0x564] sm:$0xf0]  ;;  %v7037_v41 = vld [vmem:[%s10895_s8 + $0x124] sm:$0xf]  ;;  %v6398_v48 = vld [vmem:[%s10895_s8 + $0x2fc] sm:$0xf0] }
 0x339   : > { %3882 = vmatmul.bf16.vlgmr.msrb.gmra.mxu2 %v9444_v54  ;;  %6722 = vmatmul.msk.bf16.vlgmr.msrb.gmra.mxu3 %vm1654_vm0, %v9446_v22  ;;  %v7149_v63 = vld [vmem:[%s10895_s8 + $0x4a4] sm:$0xf]  ;;  %v6622_v0 = vld [vmem:[%s10895_s8 + $0x4bc] sm:$0xf0] }
 0x33a   : > { %v2666_v36 = vpop.f32.mrf.mxu2  ;;  %v2685_v37 = vpop.f32.mrf.mxu3  ;;  %4026 = vmatpush.bf16.msrb.mxu2 %v6677_v31  ;;  %4052 = vmatpush.bf16.msrb.mxu3 %v6705_v53  ;;  %v6284_v53 = vld [vmem:[%s10895_s8 + $0x200] sm:$0xf] }
 0x33b   : > { %v2630_v1 = vpop.f32.mrf.mxu0  ;;  %v2649_v5 = vpop.f32.mrf.mxu1  ;;  %3990 = vmatpush.bf16.msrb.mxu0 %v6173_v6  ;;  %4009 = vmatpush.bf16.msrb.mxu1 %v6397_v7  ;;  %v2667_v26 = vadd.f32 %v2666_v36, %v9400_v10  ;;  %v2686_v27 = vadd.f32 %v2685_v37, %v9402_v13  ;;  %v6060_v36 = vld [vmem:[%s10895_s8 + $0x40] sm:$0xf]  ;;  %v7012_v37 = vld [vmem:[%s10895_s8 + $0x58] sm:$0xf0]  ;;  %v6032_v7 = vld [vmem:[%s10895_s8 + $0x8] sm:$0xf] }
 0x33c   : > { %v2631_v59 = vadd.f32 %v2630_v1, %v9347_v18  ;;  %v2650_v17 = vadd.f32 %v2649_v5, %v9349_v2  ;;  %v6620_v18 = vld [vmem:[%s10895_s8 + $0x4a0] sm:$0xf]  ;;  %v7152_v2 = vld [vmem:[%s10895_s8 + $0x4b8] sm:$0xf0]  ;;  %v6061_v61 = vor.u32 %v7012_v37, %v6060_v36  ;;  %v7131_v1 = vld [vmem:[%s10895_s8 + $0x410] sm:$0xf0]  ;;  %v6285_v5 = vor.u32 %v7068_v3, %v6284_v53 }
 0x33d   : > { %v6621_v12 = vor.u32 %v7152_v2, %v6620_v18  ;;  %v2701_v46 = vmax.f32 %v2686_v27, 0.0  ;;  %v6537_v6 = vor.u32 %v7131_v1, %v6536_v4  ;;  %v7107_v18 = vld [vmem:[%s10895_s8 + $0x354] sm:$0xf]  ;;  %v6625_v36 = vor.u32 %v7149_v63, %v6622_v0  ;;  %v6118_v53 = vld [vmem:[%s10895_s8 + $0xcc] sm:$0xf0] }
 0x33e   : > { %v2702_v43 = vmax.f32 %v2631_v59, 0.0  ;;  %v2703_v49 = vmax.f32 %v2650_v17, 0.0  ;;  %4027 = vmatpush.bf16.msrb.mxu2 %v6649_v19  ;;  %v6508_v59 = vld [vmem:[%s10895_s8 + $0x3c0] sm:$0xf]  ;;  %v7124_v17 = vld [vmem:[%s10895_s8 + $0x3d8] sm:$0xf0]  ;;  %v6033_v19 = vor.u32 %v7005_v8, %v6032_v7 }
 0x33f   : > { %3991 = vmatpush.bf16.msrb.mxu0 %v6145_v21  ;;  %4010 = vmatpush.bf16.msrb.mxu1 %v6369_v45  ;;  %v6509_v20 = vor.u32 %v7124_v17, %v6508_v59  ;;  %v6230_v21 = vld [vmem:[%s10895_s8 + $0x1ac] sm:$0xf0]  ;;  %v7044_v45 = vld [vmem:[%s10895_s8 + $0x15c] sm:$0xf]  ;;  %v7023_v37 = vld [vmem:[%s10895_s8 + $0xb4] sm:$0xf] }
 0x340   : > { %v9503_v24 = vpack.c.bf16 %v2702_v43, %v2698_v23  ;;  %v9505_v44 = vpack.c.bf16 %v2703_v49, %v2699_v55  ;;  %v6233_v2 = vor.u32 %v7051_v15, %v6230_v21  ;;  %v6454_v23 = vld [vmem:[%s10895_s8 + $0x36c] sm:$0xf0]  ;;  %v6480_v55 = vld [vmem:[%s10895_s8 + $0x388] sm:$0xf]  ;;  %v7117_v43 = vld [vmem:[%s10895_s8 + $0x3a0] sm:$0xf0]  ;;  %v6121_v3 = vor.u32 %v7023_v37, %v6118_v53 }
 0x341   : > { %v6457_v49 = vor.u32 %v7107_v18, %v6454_v23  ;;  %v6481_v27 = vor.u32 %v7117_v43, %v6480_v55  ;;  %v6342_v4 = vld [vmem:[%s10895_s8 + $0x28c] sm:$0xf0]  ;;  %v7142_v1 = vld [vmem:[%s10895_s8 + $0x46c] sm:$0xf]  ;;  %v7016_v8 = vld [vmem:[%s10895_s8 + $0x7c] sm:$0xf] }
 0x342   : > { %v2668_v30 = vpop.f32.mrf.mxu2  ;;  %v2687_v32 = vpop.f32.mrf.mxu3  ;;  %3849 = vmatmul.bf16.gmra.mxu0 %v9503_v24  ;;  %3868 = vmatmul.bf16.gmra.mxu1 %v9505_v44  ;;  %v6314_v59 = vld [vmem:[%s10895_s8 + $0x254] sm:$0xf0]  ;;  %v6093_v17 = vor.u32 %v7016_v8, %v6090_v9  ;;  %v7009_v21 = vld [vmem:[%s10895_s8 + $0x44] sm:$0xf]  ;;  %v6062_v18 = vld [vmem:[%s10895_s8 + $0x5c] sm:$0xf0] }
 0x343   : > { %v2669_v38 = vadd.f32 %v2668_v30, %v9400_v10  ;;  %v2688_v47 = vadd.f32 %v2687_v32, %v9402_v13  ;;  %4028 = vmatpush.bf16.msrb.mxu2 %v6621_v12  ;;  %v7075_v10 = vld [vmem:[%s10895_s8 + $0x250] sm:$0xf0]  ;;  %v2700_v13 = vmax.f32 %v2667_v26, 0.0  ;;  %3992 = vmatpush.bf16.msrb.mxu0 %v6117_v33  ;;  %v6202_v12 = vld [vmem:[%s10895_s8 + $0x174] sm:$0xf0]  ;;  %v6065_v23 = vor.u32 %v7009_v21, %v6062_v18 }
 0x344   : > { %4011 = vmatpush.bf16.msrb.mxu1 %v6341_v39  ;;  %v6313_v62 = vor.u32 %v7075_v10, %v6312_v25  ;;  %v7100_v26 = vld [vmem:[%s10895_s8 + $0x31c] sm:$0xf]  ;;  %v6205_v50 = vor.u32 %v7044_v45, %v6202_v12  ;;  %v7163_v30 = vld [vmem:[%s10895_s8 + $0x514] sm:$0xf]  ;;  %v6678_v32 = vld [vmem:[%s10895_s8 + $0x52c] sm:$0xf0] }
 0x345   : > { %v2704_v42 = vmax.f32 %v2669_v38, 0.0  ;;  %v2705_v57 = vmax.f32 %v2688_v47, 0.0  ;;  %v6429_v28 = vor.u32 %v7100_v26, %v6426_v51  ;;  %v6681_v33 = vor.u32 %v7163_v30, %v6678_v32  ;;  %v6174_v47 = vld [vmem:[%s10895_s8 + $0x13c] sm:$0xf0]  ;;  %v7093_v39 = vld [vmem:[%s10895_s8 + $0x2e4] sm:$0xf] }
 0x346   : > { %v6709_v38 = vor.u32 %v7170_v34, %v6706_v35  ;;  %v6177_v16 = vor.u32 %v7037_v41, %v6174_v47  ;;  %v7156_v25 = vld [vmem:[%s10895_s8 + $0x4dc] sm:$0xf]  ;;  %v6650_v10 = vld [vmem:[%s10895_s8 + $0x4f4] sm:$0xf0]  ;;  %v6286_v55 = vld [vmem:[%s10895_s8 + $0x21c] sm:$0xf0] }
 0x347   : > { %v9543_v31 = vpack.c.bf16 %v2704_v42, %v2700_v13  ;;  %v9545_v52 = vpack.c.bf16 %v2705_v57, %v2701_v46  ;;  %4029 = vmatpush.bf16.msrb.mxu2 %v6593_v56  ;;  %3993 = vmatpush.bf16.msrb.mxu0 %v6089_v60  ;;  %v6401_v56 = vor.u32 %v7093_v39, %v6398_v48  ;;  %v7030_v13 = vld [vmem:[%s10895_s8 + $0xec] sm:$0xf]  ;;  %v6146_v42 = vld [vmem:[%s10895_s8 + $0x104] sm:$0xf0]  ;;  %v7128_v43 = vld [vmem:[%s10895_s8 + $0x3fc] sm:$0xf] }
 0x348   : > { %4012 = vmatpush.bf16.msrb.mxu1 %v6313_v62  ;;  %v6653_v46 = vor.u32 %v7156_v25, %v6650_v10  ;;  %v7086_v57 = vld [vmem:[%s10895_s8 + $0x2ac] sm:$0xf]  ;;  %v6370_v60 = vld [vmem:[%s10895_s8 + $0x2c4] sm:$0xf0]  ;;  %v6149_v62 = vor.u32 %v7030_v13, %v6146_v42  ;;  %v6510_v30 = vld [vmem:[%s10895_s8 + $0x3dc] sm:$0xf0] }
 0x349   : > { %3887 = vmatmul.bf16.gmra.mxu2 %v9543_v31  ;;  %6723 = vmatmul.msk.bf16.gmra.mxu3 %vm1654_vm0, %v9545_v52  ;;  %v7002_v26 = vld [vmem:[%s10895_s8 + $0xc] sm:$0xf]  ;;  %v6258_v51 = vld [vmem:[%s10895_s8 + $0x1e4] sm:$0xf0]  ;;  %v6236_v35 = vld [vmem:[%s10895_s8 + $0x198] sm:$0xf] }
 0x34a   : > { %v7055_v41 = vld [vmem:[%s10895_s8 + $0x1b0] sm:$0xf0]  ;;  %v7114_v48 = vld [vmem:[%s10895_s8 + $0x38c] sm:$0xf]  ;;  %v6208_v25 = vld [vmem:[%s10895_s8 + $0x160] sm:$0xf] }
 0x34b   : > { %4030 = vmatpush.bf16.msrb.mxu2 %v6565_v58  ;;  %3994 = vmatpush.bf16.msrb.mxu0 %v6061_v61  ;;  %v6373_v58 = vor.u32 %v7086_v57, %v6370_v60  ;;  %v7079_v61 = vld [vmem:[%s10895_s8 + $0x274] sm:$0xf]  ;;  %v6237_v47 = vor.u32 %v7055_v41, %v6236_v35  ;;  %v7048_v10 = vld [vmem:[%s10895_s8 + $0x178] sm:$0xf0]  ;;  %v6432_v13 = vld [vmem:[%s10895_s8 + $0x320] sm:$0xf] }
 0x34c   : > { %4013 = vmatpush.bf16.msrb.mxu1 %v6285_v5  ;;  %v6594_v5 = vld [vmem:[%s10895_s8 + $0x484] sm:$0xf0]  ;;  %v7111_v39 = vld [vmem:[%s10895_s8 + $0x370] sm:$0xf0]  ;;  %v6209_v42 = vor.u32 %v7048_v10, %v6208_v25  ;;  %v7104_v57 = vld [vmem:[%s10895_s8 + $0x338] sm:$0xf0] }
 0x34d   : > { %v6597_v7 = vor.u32 %v7142_v1, %v6594_v5  ;;  %v6433_v60 = vor.u32 %v7104_v57, %v6432_v13  ;;  %v7167_v63 = vld [vmem:[%s10895_s8 + $0x530] sm:$0xf0]  ;;  %v6180_v37 = vld [vmem:[%s10895_s8 + $0x128] sm:$0xf]  ;;  %v6152_v8 = vld [vmem:[%s10895_s8 + $0xf0] sm:$0xf] }
 0x34e   : > { %v6124_v18 = vld [vmem:[%s10895_s8 + $0xb8] sm:$0xf]  ;;  %v6068_v41 = vld [vmem:[%s10895_s8 + $0x48] sm:$0xf]  ;;  %v6040_v13 = vld [vmem:[%s10895_s8 + $0x10] sm:$0xf] }
 0x34f   : > { %4031 = vmatpush.bf16.msrb.mxu2 %v6537_v6  ;;  %3995 = vmatpush.bf16.msrb.mxu0 %v6033_v19  ;;  %v6345_v6 = vor.u32 %v7079_v61, %v6342_v4  ;;  %v6317_v19 = vor.u32 %v7072_v29, %v6314_v59  ;;  %v7041_v61 = vld [vmem:[%s10895_s8 + $0x140] sm:$0xf0]  ;;  %v7034_v29 = vld [vmem:[%s10895_s8 + $0x108] sm:$0xf0]  ;;  %v6376_v59 = vld [vmem:[%s10895_s8 + $0x2b0] sm:$0xf] }
 0x350   : > { %4014 = vmatpush.bf16.msrb.mxu1 %v6257_v11  ;;  %v7135_v11 = vld [vmem:[%s10895_s8 + $0x434] sm:$0xf]  ;;  %v7097_v4 = vld [vmem:[%s10895_s8 + $0x300] sm:$0xf0]  ;;  %v6181_v1 = vor.u32 %v7041_v61, %v6180_v37  ;;  %v7062_v57 = vld [vmem:[%s10895_s8 + $0x1e8] sm:$0xf0] }
 0x351   : > { %v6238_v37 = vld [vmem:[%s10895_s8 + $0x1b4] sm:$0xf0] }
 0x352   : > { %3920 = vmatmul.bf16.vlgmr.msra.gmra.mxu0 %v9404_v40  ;;  %3939 = vmatmul.bf16.vlgmr.msra.gmra.mxu1 %v9406_v14 }
 0x353   : > { %4032 = vmatpush.bf16.msrb.mxu2 %v6509_v20  ;;  %4064 = vmatpush.bf16.msra.mxu0 %v6233_v2  ;;  %v6566_v20 = vld [vmem:[%s10895_s8 + $0x44c] sm:$0xf0]  ;;  %v7065_v2 = vld [vmem:[%s10895_s8 + $0x204] sm:$0xf] }
 0x354   : > { %4083 = vmatpush.bf16.msra.mxu1 %v6457_v49  ;;  %v6569_v15 = vor.u32 %v7135_v11, %v6566_v20  ;;  %v6538_v49 = vld [vmem:[%s10895_s8 + $0x414] sm:$0xf0]  ;;  %v6289_v45 = vor.u32 %v7065_v2, %v6286_v55  ;;  %v6628_v11 = vld [vmem:[%s10895_s8 + $0x4a8] sm:$0xf]  ;;  %v7153_v20 = vld [vmem:[%s10895_s8 + $0x4c0] sm:$0xf0] }
 0x355   : > { %v6541_v12 = vor.u32 %v7128_v43, %v6538_v49  ;;  %v6629_v21 = vor.u32 %v7153_v20, %v6628_v11  ;;  %v7027_v2 = vld [vmem:[%s10895_s8 + $0xd0] sm:$0xf0]  ;;  %v6600_v49 = vld [vmem:[%s10895_s8 + $0x470] sm:$0xf]  ;;  %v6686_v11 = vld [vmem:[%s10895_s8 + $0x534] sm:$0xf0] }
 0x356   : > { %v6125_v55 = vor.u32 %v7027_v2, %v6124_v18  ;;  %v7083_v43 = vld [vmem:[%s10895_s8 + $0x290] sm:$0xf0]  ;;  %v7094_v18 = vld [vmem:[%s10895_s8 + $0x2ec] sm:$0xf] }
 0x357   : > { %4033 = vmatpush.bf16.msrb.mxu2 %v6481_v27  ;;  %4065 = vmatpush.bf16.msra.mxu0 %v6205_v50  ;;  %v6034_v27 = vld [vmem:[%s10895_s8 + $0x24] sm:$0xf0]  ;;  %v7058_v50 = vld [vmem:[%s10895_s8 + $0x1cc] sm:$0xf]  ;;  %v7171_v2 = vld [vmem:[%s10895_s8 + $0x554] sm:$0xf] }
 0x358   : > { %4084 = vmatpush.bf16.msra.mxu1 %v6429_v28  ;;  %v7121_v28 = vld [vmem:[%s10895_s8 + $0x3c4] sm:$0xf]  ;;  %v6037_v32 = vor.u32 %v7002_v26, %v6034_v27  ;;  %v6096_v27 = vld [vmem:[%s10895_s8 + $0x80] sm:$0xf] }
 0x359   : > { %3958 = vmatmul.bf16.vlgmr.msra.gmra.mxu2 %v9444_v54  ;;  %6724 = vmatmul.msk.bf16.vlgmr.msra.gmra.mxu3 %vm1654_vm0, %v9446_v22  ;;  %v6513_v34 = vor.u32 %v7121_v28, %v6510_v30  ;;  %v7076_v28 = vld [vmem:[%s10895_s8 + $0x258] sm:$0xf0] }
 0x35a   : > { %4128 = vmatpush.bf16.msra.mxu3 %v6709_v38  ;;  %v6460_v38 = vld [vmem:[%s10895_s8 + $0x358] sm:$0xf] }
 0x35b   : > { %4102 = vmatpush.bf16.msra.mxu2 %v6681_v33  ;;  %4066 = vmatpush.bf16.msra.mxu0 %v6177_v16  ;;  %v6261_v33 = vor.u32 %v7058_v50, %v6258_v51  ;;  %v6482_v16 = vld [vmem:[%s10895_s8 + $0x3a4] sm:$0xf0]  ;;  %v7020_v50 = vld [vmem:[%s10895_s8 + $0x98] sm:$0xf0]  ;;  %v6320_v51 = vld [vmem:[%s10895_s8 + $0x240] sm:$0xf] }
 0x35c   : > { %4085 = vmatpush.bf16.msra.mxu1 %v6401_v56  ;;  %v6461_v56 = vor.u32 %v7111_v39, %v6460_v38  ;;  %v6097_v30 = vor.u32 %v7020_v50, %v6096_v27  ;;  %v7013_v38 = vld [vmem:[%s10895_s8 + $0x60] sm:$0xf0]  ;;  %v7031_v50 = vld [vmem:[%s10895_s8 + $0xf4] sm:$0xf] }
 0x35d   : > { %v6069_v39 = vor.u32 %v7013_v38, %v6068_v41  ;;  %v7024_v38 = vld [vmem:[%s10895_s8 + $0xbc] sm:$0xf] }
 0x35f   : > { %4103 = vmatpush.bf16.msra.mxu2 %v6653_v46  ;;  %4067 = vmatpush.bf16.msra.mxu0 %v6149_v62  ;;  %v6485_v46 = vor.u32 %v7114_v48, %v6482_v16  ;;  %v6684_v62 = vld [vmem:[%s10895_s8 + $0x518] sm:$0xf]  ;;  %v7069_v48 = vld [vmem:[%s10895_s8 + $0x220] sm:$0xf0]  ;;  %v6544_v16 = vld [vmem:[%s10895_s8 + $0x400] sm:$0xf] }
 0x360   : > { %4086 = vmatpush.bf16.msra.mxu1 %v6373_v58  ;;  %v6685_v0 = vor.u32 %v7167_v63, %v6684_v62  ;;  %v6712_v58 = vld [vmem:[%s10895_s8 + $0x550] sm:$0xf]  ;;  %v6516_v63 = vld [vmem:[%s10895_s8 + $0x3c8] sm:$0xf] }
 0x362   : > { %3925 = vmatmul.bf16.gmra.mxu0 %v9503_v24  ;;  %3944 = vmatmul.bf16.gmra.mxu1 %v9505_v44 }
 0x363   : > { %4104 = vmatpush.bf16.msra.mxu2 %v6625_v36  ;;  %4068 = vmatpush.bf16.msra.mxu0 %v6121_v3  ;;  %v7174_v36 = vld [vmem:[%s10895_s8 + $0x568] sm:$0xf0]  ;;  %v6404_v3 = vld [vmem:[%s10895_s8 + $0x2e8] sm:$0xf] }
 0x364   : > { %4087 = vmatpush.bf16.msra.mxu1 %v6345_v6  ;;  %v6713_v53 = vor.u32 %v7174_v36, %v6712_v58  ;;  %v6405_v5 = vor.u32 %v7097_v4, %v6404_v3  ;;  %v6656_v6 = vld [vmem:[%s10895_s8 + $0x4e0] sm:$0xf]  ;;  %v7052_v36 = vld [vmem:[%s10895_s8 + $0x19c] sm:$0xf]  ;;  %v6462_v3 = vld [vmem:[%s10895_s8 + $0x374] sm:$0xf0] }
 0x365   : > { %v6241_v61 = vor.u32 %v7052_v36, %v6238_v37  ;;  %v6488_v4 = vld [vmem:[%s10895_s8 + $0x390] sm:$0xf]  ;;  %v7010_v37 = vld [vmem:[%s10895_s8 + $0x4c] sm:$0xf] }
 0x367   : > { %4105 = vmatpush.bf16.msra.mxu2 %v6597_v7  ;;  %4069 = vmatpush.bf16.msra.mxu0 %v6093_v17  ;;  %v7160_v7 = vld [vmem:[%s10895_s8 + $0x4f8] sm:$0xf0]  ;;  %v7090_v17 = vld [vmem:[%s10895_s8 + $0x2c8] sm:$0xf0] }
 0x368   : > { %4088 = vmatpush.bf16.msra.mxu1 %v6317_v19  ;;  %v6657_v9 = vor.u32 %v7160_v7, %v6656_v6  ;;  %v6153_v19 = vor.u32 %v7034_v29, %v6152_v8  ;;  %v7045_v7 = vld [vmem:[%s10895_s8 + $0x164] sm:$0xf]  ;;  %v6210_v8 = vld [vmem:[%s10895_s8 + $0x17c] sm:$0xf0] }
 0x369   : > { %3963 = vmatmul.bf16.gmra.mxu2 %v9543_v31  ;;  %6725 = vmatmul.msk.bf16.gmra.mxu3 %vm1654_vm0, %v9545_v52  ;;  %v6213_v29 = vor.u32 %v7045_v7, %v6210_v8  ;;  %v7003_v8 = vld [vmem:[%s10895_s8 + $0x14] sm:$0xf] }
 0x36b   : > { %4106 = vmatpush.bf16.msra.mxu2 %v6569_v15  ;;  %4070 = vmatpush.bf16.msra.mxu0 %v6065_v23  ;;  %v6377_v15 = vor.u32 %v7090_v17, %v6376_v59  ;;  %v6348_v23 = vld [vmem:[%s10895_s8 + $0x278] sm:$0xf]  ;;  %v6434_v59 = vld [vmem:[%s10895_s8 + $0x33c] sm:$0xf0] }
 0x36c   : > { %4089 = vmatpush.bf16.msra.mxu1 %v6289_v45  ;;  %v7146_v45 = vld [vmem:[%s10895_s8 + $0x488] sm:$0xf0] }
 0x36d   : > { %v6601_v26 = vor.u32 %v7146_v45, %v6600_v49 }
 0x36f   : > { %4107 = vmatpush.bf16.msra.mxu2 %v6541_v12  ;;  %4071 = vmatpush.bf16.msra.mxu0 %v6037_v32  ;;  %v6349_v12 = vor.u32 %v7083_v43, %v6348_v23  ;;  %v6321_v32 = vor.u32 %v7076_v28, %v6320_v51  ;;  %v6714_v23 = vld [vmem:[%s10895_s8 + $0x56c] sm:$0xf0]  ;;  %v6406_v43 = vld [vmem:[%s10895_s8 + $0x304] sm:$0xf0]  ;;  %v7087_v28 = vld [vmem:[%s10895_s8 + $0x2b4] sm:$0xf] }
 0x370   : > { %4090 = vmatpush.bf16.msra.mxu1 %v6261_v33  ;;  %v6572_v33 = vld [vmem:[%s10895_s8 + $0x438] sm:$0xf]  ;;  %v6717_v49 = vor.u32 %v7171_v2, %v6714_v23  ;;  %v6409_v45 = vor.u32 %v7094_v18, %v6406_v43  ;;  %v6154_v51 = vld [vmem:[%s10895_s8 + $0x10c] sm:$0xf0]  ;;  %v6244_v2 = vld [vmem:[%s10895_s8 + $0x1a0] sm:$0xf] }
 0x371   : > { %v7056_v23 = vld [vmem:[%s10895_s8 + $0x1b8] sm:$0xf0] }
 0x372   : > { %3996 = vmatmul.bf16.vlgmr.msrb.gmra.mxu0 %v9404_v40  ;;  %4015 = vmatmul.bf16.vlgmr.msrb.gmra.mxu1 %v9406_v14  ;;  %v6245_v43 = vor.u32 %v7056_v23, %v6244_v2  ;;  %v7147_v2 = vld [vmem:[%s10895_s8 + $0x490] sm:$0xf0] }
 0x373   : > { %4108 = vmatpush.bf16.msra.mxu2 %v6513_v34  ;;  %4140 = vmatpush.bf16.msrb.mxu0 %v6237_v47  ;;  %v7139_v34 = vld [vmem:[%s10895_s8 + $0x450] sm:$0xf0]  ;;  %v6292_v47 = vld [vmem:[%s10895_s8 + $0x208] sm:$0xf] }
 0x374   : > { %4159 = vmatpush.bf16.msrb.mxu1 %v6461_v56  ;;  %v6573_v35 = vor.u32 %v7139_v34, %v6572_v33  ;;  %v7132_v56 = vld [vmem:[%s10895_s8 + $0x418] sm:$0xf0]  ;;  %v6293_v25 = vor.u32 %v7069_v48, %v6292_v47  ;;  %v7150_v34 = vld [vmem:[%s10895_s8 + $0x4ac] sm:$0xf]  ;;  %v6126_v47 = vld [vmem:[%s10895_s8 + $0xd4] sm:$0xf0] }
 0x375   : > { %v6545_v10 = vor.u32 %v7132_v56, %v6544_v16  ;;  %v6129_v48 = vor.u32 %v7024_v38, %v6126_v47  ;;  %v6350_v16 = vld [vmem:[%s10895_s8 + $0x294] sm:$0xf0]  ;;  %v7168_v38 = vld [vmem:[%s10895_s8 + $0x538] sm:$0xf0]  ;;  %v10121_v47 = vld [vmem:[%s10896_s9] sm:$0x7f] }
 0x377   : > { %4109 = vmatpush.bf16.msra.mxu2 %v6485_v46  ;;  %4141 = vmatpush.bf16.msrb.mxu0 %v6209_v42  ;;  %v7006_v46 = vld [vmem:[%s10895_s8 + $0x28] sm:$0xf0]  ;;  %v6264_v42 = vld [vmem:[%s10895_s8 + $0x1d0] sm:$0xf] }
 0x378   : > { %4160 = vmatpush.bf16.msrb.mxu1 %v6433_v60  ;;  %v6041_v60 = vor.u32 %v7006_v46, %v6040_v13  ;;  %v6265_v62 = vor.u32 %v7062_v57, %v6264_v42  ;;  %v7017_v46 = vld [vmem:[%s10895_s8 + $0x84] sm:$0xf]  ;;  %v6098_v42 = vld [vmem:[%s10895_s8 + $0x9c] sm:$0xf0] }
 0x379   : > { %4034 = vmatmul.bf16.vlgmr.msrb.gmra.mxu2 %v9444_v54  ;;  %6726 = vmatmul.msk.bf16.vlgmr.msrb.gmra.mxu3 %vm1654_vm0, %v9446_v22  ;;  %v7073_v57 = vld [vmem:[%s10895_s8 + $0x244] sm:$0xf] }
 0x37a   : > { %4204 = vmatpush.bf16.msrb.mxu3 %v6713_v53  ;;  %v7108_v53 = vld [vmem:[%s10895_s8 + $0x35c] sm:$0xf] }
 0x37b   : > { %4178 = vmatpush.bf16.msrb.mxu2 %v6685_v0  ;;  %4142 = vmatpush.bf16.msrb.mxu0 %v6181_v1  ;;  %v7125_v0 = vld [vmem:[%s10895_s8 + $0x3e0] sm:$0xf0]  ;;  %v7118_v1 = vld [vmem:[%s10895_s8 + $0x3a8] sm:$0xf0] }
 0x37c   : > { %4161 = vmatpush.bf16.msrb.mxu1 %v6405_v5  ;;  %v6517_v58 = vor.u32 %v7125_v0, %v6516_v63  ;;  %v6465_v5 = vor.u32 %v7108_v53, %v6462_v3  ;;  %v6489_v6 = vor.u32 %v7118_v1, %v6488_v4  ;;  %v7136_v0 = vld [vmem:[%s10895_s8 + $0x43c] sm:$0xf]  ;;  %v6070_v53 = vld [vmem:[%s10895_s8 + $0x64] sm:$0xf0] }
 0x37d   : > { %v6073_v3 = vor.u32 %v7010_v37, %v6070_v53  ;;  %v6294_v4 = vld [vmem:[%s10895_s8 + $0x224] sm:$0xf0] }
 0x37f   : > { %4179 = vmatpush.bf16.msrb.mxu2 %v6657_v9  ;;  %4143 = vmatpush.bf16.msrb.mxu0 %v6153_v19  ;;  %v7101_v9 = vld [vmem:[%s10895_s8 + $0x324] sm:$0xf]  ;;  %v7164_v19 = vld [vmem:[%s10895_s8 + $0x51c] sm:$0xf] }
 0x380   : > { %4162 = vmatpush.bf16.msrb.mxu1 %v6377_v15  ;;  %v6437_v17 = vor.u32 %v7101_v9, %v6434_v59  ;;  %v6689_v20 = vor.u32 %v7164_v19, %v6686_v11  ;;  %v7038_v15 = vld [vmem:[%s10895_s8 + $0x12c] sm:$0xf]  ;;  %v6042_v9 = vld [vmem:[%s10895_s8 + $0x2c] sm:$0xf0] }
 0x381   : > { %v6045_v19 = vor.u32 %v7003_v8, %v6042_v9  ;;  %v6266_v11 = vld [vmem:[%s10895_s8 + $0x1ec] sm:$0xf0]  ;;  %v6132_v8 = vld [vmem:[%s10895_s8 + $0xc0] sm:$0xf]  ;;  %v7028_v9 = vld [vmem:[%s10895_s8 + $0xd8] sm:$0xf0] }
 0x382   : > { %4001 = vmatmul.bf16.gmra.mxu0 %v9503_v24  ;;  %4020 = vmatmul.bf16.gmra.mxu1 %v9505_v44 }
 0x383   : > { %4180 = vmatpush.bf16.msrb.mxu2 %v6629_v21  ;;  %4144 = vmatpush.bf16.msrb.mxu0 %v6125_v55  ;;  %v6182_v21 = vld [vmem:[%s10895_s8 + $0x144] sm:$0xf0] }
 0x384   : > { %4163 = vmatpush.bf16.msrb.mxu1 %v6349_v12  ;;  %v6185_v55 = vor.u32 %v7038_v15, %v6182_v21  ;;  %v7157_v12 = vld [vmem:[%s10895_s8 + $0x4e4] sm:$0xf]  ;;  %v7122_v15 = vld [vmem:[%s10895_s8 + $0x3cc] sm:$0xf]  ;;  %v6518_v21 = vld [vmem:[%s10895_s8 + $0x3e4] sm:$0xf0] }
 0x385   : > { %v6521_v18 = vor.u32 %v7122_v15, %v6518_v21 }
 0x387   : > { %4181 = vmatpush.bf16.msrb.mxu2 %v6601_v26  ;;  %4145 = vmatpush.bf16.msrb.mxu0 %v6097_v30  ;;  %v6658_v26 = vld [vmem:[%s10895_s8 + $0x4fc] sm:$0xf0]  ;;  %v6157_v30 = vor.u32 %v7031_v50, %v6154_v51  ;;  %v6216_v50 = vld [vmem:[%s10895_s8 + $0x168] sm:$0xf]  ;;  %v7049_v51 = vld [vmem:[%s10895_s8 + $0x180] sm:$0xf0] }
 0x388   : > { %4164 = vmatpush.bf16.msrb.mxu1 %v6321_v32  ;;  %v6661_v27 = vor.u32 %v7157_v12, %v6658_v26  ;;  %v6378_v32 = vld [vmem:[%s10895_s8 + $0x2cc] sm:$0xf0]  ;;  %v7115_v12 = vld [vmem:[%s10895_s8 + $0x394] sm:$0xf] }
 0x389   : > { %4039 = vmatmul.bf16.gmra.mxu2 %v9543_v31  ;;  %6727 = vmatmul.msk.bf16.gmra.mxu3 %vm1654_vm0, %v9545_v52  ;;  %v6381_v33 = vor.u32 %v7087_v28, %v6378_v32  ;;  %v6490_v26 = vld [vmem:[%s10895_s8 + $0x3ac] sm:$0xf0]  ;;  %v6440_v28 = vld [vmem:[%s10895_s8 + $0x328] sm:$0xf] }
 0x38b   : > { %4182 = vmatpush.bf16.msrb.mxu2 %v6573_v35  ;;  %4146 = vmatpush.bf16.msrb.mxu0 %v6069_v39  ;;  %v6630_v35 = vld [vmem:[%s10895_s8 + $0x4c4] sm:$0xf0]  ;;  %v7080_v39 = vld [vmem:[%s10895_s8 + $0x27c] sm:$0xf] }
 0x38c   : > { %4165 = vmatpush.bf16.msrb.mxu1 %v6293_v25  ;;  %v6633_v41 = vor.u32 %v7150_v34, %v6630_v35  ;;  %v6353_v56 = vor.u32 %v7080_v39, %v6350_v16  ;;  %v7143_v25 = vld [vmem:[%s10895_s8 + $0x474] sm:$0xf]  ;;  %v7105_v34 = vld [vmem:[%s10895_s8 + $0x340] sm:$0xf0]  ;;  %v7042_v16 = vld [vmem:[%s10895_s8 + $0x148] sm:$0xf0] }
 0x38d   : > { %v6441_v35 = vor.u32 %v7105_v34, %v6440_v28  ;;  %v6580_v28 = vld [vmem:[%s10895_s8 + $0x440] sm:$0xf] }
 0x38f   : > { %4183 = vmatpush.bf16.msrb.mxu2 %v6545_v10  ;;  %4147 = vmatpush.bf16.msrb.mxu0 %v6041_v60  ;;  %v6602_v10 = vld [vmem:[%s10895_s8 + $0x48c] sm:$0xf0]  ;;  %v6101_v60 = vor.u32 %v7017_v46, %v6098_v42 }
 0x390   : > { %4166 = vmatpush.bf16.msrb.mxu1 %v6265_v62  ;;  %v6605_v13 = vor.u32 %v7143_v25, %v6602_v10  ;;  %v6322_v62 = vld [vmem:[%s10895_s8 + $0x25c] sm:$0xf0]  ;;  %v7098_v10 = vld [vmem:[%s10895_s8 + $0x308] sm:$0xf0] }
 0x391   : > { %v6325_v63 = vor.u32 %v7073_v57, %v6322_v62  ;;  %v7161_v62 = vld [vmem:[%s10895_s8 + $0x500] sm:$0xf0] }
 0x392   : > { %4072 = vmatmul.bf16.vlgmr.msra.gmra.mxu0 %v9404_v40  ;;  %4091 = vmatmul.bf16.vlgmr.msra.gmra.mxu1 %v9406_v14 }
 0x393   : > { %4184 = vmatpush.bf16.msrb.mxu2 %v6517_v58  ;;  %4216 = vmatpush.bf16.msra.mxu0 %v6241_v61  ;;  %v6574_v58 = vld [vmem:[%s10895_s8 + $0x454] sm:$0xf0]  ;;  %v7066_v61 = vld [vmem:[%s10895_s8 + $0x20c] sm:$0xf] }
 0x394   : > { %4235 = vmatpush.bf16.msra.mxu1 %v6465_v5  ;;  %v6577_v36 = vor.u32 %v7136_v0, %v6574_v58  ;;  %v6297_v1 = vor.u32 %v7066_v61, %v6294_v4  ;;  %v7129_v5 = vld [vmem:[%s10895_s8 + $0x404] sm:$0xf]  ;;  %v6160_v0 = vld [vmem:[%s10895_s8 + $0xf8] sm:$0xf]  ;;  %v7035_v58 = vld [vmem:[%s10895_s8 + $0x110] sm:$0xf0] }
 0x395   : > { %v6161_v61 = vor.u32 %v7035_v58, %v6160_v0 }
 0x397   : > { %4185 = vmatpush.bf16.msrb.mxu2 %v6489_v6  ;;  %4217 = vmatpush.bf16.msra.mxu0 %v6213_v29  ;;  %v6546_v6 = vld [vmem:[%s10895_s8 + $0x41c] sm:$0xf0]  ;;  %v7059_v29 = vld [vmem:[%s10895_s8 + $0x1d4] sm:$0xf] }
 0x398   : > { %4236 = vmatpush.bf16.msra.mxu1 %v6437_v17  ;;  %v6549_v7 = vor.u32 %v7129_v5, %v6546_v6  ;;  %v6636_v5 = vld [vmem:[%s10895_s8 + $0x4b0] sm:$0xf]  ;;  %v7154_v6 = vld [vmem:[%s10895_s8 + $0x4c8] sm:$0xf0] }
 0x399   : > { %4110 = vmatmul.bf16.vlgmr.msra.gmra.mxu2 %v9444_v54  ;;  %6728 = vmatmul.msk.bf16.vlgmr.msra.gmra.mxu3 %vm1654_vm0, %v9446_v22 }
 0x39a   : > { %4280 = vmatpush.bf16.msra.mxu3 %v6717_v49  ;;  %v7112_v49 = vld [vmem:[%s10895_s8 + $0x378] sm:$0xf0] }
 0x39b   : > { %4254 = vmatpush.bf16.msra.mxu2 %v6689_v20  ;;  %4218 = vmatpush.bf16.msra.mxu0 %v6185_v55  ;;  %v6269_v20 = vor.u32 %v7059_v29, %v6266_v11  ;;  %v6468_v55 = vld [vmem:[%s10895_s8 + $0x360] sm:$0xf] }
 0x39c   : > { %4237 = vmatpush.bf16.msra.mxu1 %v6409_v45  ;;  %v6469_v45 = vor.u32 %v7112_v49, %v6468_v55  ;;  %v6356_v29 = vld [vmem:[%s10895_s8 + $0x280] sm:$0xf]  ;;  %v6328_v49 = vld [vmem:[%s10895_s8 + $0x248] sm:$0xf] }
 0x39f   : > { %4255 = vmatpush.bf16.msra.mxu2 %v6661_v27  ;;  %4219 = vmatpush.bf16.msra.mxu0 %v6157_v30  ;;  %v6493_v27 = vor.u32 %v7115_v12, %v6490_v26 }
 0x3a0   : > { %4238 = vmatpush.bf16.msra.mxu1 %v6381_v33  ;;  %v6217_v33 = vor.u32 %v7049_v51, %v6216_v50 }
 0x3a2   : > { %4077 = vmatmul.bf16.gmra.mxu0 %v9503_v24  ;;  %4096 = vmatmul.bf16.gmra.mxu1 %v9505_v44 }
 0x3a3   : > { %4256 = vmatpush.bf16.msra.mxu2 %v6633_v41  ;;  %4220 = vmatpush.bf16.msra.mxu0 %v6129_v48  ;;  %v6692_v41 = vld [vmem:[%s10895_s8 + $0x520] sm:$0xf]  ;;  %v6188_v48 = vld [vmem:[%s10895_s8 + $0x130] sm:$0xf] }
 0x3a4   : > { %4239 = vmatpush.bf16.msra.mxu1 %v6353_v56  ;;  %v6693_v39 = vor.u32 %v7168_v38, %v6692_v41  ;;  %v6412_v56 = vld [vmem:[%s10895_s8 + $0x2f0] sm:$0xf]  ;;  %v6189_v25 = vor.u32 %v7042_v16, %v6188_v48  ;;  %v7014_v41 = vld [vmem:[%s10895_s8 + $0x68] sm:$0xf0] }
 0x3a5   : > { %v6413_v57 = vor.u32 %v7098_v10, %v6412_v56  ;;  %v7070_v48 = vld [vmem:[%s10895_s8 + $0x228] sm:$0xf0]  ;;  %v6552_v10 = vld [vmem:[%s10895_s8 + $0x408] sm:$0xf] }
 0x3a7   : > { %4257 = vmatpush.bf16.msra.mxu2 %v6605_v13  ;;  %4221 = vmatpush.bf16.msra.mxu0 %v6101_v60  ;;  %v10139_v13 = vperm.slane %v10121_v47, 0  ;;  %v6664_v60 = vld [vmem:[%s10895_s8 + $0x4e8] sm:$0xf] }
 0x3a8   : > { %4240 = vmatpush.bf16.msra.mxu1 %v6325_v63  ;;  %v6665_v63 = vor.u32 %v7161_v62, %v6664_v60 }
 0x3a9   : > { %4115 = vmatmul.bf16.gmra.mxu2 %v9543_v31  ;;  %6729 = vmatmul.msk.bf16.gmra.mxu3 %vm1654_vm0, %v9545_v52 }
 0x3ab   : > { %4258 = vmatpush.bf16.msra.mxu2 %v6577_v36  ;;  %4222 = vmatpush.bf16.msra.mxu0 %v6073_v3  ;;  %v6384_v36 = vld [vmem:[%s10895_s8 + $0x2b8] sm:$0xf]  ;;  %v7091_v3 = vld [vmem:[%s10895_s8 + $0x2d0] sm:$0xf0] }
 0x3ac   : > { %4241 = vmatpush.bf16.msra.mxu1 %v6297_v1  ;;  %v6385_v1 = vor.u32 %v7091_v3, %v6384_v36  ;;  %v7063_v3 = vld [vmem:[%s10895_s8 + $0x1f0] sm:$0xf0] }
 0x3af   : > { %v10063_v59 = vpop.f32.mrf.mxu0  ;;  %v10065_v17 = vpop.f32.mrf.mxu1  ;;  %4259 = vmatpush.bf16.msra.mxu2 %v6549_v7  ;;  %4223 = vmatpush.bf16.msra.mxu0 %v6045_v19  ;;  %v6637_v7 = vor.u32 %v7154_v6, %v6636_v5  ;;  %v7084_v19 = vld [vmem:[%s10895_s8 + $0x298] sm:$0xf0]  ;;  %v6524_v5 = vld [vmem:[%s10895_s8 + $0x3d0] sm:$0xf]  ;;  %v7126_v6 = vld [vmem:[%s10895_s8 + $0x3e8] sm:$0xf0] }
 0x3b0   : > { %4242 = vmatpush.bf16.msra.mxu1 %v6269_v20  ;;  %v3846_v4 = vadd.f32 %v10063_v59, %v10139_v13  ;;  %v6133_v59 = vor.u32 %v7028_v9, %v6132_v8  ;;  %v6357_v21 = vor.u32 %v7084_v19, %v6356_v29  ;;  %v10261_v9 = vperm.slane %v10121_v47, 1  ;;  %v6720_v19 = vld [vmem:[%s10895_s8 + $0x558] sm:$0xf] }
 0x3b2   : > { %4148 = vmatmul.bf16.vlgmr.msrb.gmra.mxu0 %v9404_v40  ;;  %4167 = vmatmul.bf16.vlgmr.msrb.gmra.mxu1 %v9406_v14  ;;  %v3865_v11 = vadd.f32 %v10065_v17, %v3846_v4  ;;  %v7021_v17 = vld [vmem:[%s10895_s8 + $0xa0] sm:$0xf0] }
 0x3b3   : > { %4260 = vmatpush.bf16.msra.mxu2 %v6521_v18  ;;  %4292 = vmatpush.bf16.msrb.mxu0 %v6245_v43  ;;  %v6608_v18 = vld [vmem:[%s10895_s8 + $0x478] sm:$0xf]  ;;  %v6104_v43 = vld [vmem:[%s10895_s8 + $0x88] sm:$0xf] }
 0x3b4   : > { %4311 = vmatpush.bf16.msrb.mxu1 %v6469_v45  ;;  %v6609_v23 = vor.u32 %v7147_v2, %v6608_v18  ;;  %v6105_v26 = vor.u32 %v7021_v17, %v6104_v43 }
 0x3b7   : > { %v10105_v30 = vpop.f32.mrf.mxu0  ;;  %v10107_v32 = vpop.f32.mrf.mxu1  ;;  %4261 = vmatpush.bf16.msra.mxu2 %v6493_v27  ;;  %4293 = vmatpush.bf16.msrb.mxu0 %v6217_v33  ;;  %v7077_v27 = vld [vmem:[%s10895_s8 + $0x260] sm:$0xf0]  ;;  %v7140_v33 = vld [vmem:[%s10895_s8 + $0x458] sm:$0xf0] }
 0x3b8   : > { %4312 = vmatpush.bf16.msrb.mxu1 %v6441_v35  ;;  %v3848_v50 = vadd.f32 %v10105_v30, %v10139_v13  ;;  %v6329_v51 = vor.u32 %v7077_v27, %v6328_v49  ;;  %v6581_v34 = vor.u32 %v7140_v33, %v6580_v28  ;;  %v6076_v30 = vld [vmem:[%s10895_s8 + $0x50] sm:$0xf] }
 0x3b9   : > { %4186 = vmatmul.bf16.vlgmr.msrb.gmra.mxu2 %v9444_v54  ;;  %6730 = vmatmul.msk.bf16.vlgmr.msrb.gmra.mxu3 %vm1654_vm0, %v9446_v22  ;;  %v6077_v38 = vor.u32 %v7014_v41, %v6076_v30 }
 0x3ba   : > { %v3867_v16 = vadd.f32 %v10107_v32, %v3848_v50  ;;  %v7007_v32 = vld [vmem:[%s10895_s8 + $0x30] sm:$0xf0] }
 0x3bb   : > { %4330 = vmatpush.bf16.msrb.mxu2 %v6693_v39  ;;  %4294 = vmatpush.bf16.msrb.mxu0 %v6189_v25  ;;  %v6300_v39 = vld [vmem:[%s10895_s8 + $0x210] sm:$0xf] }
 0x3bc   : > { %v3883_v46 = vpop.f32.mrf.mxu2  ;;  %v3902_v42 = vpop.f32.mrf.mxu3  ;;  %4313 = vmatpush.bf16.msrb.mxu1 %v6413_v57 }
 0x3bd   : > { %v3884_v55 = vadd.f32 %v3883_v46, %v3865_v11  ;;  %v6301_v46 = vor.u32 %v7070_v48, %v6300_v39  ;;  %v7175_v11 = vld [vmem:[%s10895_s8 + $0x570] sm:$0xf0] }
 0x3be   : > { %v6721_v18 = vor.u32 %v7175_v11, %v6720_v19 }
 0x3bf   : > { %v10156_v37 = vpop.f32.mrf.mxu0  ;;  %v10158_v53 = vpop.f32.mrf.mxu1  ;;  %4331 = vmatpush.bf16.msrb.mxu2 %v6665_v63  ;;  %4295 = vmatpush.bf16.msrb.mxu0 %v6161_v61  ;;  %v3903_v35 = vadd.f32 %v3902_v42, %v3884_v55  ;;  %v7133_v42 = vld [vmem:[%s10895_s8 + $0x420] sm:$0xf0]  ;;  %v6048_v63 = vld [vmem:[%s10895_s8 + $0x18] sm:$0xf] }
 0x3c0   : > { %4314 = vmatpush.bf16.msrb.mxu1 %v6385_v1  ;;  %v6553_v62 = vor.u32 %v7133_v42, %v6552_v10  ;;  %v6049_v36 = vor.u32 %v7007_v32, %v6048_v63  ;;  %v6272_v61 = vld [vmem:[%s10895_s8 + $0x1d8] sm:$0xf]  ;;  %v3851_v4 = vadd.f32 %v10156_v37, %v10139_v13  ;;  %4356 = vmatpush.bf16.msrb.mxu3 %v6721_v18 }
 0x3c1   : > { %v6736_v57 = vmul.f32 -1.442695, %v3903_v35  ;;  %v6273_v1 = vor.u32 %v7063_v3, %v6272_v61 }
 0x3c2   : > { %4153 = vmatmul.bf16.gmra.mxu0 %v9503_v24  ;;  %4172 = vmatmul.bf16.gmra.mxu1 %v9505_v44  ;;  %v3870_v37 = vadd.f32 %v10158_v53, %v3851_v4  ;;  %v7119_v53 = vld [vmem:[%s10895_s8 + $0x3b0] sm:$0xf0] }
 0x3c3   : > { %4332 = vmatpush.bf16.msrb.mxu2 %v6637_v7  ;;  %4296 = vmatpush.bf16.msrb.mxu0 %v6133_v59  ;;  %v6525_v7 = vor.u32 %v7126_v6, %v6524_v5  ;;  %7238 = vpow2.f32 %v6736_v57 }
 0x3c4   : > { %v3885_v20 = vpop.f32.mrf.mxu2  ;;  %v3904_v15 = vpop.f32.mrf.mxu3  ;;  %4315 = vmatpush.bf16.msrb.mxu1 %v6357_v21 }
 0x3c5   : > { %v3886_v60 = vadd.f32 %v3885_v20, %v3867_v16  ;;  %v6496_v20 = vld [vmem:[%s10895_s8 + $0x398] sm:$0xf] }
 0x3c6   : > { %v6497_v43 = vor.u32 %v7119_v53, %v6496_v20 }
 0x3c7   : > { %v10201_v45 = vpop.f32.mrf.mxu0  ;;  %v10203_v12 = vpop.f32.mrf.mxu1  ;;  %4333 = vmatpush.bf16.msrb.mxu2 %v6609_v23  ;;  %4297 = vmatpush.bf16.msrb.mxu0 %v6105_v26  ;;  %v3905_v8 = vadd.f32 %v3904_v15, %v3886_v60 }
 0x3c8   : > { %4316 = vmatpush.bf16.msrb.mxu1 %v6329_v51  ;;  %v3853_v49 = vadd.f32 %v10201_v45, %v10139_v13 }
 0x3c9   : > { %4191 = vmatmul.bf16.gmra.mxu2 %v9543_v31  ;;  %6731 = vmatmul.msk.bf16.gmra.mxu3 %vm1654_vm0, %v9545_v52  ;;  %v6743_v15 = vmul.f32 -1.442695, %v3905_v8  ;;  %v7239_v17 = vpop.eup %7238 }
 0x3ca   : > { %v10282_v27 = vadd.f32 1.0, %v7239_v17  ;;  %v3872_v51 = vadd.f32 %v10203_v12, %v3853_v49 }
 0x3cb   : > { %4334 = vmatpush.bf16.msrb.mxu2 %v6581_v34  ;;  %4298 = vmatpush.bf16.msrb.mxu0 %v6077_v38  ;;  %7240 = vpow2.f32 %v6743_v15 }
 0x3cc   : > { %v3888_v56 = vpop.f32.mrf.mxu2  ;;  %v3907_v25 = vpop.f32.mrf.mxu3  ;;  %4317 = vmatpush.bf16.msrb.mxu1 %v6301_v46  ;;  %7242 = vrcp.f32 %v10282_v27  ;;  %vm4485_vm3 = vweird.f32 %v10282_v27 }
 0x3cd   : > { %v3889_v21 = vadd.f32 %v3888_v56, %v3870_v37 }
 0x3cf   : > { %v3921_v0 = vpop.f32.mrf.mxu0  ;;  %v3940_v58 = vpop.f32.mrf.mxu1  ;;  %4335 = vmatpush.bf16.msrb.mxu2 %v6553_v62  ;;  %4299 = vmatpush.bf16.msrb.mxu0 %v6049_v36  ;;  %v3908_v26 = vadd.f32 %v3907_v25, %v3889_v21 }
 0x3d0   : > { %4318 = vmatpush.bf16.msrb.mxu1 %v6273_v1  ;;  %v3922_v2 = vadd.f32 %v3921_v0, %v10261_v9 }
 0x3d1   : > { %v6750_v35 = vmul.f32 -1.442695, %v3908_v26  ;;  %v7241_v39 = vpop.eup %7240 }
 0x3d2   : > { %4224 = vmatmul.bf16.vlgmr.msra.gmra.mxu0 %v9404_v40  ;;  %4243 = vmatmul.bf16.vlgmr.msra.gmra.mxu1 %v9406_v14  ;;  %v3941_v50 = vadd.f32 %v3940_v58, %v3922_v2  ;;  %v10289_v12 = vadd.f32 1.0, %v7241_v39  ;;  %v10291_v46 = vpop.eup %7242 }
 0x3d3   : > { %4336 = vmatpush.bf16.msrb.mxu2 %v6525_v7  ;;  %7244 = vpow2.f32 %v6750_v35  ;;  %v4481_v58 = vmul.f32 %v10291_v46, %v10282_v27  ;;  %vm4486_vm2 = vweird.f32 %v10291_v46 }
 0x3d4   : > { %v3890_v29 = vpop.f32.mrf.mxu2  ;;  %v3909_v59 = vpop.f32.mrf.mxu3  ;;  %vm10338_vm5 = vmor %vm4485_vm3, %vm4486_vm2  ;;  %vm4590_vm11 = vweird.f32 %v10289_v12 }
 0x3d5   : > { %v3891_v30 = vadd.f32 %v3890_v29, %v3872_v51  ;;  %v4482_v1 = vsub.f32 1.0, %v4481_v58 }
 0x3d7   : > { %v3923_v23 = vpop.f32.mrf.mxu0  ;;  %v3942_v55 = vpop.f32.mrf.mxu1  ;;  %4337 = vmatpush.bf16.msrb.mxu2 %v6497_v43  ;;  %v3910_v16 = vadd.f32 %v3909_v59, %v3891_v30  ;;  %v4483_v15 = vmul.f32 %v10291_v46, %v4482_v1 }
 0x3d8   : > { %v3924_v13 = vadd.f32 %v3923_v23, %v10261_v9  ;;  %v4489_v23 = vand.u32 2147483647, %v10282_v27 }
 0x3d9   : > { %4262 = vmatmul.bf16.vlgmr.msra.gmra.mxu2 %v9444_v54  ;;  %6732 = vmatmul.msk.bf16.vlgmr.msra.gmra.mxu3 %vm1654_vm0, %v9446_v22  ;;  %v6757_v57 = vmul.f32 -1.442695, %v3910_v16  ;;  %v7245_v0 = vpop.eup %7244  ;;  %v4484_v49 = vadd.f32 %v10291_v46, %v4483_v15 }
 0x3da   : > { %v3943_v56 = vadd.f32 %v3942_v55, %v3924_v13  ;;  %v10302_v5 = vadd.f32 1.0, %v7245_v0  ;;  %vm10331_vm4 = vcmp.eq.f32.partialorder %v4489_v23, 8.507059e+37 }
 0x3db   : > { %v4488_v39 = vsel %vm10338_vm5, %v10291_v46, %v4484_v49 }
 0x3dc   : > { %v3959_v28 = vpop.f32.mrf.mxu2  ;;  %v3978_v33 = vpop.f32.mrf.mxu3  ;;  %v4701_v30 = vand.u32 2147483648, %v10302_v5 }
 0x3dd   : > { %v3960_v34 = vadd.f32 %v3959_v28, %v3941_v50 }
 0x3df   : > { %v3979_v45 = vadd.f32 %v3978_v33, %v3960_v34  ;;  %v3926_v41 = vpop.f32.mrf.mxu0  ;;  %v3945_v38 = vpop.f32.mrf.mxu1 }
 0x3e0   : > { %v3927_v60 = vadd.f32 %v3926_v41, %v10261_v9 }
 0x3e1   : > { %v6737_v48 = vmul.f32 -1.442695, %v3979_v45 }
 0x3e2   : > { %4229 = vmatmul.bf16.gmra.mxu0 %v9503_v24  ;;  %4248 = vmatmul.bf16.gmra.mxu1 %v9505_v44  ;;  %v3946_v4 = vadd.f32 %v3945_v38, %v3927_v60 }
 0x3e3   : > { %7246 = vpow2.f32 %v6737_v48 }
 0x3e4   : > { %v3961_v25 = vpop.f32.mrf.mxu2  ;;  %v3980_v10 = vpop.f32.mrf.mxu3  ;;  %7248 = vrcp.f32 %v10289_v12 }
 0x3e5   : > { %v3962_v42 = vadd.f32 %v3961_v25, %v3943_v56  ;;  %7250 = vpow2.f32 %v6757_v57 }
 0x3e7   : > { %v3981_v62 = vadd.f32 %v3980_v10, %v3962_v42  ;;  %v3928_v63 = vpop.f32.mrf.mxu0  ;;  %v3947_v32 = vpop.f32.mrf.mxu1 }
 0x3e8   : > { %v3929_v29 = vadd.f32 %v3928_v63, %v10261_v9  ;;  %v4491_v9 = vand.u32 2147483648, %v10282_v27 }
 0x3e9   : > { %v7247_v36 = vpop.eup %7246  ;;  %v6744_v61 = vmul.f32 -1.442695, %v3981_v62  ;;  %4267 = vmatmul.bf16.gmra.mxu2 %v9543_v31  ;;  %6733 = vmatmul.msk.bf16.gmra.mxu3 %vm1654_vm0, %v9545_v52  ;;  %v10364_v62 = vperm.slane %v10121_v47, 2 }
 0x3ea   : > { %v10300_v3 = vadd.f32 1.0, %v7247_v36  ;;  %v10305_v8 = vpop.eup %7248  ;;  %v3948_v17 = vadd.f32 %v3947_v32, %v3929_v29  ;;  %v4492_v48 = vor.u32 1.1754944e-38, %v4491_v9 }
 0x3eb   : > { %7252 = vpow2.f32 %v6744_v61  ;;  %v7251_v20 = vpop.eup %7250  ;;  %v4586_v21 = vmul.f32 %v10305_v8, %v10289_v12  ;;  %vm4591_vm8 = vweird.f32 %v10305_v8 }
 0x3ec   : > { %7254 = vrcp.f32 %v10300_v3  ;;  %v3964_v6 = vpop.f32.mrf.mxu2  ;;  %v3983_v7 = vpop.f32.mrf.mxu3  ;;  %v10325_v50 = vadd.f32 1.0, %v7251_v20  ;;  %v4506_v35 = vand.u32 2147483648, %v10300_v3  ;;  %v4504_v45 = vand.u32 2147483647, %v10300_v3  ;;  %vm10381_vm12 = vmor %vm4590_vm11, %vm4591_vm8 }
 0x3ed   : > { %v3965_v37 = vadd.f32 %v3964_v6, %v3946_v4  ;;  %7256 = vrcp.f32 %v10302_v5  ;;  %v4587_v26 = vsub.f32 1.0, %v4586_v21  ;;  %vm4500_vm7 = vweird.f32 %v10300_v3 }
 0x3ee   : > { %v4507_v46 = vor.u32 1.1754944e-38, %v4506_v35  ;;  %vm4505_vm10 = vcmp.eq.f32.partialorder %v4504_v45, 8.507059e+37  ;;  %v4594_v6 = vand.u32 2147483647, %v10289_v12  ;;  %vm4800_vm11 = vweird.f32 %v10325_v50 }
 0x3ef   : > { %v3984_v59 = vadd.f32 %v3983_v7, %v3965_v37  ;;  %v10308_v19 = vpop.f32.mrf.mxu0  ;;  %v10310_v11 = vpop.f32.mrf.mxu1  ;;  %v4588_v16 = vmul.f32 %v10305_v8, %v4587_v26  ;;  %v4596_v7 = vand.u32 2147483648, %v10289_v12 }
 0x3f0   : > { %vm4595_vm15 = vcmp.eq.f32.partialorder %v4594_v6, 8.507059e+37 }
 0x3f1   : > { %v7253_v18 = vpop.eup %7252  ;;  %v6751_v53 = vmul.f32 -1.442695, %v3984_v59 }
 0x3f2   : > { %v7255_v2 = vpop.eup %7254  ;;  %v10318_v55 = vadd.f32 1.0, %v7253_v18  ;;  %4300 = vmatmul.bf16.vlgmr.msrb.gmra.mxu0 %v9404_v40  ;;  %4319 = vmatmul.bf16.vlgmr.msrb.gmra.mxu1 %v9406_v14  ;;  %v3998_v18 = vadd.f32 %v10308_v19, %v10364_v62 }
 0x3f3   : > { %v4496_v43 = vmul.f32 %v7255_v2, %v10300_v3  ;;  %7258 = vpow2.f32 %v6751_v53  ;;  %v10328_v34 = vpop.eup %7256  ;;  %vm4501_vm6 = vweird.f32 %v7255_v2 }
 0x3f4   : > { %7260 = vrcp.f32 %v10318_v55  ;;  %v3966_v51 = vpop.f32.mrf.mxu2  ;;  %v3985_v28 = vpop.f32.mrf.mxu3  ;;  %v4691_v25 = vmul.f32 %v10328_v34, %v10302_v5  ;;  %vm4502_vm9 = vmor %vm4500_vm7, %vm4501_vm6  ;;  %v4611_v37 = vand.u32 2147483648, %v10318_v55  ;;  %v4609_v20 = vand.u32 2147483647, %v10318_v55 }
 0x3f5   : > { %v4497_v33 = vsub.f32 1.0, %v4496_v43  ;;  %v3967_v40 = vadd.f32 %v3966_v51, %v3948_v17  ;;  %7262 = vrcp.f32 %v10325_v50  ;;  %vm4605_vm14 = vweird.f32 %v10318_v55 }
 0x3f6   : > { %v4692_v61 = vsub.f32 1.0, %v4691_v25  ;;  %v4597_v17 = vor.u32 1.1754944e-38, %v4596_v7  ;;  %v4612_v49 = vor.u32 1.1754944e-38, %v4611_v37  ;;  %vm4696_vm2 = vweird.f32 %v10328_v34 }
 0x3f7   : > { %v4498_v13 = vmul.f32 %v7255_v2, %v4497_v33  ;;  %v3986_v41 = vadd.f32 %v3985_v28, %v3967_v40  ;;  %v10343_v38 = vpop.f32.mrf.mxu0  ;;  %v10345_v27 = vpop.f32.mrf.mxu1  ;;  %vm4610_vm3 = vcmp.eq.f32.partialorder %v4609_v20, 8.507059e+37  ;;  %v4017_v28 = vadd.f32 %v10310_v11, %v3998_v18 }
 0x3f8   : > { %v4000_v25 = vadd.f32 %v10343_v38, %v10364_v62  ;;  %v4804_v7 = vand.u32 2147483647, %v10325_v50 }
 0x3f9   : > { %v7259_v56 = vpop.eup %7258  ;;  %v4499_v10 = vadd.f32 %v7255_v2, %v4498_v13  ;;  %v6758_v42 = vmul.f32 -1.442695, %v3986_v41  ;;  %4338 = vmatmul.bf16.vlgmr.msrb.gmra.mxu2 %v9444_v54  ;;  %6734 = vmatmul.msk.bf16.vlgmr.msrb.gmra.mxu3 %vm1654_vm0, %v9446_v22  ;;  %v4493_v54 = vsel %vm10331_vm4, %v4492_v48, %v4488_v39  ;;  %v4589_v22 = vadd.f32 %v10305_v8, %v4588_v16 }
 0x3fa   : > { %v7261_v57 = vpop.eup %7260  ;;  %v10361_v60 = vadd.f32 1.0, %v7259_v56  ;;  %vm4695_vm4 = vweird.f32 %v10302_v5  ;;  %v4699_v41 = vand.u32 2147483647, %v10302_v5 }
 0x3fb   : > { %v4503_v63 = vsel %vm4502_vm9, %v7255_v2, %v4499_v10  ;;  %v4601_v32 = vmul.f32 %v7261_v57, %v10318_v55  ;;  %7264 = vpow2.f32 %v6758_v42  ;;  %v10373_v1 = vpop.eup %7262  ;;  %vm4606_vm13 = vweird.f32 %v7261_v57  ;;  %vm10427_vm6 = vmor %vm4695_vm4, %vm4696_vm2 }
 0x3fc   : > { %v4508_v0 = vsel %vm4505_vm10, %v4507_v46, %v4503_v63  ;;  %7266 = vrcp.f32 %v10361_v60  ;;  %v4035_v58 = vpop.f32.mrf.mxu2  ;;  %v10371_v36 = vpop.f32.mrf.mxu3  ;;  %v4593_v21 = vsel %vm10381_vm12, %v10305_v8, %v4589_v22  ;;  %v4693_v2 = vmul.f32 %v10328_v34, %v4692_v61  ;;  %vm4607_vm1 = vmor %vm4605_vm14, %vm4606_vm13 }
 0x3fd   : > { %v4900_v3 = vpack.c.bf16 %v4508_v0, %v4493_v54  ;;  %v4602_v4 = vsub.f32 1.0, %v4601_v32  ;;  %v4796_v23 = vmul.f32 %v10373_v1, %v10325_v50  ;;  %v4598_v51 = vsel %vm4595_vm15, %v4597_v17, %v4593_v21 }
 0x3fe   : > { %v4716_v13 = vand.u32 2147483648, %v10361_v60  ;;  %v4036_v45 = vadd.f32 %v4035_v58, %v4017_v28  ;;  %v4714_v39 = vand.u32 2147483647, %v10361_v60  ;;  %vm4710_vm7 = vweird.f32 %v10361_v60 }
 0x3ff   : > { %4916 = vst [vmem:[%s10387_s26] sm:$0xff] %v4900_v3  ;;  %v4603_v59 = vmul.f32 %v7261_v57, %v4602_v4  ;;  %v10391_v15 = vpop.f32.mrf.mxu0  ;;  %v10393_v12 = vpop.f32.mrf.mxu1  ;;  %v4797_v14 = vsub.f32 1.0, %v4796_v23  ;;  %v4702_v46 = vor.u32 1.1754944e-38, %v4701_v30  ;;  %vm4700_vm9 = vcmp.eq.f32.partialorder %v4699_v41, 8.507059e+37 }
 0x400   : > { %v4717_v63 = vor.u32 1.1754944e-38, %v4716_v13  ;;  %v4055_v38 = vadd.f32 %v10371_v36, %v4036_v45  ;;  %vm4715_vm10 = vcmp.eq.f32.partialorder %v4714_v39, 8.507059e+37  ;;  %v4806_v61 = vand.u32 2147483648, %v10325_v50 }
 0x401   : > { %v7265_v53 = vpop.eup %7264  ;;  %v4604_v9 = vadd.f32 %v7261_v57, %v4603_v59  ;;  %v4798_v10 = vmul.f32 %v10373_v1, %v4797_v14  ;;  %v4003_v20 = vadd.f32 %v10391_v15, %v10364_v62  ;;  %v2919_v50 = vperm.slane %v10121_v47, 3 }
 0x402   : > { %v7267_v43 = vpop.eup %7266  ;;  %v10404_v26 = vadd.f32 1.0, %v7265_v53  ;;  %4305 = vmatmul.bf16.gmra.mxu0 %v9503_v24  ;;  %4324 = vmatmul.bf16.gmra.mxu1 %v9505_v44  ;;  %v4694_v24 = vadd.f32 %v10328_v34, %v4693_v2  ;;  %v6738_v4 = vmul.f32 -1.442695, %v4055_v38  ;;  %v4807_v53 = vor.u32 1.1754944e-38, %v4806_v61 }
 0x403   : > { %v4608_v8 = vsel %vm4607_vm1, %v7261_v57, %v4604_v9  ;;  %v4706_v19 = vmul.f32 %v7267_v43, %v10361_v60  ;;  %vm4711_vm5 = vweird.f32 %v7267_v43  ;;  %v4799_v0 = vadd.f32 %v10373_v1, %v4798_v10 }
 0x404   : > { %v4613_v55 = vsel %vm4610_vm3, %v4612_v49, %v4608_v8  ;;  %7268 = vrcp.f32 %v10404_v26  ;;  %v4037_v33 = vpop.f32.mrf.mxu2  ;;  %v10412_v40 = vpop.f32.mrf.mxu3  ;;  %v4698_v5 = vsel %vm10427_vm6, %v10328_v34, %v4694_v24  ;;  %vm4712_vm8 = vmor %vm4710_vm7, %vm4711_vm5  ;;  %v4821_v3 = vand.u32 2147483648, %v10404_v26 }
 0x405   : > { %v4904_v44 = vpack.c.bf16 %v4613_v55, %v4598_v51  ;;  %v4707_v35 = vsub.f32 1.0, %v4706_v19  ;;  %v4703_v54 = vsel %vm4700_vm9, %v4702_v46, %v4698_v5  ;;  %vm4815_vm14 = vweird.f32 %v10404_v26 }
 0x406   : > { %v4822_v2 = vor.u32 1.1754944e-38, %v4821_v3  ;;  %7270 = vpow2.f32 %v6738_v4  ;;  %vm4805_vm1 = vcmp.eq.f32.partialorder %v4804_v7, 8.507059e+37  ;;  %v4022_v15 = vadd.f32 %v10393_v12, %v4003_v20 }
 0x407   : > { %4921 = vst [vmem:[%s10387_s26 + $0x1c] sm:$0xff] %v4904_v44  ;;  %v4708_v11 = vmul.f32 %v7267_v43, %v4707_v35  ;;  %v10421_v48 = vpop.f32.mrf.mxu0  ;;  %v10423_v16 = vpop.f32.mrf.mxu1 }
 0x409   : > { %v4709_v42 = vadd.f32 %v7267_v43, %v4708_v11  ;;  %4343 = vmatmul.bf16.gmra.mxu2 %v9543_v31  ;;  %6735 = vmatmul.msk.bf16.gmra.mxu3 %vm1654_vm0, %v9545_v52  ;;  %v4019_v31 = vadd.f32 %v10345_v27, %v4000_v25  ;;  %vm4801_vm0 = vweird.f32 %v10373_v1  ;;  %v4819_v27 = vand.u32 2147483647, %v10404_v26 }
 0x40a   : > { %v7269_v57 = vpop.eup %7268  ;;  %vm4802_vm13 = vmor %vm4800_vm11, %vm4801_vm0 }
 0x40b   : > { %v4713_v32 = vsel %vm4712_vm8, %v7267_v43, %v4709_v42  ;;  %v4811_v34 = vmul.f32 %v7269_v57, %v10404_v26  ;;  %v4038_v6 = vadd.f32 %v4037_v33, %v4019_v31  ;;  %vm4816_vm12 = vweird.f32 %v7269_v57 }
 0x40c   : > { %v4718_v60 = vsel %vm4715_vm10, %v4717_v63, %v4713_v32  ;;  %v4040_v22 = vpop.f32.mrf.mxu2  ;;  %v4059_v52 = vpop.f32.mrf.mxu3  ;;  %v4803_v21 = vsel %vm4802_vm13, %v10373_v1, %v4799_v0  ;;  %vm4817_vm15 = vmor %vm4815_vm14, %vm4816_vm12  ;;  %vm4820_vm2 = vcmp.eq.f32.partialorder %v4819_v27, 8.507059e+37 }
 0x40d   : > { %v4908_v58 = vpack.c.bf16 %v4718_v60, %v4703_v54  ;;  %v4812_v36 = vsub.f32 1.0, %v4811_v34  ;;  %v4057_v23 = vadd.f32 %v10412_v40, %v4038_v6  ;;  %v4808_v43 = vsel %vm4805_vm1, %v4807_v53, %v4803_v21  ;;  %v7271_v33 = vpop.eup %7270 }
 0x40e   : > { %v4041_v19 = vadd.f32 %v4040_v22, %v4022_v15  ;;  %v4005_v40 = vadd.f32 %v10421_v48, %v10364_v62  ;;  %v10464_v14 = vadd.f32 1.0, %v7271_v33 }
 0x40f   : > { %4925 = vst [vmem:[%s10387_s26 + $0x38] sm:$0xff] %v4908_v58  ;;  %v4813_v37 = vmul.f32 %v7269_v57, %v4812_v36  ;;  %v4073_v29 = vpop.f32.mrf.mxu0  ;;  %v4092_v59 = vpop.f32.mrf.mxu1  ;;  %v6745_v26 = vmul.f32 -1.442695, %v4057_v23 }
 0x410   : > { %v4074_v51 = vadd.f32 %v4073_v29, %v2919_v50  ;;  %v4060_v24 = vadd.f32 %v4059_v52, %v4041_v19  ;;  %v4024_v12 = vadd.f32 %v10423_v16, %v4005_v40  ;;  %vm4515_vm4 = vweird.f32 %v10464_v14 }
 0x411   : > { %v4814_v18 = vadd.f32 %v7269_v57, %v4813_v37  ;;  %7272 = vpow2.f32 %v6745_v26 }
 0x412   : > { %v4093_v44 = vadd.f32 %v4092_v59, %v4074_v51  ;;  %v6752_v45 = vmul.f32 -1.442695, %v4060_v24  ;;  %7274 = vrcp.f32 %v10464_v14 }
 0x413   : > { %v4818_v9 = vsel %vm4817_vm15, %v7269_v57, %v4814_v18 }
 0x414   : > { %v4823_v17 = vsel %vm4820_vm2, %v4822_v2, %v4818_v9  ;;  %v4042_v1 = vpop.f32.mrf.mxu2  ;;  %v4061_v49 = vpop.f32.mrf.mxu3  ;;  %7276 = vpow2.f32 %v6752_v45 }
 0x415   : > { %v4912_v8 = vpack.c.bf16 %v4823_v17, %v4808_v43  ;;  %v4043_v41 = vadd.f32 %v4042_v1, %v4024_v12  ;;  %v4521_v43 = vand.u32 2147483648, %v10464_v14 }
 0x417   : > { %4929 = vst [vmem:[%s10387_s26 + $0x54] sm:$0xff] %v4912_v8  ;;  %v4075_v55 = vpop.f32.mrf.mxu0  ;;  %v4094_v28 = vpop.f32.mrf.mxu1  ;;  %v4062_v48 = vadd.f32 %v4061_v49, %v4043_v41  ;;  %v4522_v24 = vor.u32 1.1754944e-38, %v4521_v43 }
 0x418   : > { %v4076_v11 = vadd.f32 %v4075_v55, %v2919_v50  ;;  %v7273_v5 = vpop.eup %7272 }
 0x419   : > { %v10468_v10 = vadd.f32 1.0, %v7273_v5  ;;  %v10470_v46 = vpop.eup %7274  ;;  %v6759_v38 = vmul.f32 -1.442695, %v4062_v48 }
 0x41a   : > { %v4095_v42 = vadd.f32 %v4094_v28, %v4076_v11  ;;  %v7277_v31 = vpop.eup %7276  ;;  %v4511_v22 = vmul.f32 %v10470_v46, %v10464_v14  ;;  %vm4516_vm3 = vweird.f32 %v10470_v46 }
 0x41b   : > { %v10477_v3 = vadd.f32 1.0, %v7277_v31  ;;  %vm10520_vm6 = vmor %vm4515_vm4, %vm4516_vm3 }
 0x41c   : > { %v4111_v35 = vpop.f32.mrf.mxu2  ;;  %v4130_v30 = vpop.f32.mrf.mxu3  ;;  %v4512_v61 = vsub.f32 1.0, %v4511_v22 }
 0x41d   : > { %v4112_v13 = vadd.f32 %v4111_v35, %v4093_v44 }
 0x41e   : > { %v4513_v18 = vmul.f32 %v10470_v46, %v4512_v61 }
 0x41f   : > { %v4131_v39 = vadd.f32 %v4130_v30, %v4112_v13  ;;  %v4078_v56 = vpop.f32.mrf.mxu0  ;;  %v4097_v25 = vpop.f32.mrf.mxu1 }
 0x420   : > { %v4079_v32 = vadd.f32 %v4078_v56, %v2919_v50  ;;  %v10500_v49 = vadd.f32 %v10470_v46, %v4513_v18 }
 0x421   : > { %v6739_v62 = vmul.f32 -1.442695, %v4131_v39  ;;  %v10540_v39 = vperm.slane %v10121_v47, 4 }
 0x422   : > { %v4098_v36 = vadd.f32 %v4097_v25, %v4079_v32  ;;  %v4518_v41 = vsel %vm10520_vm6, %v10470_v46, %v10500_v49 }
 0x423   : > { %7278 = vpow2.f32 %v6739_v62 }
 0x424   : > { %v4113_v16 = vpop.f32.mrf.mxu2  ;;  %v4132_v57 = vpop.f32.mrf.mxu3  ;;  %7280 = vrcp.f32 %v10468_v10 }
 0x425   : > { %v4114_v63 = vadd.f32 %v4113_v16, %v4095_v42  ;;  %7282 = vpow2.f32 %v6759_v38  ;;  %v4624_v42 = vand.u32 2147483647, %v10468_v10 }
 0x427   : > { %v4133_v34 = vadd.f32 %v4132_v57, %v4114_v63  ;;  %v4080_v54 = vpop.f32.mrf.mxu0  ;;  %v4099_v60 = vpop.f32.mrf.mxu1 }
 0x428   : > { %v4081_v27 = vadd.f32 %v4080_v54, %v2919_v50  ;;  %v4519_v50 = vand.u32 2147483647, %v10464_v14 }
 0x429   : > { %v7279_v52 = vpop.eup %7278  ;;  %v6746_v0 = vmul.f32 -1.442695, %v4133_v34 }
 0x42a   : > { %v10475_v58 = vadd.f32 1.0, %v7279_v52  ;;  %v10480_v7 = vpop.eup %7280  ;;  %v4100_v1 = vadd.f32 %v4099_v60, %v4081_v27  ;;  %vm10510_vm5 = vcmp.eq.f32.partialorder %v4519_v50, 8.507059e+37 }
 0x42b   : > { %7284 = vpow2.f32 %v6746_v0  ;;  %v7283_v21 = vpop.eup %7282  ;;  %v4616_v53 = vmul.f32 %v10480_v7, %v10468_v10  ;;  %vm4621_vm9 = vweird.f32 %v10480_v7 }
 0x42c   : > { %7286 = vrcp.f32 %v10475_v58  ;;  %v4116_v4 = vpop.f32.mrf.mxu2  ;;  %v4135_v6 = vpop.f32.mrf.mxu3  ;;  %v10502_v26 = vadd.f32 1.0, %v7283_v21  ;;  %v4536_v44 = vand.u32 2147483648, %v10475_v58  ;;  %v4534_v14 = vand.u32 2147483647, %v10475_v58 }
 0x42d   : > { %v4117_v37 = vadd.f32 %v4116_v4, %v4098_v36  ;;  %7288 = vrcp.f32 %v10477_v3  ;;  %v4617_v8 = vsub.f32 1.0, %v4616_v53  ;;  %vm4530_vm8 = vweird.f32 %v10475_v58 }
 0x42e   : > { %v4537_v16 = vor.u32 1.1754944e-38, %v4536_v44  ;;  %vm10561_vm11 = vcmp.eq.f32.partialorder %v4534_v14, 8.507059e+37 }
 0x42f   : > { %v4136_v29 = vadd.f32 %v4135_v6, %v4117_v37  ;;  %v10482_v59 = vpop.f32.mrf.mxu0  ;;  %v10484_v20 = vpop.f32.mrf.mxu1  ;;  %v4618_v11 = vmul.f32 %v10480_v7, %v4617_v8 }
 0x431   : > { %v7285_v2 = vpop.eup %7284  ;;  %v6753_v23 = vmul.f32 -1.442695, %v4136_v29 }
 0x432   : > { %v10490_v9 = vpop.eup %7286  ;;  %v10494_v17 = vadd.f32 1.0, %v7285_v2 }
 0x433   : > { %v4526_v15 = vmul.f32 %v10490_v9, %v10475_v58  ;;  %7290 = vpow2.f32 %v6753_v23  ;;  %v10507_v33 = vpop.eup %7288  ;;  %vm4531_vm7 = vweird.f32 %v10490_v9 }
 0x434   : > { %7292 = vrcp.f32 %v10494_v17  ;;  %v4118_v19 = vpop.f32.mrf.mxu2  ;;  %v4137_v51 = vpop.f32.mrf.mxu3  ;;  %v4721_v25 = vmul.f32 %v10507_v33, %v10477_v3  ;;  %vm10552_vm10 = vmor %vm4530_vm8, %vm4531_vm7 }
 0x435   : > { %v4527_v55 = vsub.f32 1.0, %v4526_v15  ;;  %v4119_v28 = vadd.f32 %v4118_v19, %v4100_v1  ;;  %7294 = vrcp.f32 %v10502_v26 }
 0x437   : > { %v4528_v35 = vmul.f32 %v10490_v9, %v4527_v55  ;;  %v4138_v30 = vadd.f32 %v4137_v51, %v4119_v28  ;;  %v10527_v13 = vpop.f32.mrf.mxu0  ;;  %v10529_v45 = vpop.f32.mrf.mxu1 }
 0x439   : > { %v7291_v56 = vpop.eup %7290  ;;  %v4529_v5 = vadd.f32 %v10490_v9, %v4528_v35  ;;  %v6760_v62 = vmul.f32 -1.442695, %v4138_v30 }
 0x43a   : > { %v10546_v48 = vpop.eup %7292  ;;  %v10556_v57 = vadd.f32 1.0, %v7291_v56 }
 0x43b   : > { %v4533_v46 = vsel %vm10552_vm10, %v10490_v9, %v4529_v5  ;;  %v4631_v38 = vmul.f32 %v10546_v48, %v10494_v17  ;;  %7296 = vpow2.f32 %v6760_v62 }
 0x43c   : > { %7378 = shalt.err (!%p7375_p3)
}
 0x43d   : > { %s7448_s15 = smov 128   ;;  %s7449_s22 = smov 8   ;;  %v4523_v32 = vsel %vm10510_vm5, %v4522_v24, %v4518_v41  ;;  %v4619_v34 = vadd.f32 %v10480_v7, %v4618_v11  ;;  %v4538_v54 = vsel %vm10561_vm11, %v4537_v16, %v4533_v46  ;;  %7298 = vrcp.f32 %v10556_v57  ;;  %v4187_v60 = vpop.f32.mrf.mxu2  ;;  %v4206_v31 = vpop.f32.mrf.mxu3 }
 0x43e   : > { %7181 = dma.vmem_to_hbm [thread:$0]  (%p7550_p5), %s10531_s13, 512, %s4972_s29, %s4939_s19, %s7448_s15, %s7448_s15, %s7449_s22   ;;  %v4722_v22 = vsub.f32 1.0, %v4721_v25  ;;  %v4901_v52 = vpack.c.bf16 %v4538_v54, %v4523_v32  ;;  %v4632_v0 = vsub.f32 1.0, %v4631_v38  ;;  %v10585_v58 = vpop.eup %7294  ;;  %vm4620_vm0 = vweird.f32 %v10468_v10 }
 0x43f   : > { %v4626_v36 = vand.u32 2147483648, %v10468_v10  ;;  %v4641_v61 = vand.u32 2147483648, %v10494_v17  ;;  %v4150_v4 = vadd.f32 %v10482_v59, %v10540_v39  ;;  %vm10594_vm12 = vmor %vm4620_vm0, %vm4621_vm9  ;;  %vm4636_vm13 = vweird.f32 %v10546_v48  ;;  %v10602_v29 = vpop.f32.mrf.mxu0  ;;  %v10604_v10 = vpop.f32.mrf.mxu1  ;;  %s7179_s29 = smul.u32 112, %s7533_s21  ;;  %s4952_s0 = sshll.u32 %s10387_s26, 4  ;;  %s4953_s0 = int_to_ptr.vmem [resolvable:$true] %s4952_s0 }
 0x440   : > { %4917 = vst [vmem:[%s10387_s26 + $0x8] sm:$0xff] %v4901_v52  ;;  %v4633_v37 = vmul.f32 %v10546_v48, %v4632_v0  ;;  %v4639_v27 = vand.u32 2147483647, %v10494_v17  ;;  %v4623_v59 = vsel %vm10594_vm12, %v10480_v7, %v4619_v34  ;;  %vm10609_vm14 = vcmp.eq.f32.partialorder %v4624_v42, 8.507059e+37  ;;  %s4934_s2 = scalar_lea.sflag [#allocation3], %s9000_s24  ;;  %s7399_s22 = scalar_lea.hbm %s10897_s10, 224 }
 0x441   : > { %v7297_v18 = vpop.eup %7296  ;;  %v4723_v53 = vmul.f32 %v10507_v33, %v4722_v22  ;;  %v4826_v2 = vmul.f32 %v10585_v58, %v10502_v26  ;;  %vm4635_vm15 = vweird.f32 %v10494_v17  ;;  %v4627_v50 = vor.u32 1.1754944e-38, %v4626_v36  ;;  %s4951_s16 = scalar_lea.hbm %s10897_s10, %s7179_s29 }
 0x442   : > { %v4634_v23 = vadd.f32 %v10546_v48, %v4633_v37  ;;  %vm4637_vm1 = vmor %vm4635_vm15, %vm4636_vm13  ;;  %v4642_v43 = vor.u32 1.1754944e-38, %v4641_v61  ;;  %v4169_v7 = vadd.f32 %v10484_v20, %v4150_v4  ;;  %v10619_v15 = vadd.f32 1.0, %v7297_v18  ;;  %s4954_s21 = sshll.u32 %s4951_s16, 4  ;;  %s4955_s21 = int_to_ptr.hbm [resolvable:$true] %s4954_s21 }
 0x443   : > { %v7299_v9 = vpop.eup %7298  ;;  %vm4726_vm2 = vweird.f32 %v10507_v33  ;;  %vm4640_vm3 = vcmp.eq.f32.partialorder %v4639_v27, 8.507059e+37  ;;  %v4628_v8 = vsel %vm10609_vm14, %v4627_v50, %v4623_v59  ;;  %v4724_v20 = vadd.f32 %v10507_v33, %v4723_v53  ;;  %s7393_s1 = sshra.s32 %s4955_s21, 4  ;;  %s7394_s1 = int_to_ptr.hbm [resolvable:$true] %s7393_s1 }
 0x444   : > { %v4638_v1 = vsel %vm4637_vm1, %v10546_v48, %v4634_v23  ;;  %v4736_v49 = vmul.f32 %v7299_v9, %v10556_v57  ;;  %7300 = vrcp.f32 %v10619_v15  ;;  %v4188_v19 = vadd.f32 %v4187_v60, %v4169_v7  ;;  %v10674_v23 = vld [vmem:[%s10896_s9] sm:$0x7f]  ;;  %s7395_s30 = scalar_lea.hbm %s7394_s1, 112  ;;  %p7400_p9 = scmp.lt.s32.totalorder %s7394_s1, %s10897_s10 }
 0x445   : > { %v4643_v17 = vsel %vm4640_vm3, %v4642_v43, %v4638_v1  ;;  %v4189_v51 = vpop.f32.mrf.mxu2  ;;  %v4208_v55 = vpop.f32.mrf.mxu3  ;;  %v4827_v28 = vsub.f32 1.0, %v4826_v2  ;;  %vm4725_vm4 = vweird.f32 %v10477_v3  ;;  %v4731_v44 = vand.u32 2147483648, %v10477_v3  ;;  %p7396_p4 = scmp.ne.s32.totalorder %s7394_s1, %s7395_s30  ;;  %p7401_p10 = scmp.lt.s32.totalorder %s7399_s22, %s7395_s30 }
 0x446   : > { %v4905_v40 = vpack.c.bf16 %v4643_v17, %v4628_v8  ;;  %v4737_v24 = vsub.f32 1.0, %v4736_v49  ;;  %v4746_v12 = vand.u32 2147483648, %v10556_v57  ;;  %v4729_v35 = vand.u32 2147483647, %v10477_v3  ;;  %vm10640_vm6 = vmor %vm4725_vm4, %vm4726_vm2 }
 0x447   : > { %vm4741_vm5 = vweird.f32 %v7299_v9  ;;  %v4744_v30 = vand.u32 2147483647, %v10556_v57  ;;  %v10634_v41 = vpop.f32.mrf.mxu0  ;;  %v10636_v11 = vpop.f32.mrf.mxu1  ;;  %v4152_v25 = vadd.f32 %v10527_v13, %v10540_v39  ;;  %v4207_v5 = vadd.f32 %v4206_v31, %v4188_v19  ;;  %p7397_p7 = pnand %p7396_p4, %p7550_p5  ;;  %p7402_p11 = por %p7401_p10, %p7400_p9 }
 0x448   : > { %4922 = vst [vmem:[%s10387_s26 + $0x24] sm:$0xff] %v4905_v40  ;;  %v4738_v14 = vmul.f32 %v7299_v9, %v4737_v24  ;;  %v4728_v3 = vsel %vm10640_vm6, %v10507_v33, %v4724_v20  ;;  %v4828_v62 = vmul.f32 %v10585_v58, %v4827_v28  ;;  %vm4740_vm7 = vweird.f32 %v10556_v57 }
 0x449   : > { %v4732_v47 = vor.u32 1.1754944e-38, %v4731_v44  ;;  %vm4742_vm8 = vmor %vm4740_vm7, %vm4741_vm5  ;;  %v4747_v16 = vor.u32 1.1754944e-38, %v4746_v12  ;;  %vm4730_vm9 = vcmp.eq.f32.partialorder %v4729_v35, 8.507059e+37  ;;  %vm4745_vm10 = vcmp.eq.f32.partialorder %v4744_v30, 8.507059e+37  ;;  %p7398_p8 = pneg %p7397_p7 }
 0x44a   : > { %v4739_v48 = vadd.f32 %v7299_v9, %v4738_v14  ;;  %v7301_v42 = vpop.eup %7300  ;;  %v4171_v32 = vadd.f32 %v10529_v45, %v4152_v25  ;;  %v6740_v33 = vmul.f32 -1.442695, %v4207_v5  ;;  %v4829_v60 = vadd.f32 %v10585_v58, %v4828_v62 }
 0x44b   : > { %v4841_v63 = vmul.f32 %v7301_v42, %v10619_v15  ;;  %v4733_v13 = vsel %vm4730_vm9, %v4732_v47, %v4728_v3  ;;  %vm4831_vm11 = vweird.f32 %v10585_v58  ;;  %vm4830_vm0 = vweird.f32 %v10502_v26  ;;  %p7403_p12 = pnand %p7402_p11, %p7398_p8 }
 0x44c   : > { %v4743_v46 = vsel %vm4742_vm8, %v7299_v9, %v4739_v48  ;;  %v4836_v22 = vand.u32 2147483648, %v10502_v26  ;;  %v4851_v52 = vand.u32 2147483648, %v10619_v15  ;;  %v4190_v0 = vadd.f32 %v4189_v51, %v4171_v32  ;;  %vm10661_vm13 = vmor %vm4830_vm0, %vm4831_vm11 }
 0x44d   : > { %v4748_v38 = vsel %vm4745_vm10, %v4747_v16, %v4743_v46  ;;  %v4192_v34 = vpop.f32.mrf.mxu2  ;;  %v4211_v54 = vpop.f32.mrf.mxu3  ;;  %v4842_v31 = vsub.f32 1.0, %v4841_v63  ;;  %v4834_v36 = vand.u32 2147483647, %v10502_v26  ;;  %vm4846_vm12 = vweird.f32 %v7301_v42 }
 0x44e   : > { %v4909_v57 = vpack.c.bf16 %v4748_v38, %v4733_v13  ;;  %v4849_v61 = vand.u32 2147483647, %v10619_v15  ;;  %7302 = vpow2.f32 %v6740_v33  ;;  %v4155_v27 = vadd.f32 %v10602_v29, %v10540_v39 }
 0x44f   : > { %v4843_v45 = vmul.f32 %v7301_v42, %v4842_v31  ;;  %v4225_v4 = vpop.f32.mrf.mxu0  ;;  %v4244_v6 = vpop.f32.mrf.mxu1  ;;  %v4833_v59 = vsel %vm10661_vm13, %v10585_v58, %v4829_v60  ;;  %vm4845_vm14 = vweird.f32 %v10619_v15  ;;  %v4837_v21 = vor.u32 1.1754944e-38, %v4836_v22 }
 0x450   : > { %4926 = vst [vmem:[%s10387_s26 + $0x40] sm:$0xff] %v4909_v57  ;;  %vm4847_vm15 = vmor %vm4845_vm14, %vm4846_vm12  ;;  %v4852_v18 = vor.u32 1.1754944e-38, %v4851_v52  ;;  %v4209_v53 = vadd.f32 %v4208_v55, %v4190_v0  ;;  %vm4835_vm1 = vcmp.eq.f32.partialorder %v4834_v36, 8.507059e+37  ;;  %vm4850_vm2 = vcmp.eq.f32.partialorder %v4849_v61, 8.507059e+37 }
 0x451   : > { %v4844_v26 = vadd.f32 %v7301_v42, %v4843_v45  ;;  %v10677_v29 = vperm.slane %v10674_v23, 5  ;;  %v4838_v58 = vsel %vm4835_vm1, %v4837_v21, %v4833_v59  ;;  %v4174_v50 = vadd.f32 %v10604_v10, %v4155_v27 }
 0x452   : > { %v6747_v49 = vmul.f32 -1.442695, %v4209_v53  ;;  %v4157_v55 = vadd.f32 %v10634_v41, %v10540_v39 }
 0x453   : > { %v4848_v2 = vsel %vm4847_vm15, %v7301_v42, %v4844_v26  ;;  %v4193_v8 = vadd.f32 %v4192_v34, %v4174_v50  ;;  %v4226_v17 = vadd.f32 %v4225_v4, %v10677_v29 }
 0x454   : > { %v4853_v9 = vsel %vm4850_vm2, %v4852_v18, %v4848_v2  ;;  %v7303_v1 = vpop.eup %7302  ;;  %7304 = vpow2.f32 %v6747_v49  ;;  %v4176_v10 = vadd.f32 %v10636_v11, %v4157_v55 }
 0x455   : > { %v4194_v43 = vpop.f32.mrf.mxu2  ;;  %v4213_v7 = vpop.f32.mrf.mxu3  ;;  %v4913_v15 = vpack.c.bf16 %v4853_v9, %v4838_v58  ;;  %v10684_v20 = vadd.f32 1.0, %v7303_v1  ;;  %v4212_v28 = vadd.f32 %v4211_v54, %v4193_v8  ;;  %v4245_v40 = vadd.f32 %v4244_v6, %v4226_v17 }
 0x456   : > { %v4195_v14 = vadd.f32 %v4194_v43, %v4176_v10 }
 0x457   : > { %4930 = vst [vmem:[%s10387_s26 + $0x5c] sm:$0xff] %v4913_v15  ;;  %v4227_v19 = vpop.f32.mrf.mxu0  ;;  %v4246_v51 = vpop.f32.mrf.mxu1  ;;  %7306 = vrcp.f32 %v10684_v20  ;;  %v6754_v35 = vmul.f32 -1.442695, %v4212_v28  ;;  %v4549_v18 = vand.u32 2147483647, %v10684_v20  ;;  %v4551_v53 = vand.u32 2147483648, %v10684_v20 }
 0x458   : > { %v4228_v30 = vadd.f32 %v4227_v19, %v10677_v29  ;;  %v4214_v3 = vadd.f32 %v4213_v7, %v4195_v14  ;;  %v10717_v7 = vperm.slane %v10674_v23, 6  ;;  %vm4545_vm4 = vweird.f32 %v10684_v20 }
 0x459   : > { %7308 = vpow2.f32 %v6754_v35  ;;  %vm10729_vm6 = vcmp.eq.f32.partialorder %v4549_v18, 8.507059e+37  ;;  %v4552_v23 = vor.u32 1.1754944e-38, %v4551_v53 }
 0x45a   : > { %v7305_v39 = vpop.eup %7304  ;;  %v4247_v11 = vadd.f32 %v4246_v51, %v4228_v30  ;;  %v6761_v63 = vmul.f32 -1.442695, %v4214_v3 }
 0x45b   : > { %v10691_v48 = vadd.f32 1.0, %v7305_v39 }
 0x45d   : > { %v4263_v24 = vpop.f32.mrf.mxu2  ;;  %v4282_v44 = vpop.f32.mrf.mxu3  ;;  %v4654_v10 = vand.u32 2147483647, %v10691_v48  ;;  %vm4650_vm0 = vweird.f32 %v10691_v48 }
 0x45e   : > { %v4264_v12 = vadd.f32 %v4263_v24, %v4245_v40  ;;  %v10689_v62 = vpop.eup %7306 }
 0x45f   : > { %v4230_v25 = vpop.f32.mrf.mxu0  ;;  %v4249_v5 = vpop.f32.mrf.mxu1  ;;  %v4541_v46 = vmul.f32 %v10689_v62, %v10684_v20  ;;  %vm4546_vm3 = vweird.f32 %v10689_v62  ;;  %vm10758_vm12 = vcmp.eq.f32.partialorder %v4654_v10, 8.507059e+37 }
 0x460   : > { %v4283_v56 = vadd.f32 %v4282_v44, %v4264_v12  ;;  %v4231_v13 = vadd.f32 %v4230_v25, %v10677_v29  ;;  %v7309_v33 = vpop.eup %7308  ;;  %vm10725_vm5 = vmor %vm4545_vm4, %vm4546_vm3  ;;  %v4656_v25 = vand.u32 2147483648, %v10691_v48 }
 0x461   : > { %v4542_v57 = vsub.f32 1.0, %v4541_v46  ;;  %v10699_v22 = vadd.f32 1.0, %v7309_v33 }
 0x462   : > { %v6741_v41 = vmul.f32 -1.442695, %v4283_v56  ;;  %v4250_v52 = vadd.f32 %v4249_v5, %v4231_v13 }
 0x463   : > { %v4543_v4 = vmul.f32 %v10689_v62, %v4542_v57  ;;  %v4761_v18 = vand.u32 2147483648, %v10699_v22  ;;  %vm4755_vm4 = vweird.f32 %v10699_v22 }
 0x464   : > { %7310 = vpow2.f32 %v6741_v41 }
 0x465   : > { %v4265_v42 = vpop.f32.mrf.mxu2  ;;  %v4284_v47 = vpop.f32.mrf.mxu3  ;;  %7312 = vrcp.f32 %v10691_v48  ;;  %v4544_v9 = vadd.f32 %v10689_v62, %v4543_v4 }
 0x466   : > { %v4266_v16 = vadd.f32 %v4265_v42, %v4247_v11  ;;  %7314 = vpow2.f32 %v6761_v63 }
 0x467   : > { %v4232_v32 = vpop.f32.mrf.mxu0  ;;  %v4251_v60 = vpop.f32.mrf.mxu1  ;;  %v4548_v40 = vsel %vm10725_vm5, %v10689_v62, %v4544_v9 }
 0x468   : > { %v4285_v38 = vadd.f32 %v4284_v47, %v4266_v16  ;;  %v4233_v6 = vadd.f32 %v4232_v32, %v10677_v29  ;;  %v4553_v11 = vsel %vm10729_vm6, %v4552_v23, %v4548_v40 }
 0x46a   : > { %v7311_v34 = vpop.eup %7310  ;;  %v6748_v54 = vmul.f32 -1.442695, %v4285_v38  ;;  %v4252_v43 = vadd.f32 %v4251_v60, %v4233_v6 }
 0x46b   : > { %v10697_v31 = vadd.f32 1.0, %v7311_v34  ;;  %v10702_v45 = vpop.eup %7312 }
 0x46c   : > { %7316 = vpow2.f32 %v6748_v54  ;;  %v7315_v59 = vpop.eup %7314  ;;  %v4646_v26 = vmul.f32 %v10702_v45, %v10691_v48  ;;  %vm4651_vm8 = vweird.f32 %v10702_v45 }
 0x46d   : > { %7318 = vrcp.f32 %v10697_v31  ;;  %v4268_v0 = vpop.f32.mrf.mxu2  ;;  %v4287_v36 = vpop.f32.mrf.mxu3  ;;  %v10720_v49 = vadd.f32 1.0, %v7315_v59  ;;  %v4564_v24 = vand.u32 2147483647, %v10697_v31  ;;  %v4566_v44 = vand.u32 2147483648, %v10697_v31  ;;  %vm10766_vm13 = vmor %vm4650_vm0, %vm4651_vm8 }
 0x46e   : > { %v4269_v61 = vadd.f32 %v4268_v0, %v4250_v52  ;;  %7320 = vrcp.f32 %v10699_v22  ;;  %v4647_v1 = vsub.f32 1.0, %v4646_v26  ;;  %vm4560_vm9 = vweird.f32 %v10697_v31 }
 0x46f   : > { %v4301_v27 = vpop.f32.mrf.mxu0  ;;  %v4320_v15 = vpop.f32.mrf.mxu1  ;;  %vm4565_vm11 = vcmp.eq.f32.partialorder %v4564_v24, 8.507059e+37  ;;  %v4567_v42 = vor.u32 1.1754944e-38, %v4566_v44  ;;  %v4657_v0 = vor.u32 1.1754944e-38, %v4656_v25  ;;  %vm4860_vm0 = vweird.f32 %v10720_v49 }
 0x470   : > { %v4288_v37 = vadd.f32 %v4287_v36, %v4269_v61  ;;  %v4302_v35 = vadd.f32 %v4301_v27, %v10717_v7  ;;  %v4648_v56 = vmul.f32 %v10702_v45, %v4647_v1 }
 0x472   : > { %v7317_v21 = vpop.eup %7316  ;;  %v6755_v2 = vmul.f32 -1.442695, %v4288_v37  ;;  %v4321_v63 = vadd.f32 %v4320_v15, %v4302_v35  ;;  %v4649_v13 = vadd.f32 %v10702_v45, %v4648_v56 }
 0x473   : > { %v7319_v58 = vpop.eup %7318  ;;  %v10713_v50 = vadd.f32 1.0, %v7317_v21  ;;  %v4759_v21 = vand.u32 2147483647, %v10699_v22 }
 0x474   : > { %v4556_v29 = vmul.f32 %v7319_v58, %v10697_v31  ;;  %7322 = vpow2.f32 %v6755_v2  ;;  %v10723_v19 = vpop.eup %7320  ;;  %vm4561_vm7 = vweird.f32 %v7319_v58  ;;  %v4653_v59 = vsel %vm10766_vm13, %v10702_v45, %v4649_v13 }
 0x475   : > { %7324 = vrcp.f32 %v10713_v50  ;;  %v4270_v8 = vpop.f32.mrf.mxu2  ;;  %v4289_v17 = vpop.f32.mrf.mxu3  ;;  %v4751_v5 = vmul.f32 %v10723_v19, %v10699_v22  ;;  %vm4562_vm10 = vmor %vm4560_vm9, %vm4561_vm7  ;;  %v4669_v36 = vand.u32 2147483647, %v10713_v50  ;;  %v4671_v61 = vand.u32 2147483648, %v10713_v50 }
 0x476   : > { %v4557_v28 = vsub.f32 1.0, %v4556_v29  ;;  %v4271_v20 = vadd.f32 %v4270_v8, %v4252_v43  ;;  %7326 = vrcp.f32 %v10720_v49  ;;  %vm4665_vm15 = vweird.f32 %v10713_v50 }
 0x477   : > { %v4303_v30 = vpop.f32.mrf.mxu0  ;;  %v4752_v38 = vsub.f32 1.0, %v4751_v5  ;;  %v4322_v4 = vpop.f32.mrf.mxu1  ;;  %vm4756_vm1 = vweird.f32 %v10723_v19  ;;  %vm4670_vm3 = vcmp.eq.f32.partialorder %v4669_v36, 8.507059e+37  ;;  %v4672_v45 = vor.u32 1.1754944e-38, %v4671_v61 }
 0x478   : > { %v4558_v12 = vmul.f32 %v7319_v58, %v4557_v28  ;;  %v4290_v14 = vadd.f32 %v4289_v17, %v4271_v20  ;;  %v4304_v37 = vadd.f32 %v4303_v30, %v10717_v7  ;;  %vm10795_vm5 = vmor %vm4755_vm4, %vm4756_vm1  ;;  %vm10804_vm7 = vcmp.eq.f32.partialorder %v4759_v21, 8.507059e+37 }
 0x479   : > { %v4753_v26 = vmul.f32 %v10723_v19, %v4752_v38  ;;  %v4762_v5 = vor.u32 1.1754944e-38, %v4761_v18  ;;  %v4866_v36 = vand.u32 2147483648, %v10720_v49 }
 0x47a   : > { %v7323_v39 = vpop.eup %7322  ;;  %v4559_v41 = vadd.f32 %v7319_v58, %v4558_v12  ;;  %v6762_v3 = vmul.f32 -1.442695, %v4290_v14  ;;  %v4323_v17 = vadd.f32 %v4322_v4, %v4304_v37 }
 0x47b   : > { %v7325_v62 = vpop.eup %7324  ;;  %v10750_v47 = vadd.f32 1.0, %v7323_v39  ;;  %v4754_v51 = vadd.f32 %v10723_v19, %v4753_v26 }
 0x47c   : > { %v4563_v16 = vsel %vm4562_vm10, %v7319_v58, %v4559_v41  ;;  %v4661_v46 = vmul.f32 %v7325_v62, %v10713_v50  ;;  %7328 = vpow2.f32 %v6762_v3  ;;  %v10756_v31 = vpop.eup %7326  ;;  %vm4666_vm14 = vweird.f32 %v7325_v62 }
 0x47d   : > { %v4568_v32 = vsel %vm4565_vm11, %v4567_v42, %v4563_v16  ;;  %7330 = vrcp.f32 %v10750_v47  ;;  %v4339_v33 = vpop.f32.mrf.mxu2  ;;  %v4358_v34 = vpop.f32.mrf.mxu3  ;;  %v4856_v2 = vmul.f32 %v10756_v31, %v10720_v49  ;;  %vm4667_vm2 = vmor %vm4665_vm15, %vm4666_vm14  ;;  %v4658_v50 = vsel %vm10758_vm12, %v4657_v0, %v4653_v59 }
 0x47e   : > { %v4902_v54 = vpack.c.bf16 %v4568_v32, %v4553_v11  ;;  %v4662_v60 = vsub.f32 1.0, %v4661_v46  ;;  %v4340_v57 = vadd.f32 %v4339_v33, %v4321_v63  ;;  %v4774_v44 = vand.u32 2147483647, %v10750_v47 }
 0x47f   : > { %v4306_v29 = vpop.f32.mrf.mxu0  ;;  %v4857_v20 = vsub.f32 1.0, %v4856_v2  ;;  %v4776_v12 = vand.u32 2147483648, %v10750_v47  ;;  %v4758_v22 = vsel %vm10795_vm5, %v10723_v19, %v4754_v51  ;;  %v4325_v39 = vpop.f32.mrf.mxu1  ;;  %vm4770_vm8 = vweird.f32 %v10750_v47 }
 0x480   : > { %4918 = vst [vmem:[%s10387_s26 + $0x10] sm:$0xff] %v4902_v54  ;;  %v4663_v48 = vmul.f32 %v7325_v62, %v4662_v60  ;;  %v4359_v27 = vadd.f32 %v4358_v34, %v4340_v57  ;;  %v4307_v30 = vadd.f32 %v4306_v29, %v10717_v7  ;;  %v4864_v16 = vand.u32 2147483647, %v10720_v49 }
 0x481   : > { %v4858_v3 = vmul.f32 %v10756_v31, %v4857_v20  ;;  %vm4775_vm10 = vcmp.eq.f32.partialorder %v4774_v44, 8.507059e+37  ;;  %v4777_v46 = vor.u32 1.1754944e-38, %v4776_v12  ;;  %v4763_v33 = vsel %vm10804_vm7, %v4762_v5, %v4758_v22 }
 0x482   : > { %v7329_v53 = vpop.eup %7328  ;;  %v4664_v58 = vadd.f32 %v7325_v62, %v4663_v48  ;;  %v6742_v9 = vmul.f32 -1.442695, %v4359_v27  ;;  %v4326_v38 = vadd.f32 %v4325_v39, %v4307_v30  ;;  %vm4861_vm11 = vweird.f32 %v10756_v31 }
 0x483   : > { %v7331_v43 = vpop.eup %7330  ;;  %v10783_v15 = vadd.f32 1.0, %v7329_v53  ;;  %v4859_v60 = vadd.f32 %v10756_v31, %v4858_v3  ;;  %vm10827_vm13 = vmor %vm4860_vm0, %vm4861_vm11  ;;  %vm10831_vm14 = vcmp.eq.f32.partialorder %v4864_v16, 8.507059e+37  ;;  %v4867_v53 = vor.u32 1.1754944e-38, %v4866_v36 }
 0x484   : > { %v4668_v1 = vsel %vm4667_vm2, %v7325_v62, %v4664_v58  ;;  %v4766_v8 = vmul.f32 %v7331_v43, %v10750_v47  ;;  %7332 = vpow2.f32 %v6742_v9  ;;  %vm4771_vm6 = vweird.f32 %v7331_v43 }
 0x485   : > { %v4673_v55 = vsel %vm4670_vm3, %v4672_v45, %v4668_v1  ;;  %7334 = vrcp.f32 %v10783_v15  ;;  %v4341_v23 = vpop.f32.mrf.mxu2  ;;  %v4360_v28 = vpop.f32.mrf.mxu3  ;;  %vm4772_vm9 = vmor %vm4770_vm8, %vm4771_vm6  ;;  %v4879_v61 = vand.u32 2147483647, %v10783_v15  ;;  %v4881_v4 = vand.u32 2147483648, %v10783_v15 }
 0x486   : > { %v4906_v40 = vpack.c.bf16 %v4673_v55, %v4658_v50  ;;  %v4767_v10 = vsub.f32 1.0, %v4766_v8  ;;  %v4342_v24 = vadd.f32 %v4341_v23, %v4323_v17  ;;  %v4863_v26 = vsel %vm10827_vm13, %v10756_v31, %v4859_v60 }
 0x487   : > { %v4308_v32 = vpop.f32.mrf.mxu0  ;;  %vm4875_vm15 = vweird.f32 %v10783_v15  ;;  %vm4880_vm2 = vcmp.eq.f32.partialorder %v4879_v61, 8.507059e+37  ;;  %v4882_v2 = vor.u32 1.1754944e-38, %v4881_v4  ;;  %v4327_v9 = vpop.f32.mrf.mxu1  ;;  %v4868_v31 = vsel %vm10831_vm14, %v4867_v53, %v4863_v26 }
 0x488   : > { %4923 = vst [vmem:[%s10387_s26 + $0x2c] sm:$0xff] %v4906_v40  ;;  %v4768_v14 = vmul.f32 %v7331_v43, %v4767_v10  ;;  %v4361_v56 = vadd.f32 %v4360_v28, %v4342_v24  ;;  %v4309_v48 = vadd.f32 %v4308_v32, %v10717_v7  ;;  %vm4919_vm7 = vcmask 125952  }
 0x48a   : > { %v7333_v41 = vpop.eup %7332  ;;  %v4769_v62 = vadd.f32 %v7331_v43, %v4768_v14  ;;  %v6749_v11 = vmul.f32 -1.442695, %v4361_v56  ;;  %v4328_v45 = vadd.f32 %v4327_v9, %v4309_v48 }
 0x48b   : > { %v7335_v42 = vpop.eup %7334  ;;  %v10811_v19 = vadd.f32 1.0, %v7333_v41 }
 0x48c   : > { %v4773_v63 = vsel %vm4772_vm9, %v7331_v43, %v4769_v62  ;;  %v4871_v13 = vmul.f32 %v7335_v42, %v10783_v15  ;;  %7336 = vpow2.f32 %v6749_v11  ;;  %vm4876_vm12 = vweird.f32 %v7335_v42 }
 0x48d   : > { %v4778_v47 = vsel %vm4775_vm10, %v4777_v46, %v4773_v63  ;;  %7338 = vrcp.f32 %v10811_v19  ;;  %v4344_v34 = vpop.f32.mrf.mxu2  ;;  %v4363_v54 = vpop.f32.mrf.mxu3  ;;  %vm4877_vm1 = vmor %vm4875_vm15, %vm4876_vm12  ;;  %v4581_v51 = vand.u32 2147483648, %v10811_v19  ;;  %v4579_v28 = vand.u32 2147483647, %v10811_v19 }
 0x48e   : > { %v4910_v57 = vpack.c.bf16 %v4778_v47, %v4763_v33  ;;  %v4872_v52 = vsub.f32 1.0, %v4871_v13  ;;  %v4345_v0 = vadd.f32 %v4344_v34, %v4326_v38  ;;  %vm4575_vm4 = vweird.f32 %v10811_v19 }
 0x48f   : > { %v4582_v12 = vor.u32 1.1754944e-38, %v4581_v51  ;;  %vm4580_vm6 = vcmp.eq.f32.partialorder %v4579_v28, 8.507059e+37 }
 0x490   : > { %4927 = vst [vmem:[%s10387_s26 + $0x48] sm:$0xff] %v4910_v57  ;;  %v4873_v6 = vmul.f32 %v7335_v42, %v4872_v52  ;;  %v4364_v37 = vadd.f32 %v4363_v54, %v4345_v0 }
 0x492   : > { %v7337_v49 = vpop.eup %7336  ;;  %v4874_v21 = vadd.f32 %v7335_v42, %v4873_v6  ;;  %v6756_v7 = vmul.f32 -1.442695, %v4364_v37 }
 0x493   : > { %v7339_v18 = vpop.eup %7338  ;;  %v4465_v58 = vadd.f32 1.0, %v7337_v49 }
 0x494   : > { %v4878_v29 = vsel %vm4877_vm1, %v7335_v42, %v4874_v21  ;;  %v4571_v43 = vmul.f32 %v7339_v18, %v10811_v19  ;;  %7340 = vpow2.f32 %v6756_v7  ;;  %vm4576_vm3 = vweird.f32 %v7339_v18 }
 0x495   : > { %v4883_v1 = vsel %vm4880_vm2, %v4882_v2, %v4878_v29  ;;  %7342 = vrcp.f32 %v4465_v58  ;;  %v4346_v15 = vpop.f32.mrf.mxu2  ;;  %v4365_v55 = vpop.f32.mrf.mxu3  ;;  %vm4577_vm5 = vmor %vm4575_vm4, %vm4576_vm3  ;;  %v4686_v5 = vand.u32 2147483648, %v4465_v58  ;;  %v4684_v41 = vand.u32 2147483647, %v4465_v58 }
 0x496   : > { %v4914_v8 = vpack.c.bf16 %v4883_v1, %v4868_v31  ;;  %v4572_v17 = vsub.f32 1.0, %v4571_v43  ;;  %v4347_v50 = vadd.f32 %v4346_v15, %v4328_v45  ;;  %vm4680_vm9 = vweird.f32 %v4465_v58 }
 0x497   : > { %v4687_v42 = vor.u32 1.1754944e-38, %v4686_v5  ;;  %vm4685_vm11 = vcmp.eq.f32.partialorder %v4684_v41, 8.507059e+37 }
 0x498   : > { %4931 = vst [vmem:[%s10387_s26 + $0x64] sm:$0xff] %v4914_v8  ;;  %v4573_v23 = vmul.f32 %v7339_v18, %v4572_v17  ;;  %v4366_v20 = vadd.f32 %v4365_v55, %v4347_v50 }
 0x49a   : > { %v7341_v40 = vpop.eup %7340  ;;  %v4574_v10 = vadd.f32 %v7339_v18, %v4573_v23  ;;  %v6763_v24 = vmul.f32 -1.442695, %v4366_v20 }
 0x49b   : > { %v7343_v44 = vpop.eup %7342  ;;  %v4472_v35 = vadd.f32 1.0, %v7341_v40 }
 0x49c   : > { %v4578_v14 = vsel %vm4577_vm5, %v7339_v18, %v4574_v10  ;;  %v4676_v30 = vmul.f32 %v7343_v44, %v4465_v58  ;;  %7344 = vpow2.f32 %v6763_v24  ;;  %vm4681_vm8 = vweird.f32 %v7343_v44 }
 0x49d   : > { %v4583_v56 = vsel %vm4580_vm6, %v4582_v12, %v4578_v14  ;;  %7346 = vrcp.f32 %v4472_v35  ;;  %vm4682_vm10 = vmor %vm4680_vm9, %vm4681_vm8  ;;  %v4791_v32 = vand.u32 2147483648, %v4472_v35  ;;  %v4789_v47 = vand.u32 2147483647, %v4472_v35 }
 0x49e   : > { %v4903_v22 = vpack.c.bf16 %v4583_v56, %v4583_v56  ;;  %v4677_v25 = vsub.f32 1.0, %v4676_v30  ;;  %vm4785_vm12 = vweird.f32 %v4472_v35 }
 0x49f   : > { %v4792_v60 = vor.u32 1.1754944e-38, %v4791_v32  ;;  %vm4790_vm14 = vcmp.eq.f32.partialorder %v4789_v47, 8.507059e+37 }
 0x4a0   : > { %4920 = vst.msk [vmem:[%s10387_s26 + $0x18] sm:$0xf] %vm4919_vm7, %v4903_v22  ;;  %v4678_v39 = vmul.f32 %v7343_v44, %v4677_v25 }
 0x4a2   : > { %v7345_v3 = vpop.eup %7344  ;;  %v4679_v62 = vadd.f32 %v7343_v44, %v4678_v39 }
 0x4a3   : > { %v7347_v11 = vpop.eup %7346  ;;  %v4479_v16 = vadd.f32 1.0, %v7345_v3 }
 0x4a4   : > { %v4683_v46 = vsel %vm4682_vm10, %v7343_v44, %v4679_v62  ;;  %v4781_v19 = vmul.f32 %v7347_v11, %v4472_v35  ;;  %vm4786_vm0 = vweird.f32 %v7347_v11 }
 0x4a5   : > { %v4688_v63 = vsel %vm4685_vm11, %v4687_v42, %v4683_v46  ;;  %7348 = vrcp.f32 %v4479_v16  ;;  %vm4787_vm13 = vmor %vm4785_vm12, %vm4786_vm0  ;;  %v4896_v4 = vand.u32 2147483648, %v4479_v16  ;;  %v4894_v48 = vand.u32 2147483647, %v4479_v16 }
 0x4a6   : > { %v4907_v13 = vpack.c.bf16 %v4688_v63, %v4688_v63  ;;  %v4782_v38 = vsub.f32 1.0, %v4781_v19  ;;  %vm4890_vm1 = vweird.f32 %v4479_v16 }
 0x4a7   : > { %v4897_v27 = vor.u32 1.1754944e-38, %v4896_v4  ;;  %vm4895_vm3 = vcmp.eq.f32.partialorder %v4894_v48, 8.507059e+37 }
 0x4a8   : > { %4924 = vst.msk [vmem:[%s10387_s26 + $0x34] sm:$0xf] %vm4919_vm7, %v4907_v13  ;;  %v4783_v33 = vmul.f32 %v7347_v11, %v4782_v38 }
 0x4aa   : > { %v4784_v34 = vadd.f32 %v7347_v11, %v4783_v33 }
 0x4ab   : > { %v7349_v54 = vpop.eup %7348 }
 0x4ac   : > { %v4788_v57 = vsel %vm4787_vm13, %v7347_v11, %v4784_v34  ;;  %v4886_v52 = vmul.f32 %v7349_v54, %v4479_v16  ;;  %vm4891_vm15 = vweird.f32 %v7349_v54 }
 0x4ad   : > { %v4793_v0 = vsel %vm4790_vm14, %v4792_v60, %v4788_v57  ;;  %vm4892_vm2 = vmor %vm4890_vm1, %vm4891_vm15 }
 0x4ae   : > { %v4911_v36 = vpack.c.bf16 %v4793_v0, %v4793_v0  ;;  %v4887_v61 = vsub.f32 1.0, %v4886_v52 }
 0x4b0   : > { %4928 = vst.msk [vmem:[%s10387_s26 + $0x50] sm:$0xf] %vm4919_vm7, %v4911_v36  ;;  %v4888_v6 = vmul.f32 %v7349_v54, %v4887_v61 }
 0x4b2   : > { %v4889_v37 = vadd.f32 %v7349_v54, %v4888_v6 }
 0x4b4   : > { %v4893_v59 = vsel %vm4892_vm2, %v7349_v54, %v4889_v37 }
 0x4b5   : > { %v4898_v49 = vsel %vm4895_vm3, %v4897_v27, %v4893_v59 }
 0x4b6   : > { %v4915_v26 = vpack.c.bf16 %v4898_v49, %v4898_v49 }
 0x4b8   : > { %4932 = vst.msk [vmem:[%s10387_s26 + $0x6c] sm:$0xf] %vm4919_vm7, %v4915_v26 }
 0x4b9   : > { %7406 = shalt.err (!%p7403_p12)
}
 0x4ba   : > { %s7450_s24 = smov 448   ;;  %s7451_s26 = smov 28  }
 0x4bb   : > { %7180 = dma.vmem_to_hbm [thread:$0]  (%p7550_p5), %s4953_s0, 1792, %s4955_s21, %s4934_s2, %s7450_s24, %s7450_s24, %s7451_s26  }
 0x4bc PF: > { %p7191_p13 = scmp.ge.s32.totalorder %s7445_s20, 2  ;;  %s4986_s29 = sand.u32 1, %s7433_s17  }
 0x4bd   : > { %s4987_s19 = scalar_lea.sflag [#allocation3], %s4986_s29 }
 0x4be   : > { %p7185_p0 = pnand %p7191_p13, %p7554_p6 }
 0x4c0   : > { %p7186_p1 = pneg %p7185_p0 }
 0x4c2   : > { %7424 = dma.done.wait (%p7186_p1), %s4987_s19, 1792  }
 0x4c3   : > { %7426 = vsyncadd (%p7186_p1), %s4987_s19, 4294965504  ;;  %s4997_s12 = scalar_lea.sflag [#allocation5], %s4986_s29 }
 0x4c4   : > { %7428 = dma.done.wait (%p7186_p1), %s4997_s12, 512  }
 0x4c5   : > { %7430 = vsyncadd (%p7186_p1), %s4997_s12, 4294966784  ;;  %s10950_s16 = sld [smem:[#allocation8_spill]]  ;;  %p25_p5 = scmp.ge.s32.totalorder %s7537_s23, 4  }
 0x4c6   : > { %s10951_s19 = sld [smem:[#allocation9_spill]]  ;;  %s10952_s17 = smov %s7437_s18 }
 0x4c7   : > { %s10954_s20 = smov %s7537_s23  ;;  %27 = sbr.rel (!%p25_p5) target bundleno = 9 (0x9), region = 115 }
 0x4cb   : > { %s10953_s18 = smov %s10950_s16 }
 0x4cc   :  { %5003 = vsyncpa [#allocation3], 1 }
 0x4cd   :  { %5005 = vsyncpa [#allocation3 + $0x1], 1 }
 0x4ce   :  { %5006 = vsyncpa [#allocation5], 1 }
 0x4cf   :  { %5008 = vsyncpa [#allocation5 + $0x1], 1 }

</bundles_post_ra>
